<compile_context>
chip_gen: v5e
topology: v5e:2x2
jax: 0.10.0
libtpu: 0.0.40
codegen_flags: <defaults>
</compile_context>

<pallas_src>
import numpy as np
import jax
import jax.numpy as jnp
from jax import lax
from jax.experimental import pallas as pl

SQRT2 = float(np.sqrt(2.0))


def _lrelu(x):
    # bias_act 'lrelu': leaky_relu(x, 0.2) * sqrt(2)
    return jnp.where(x >= 0.0, x, 0.2 * x) * SQRT2


def _full_spec(shape):
    # whole-array block, single grid step
    return pl.BlockSpec(tuple(shape), lambda i: (0,) * len(shape))


# ----------------------------- fused Pallas kernel ---------------------------- #

def _make_fused_kernel(compute_w):
    """Fused CoModStyleMapper forward.

    compute_w=True : kernel(x, z, mask, pw, pb, w0, b0, w1, b1, dww, dwy, db, o)
    compute_w=False: kernel(x, w, mask, pw, pb, dww, dwy, db, o)
    """

    def _projection_dropout(x_ref, mask_ref, pw_ref, pb_ref):
        # comod_projection (equalized-lr linear FC; weight_gain folded into pw)
        # followed by F.dropout(p=0.5): mask is pre-scaled to {0, 2}.
        y = jnp.dot(x_ref[...].astype(pw_ref.dtype), pw_ref[...],
                    preferred_element_type=jnp.float32)
        return (y + pb_ref[...]) * mask_ref[...]

    def _dec(w, y, dww_ref, dwy_ref, db_ref, o_ref):
        # all dec layers at once (out dim concatenated, padded to 128 lanes):
        #   out = w @ Ww + y @ Wy + b      (never materializes cat(w, y))
        out = jnp.dot(w.astype(dww_ref.dtype), dww_ref[...],
                      preferred_element_type=jnp.float32)
        out = out + jnp.dot(y.astype(dwy_ref.dtype), dwy_ref[...],
                            preferred_element_type=jnp.float32)
        o_ref[...] = (out + db_ref[...]).astype(o_ref.dtype)

    if compute_w:
        def kernel(x_ref, z_ref, mask_ref, pw_ref, pb_ref,
                   w0_ref, b0_ref, w1_ref, b1_ref,
                   dww_ref, dwy_ref, db_ref, o_ref):
            y = _projection_dropout(x_ref, mask_ref, pw_ref, pb_ref)
            # LatentMapper (n_layer=2): normalize_2nd_moment -> lrelu FC -> lrelu FC
            z = z_ref[...].astype(jnp.float32)
            z = z * lax.rsqrt(jnp.mean(z * z, axis=1, keepdims=True) + 1e-8)
            h = jnp.dot(z.astype(w0_ref.dtype), w0_ref[...],
                        preferred_element_type=jnp.float32)
            h = _lrelu(h + b0_ref[...])
            w = jnp.dot(h.astype(w1_ref.dtype), w1_ref[...],
                        preferred_element_type=jnp.float32)
            w = _lrelu(w + b1_ref[...])
            _dec(w, y, dww_ref, dwy_ref, db_ref, o_ref)
    else:
        def kernel(x_ref, w_ref, mask_ref, pw_ref, pb_ref,
                   dww_ref, dwy_ref, db_ref, o_ref):
            y = _projection_dropout(x_ref, mask_ref, pw_ref, pb_ref)
            _dec(w_ref[...], y, dww_ref, dwy_ref, db_ref, o_ref)

    return kernel


# --------------------------------- model glue --------------------------------- #

class CoModStyleMapperPallas:
    """Pallas port of CoModStyleMapper.  Parameters are created torch.randn-style at
    init, pre-transposed to (in, out), pre-scaled by the equalized-lr weight_gain,
    and stored in bf16 (biases stay f32)."""

    W_MAP_OUT_DIM = 512   # LatentMapper default out_dim
    PROJ_DIM = 1024       # comod_projection output width

    def __init__(self, feature_sizes_enc, feature_sizes_dec, feature_sizes_mid,
                 z_channels, only_gamma=True, included_features=None, *,
                 key, weight_dtype=jnp.bfloat16):
        self.feature_sizes_dec = list(feature_sizes_mid) + list(feature_sizes_dec)
        self.z_channels = z_channels
        self.only_gamma = only_gamma
        self.included_features = included_features
        self.cond_ch = feature_sizes_dec[0][0] * 9 * 5
        self.min_fmap_H = min(
            s[1] for s in (list(feature_sizes_enc) + list(feature_sizes_dec)
                           + list(feature_sizes_mid)))

        od = self.W_MAP_OUT_DIM
        keys = jax.random.split(key, 3 + len(self.feature_sizes_dec))

        def eq_fc(k, in_f, out_f, bias_init=0.0):
            # StyleGAN2 FullyConnectedLayer init (lr_multiplier=1):
            #   weight ~ randn(out, in), weight_gain = 1/sqrt(in), bias = bias_init
            w = jax.random.normal(k, (out_f, in_f), jnp.float32)
            w_t = (w.T * (1.0 / np.sqrt(in_f))).astype(weight_dtype)   # (in, out)
            b = jnp.full((1, out_f), float(bias_init), jnp.float32)
            return w_t, b

        # LatentMapper (n_layer=2 -> no residual branches): fromZ0, fromZ1 (lrelu)
        self.fromZ0_w, self.fromZ0_b = eq_fc(keys[0], z_channels, od)
        self.fromZ1_w, self.fromZ1_b = eq_fc(keys[1], od, od)
        # comod_projection: FullyConnectedLayer(cond_ch, 1024), linear
        self.proj_w, self.proj_b = eq_fc(keys[2], self.cond_ch, self.PROJ_DIM)

        # dec layers: FullyConnectedLayer(512+1024, C*(1+!only_gamma)), linear,
        # bias_init = int(only_gamma).  Concatenate along the out dim and zero-pad
        # to a multiple of 128 lanes -> one wide, lane-dense matmul.
        self.dec_out_dims = []
        dec_ws, dec_bs = [], []
        for idx, shape in enumerate(self.feature_sizes_dec):
            nout = shape[0] * (1 + int(not only_gamma))
            w_t, b = eq_fc(keys[3 + idx], od + self.PROJ_DIM, nout,
                           bias_init=int(only_gamma))
            dec_ws.append(w_t)
            dec_bs.append(b)
            self.dec_out_dims.append(nout)
        total = sum(self.dec_out_dims)
        pad = (-total) % 128
        self.dec_padded = total + pad
        dec_w_all = jnp.concatenate(dec_ws, axis=1)              # (1536, total)
        dec_b_all = jnp.concatenate(dec_bs, axis=1)              # (1,    total)
        if pad:
            dec_w_all = jnp.pad(dec_w_all, ((0, 0), (0, pad)))
            dec_b_all = jnp.pad(dec_b_all, ((0, 0), (0, pad)))
        # split so the kernel computes w @ Ww + y @ Wy (no cat(w, y) ever built)
        self.dec_w_w = dec_w_all[:od]                            # (512,  Cpad) bf16
        self.dec_w_y = dec_w_all[od:]                            # (1024, Cpad) bf16
        self.dec_b = dec_b_all                                   # (1,    Cpad) f32

    # ---- single fused pallas_call -------------------------------------------- #
    def _fused_call(self, inputs, B, compute_w):
        return pl.pallas_call(
            _make_fused_kernel(compute_w),
            out_shape=jax.ShapeDtypeStruct((B, self.dec_padded), jnp.float32),
            grid=(1,),
            in_specs=[_full_spec(a.shape) for a in inputs],
            out_specs=_full_spec((B, self.dec_padded)),
        )(*inputs)

    def __call__(self, comod_input, z=None, w=None, dropout_key=None, **kwargs):
        B = comod_input.shape[0]
        # flatten(start_dim=1) on NCHW == row-major reshape.  No f32 cast here —
        # the kernel casts to the bf16 matmul dtype itself.
        x = comod_input.reshape(B, -1)
        if dropout_key is None:
            dropout_key = jax.random.PRNGKey(0)
        # F.dropout(p=0.5, training=True): keep w.p. 0.5, scale kept values by 2.
        # TODO(synk): on real TPU this mask could come from the on-chip PRNG
        # (pltpu.prng_seed / prng_random_bits), but that primitive has no
        # CPU/interpret lowering, so it is generated host-side with jax.random.
        mask = jnp.where(jax.random.bernoulli(dropout_key, 0.5, (B, self.PROJ_DIM)),
                         2.0, 0.0).astype(jnp.float32)

        if w is None:
            inputs = (x, z, mask, self.proj_w, self.proj_b,
                      self.fromZ0_w, self.fromZ0_b, self.fromZ1_w, self.fromZ1_b,
                      self.dec_w_w, self.dec_w_y, self.dec_b)
            out = self._fused_call(inputs, B, compute_w=True)
        else:
            inputs = (x, w, mask, self.proj_w, self.proj_b,
                      self.dec_w_w, self.dec_w_y, self.dec_b)
            out = self._fused_call(inputs, B, compute_w=False)

        mod_params = []
        off = 0
        for nout in self.dec_out_dims:
            gamma = out[:, off:off + nout].reshape(B, -1, 1, 1)
            off += nout
            if self.only_gamma:
                mod_params.append({"gamma": gamma})
            else:
                gamma, beta = jnp.split(gamma, 2, axis=1)
                mod_params.append({"gamma": gamma + 1.0, "beta": beta})
        return mod_params


# ------------------------------ pure-JAX reference ----------------------------- #

def _reference_forward(model, comod_input, z, mask):
    """jnp mirror of the fused kernel (same bf16 weight values / cast points)."""
    B = comod_input.shape[0]
    x = comod_input.reshape(B, -1)

    def dot(a, wt):
        return jnp.dot(a.astype(wt.dtype), wt, preferred_element_type=jnp.float32)

    y = (dot(x, model.proj_w) + model.proj_b) * mask
    zz = z.astype(jnp.float32)
    zz = zz * lax.rsqrt(jnp.mean(zz * zz, axis=1, keepdims=True) + 1e-8)
    h = _lrelu(dot(zz, model.fromZ0_w) + model.fromZ0_b)
    w_lat = _lrelu(dot(h, model.fromZ1_w) + model.fromZ1_b)
    out = dot(w_lat, model.dec_w_w) + dot(y, model.dec_w_y) + model.dec_b
    return out[:, :sum(model.dec_out_dims)]


# ------------------------------------ main ------------------------------------- #

if __name__ == "__main__":
    key = jax.random.PRNGKey(0)
    k_param, k_z, k_c, k_drop = jax.random.split(key, 4)

    # small synthetic feature-size config (channels, H, W)
    feature_sizes_enc = [(16, 16, 16), (32, 8, 8)]
    feature_sizes_mid = [(64, 4, 4)]
    feature_sizes_dec = [(32, 8, 8), (16, 16, 16)]
    z_channels = 64
    B = 2

    model = CoModStyleMapperPallas(
        feature_sizes_enc, feature_sizes_dec, feature_sizes_mid,
        z_channels=z_channels, only_gamma=True, key=k_param)

    # comod_input matches cond_ch = feature_sizes_dec[0][0] * 9 * 5 = 1440
    comod_input = jax.random.normal(k_c, (B, feature_sizes_dec[0][0], 9, 5), jnp.float32)
    z = jax.random.normal(k_z, (B, z_channels), jnp.float32)

    mod_params = model(comod_input, z, dropout_key=k_drop)
    for mp in mod_params:
        jax.block_until_ready(mp["gamma"])

    # shape checks
    expected_channels = [s[0] for s in (feature_sizes_mid + feature_sizes_dec)]
    assert len(mod_params) == len(expected_channels)
    for mp, c in zip(mod_params, expected_channels):
        assert mp["gamma"].shape == (B, c, 1, 1)

    # numerical check against the pure-JAX reference (same dropout mask)
    mask = jnp.where(jax.random.bernoulli(k_drop, 0.5, (B, model.PROJ_DIM)),
                     2.0, 0.0).astype(jnp.float32)
    ref = _reference_forward(model, comod_input, z, mask)
    got = jnp.concatenate([mp["gamma"].reshape(B, -1) for mp in mod_params], axis=1)
    np.testing.assert_allclose(np.asarray(got), np.asarray(ref), rtol=1e-2, atol=1e-2)

    print("KERNEL_OK")
</pallas_src>

<mosaic_0001>
module attributes {stable_mosaic.version = 11 : i64} {
  func.func @kernel(%arg0: i32, %arg1: memref<2x1440xf32, #tpu.memory_space<vmem>>, %arg2: memref<2x64xf32, #tpu.memory_space<vmem>>, %arg3: memref<2x1024xf32, #tpu.memory_space<vmem>>, %arg4: memref<1440x1024xbf16, #tpu.memory_space<vmem>>, %arg5: memref<1x1024xf32, #tpu.memory_space<vmem>>, %arg6: memref<64x512xbf16, #tpu.memory_space<vmem>>, %arg7: memref<1x512xf32, #tpu.memory_space<vmem>>, %arg8: memref<512x512xbf16, #tpu.memory_space<vmem>>, %arg9: memref<1x512xf32, #tpu.memory_space<vmem>>, %arg10: memref<512x128xbf16, #tpu.memory_space<vmem>>, %arg11: memref<1024x128xbf16, #tpu.memory_space<vmem>>, %arg12: memref<1x128xf32, #tpu.memory_space<vmem>>, %arg13: memref<2x128xf32, #tpu.memory_space<vmem>>) attributes {dimension_semantics = [#tpu.dimension_semantics<arbitrary>], iteration_bounds = array<i64: 1>, scalar_prefetch = 0 : i64, scratch_operands = 0 : i64, tpu.core_type = #tpu.core_type<tc>, window_params = [{pipeline_mode = #tpu.pipeline_mode<synchronous>, transform_indices = @transform_0, window_bounds = array<i64: 2, 1440>}, {pipeline_mode = #tpu.pipeline_mode<synchronous>, transform_indices = @transform_1, window_bounds = array<i64: 2, 64>}, {pipeline_mode = #tpu.pipeline_mode<synchronous>, transform_indices = @transform_2, window_bounds = array<i64: 2, 1024>}, {pipeline_mode = #tpu.pipeline_mode<synchronous>, transform_indices = @transform_3, window_bounds = array<i64: 1440, 1024>}, {pipeline_mode = #tpu.pipeline_mode<synchronous>, transform_indices = @transform_4, window_bounds = array<i64: 1, 1024>}, {pipeline_mode = #tpu.pipeline_mode<synchronous>, transform_indices = @transform_5, window_bounds = array<i64: 64, 512>}, {pipeline_mode = #tpu.pipeline_mode<synchronous>, transform_indices = @transform_6, window_bounds = array<i64: 1, 512>}, {pipeline_mode = #tpu.pipeline_mode<synchronous>, transform_indices = @transform_7, window_bounds = array<i64: 512, 512>}, {pipeline_mode = #tpu.pipeline_mode<synchronous>, transform_indices = @transform_8, window_bounds = array<i64: 1, 512>}, {pipeline_mode = #tpu.pipeline_mode<synchronous>, transform_indices = @transform_9, window_bounds = array<i64: 512, 128>}, {pipeline_mode = #tpu.pipeline_mode<synchronous>, transform_indices = @transform_10, window_bounds = array<i64: 1024, 128>}, {pipeline_mode = #tpu.pipeline_mode<synchronous>, transform_indices = @transform_11, window_bounds = array<i64: 1, 128>}, {pipeline_mode = #tpu.pipeline_mode<synchronous>, transform_indices = @transform_12, window_bounds = array<i64: 2, 128>}]} {
    %c0 = arith.constant 0 : index
    %c0_0 = arith.constant 0 : index
    %0 = vector.load %arg1[%c0, %c0_0] : memref<2x1440xf32, #tpu.memory_space<vmem>>, vector<2x1440xf32>
    %1 = arith.truncf %0 : vector<2x1440xf32> to vector<2x1440xbf16>
    %c0_1 = arith.constant 0 : index
    %c0_2 = arith.constant 0 : index
    %2 = vector.load %arg4[%c0_1, %c0_2] : memref<1440x1024xbf16, #tpu.memory_space<vmem>>, vector<1440x1024xbf16>
    %cst = arith.constant dense<0.000000e+00> : vector<2x1024xf32>
    %3 = tpu.matmul %1, %2, %cst {dimension_numbers = #tpu.dot_dimension_numbers<[1], [0], [0], [1], [0, 0, 1, 1], [], []>} : vector<2x1440xbf16>, vector<1440x1024xbf16>, vector<2x1024xf32> -> vector<2x1024xf32>
    %c0_3 = arith.constant 0 : index
    %c0_4 = arith.constant 0 : index
    %4 = vector.load %arg5[%c0_3, %c0_4] : memref<1x1024xf32, #tpu.memory_space<vmem>>, vector<1x1024xf32>
    %5 = vector.broadcast %4 : vector<1x1024xf32> to vector<2x1024xf32>
    %6 = arith.addf %3, %5 : vector<2x1024xf32>
    %c0_5 = arith.constant 0 : index
    %c0_6 = arith.constant 0 : index
    %7 = vector.load %arg3[%c0_5, %c0_6] : memref<2x1024xf32, #tpu.memory_space<vmem>>, vector<2x1024xf32>
    %8 = arith.mulf %6, %7 : vector<2x1024xf32>
    %c0_7 = arith.constant 0 : index
    %c0_8 = arith.constant 0 : index
    %9 = vector.load %arg2[%c0_7, %c0_8] : memref<2x64xf32, #tpu.memory_space<vmem>>, vector<2x64xf32>
    %10 = arith.mulf %9, %9 : vector<2x64xf32>
    %cst_9 = arith.constant dense<0.000000e+00> : vector<2xf32>
    %11 = vector.multi_reduction <add>, %10, %cst_9 [1] : vector<2x64xf32> to vector<2xf32>
    %12 = vector.shape_cast %11 : vector<2xf32> to vector<2x1xf32>
    %cst_10 = arith.constant 6.400000e+01 : f32
    %13 = vector.broadcast %cst_10 : f32 to vector<2x1xf32>
    %14 = arith.divf %12, %13 : vector<2x1xf32>
    %cst_11 = arith.constant 9.99999993E-9 : f32
    %15 = vector.broadcast %cst_11 : f32 to vector<2x1xf32>
    %16 = arith.addf %14, %15 : vector<2x1xf32>
    %17 = math.rsqrt %16 : vector<2x1xf32>
    %18 = vector.broadcast %17 : vector<2x1xf32> to vector<2x64xf32>
    %19 = arith.mulf %9, %18 : vector<2x64xf32>
    %20 = arith.truncf %19 : vector<2x64xf32> to vector<2x64xbf16>
    %c0_12 = arith.constant 0 : index
    %c0_13 = arith.constant 0 : index
    %21 = vector.load %arg6[%c0_12, %c0_13] : memref<64x512xbf16, #tpu.memory_space<vmem>>, vector<64x512xbf16>
    %cst_14 = arith.constant dense<0.000000e+00> : vector<2x512xf32>
    %22 = tpu.matmul %20, %21, %cst_14 {dimension_numbers = #tpu.dot_dimension_numbers<[1], [0], [0], [1], [0, 0, 1, 1], [], []>} : vector<2x64xbf16>, vector<64x512xbf16>, vector<2x512xf32> -> vector<2x512xf32>
    %c0_15 = arith.constant 0 : index
    %c0_16 = arith.constant 0 : index
    %23 = vector.load %arg7[%c0_15, %c0_16] : memref<1x512xf32, #tpu.memory_space<vmem>>, vector<1x512xf32>
    %24 = vector.broadcast %23 : vector<1x512xf32> to vector<2x512xf32>
    %25 = arith.addf %22, %24 : vector<2x512xf32>
    %cst_17 = arith.constant 0.000000e+00 : f32
    %26 = vector.broadcast %cst_17 : f32 to vector<2x512xf32>
    %27 = arith.cmpf oge, %25, %26 : vector<2x512xf32>
    %cst_18 = arith.constant 2.000000e-01 : f32
    %28 = vector.broadcast %cst_18 : f32 to vector<2x512xf32>
    %29 = arith.mulf %28, %25 : vector<2x512xf32>
    %30 = arith.select %27, %25, %29 : vector<2x512xi1>, vector<2x512xf32>
    %cst_19 = arith.constant 1.41421354 : f32
    %31 = vector.broadcast %cst_19 : f32 to vector<2x512xf32>
    %32 = arith.mulf %30, %31 : vector<2x512xf32>
    %33 = arith.truncf %32 : vector<2x512xf32> to vector<2x512xbf16>
    %c0_20 = arith.constant 0 : index
    %c0_21 = arith.constant 0 : index
    %34 = vector.load %arg8[%c0_20, %c0_21] : memref<512x512xbf16, #tpu.memory_space<vmem>>, vector<512x512xbf16>
    %cst_22 = arith.constant dense<0.000000e+00> : vector<2x512xf32>
    %35 = tpu.matmul %33, %34, %cst_22 {dimension_numbers = #tpu.dot_dimension_numbers<[1], [0], [0], [1], [0, 0, 1, 1], [], []>} : vector<2x512xbf16>, vector<512x512xbf16>, vector<2x512xf32> -> vector<2x512xf32>
    %c0_23 = arith.constant 0 : index
    %c0_24 = arith.constant 0 : index
    %36 = vector.load %arg9[%c0_23, %c0_24] : memref<1x512xf32, #tpu.memory_space<vmem>>, vector<1x512xf32>
    %37 = vector.broadcast %36 : vector<1x512xf32> to vector<2x512xf32>
    %38 = arith.addf %35, %37 : vector<2x512xf32>
    %cst_25 = arith.constant 0.000000e+00 : f32
    %39 = vector.broadcast %cst_25 : f32 to vector<2x512xf32>
    %40 = arith.cmpf oge, %38, %39 : vector<2x512xf32>
    %cst_26 = arith.constant 2.000000e-01 : f32
    %41 = vector.broadcast %cst_26 : f32 to vector<2x512xf32>
    %42 = arith.mulf %41, %38 : vector<2x512xf32>
    %43 = arith.select %40, %38, %42 : vector<2x512xi1>, vector<2x512xf32>
    %cst_27 = arith.constant 1.41421354 : f32
    %44 = vector.broadcast %cst_27 : f32 to vector<2x512xf32>
    %45 = arith.mulf %43, %44 : vector<2x512xf32>
    %46 = arith.truncf %45 : vector<2x512xf32> to vector<2x512xbf16>
    %c0_28 = arith.constant 0 : index
    %c0_29 = arith.constant 0 : index
    %47 = vector.load %arg10[%c0_28, %c0_29] : memref<512x128xbf16, #tpu.memory_space<vmem>>, vector<512x128xbf16>
    %cst_30 = arith.constant dense<0.000000e+00> : vector<2x128xf32>
    %48 = tpu.matmul %46, %47, %cst_30 {dimension_numbers = #tpu.dot_dimension_numbers<[1], [0], [0], [1], [0, 0, 1, 1], [], []>} : vector<2x512xbf16>, vector<512x128xbf16>, vector<2x128xf32> -> vector<2x128xf32>
    %49 = arith.truncf %8 : vector<2x1024xf32> to vector<2x1024xbf16>
    %c0_31 = arith.constant 0 : index
    %c0_32 = arith.constant 0 : index
    %50 = vector.load %arg11[%c0_31, %c0_32] : memref<1024x128xbf16, #tpu.memory_space<vmem>>, vector<1024x128xbf16>
    %cst_33 = arith.constant dense<0.000000e+00> : vector<2x128xf32>
    %51 = tpu.matmul %49, %50, %cst_33 {dimension_numbers = #tpu.dot_dimension_numbers<[1], [0], [0], [1], [0, 0, 1, 1], [], []>} : vector<2x1024xbf16>, vector<1024x128xbf16>, vector<2x128xf32> -> vector<2x128xf32>
    %52 = arith.addf %48, %51 : vector<2x128xf32>
    %c0_34 = arith.constant 0 : index
    %c0_35 = arith.constant 0 : index
    %53 = vector.load %arg12[%c0_34, %c0_35] : memref<1x128xf32, #tpu.memory_space<vmem>>, vector<1x128xf32>
    %54 = vector.broadcast %53 : vector<1x128xf32> to vector<2x128xf32>
    %55 = arith.addf %52, %54 : vector<2x128xf32>
    %c0_36 = arith.constant 0 : index
    %c0_37 = arith.constant 0 : index
    %56 = vector.load %arg13[%c0_36, %c0_37] : memref<2x128xf32, #tpu.memory_space<vmem>>, vector<2x128xf32>
    tpu.vector_store %arg13[%c0_36, %c0_37], %55 {strides = array<i32>} : memref<2x128xf32, #tpu.memory_space<vmem>>, vector<2x128xf32>,
    return
  }
  func.func @transform_0(%arg0: i32) -> (i32, i32) {
    %c0_i32 = arith.constant 0 : i32
    %c0_i32_0 = arith.constant 0 : i32
    %c0_i32_1 = arith.constant 0 : i32
    return %c0_i32, %c0_i32_0 : i32, i32
  }
  func.func @transform_1(%arg0: i32) -> (i32, i32) {
    %c0_i32 = arith.constant 0 : i32
    %c0_i32_0 = arith.constant 0 : i32
    %c0_i32_1 = arith.constant 0 : i32
    return %c0_i32, %c0_i32_0 : i32, i32
  }
  func.func @transform_2(%arg0: i32) -> (i32, i32) {
    %c0_i32 = arith.constant 0 : i32
    %c0_i32_0 = arith.constant 0 : i32
    %c0_i32_1 = arith.constant 0 : i32
    return %c0_i32, %c0_i32_0 : i32, i32
  }
  func.func @transform_3(%arg0: i32) -> (i32, i32) {
    %c0_i32 = arith.constant 0 : i32
    %c0_i32_0 = arith.constant 0 : i32
    %c0_i32_1 = arith.constant 0 : i32
    return %c0_i32, %c0_i32_0 : i32, i32
  }
  func.func @transform_4(%arg0: i32) -> (i32, i32) {
    %c0_i32 = arith.constant 0 : i32
    %c0_i32_0 = arith.constant 0 : i32
    %c0_i32_1 = arith.constant 0 : i32
    return %c0_i32, %c0_i32_0 : i32, i32
  }
  func.func @transform_5(%arg0: i32) -> (i32, i32) {
    %c0_i32 = arith.constant 0 : i32
    %c0_i32_0 = arith.constant 0 : i32
    %c0_i32_1 = arith.constant 0 : i32
    return %c0_i32, %c0_i32_0 : i32, i32
  }
  func.func @transform_6(%arg0: i32) -> (i32, i32) {
    %c0_i32 = arith.constant 0 : i32
    %c0_i32_0 = arith.constant 0 : i32
    %c0_i32_1 = arith.constant 0 : i32
    return %c0_i32, %c0_i32_0 : i32, i32
  }
  func.func @transform_7(%arg0: i32) -> (i32, i32) {
    %c0_i32 = arith.constant 0 : i32
    %c0_i32_0 = arith.constant 0 : i32
    %c0_i32_1 = arith.constant 0 : i32
    return %c0_i32, %c0_i32_0 : i32, i32
  }
  func.func @transform_8(%arg0: i32) -> (i32, i32) {
    %c0_i32 = arith.constant 0 : i32
    %c0_i32_0 = arith.constant 0 : i32
    %c0_i32_1 = arith.constant 0 : i32
    return %c0_i32, %c0_i32_0 : i32, i32
  }
  func.func @transform_9(%arg0: i32) -> (i32, i32) {
    %c0_i32 = arith.constant 0 : i32
    %c0_i32_0 = arith.constant 0 : i32
    %c0_i32_1 = arith.constant 0 : i32
    return %c0_i32, %c0_i32_0 : i32, i32
  }
  func.func @transform_10(%arg0: i32) -> (i32, i32) {
    %c0_i32 = arith.constant 0 : i32
    %c0_i32_0 = arith.constant 0 : i32
    %c0_i32_1 = arith.constant 0 : i32
    return %c0_i32, %c0_i32_0 : i32, i32
  }
  func.func @transform_11(%arg0: i32) -> (i32, i32) {
    %c0_i32 = arith.constant 0 : i32
    %c0_i32_0 = arith.constant 0 : i32
    %c0_i32_1 = arith.constant 0 : i32
    return %c0_i32, %c0_i32_0 : i32, i32
  }
  func.func @transform_12(%arg0: i32) -> (i32, i32) {
    %c0_i32 = arith.constant 0 : i32
    %c0_i32_0 = arith.constant 0 : i32
    %c0_i32_1 = arith.constant 0 : i32
    return %c0_i32, %c0_i32_0 : i32, i32
  }
}

</mosaic_0001>

<bundles_post_ra>
// kernel: tpu_custom_call.1
= control target key start
LH: loop header
LB: loop body
LE: loop exit
PB: predicated region body
PF: predicated region fallthrough
CT: control target
= control target key end

     0   :  { %17 = vsyncpa [#allocation3], 0  ;;  %s13645_s0 = inlined_call_operand.hbm [shape: f32[2,1440], index: 0, kind: input, shape index: {}]   ;;  %s13646_s1 = inlined_call_operand.hbm [shape: f32[2,64], index: 1, kind: input, shape index: {}]   ;;  %s13647_s2 = inlined_call_operand.hbm [shape: f32[2,1024], index: 2, kind: input, shape index: {}]   ;;  %s13648_s3 = inlined_call_operand.hbm [shape: bf16[1440,1024], index: 3, kind: input, shape index: {}]   ;;  %s13649_s4 = inlined_call_operand.hbm [shape: f32[1,1024], index: 4, kind: input, shape index: {}]   ;;  %s13650_s5 = inlined_call_operand.hbm [shape: bf16[64,512], index: 5, kind: input, shape index: {}]   ;;  %s13651_s6 = inlined_call_operand.hbm [shape: f32[1,512], index: 6, kind: input, shape index: {}]   ;;  %s13652_s7 = inlined_call_operand.hbm [shape: bf16[512,512], index: 7, kind: input, shape index: {}]   ;;  %s13653_s8 = inlined_call_operand.hbm [shape: f32[1,512], index: 8, kind: input, shape index: {}]   ;;  %s13654_s9 = inlined_call_operand.hbm [shape: bf16[512,128], index: 9, kind: input, shape index: {}]   ;;  %s13655_s10 = inlined_call_operand.hbm [shape: bf16[1024,128], index: 10, kind: input, shape index: {}]   ;;  %s13656_s11 = inlined_call_operand.hbm [shape: f32[1,128], index: 11, kind: input, shape index: {}]   ;;  %s13657_s12 = inlined_call_operand.hbm [shape: f32[2,128], index: 12, kind: output, shape index: {}]  }
   0x1   :  { %18 = vsyncpa [#allocation6], 0 }
   0x2   :  { %19 = vsyncpa [#allocation9], 0 }
   0x3   :  { %20 = vsyncpa [#allocation12], 0 }
   0x4   :  { %21 = vsyncpa [#allocation15], 0 }
   0x5   :  { %22 = vsyncpa [#allocation18], 0 }
   0x6   :  { %23 = vsyncpa [#allocation21], 0  ;;  %s41_s23 = sshll.u32 %s13646_s1, 4  ;;  %s42_s23 = int_to_ptr.hbm [resolvable:$true] %s41_s23 }
   0x7   :  { %24 = vsyncpa [#allocation4], 0  ;;  %s13228_s24 = smov [#allocation5]   ;;  %s62_s28 = sshll.u32 %s13648_s3, 4  ;;  %s63_s28 = int_to_ptr.hbm [resolvable:$true] %s62_s28 }
   0x8   :  { %s43_s25 = sshll.u32 %s13228_s24, 4  ;;  %s13229_s29 = smov [#allocation8]   ;;  %s44_s25 = int_to_ptr.vmem [resolvable:$true] %s43_s25 }
   0x9   :  { %46 = dma.hbm_to_vmem [thread:$0]  %s42_s23, 32, %s44_s25, [#allocation6]  }
   0xa   :  { %s64_s30 = sshll.u32 %s13229_s29, 4  ;;  %s13230_s13 = smov 512   ;;  %s65_s30 = int_to_ptr.vmem [resolvable:$true] %s64_s30 }
   0xb   :  { %s13231_s14 = smov 32   ;;  %s86_s1 = sshll.u32 %s13650_s5, 4  ;;  %s87_s1 = int_to_ptr.hbm [resolvable:$true] %s86_s1 }
   0xc   :  { %70 = dma.hbm_to_vmem [thread:$0]  %s63_s28, 92160, %s65_s30, [#allocation9], %s13230_s13, %s13230_s13, %s13231_s14  }
   0xd   :  { %s13232_s17 = smov [#allocation11]   ;;  %s110_s3 = sshll.u32 %s13652_s7, 4  ;;  %s111_s3 = int_to_ptr.hbm [resolvable:$true] %s110_s3 }
   0xe   :  { %s88_s18 = sshll.u32 %s13232_s17, 4  ;;  %s13233_s21 = smov 256   ;;  %s89_s18 = int_to_ptr.vmem [resolvable:$true] %s88_s18 }
   0xf   :  { %s13234_s22 = smov 16   ;;  %s13235_s23 = smov [#allocation14]  }
  0x10   :  { %94 = dma.hbm_to_vmem [thread:$0]  %s87_s1, 2048, %s89_s18, [#allocation12], %s13233_s21, %s13233_s21, %s13234_s22  }
  0x11   :  { %s112_s24 = sshll.u32 %s13235_s23, 4  ;;  %s134_s27 = sshll.u32 %s13654_s9, 4  ;;  %s113_s24 = int_to_ptr.vmem [resolvable:$true] %s112_s24  ;;  %s135_s27 = int_to_ptr.hbm [resolvable:$true] %s134_s27 }
  0x12   :  { %118 = dma.hbm_to_vmem [thread:$0]  %s111_s3, 16384, %s113_s24, [#allocation15], %s13233_s21, %s13233_s21, %s13234_s22  }
  0x13   :  { %s13236_s5 = smov [#allocation17]   ;;  %s30_s7 = sshll.u32 %s13645_s0, 4  ;;  %s31_s7 = int_to_ptr.hbm [resolvable:$true] %s30_s7 }
  0x14   :  { %s136_s28 = sshll.u32 %s13236_s5, 4  ;;  %s13237_s13 = smov 64   ;;  %s137_s28 = int_to_ptr.vmem [resolvable:$true] %s136_s28 }
  0x15   :  { %s13238_s14 = smov 4   ;;  %s13239_s15 = smov [#allocation2]  }
  0x16   :  { %142 = dma.hbm_to_vmem [thread:$0]  %s135_s27, 4096, %s137_s28, [#allocation18], %s13237_s13, %s13237_s13, %s13238_s14  }
  0x17   :  { %s32_s16 = sshll.u32 %s13239_s15, 4  ;;  %s52_s17 = sshll.u32 %s13647_s2, 4  ;;  %s33_s16 = int_to_ptr.vmem [resolvable:$true] %s32_s16  ;;  %s53_s17 = int_to_ptr.hbm [resolvable:$true] %s52_s17 }
  0x18   :  { %35 = dma.hbm_to_vmem [thread:$0]  %s31_s7, 384, %s33_s16, [#allocation3]  }
  0x19   :  { %s76_s0 = sshll.u32 %s13649_s4, 4  ;;  %s13240_s20 = smov [#allocation7]   ;;  %s77_s0 = int_to_ptr.hbm [resolvable:$true] %s76_s0 }
  0x1a   :  { %s54_s3 = sshll.u32 %s13240_s20, 4  ;;  %s13241_s21 = smov [#allocation10]   ;;  %s55_s3 = int_to_ptr.vmem [resolvable:$true] %s54_s3 }
  0x1b   :  { %57 = dma.hbm_to_vmem [thread:$0]  %s53_s17, 256, %s55_s3, [#allocation6]  }
  0x1c   :  { %s78_s22 = sshll.u32 %s13241_s21, 4  ;;  %s100_s25 = sshll.u32 %s13651_s6, 4  ;;  %s79_s22 = int_to_ptr.vmem [resolvable:$true] %s78_s22  ;;  %s101_s25 = int_to_ptr.hbm [resolvable:$true] %s100_s25 }
  0x1d   :  { %81 = dma.hbm_to_vmem [thread:$0]  %s77_s0, 128, %s79_s22, [#allocation9]  }
  0x1e   :  { %s124_s27 = sshll.u32 %s13653_s8, 4  ;;  %s13242_s5 = smov [#allocation13]   ;;  %s125_s27 = int_to_ptr.hbm [resolvable:$true] %s124_s27 }
  0x1f   :  { %s102_s4 = sshll.u32 %s13242_s5, 4  ;;  %s13243_s28 = smov [#allocation16]   ;;  %s103_s4 = int_to_ptr.vmem [resolvable:$true] %s102_s4 }
  0x20   :  { %105 = dma.hbm_to_vmem [thread:$0]  %s101_s25, 64, %s103_s4, [#allocation12]  }
  0x21   :  { %s126_s29 = sshll.u32 %s13243_s28, 4  ;;  %s147_s15 = sshll.u32 %s13655_s10, 4  ;;  %s127_s29 = int_to_ptr.vmem [resolvable:$true] %s126_s29  ;;  %s148_s15 = int_to_ptr.hbm [resolvable:$true] %s147_s15 }
  0x22   :  { %129 = dma.hbm_to_vmem [thread:$0]  %s125_s27, 64, %s127_s29, [#allocation15]  }
  0x23   :  { %s161_s9 = sshll.u32 %s13656_s11, 4  ;;  %s13244_s1 = smov [#allocation19]   ;;  %s162_s9 = int_to_ptr.hbm [resolvable:$true] %s161_s9 }
  0x24   :  { %s149_s8 = sshll.u32 %s13244_s1, 4  ;;  %s13245_s17 = smov [#allocation20]   ;;  %s150_s8 = int_to_ptr.vmem [resolvable:$true] %s149_s8 }
  0x25   :  { %155 = dma.hbm_to_vmem [thread:$0]  %s148_s15, 8192, %s150_s8, [#allocation18], %s13237_s13, %s13237_s13, %s13238_s14  }
  0x26   :  { %s163_s18 = sshll.u32 %s13245_s17, 4  ;;  %s164_s18 = int_to_ptr.vmem [resolvable:$true] %s163_s18 }
  0x27   :  { %166 = dma.hbm_to_vmem [thread:$0]  %s162_s9, 16, %s164_s18, [#allocation21]  }
  0x28   :  { %13212 = dma.done.wait [#allocation3], 384  }
  0x29   :  { %13213 = vsyncadd [#allocation3], 4294966912 }
  0x2a   :  { %13214 = dma.done.wait [#allocation6], 288  }
  0x2b   :  { %13215 = vsyncadd [#allocation6], 4294967008 }
  0x2c   :  { %13216 = dma.done.wait [#allocation9], 92288  }
  0x2d   :  { %13217 = vsyncadd [#allocation9], 4294875008 }
  0x2e   :  { %13218 = dma.done.wait [#allocation12], 2112  }
  0x2f   :  { %13219 = vsyncadd [#allocation12], 4294965184 }
  0x30   :  { %13220 = dma.done.wait [#allocation15], 16448  }
  0x31   :  { %13221 = vsyncadd [#allocation15], 4294950848 }
  0x32   :  { %13222 = dma.done.wait [#allocation18], 12288  }
  0x33   :  { %13223 = vsyncadd [#allocation18], 4294955008 }
  0x34   :  { %13224 = dma.done.wait [#allocation21], 16  }
  0x35   :  { %13225 = vsyncadd [#allocation21], 4294967280  ;;  %v8285_v0 = vld [vmem:[#allocation8 + $0x1c0] sm:$0xf]  ;;  %vm4600_vm0 = vcmask 261120   ;;  %vm5885_vm1 = vcmask 517120  }
  0x36   :  { %v11971_v1 = vld [vmem:[#allocation8 + $0x1dc] sm:$0xf0]  ;;  %vm6016_vm6 = vcmask 523264   ;;  %s13247_s10 = smov [#allocation22]   ;;  %s8043_s19 = sshll.u32 %s13657_s12, 4  ;;  %s8044_s19 = int_to_ptr.hbm [resolvable:$true] %s8043_s19 }
  0x37   :  { %v8541_v2 = vld [vmem:[#allocation8 + $0x3c0] sm:$0xf]  ;;  %v8286_v3 = vor.u32 %v11971_v1, %v8285_v0  ;;  %s8041_s11 = sshll.u32 %s13247_s10, 4  ;;  %s8042_s11 = int_to_ptr.vmem [resolvable:$true] %s8041_s11 }
  0x38   :  { %v12035_v4 = vld [vmem:[#allocation8 + $0x3dc] sm:$0xf0] }
  0x39   :  { %v8797_v5 = vld [vmem:[#allocation8 + $0x5c0] sm:$0xf]  ;;  %v8542_v7 = vor.u32 %v12035_v4, %v8541_v2  ;;  %4604 = vmatpush.bf16.msra.mxu0 %v8286_v3 }
  0x3a   :  { %v12099_v6 = vld [vmem:[#allocation8 + $0x5dc] sm:$0xf0] }
  0x3b   :  { %v8798_v8 = vor.u32 %v12099_v6, %v8797_v5  ;;  %v9053_v9 = vld [vmem:[#allocation8 + $0x7c0] sm:$0xf]  ;;  %4617 = vmatpush.bf16.msra.mxu1 %v8542_v7 }
  0x3c   :  { %v12163_v10 = vld [vmem:[#allocation8 + $0x7dc] sm:$0xf0] }
  0x3d   :  { %v8253_v11 = vld [vmem:[#allocation8 + $0x180] sm:$0xf]  ;;  %v9054_v12 = vor.u32 %v12163_v10, %v9053_v9  ;;  %4630 = vmatpush.bf16.msra.mxu2 %v8798_v8 }
  0x3e   :  { %v11963_v13 = vld [vmem:[#allocation8 + $0x19c] sm:$0xf0] }
  0x3f   :  { %v8509_v14 = vld [vmem:[#allocation8 + $0x380] sm:$0xf]  ;;  %v8254_v16 = vor.u32 %v11963_v13, %v8253_v11  ;;  %4643 = vmatpush.bf16.msra.mxu3 %v9054_v12 }
  0x40   :  { %v12027_v15 = vld [vmem:[#allocation8 + $0x39c] sm:$0xf0] }
  0x41   :  { %v8510_v17 = vor.u32 %v12027_v15, %v8509_v14  ;;  %v8765_v18 = vld [vmem:[#allocation8 + $0x580] sm:$0xf]  ;;  %4605 = vmatpush.bf16.msra.mxu0 %v8254_v16 }
  0x42   :  { %v12091_v19 = vld [vmem:[#allocation8 + $0x59c] sm:$0xf0] }
  0x43   :  { %v9021_v20 = vld [vmem:[#allocation8 + $0x780] sm:$0xf]  ;;  %v8766_v21 = vor.u32 %v12091_v19, %v8765_v18  ;;  %4618 = vmatpush.bf16.msra.mxu1 %v8510_v17 }
  0x44   :  { %v12155_v22 = vld [vmem:[#allocation8 + $0x79c] sm:$0xf0] }
  0x45   :  { %v8221_v23 = vld [vmem:[#allocation8 + $0x140] sm:$0xf]  ;;  %v9022_v25 = vor.u32 %v12155_v22, %v9021_v20  ;;  %4631 = vmatpush.bf16.msra.mxu2 %v8766_v21 }
  0x46   :  { %v11955_v24 = vld [vmem:[#allocation8 + $0x15c] sm:$0xf0] }
  0x47   :  { %v8477_v26 = vld [vmem:[#allocation8 + $0x340] sm:$0xf]  ;;  %v8222_v29 = vor.u32 %v11955_v24, %v8221_v23  ;;  %4644 = vmatpush.bf16.msra.mxu3 %v9022_v25 }
  0x48   :  { %v12019_v27 = vld [vmem:[#allocation8 + $0x35c] sm:$0xf0] }
  0x49   :  { %v8733_v28 = vld [vmem:[#allocation8 + $0x540] sm:$0xf]  ;;  %v8478_v33 = vor.u32 %v12019_v27, %v8477_v26  ;;  %4606 = vmatpush.bf16.msra.mxu0 %v8222_v29 }
  0x4a   :  { %v12083_v30 = vld [vmem:[#allocation8 + $0x55c] sm:$0xf0] }
  0x4b   :  { %v8989_v31 = vld [vmem:[#allocation8 + $0x740] sm:$0xf]  ;;  %v8734_v34 = vor.u32 %v12083_v30, %v8733_v28  ;;  %4619 = vmatpush.bf16.msra.mxu1 %v8478_v33 }
  0x4c   :  { %v12147_v32 = vld [vmem:[#allocation8 + $0x75c] sm:$0xf0] }
  0x4d   :  { %v8189_v35 = vld [vmem:[#allocation8 + $0x100] sm:$0xf]  ;;  %v8990_v38 = vor.u32 %v12147_v32, %v8989_v31  ;;  %4632 = vmatpush.bf16.msra.mxu2 %v8734_v34 }
  0x4e   :  { %v11947_v36 = vld [vmem:[#allocation8 + $0x11c] sm:$0xf0] }
  0x4f   :  { %v8445_v37 = vld [vmem:[#allocation8 + $0x300] sm:$0xf]  ;;  %v8190_v44 = vor.u32 %v11947_v36, %v8189_v35  ;;  %4645 = vmatpush.bf16.msra.mxu3 %v8990_v38 }
  0x50   :  { %v12011_v39 = vld [vmem:[#allocation8 + $0x31c] sm:$0xf0] }
  0x51   :  { %v8701_v40 = vld [vmem:[#allocation8 + $0x500] sm:$0xf]  ;;  %v8446_v45 = vor.u32 %v12011_v39, %v8445_v37  ;;  %4607 = vmatpush.bf16.msra.mxu0 %v8190_v44 }
  0x52   :  { %v12075_v41 = vld [vmem:[#allocation8 + $0x51c] sm:$0xf0] }
  0x53   :  { %v8957_v42 = vld [vmem:[#allocation8 + $0x700] sm:$0xf]  ;;  %v8702_v46 = vor.u32 %v12075_v41, %v8701_v40  ;;  %4620 = vmatpush.bf16.msra.mxu1 %v8446_v45 }
  0x54   :  { %v12139_v43 = vld [vmem:[#allocation8 + $0x71c] sm:$0xf0] }
  0x55   :  { %v8157_v47 = vld [vmem:[#allocation8 + $0xc0] sm:$0xf]  ;;  %v8958_v50 = vor.u32 %v12139_v43, %v8957_v42  ;;  %4633 = vmatpush.bf16.msra.mxu2 %v8702_v46 }
  0x56   :  { %v11939_v48 = vld [vmem:[#allocation8 + $0xdc] sm:$0xf0] }
  0x57   :  { %v8413_v49 = vld [vmem:[#allocation8 + $0x2c0] sm:$0xf]  ;;  %v8158_v56 = vor.u32 %v11939_v48, %v8157_v47  ;;  %4646 = vmatpush.bf16.msra.mxu3 %v8958_v50 }
  0x58   :  { %v12003_v51 = vld [vmem:[#allocation8 + $0x2dc] sm:$0xf0] }
  0x59   :  { %v8669_v52 = vld [vmem:[#allocation8 + $0x4c0] sm:$0xf]  ;;  %v8414_v57 = vor.u32 %v12003_v51, %v8413_v49  ;;  %4608 = vmatpush.bf16.msra.mxu0 %v8158_v56 }
  0x5a   :  { %v12067_v53 = vld [vmem:[#allocation8 + $0x4dc] sm:$0xf0] }
  0x5b   :  { %v8925_v54 = vld [vmem:[#allocation8 + $0x6c0] sm:$0xf]  ;;  %v8670_v58 = vor.u32 %v12067_v53, %v8669_v52  ;;  %4621 = vmatpush.bf16.msra.mxu1 %v8414_v57  ;;  %v216_v52 = vld [vmem:[#allocation2] sm:$0xff] }
  0x5c   :  { %v12131_v55 = vld [vmem:[#allocation8 + $0x6dc] sm:$0xf0]  ;;  %222 = vst [vmem:[#allocation1] ss:$4 sm:$0xff] %v216_v52 }
  0x5d   :  { %v8125_v59 = vld [vmem:[#allocation8 + $0x80] sm:$0xf]  ;;  %v8926_v62 = vor.u32 %v12131_v55, %v8925_v54  ;;  %4634 = vmatpush.bf16.msra.mxu2 %v8670_v58 }
  0x5e   :  { %v11931_v60 = vld [vmem:[#allocation8 + $0x9c] sm:$0xf0] }
  0x5f   :  { %v8381_v61 = vld [vmem:[#allocation8 + $0x280] sm:$0xf]  ;;  %v8126_v4 = vor.u32 %v11931_v60, %v8125_v59  ;;  %4647 = vmatpush.bf16.msra.mxu3 %v8926_v62 }
  0x60   :  { %v11995_v63 = vld [vmem:[#allocation8 + $0x29c] sm:$0xf0] }
  0x61   :  { %v8637_v0 = vld [vmem:[#allocation8 + $0x480] sm:$0xf]  ;;  %v8382_v5 = vor.u32 %v11995_v63, %v8381_v61  ;;  %4609 = vmatpush.bf16.msra.mxu0 %v8126_v4 }
  0x62   :  { %v12059_v1 = vld [vmem:[#allocation8 + $0x49c] sm:$0xf0] }
  0x63   :  { %v8893_v2 = vld [vmem:[#allocation8 + $0x680] sm:$0xf]  ;;  %v8638_v6 = vor.u32 %v12059_v1, %v8637_v0  ;;  %4622 = vmatpush.bf16.msra.mxu1 %v8382_v5 }
  0x64   :  { %v12123_v3 = vld [vmem:[#allocation8 + $0x69c] sm:$0xf0] }
  0x65   :  { %v8093_v7 = vld [vmem:[#allocation8 + $0x40] sm:$0xf]  ;;  %v8894_v10 = vor.u32 %v12123_v3, %v8893_v2  ;;  %4635 = vmatpush.bf16.msra.mxu2 %v8638_v6 }
  0x66   :  { %v11923_v8 = vld [vmem:[#allocation8 + $0x5c] sm:$0xf0] }
  0x67   :  { %v8349_v9 = vld [vmem:[#allocation8 + $0x240] sm:$0xf]  ;;  %v8094_v16 = vor.u32 %v11923_v8, %v8093_v7  ;;  %4648 = vmatpush.bf16.msra.mxu3 %v8894_v10 }
  0x68   :  { %v11987_v11 = vld [vmem:[#allocation8 + $0x25c] sm:$0xf0] }
  0x69   :  { %v8605_v12 = vld [vmem:[#allocation8 + $0x440] sm:$0xf]  ;;  %v8350_v19 = vor.u32 %v11987_v11, %v8349_v9  ;;  %4610 = vmatpush.bf16.msra.mxu0 %v8094_v16 }
  0x6a   :  { %v12051_v13 = vld [vmem:[#allocation8 + $0x45c] sm:$0xf0] }
  0x6b   :  { %v8861_v14 = vld [vmem:[#allocation8 + $0x640] sm:$0xf]  ;;  %v8606_v20 = vor.u32 %v12051_v13, %v8605_v12  ;;  %4623 = vmatpush.bf16.msra.mxu1 %v8350_v19  ;;  %v218_v13 = vld [vmem:[#allocation2 + $0x10] sm:$0xff] }
  0x6c   :  { %v12115_v15 = vld [vmem:[#allocation8 + $0x65c] sm:$0xf0] }
  0x6d   :  { %v8061_v17 = vld [vmem:[#allocation8] sm:$0xf]  ;;  %v8862_v24 = vor.u32 %v12115_v15, %v8861_v14  ;;  %4636 = vmatpush.bf16.msra.mxu2 %v8606_v20  ;;  %v225_v14 = vld.sshfl [vmem:[#allocation1] sm:$0xff pattern:$0x73625140] }
  0x6e   :  { %v11915_v18 = vld [vmem:[#allocation8 + $0x1c] sm:$0xf0]  ;;  %v13355_v19 = vpack.c.bf16 %v225_v14, %v225_v14 }
  0x6f   :  { %v8317_v21 = vld [vmem:[#allocation8 + $0x200] sm:$0xf]  ;;  %v8062_v31 = vor.u32 %v11915_v18, %v8061_v17  ;;  %4649 = vmatpush.bf16.msra.mxu3 %v8862_v24 }
  0x70   :  { %v11979_v22 = vld [vmem:[#allocation8 + $0x21c] sm:$0xf0] }
  0x71   :  { %v8573_v23 = vld [vmem:[#allocation8 + $0x400] sm:$0xf]  ;;  %v8318_v35 = vor.u32 %v11979_v22, %v8317_v21  ;;  %4611 = vmatpush.bf16.msra.mxu0 %v8062_v31  ;;  %v228_v21 = vld.sshfl [vmem:[#allocation1 + $0x18] sm:$0xff pattern:$0x73625140] }
  0x72   :  { %v12043_v25 = vld [vmem:[#allocation8 + $0x41c] sm:$0xf0]  ;;  %v226_v22 = vld.sshfl [vmem:[#allocation1 + $0x8] sm:$0xff pattern:$0x73625140]  ;;  %v13359_v24 = vpack.c.bf16 %v228_v21, %v228_v21 }
  0x73   :  { %v8829_v26 = vld [vmem:[#allocation8 + $0x600] sm:$0xf]  ;;  %v8574_v36 = vor.u32 %v12043_v25, %v8573_v23  ;;  %4624 = vmatpush.bf16.msra.mxu1 %v8318_v35 }
  0x74   :  { %v12107_v27 = vld [vmem:[#allocation8 + $0x61c] sm:$0xf0]  ;;  %4612 = vmatmul.bf16.vlgmr.msra.gmra.mxu0 %v13355_v19 }
  0x75   :  { %v9309_v28 = vld [vmem:[#allocation8 + $0x9c0] sm:$0xf]  ;;  %v8830_v39 = vor.u32 %v12107_v27, %v8829_v26  ;;  %4637 = vmatpush.bf16.msra.mxu2 %v8574_v36  ;;  %v13361_v27 = vpack.c.bf16 %v226_v22, %v226_v22 }
  0x76   :  { %v12227_v29 = vld [vmem:[#allocation8 + $0x9dc] sm:$0xf0] }
  0x77   :  { %v9565_v30 = vld [vmem:[#allocation8 + $0xbc0] sm:$0xf]  ;;  %v9310_v40 = vor.u32 %v12227_v29, %v9309_v28  ;;  %4650 = vmatpush.bf16.msra.mxu3 %v8830_v39  ;;  %4625 = vmatmul.bf16.vlgmr.msra.gmra.mxu1 %v13361_v27 }
  0x78   :  { %v12291_v32 = vld [vmem:[#allocation8 + $0xbdc] sm:$0xf0] }
  0x79   :  { %v9821_v33 = vld [vmem:[#allocation8 + $0xdc0] sm:$0xf]  ;;  %v9566_v41 = vor.u32 %v12291_v32, %v9565_v30  ;;  %4656 = vmatpush.bf16.msrb.mxu0 %v9310_v40 }
  0x7a   :  { %v12355_v34 = vld [vmem:[#allocation8 + $0xddc] sm:$0xf0]  ;;  %4651 = vmatmul.bf16.vlgmr.msra.gmra.mxu3 %v13359_v24 }
  0x7b   :  { %v10077_v37 = vld [vmem:[#allocation8 + $0xfc0] sm:$0xf]  ;;  %v9822_v42 = vor.u32 %v12355_v34, %v9821_v33  ;;  %4669 = vmatpush.bf16.msrb.mxu1 %v9566_v41 }
  0x7c   :  { %v12419_v38 = vld [vmem:[#allocation8 + $0xfdc] sm:$0xf0] }
  0x7d   :  { %v9277_v43 = vld [vmem:[#allocation8 + $0x980] sm:$0xf]  ;;  %v10078_v46 = vor.u32 %v12419_v38, %v10077_v37  ;;  %4682 = vmatpush.bf16.msrb.mxu2 %v9822_v42 }
  0x7e   :  { %v12219_v44 = vld [vmem:[#allocation8 + $0x99c] sm:$0xf0] }
  0x7f   :  { %v9533_v45 = vld [vmem:[#allocation8 + $0xb80] sm:$0xf]  ;;  %v9278_v53 = vor.u32 %v12219_v44, %v9277_v43  ;;  %4695 = vmatpush.bf16.msrb.mxu3 %v10078_v46 }
  0x80   :  { %v12283_v47 = vld [vmem:[#allocation8 + $0xb9c] sm:$0xf0] }
  0x81   :  { %v9789_v48 = vld [vmem:[#allocation8 + $0xd80] sm:$0xf]  ;;  %v9534_v54 = vor.u32 %v12283_v47, %v9533_v45  ;;  %4657 = vmatpush.bf16.msrb.mxu0 %v9278_v53 }
  0x82   :  { %v12347_v49 = vld [vmem:[#allocation8 + $0xd9c] sm:$0xf0] }
  0x83   :  { %v10045_v50 = vld [vmem:[#allocation8 + $0xf80] sm:$0xf]  ;;  %v9790_v55 = vor.u32 %v12347_v49, %v9789_v48  ;;  %4670 = vmatpush.bf16.msrb.mxu1 %v9534_v54 }
  0x84   :  { %v12411_v51 = vld [vmem:[#allocation8 + $0xf9c] sm:$0xf0] }
  0x85   :  { %v9245_v56 = vld [vmem:[#allocation8 + $0x940] sm:$0xf]  ;;  %v10046_v59 = vor.u32 %v12411_v51, %v10045_v50  ;;  %4683 = vmatpush.bf16.msrb.mxu2 %v9790_v55 }
  0x86   :  { %v12211_v57 = vld [vmem:[#allocation8 + $0x95c] sm:$0xf0] }
  0x87   :  { %v9501_v58 = vld [vmem:[#allocation8 + $0xb40] sm:$0xf]  ;;  %v9246_v1 = vor.u32 %v12211_v57, %v9245_v56  ;;  %4696 = vmatpush.bf16.msrb.mxu3 %v10046_v59 }
  0x88   :  { %v12275_v60 = vld [vmem:[#allocation8 + $0xb5c] sm:$0xf0] }
  0x89   :  { %v9757_v61 = vld [vmem:[#allocation8 + $0xd40] sm:$0xf]  ;;  %v9502_v5 = vor.u32 %v12275_v60, %v9501_v58  ;;  %4658 = vmatpush.bf16.msrb.mxu0 %v9246_v1 }
  0x8a   :  { %v12339_v62 = vld [vmem:[#allocation8 + $0xd5c] sm:$0xf0] }
  0x8b   :  { %v10013_v63 = vld [vmem:[#allocation8 + $0xf40] sm:$0xf]  ;;  %v9758_v6 = vor.u32 %v12339_v62, %v9757_v61  ;;  %4671 = vmatpush.bf16.msrb.mxu1 %v9502_v5 }
  0x8c   :  { %v12403_v0 = vld [vmem:[#allocation8 + $0xf5c] sm:$0xf0] }
  0x8d   :  { %v9213_v2 = vld [vmem:[#allocation8 + $0x900] sm:$0xf]  ;;  %v10014_v10 = vor.u32 %v12403_v0, %v10013_v63  ;;  %4684 = vmatpush.bf16.msrb.mxu2 %v9758_v6 }
  0x8e   :  { %v12203_v3 = vld [vmem:[#allocation8 + $0x91c] sm:$0xf0] }
  0x8f   :  { %v9469_v4 = vld [vmem:[#allocation8 + $0xb00] sm:$0xf]  ;;  %v9214_v17 = vor.u32 %v12203_v3, %v9213_v2  ;;  %4697 = vmatpush.bf16.msrb.mxu3 %v10014_v10 }
  0x90   :  { %v12267_v7 = vld [vmem:[#allocation8 + $0xb1c] sm:$0xf0] }
  0x91   :  { %v9725_v8 = vld [vmem:[#allocation8 + $0xd00] sm:$0xf]  ;;  %v9470_v18 = vor.u32 %v12267_v7, %v9469_v4  ;;  %4659 = vmatpush.bf16.msrb.mxu0 %v9214_v17 }
  0x92   :  { %v12331_v9 = vld [vmem:[#allocation8 + $0xd1c] sm:$0xf0] }
  0x93   :  { %v9981_v11 = vld [vmem:[#allocation8 + $0xf00] sm:$0xf]  ;;  %v9726_v23 = vor.u32 %v12331_v9, %v9725_v8  ;;  %4672 = vmatpush.bf16.msrb.mxu1 %v9470_v18 }
  0x94   :  { %v12395_v12 = vld [vmem:[#allocation8 + $0xf1c] sm:$0xf0] }
  0x95   :  { %v227_v15 = vld.sshfl [vmem:[#allocation1 + $0x10] sm:$0xff pattern:$0x73625140]  ;;  %v9982_v28 = vor.u32 %v12395_v12, %v9981_v11  ;;  %4685 = vmatpush.bf16.msrb.mxu2 %v9726_v23 }
  0x96   :  { %v9181_v16 = vld [vmem:[#allocation8 + $0x8c0] sm:$0xf]  ;;  %v13357_v20 = vpack.c.bf16 %v227_v15, %v227_v15  ;;  %233 = vst [vmem:[#allocation1] ss:$4 sm:$0xff] %v218_v13 }
  0x97   :  { %v12195_v25 = vld [vmem:[#allocation8 + $0x8dc] sm:$0xf0]  ;;  %4698 = vmatpush.bf16.msrb.mxu3 %v9982_v28 }
  0x98   :  { %v9437_v26 = vld [vmem:[#allocation8 + $0xac0] sm:$0xf]  ;;  %4638 = vmatmul.bf16.vlgmr.msra.gmra.mxu2 %v13357_v20  ;;  %v9182_v34 = vor.u32 %v12195_v25, %v9181_v16 }
  0x99   :  { %v12259_v29 = vld [vmem:[#allocation8 + $0xadc] sm:$0xf0] }
  0x9a   :  { %v9693_v30 = vld [vmem:[#allocation8 + $0xcc0] sm:$0xf]  ;;  %v9438_v35 = vor.u32 %v12259_v29, %v9437_v26  ;;  %4660 = vmatpush.bf16.msrb.mxu0 %v9182_v34 }
  0x9b   :  { %v12323_v31 = vld [vmem:[#allocation8 + $0xcdc] sm:$0xf0] }
  0x9c   :  { %v9949_v32 = vld [vmem:[#allocation8 + $0xec0] sm:$0xf]  ;;  %v9694_v36 = vor.u32 %v12323_v31, %v9693_v30  ;;  %4673 = vmatpush.bf16.msrb.mxu1 %v9438_v35 }
  0x9d   :  { %v12387_v33 = vld [vmem:[#allocation8 + $0xedc] sm:$0xf0] }
  0x9e   :  { %v9149_v37 = vld [vmem:[#allocation8 + $0x880] sm:$0xf]  ;;  %v9950_v40 = vor.u32 %v12387_v33, %v9949_v32  ;;  %4686 = vmatpush.bf16.msrb.mxu2 %v9694_v36 }
  0x9f   :  { %v12187_v38 = vld [vmem:[#allocation8 + $0x89c] sm:$0xf0] }
  0xa0   :  { %v9405_v39 = vld [vmem:[#allocation8 + $0xa80] sm:$0xf]  ;;  %v9150_v47 = vor.u32 %v12187_v38, %v9149_v37  ;;  %4699 = vmatpush.bf16.msrb.mxu3 %v9950_v40 }
  0xa1   :  { %v12251_v41 = vld [vmem:[#allocation8 + $0xa9c] sm:$0xf0] }
  0xa2   :  { %v9661_v42 = vld [vmem:[#allocation8 + $0xc80] sm:$0xf]  ;;  %v9406_v48 = vor.u32 %v12251_v41, %v9405_v39  ;;  %4661 = vmatpush.bf16.msrb.mxu0 %v9150_v47 }
  0xa3   :  { %v12315_v43 = vld [vmem:[#allocation8 + $0xc9c] sm:$0xf0] }
  0xa4   :  { %v9917_v44 = vld [vmem:[#allocation8 + $0xe80] sm:$0xf]  ;;  %v9662_v49 = vor.u32 %v12315_v43, %v9661_v42  ;;  %4674 = vmatpush.bf16.msrb.mxu1 %v9406_v48 }
  0xa5   :  { %v12379_v45 = vld [vmem:[#allocation8 + $0xe9c] sm:$0xf0] }
  0xa6   :  { %v217_v46 = vld [vmem:[#allocation2 + $0x8] sm:$0xff]  ;;  %v9918_v53 = vor.u32 %v12379_v45, %v9917_v44  ;;  %4687 = vmatpush.bf16.msrb.mxu2 %v9662_v49 }
  0xa7   :  { %224 = vst [vmem:[#allocation1 + $0x20] ss:$4 sm:$0xff] %v217_v46  ;;  %v9117_v50 = vld [vmem:[#allocation8 + $0x840] sm:$0xf]  ;;  %v11967_v44 = vld [vmem:[#allocation8 + $0x1c4] sm:$0xf] }
  0xa8   :  { %v12179_v51 = vld [vmem:[#allocation8 + $0x85c] sm:$0xf0]  ;;  %4700 = vmatpush.bf16.msrb.mxu3 %v9918_v53  ;;  %v8287_v45 = vld [vmem:[#allocation8 + $0x1e0] sm:$0xf0] }
  0xa9   :  { %v9373_v52 = vld [vmem:[#allocation8 + $0xa40] sm:$0xf]  ;;  %v9118_v60 = vor.u32 %v12179_v51, %v9117_v50 }
  0xaa   :  { %v12243_v54 = vld [vmem:[#allocation8 + $0xa5c] sm:$0xf0] }
  0xab   :  { %v9629_v55 = vld [vmem:[#allocation8 + $0xc40] sm:$0xf]  ;;  %v9374_v0 = vor.u32 %v12243_v54, %v9373_v52  ;;  %4662 = vmatpush.bf16.msrb.mxu0 %v9118_v60 }
  0xac   :  { %v12307_v56 = vld [vmem:[#allocation8 + $0xc5c] sm:$0xf0] }
  0xad   :  { %v9885_v57 = vld [vmem:[#allocation8 + $0xe40] sm:$0xf]  ;;  %v9630_v1 = vor.u32 %v12307_v56, %v9629_v55  ;;  %4675 = vmatpush.bf16.msrb.mxu1 %v9374_v0  ;;  %v8290_v55 = vor.u32 %v11967_v44, %v8287_v45 }
  0xae   :  { %v12371_v58 = vld [vmem:[#allocation8 + $0xe5c] sm:$0xf0]  ;;  %v229_v18 = vld.sshfl [vmem:[#allocation1 + $0x20] sm:$0xff pattern:$0x73625140] }
  0xaf   :  { %v9085_v59 = vld [vmem:[#allocation8 + $0x800] sm:$0xf]  ;;  %v9886_v5 = vor.u32 %v12371_v58, %v9885_v57  ;;  %4688 = vmatpush.bf16.msrb.mxu2 %v9630_v1  ;;  %v232_v28 = vld.sshfl [vmem:[#allocation1 + $0x38] sm:$0xff pattern:$0x73625140]  ;;  %v13367_v34 = vpack.c.bf16 %v229_v18, %v229_v18 }
  0xb0   :  { %v12171_v61 = vld [vmem:[#allocation8 + $0x81c] sm:$0xf0]  ;;  %v230_v31 = vld.sshfl [vmem:[#allocation1 + $0x28] sm:$0xff pattern:$0x73625140]  ;;  %v13371_v39 = vpack.c.bf16 %v232_v28, %v232_v28 }
  0xb1   :  { %v9341_v62 = vld [vmem:[#allocation8 + $0xa00] sm:$0xf]  ;;  %v9086_v12 = vor.u32 %v12171_v61, %v9085_v59  ;;  %4701 = vmatpush.bf16.msrb.mxu3 %v9886_v5  ;;  %v13373_v42 = vpack.c.bf16 %v230_v31, %v230_v31  ;;  %v11959_v57 = vld [vmem:[#allocation8 + $0x184] sm:$0xf] }
  0xb2   :  { %v12235_v63 = vld [vmem:[#allocation8 + $0xa1c] sm:$0xf0]  ;;  %v8255_v58 = vld [vmem:[#allocation8 + $0x1a0] sm:$0xf0] }
  0xb3   :  { %v9597_v2 = vld [vmem:[#allocation8 + $0xc00] sm:$0xf]  ;;  %v9342_v16 = vor.u32 %v12235_v63, %v9341_v62  ;;  %4663 = vmatpush.bf16.msrb.mxu0 %v9086_v12  ;;  %v11951_v5 = vld [vmem:[#allocation8 + $0x144] sm:$0xf] }
  0xb4   :  { %v12299_v3 = vld [vmem:[#allocation8 + $0xc1c] sm:$0xf0]  ;;  %v8191_v18 = vld [vmem:[#allocation8 + $0x120] sm:$0xf0] }
  0xb5   :  { %v9853_v4 = vld [vmem:[#allocation8 + $0xe00] sm:$0xf]  ;;  %v9598_v17 = vor.u32 %v12299_v3, %v9597_v2  ;;  %4676 = vmatpush.bf16.msrb.mxu1 %v9342_v16  ;;  %v8258_v3 = vor.u32 %v11959_v57, %v8255_v58  ;;  %v11943_v16 = vld [vmem:[#allocation8 + $0x104] sm:$0xf] }
  0xb6   :  { %v12363_v6 = vld [vmem:[#allocation8 + $0xe1c] sm:$0xf0]  ;;  %4664 = vmatmul.bf16.vlgmr.msrb.gmra.mxu0 %v13367_v34  ;;  %v237_v28 = vld.sshfl [vmem:[#allocation1 + $0x18] sm:$0xff pattern:$0x73625140] }
  0xb7   :  { %v10333_v7 = vld [vmem:[#allocation8 + $0x11c0] sm:$0xf]  ;;  %v9854_v23 = vor.u32 %v12363_v6, %v9853_v4  ;;  %4689 = vmatpush.bf16.msrb.mxu2 %v9598_v17  ;;  %v8223_v6 = vld [vmem:[#allocation8 + $0x160] sm:$0xf0] }
  0xb8   :  { %v12483_v8 = vld [vmem:[#allocation8 + $0x11dc] sm:$0xf0]  ;;  %4677 = vmatmul.bf16.vlgmr.msrb.gmra.mxu1 %v13373_v42 }
  0xb9   :  { %v10589_v9 = vld [vmem:[#allocation8 + $0x13c0] sm:$0xf]  ;;  %v10334_v25 = vor.u32 %v12483_v8, %v10333_v7  ;;  %4702 = vmatpush.bf16.msrb.mxu3 %v9854_v23 }
  0xba   :  { %v12547_v10 = vld [vmem:[#allocation8 + $0x13dc] sm:$0xf0] }
  0xbb   :  { %v10845_v11 = vld [vmem:[#allocation8 + $0x15c0] sm:$0xf]  ;;  %v10590_v29 = vor.u32 %v12547_v10, %v10589_v9  ;;  %4708 = vmatpush.bf16.msra.mxu0 %v10334_v25 }
  0xbc   :  { %v12611_v13 = vld [vmem:[#allocation8 + $0x15dc] sm:$0xf0]  ;;  %4703 = vmatmul.bf16.vlgmr.msrb.gmra.mxu3 %v13371_v39 }
  0xbd   :  { %v10909_v14 = vld [vmem:[#allocation8 + $0x1640] sm:$0xf]  ;;  %v10846_v30 = vor.u32 %v12611_v13, %v10845_v11  ;;  %4721 = vmatpush.bf16.msra.mxu1 %v10590_v29 }
  0xbe   :  { %v12627_v15 = vld [vmem:[#allocation8 + $0x165c] sm:$0xf0] }
  0xbf   :  { %v10301_v21 = vld [vmem:[#allocation8 + $0x1180] sm:$0xf]  ;;  %v10910_v33 = vor.u32 %v12627_v15, %v10909_v14  ;;  %4734 = vmatpush.bf16.msra.mxu2 %v10846_v30  ;;  %v8226_v15 = vor.u32 %v11951_v5, %v8223_v6  ;;  %v9055_v6 = vld [vmem:[#allocation8 + $0x7e0] sm:$0xf0] }
  0xc0   :  { %v12475_v22 = vld [vmem:[#allocation8 + $0x119c] sm:$0xf0] }
  0xc1   :  { %v231_v26 = vld.sshfl [vmem:[#allocation1 + $0x30] sm:$0xff pattern:$0x73625140]  ;;  %v10302_v43 = vor.u32 %v12475_v22, %v10301_v21  ;;  %4753 = vmatpush.bf16.msra.mxu3 %v10910_v33 }
  0xc2   :  { %v10557_v32 = vld [vmem:[#allocation8 + $0x1380] sm:$0xf]  ;;  %v13369_v38 = vpack.c.bf16 %v231_v26, %v231_v26 }
  0xc3   :  { %v12539_v35 = vld [vmem:[#allocation8 + $0x139c] sm:$0xf0]  ;;  %4709 = vmatpush.bf16.msra.mxu0 %v10302_v43 }
  0xc4   :  { %v10813_v36 = vld [vmem:[#allocation8 + $0x1580] sm:$0xf]  ;;  %v10558_v46 = vor.u32 %v12539_v35, %v10557_v32  ;;  %4690 = vmatmul.bf16.vlgmr.msrb.gmra.mxu2 %v13369_v38  ;;  %v8194_v32 = vor.u32 %v11943_v16, %v8191_v18  ;;  %v11935_v35 = vld [vmem:[#allocation8 + $0xc4] sm:$0xf] }
  0xc5   :  { %v12603_v37 = vld [vmem:[#allocation8 + $0x159c] sm:$0xf0]  ;;  %v8511_v18 = vld [vmem:[#allocation8 + $0x3a0] sm:$0xf0] }
  0xc6   :  { %v10877_v40 = vld [vmem:[#allocation8 + $0x1600] sm:$0xf]  ;;  %v10814_v47 = vor.u32 %v12603_v37, %v10813_v36  ;;  %4722 = vmatpush.bf16.msra.mxu1 %v10558_v46  ;;  %v8159_v36 = vld [vmem:[#allocation8 + $0xe0] sm:$0xf0] }
  0xc7   :  { %v12619_v41 = vld [vmem:[#allocation8 + $0x161c] sm:$0xf0] }
  0xc8   :  { %v10269_v48 = vld [vmem:[#allocation8 + $0x1140] sm:$0xf]  ;;  %v10878_v51 = vor.u32 %v12619_v41, %v10877_v40  ;;  %4735 = vmatpush.bf16.msra.mxu2 %v10814_v47  ;;  %v13379_v40 = vpack.c.bf16 %v237_v28, %v237_v28  ;;  %v12151_v28 = vld [vmem:[#allocation8 + $0x784] sm:$0xf] }
  0xc9   :  { %v12467_v49 = vld [vmem:[#allocation8 + $0x115c] sm:$0xf0] }
  0xca   :  { %v10525_v50 = vld [vmem:[#allocation8 + $0x1340] sm:$0xf]  ;;  %v10270_v56 = vor.u32 %v12467_v49, %v10269_v48  ;;  %4754 = vmatpush.bf16.msra.mxu3 %v10878_v51  ;;  %v8162_v49 = vor.u32 %v11935_v35, %v8159_v36  ;;  %v8127_v51 = vld [vmem:[#allocation8 + $0xa0] sm:$0xf0] }
  0xcb   :  { %v12531_v52 = vld [vmem:[#allocation8 + $0x135c] sm:$0xf0]  ;;  %v12015_v36 = vld [vmem:[#allocation8 + $0x344] sm:$0xf] }
  0xcc   :  { %v10781_v53 = vld [vmem:[#allocation8 + $0x1540] sm:$0xf]  ;;  %v10526_v59 = vor.u32 %v12531_v52, %v10525_v50  ;;  %4710 = vmatpush.bf16.msra.mxu0 %v10270_v56  ;;  %v11927_v50 = vld [vmem:[#allocation8 + $0x84] sm:$0xf] }
  0xcd   :  { %v12595_v54 = vld [vmem:[#allocation8 + $0x155c] sm:$0xf0]  ;;  %10939 = vmatmul.msk.bf16.vlgmr.msra.gmra.mxu3 %vm4600_vm0, %v13379_v40 }
  0xce   :  { %v10782_v60 = vor.u32 %v12595_v54, %v10781_v53  ;;  %v10237_v61 = vld [vmem:[#allocation8 + $0x1100] sm:$0xf]  ;;  %4760 = vmatpush.bf16.msrb.mxu3 %v8290_v55  ;;  %4723 = vmatpush.bf16.msra.mxu1 %v10526_v59 }
  0xcf   :  { %v12459_v62 = vld [vmem:[#allocation8 + $0x111c] sm:$0xf0] }
  0xd0   :  { %v10493_v63 = vld [vmem:[#allocation8 + $0x1300] sm:$0xf]  ;;  %v10238_v4 = vor.u32 %v12459_v62, %v10237_v61  ;;  %4736 = vmatpush.bf16.msra.mxu2 %v10782_v60  ;;  %v11919_v61 = vld [vmem:[#allocation8 + $0x44] sm:$0xf] }
  0xd1   :  { %v12523_v0 = vld [vmem:[#allocation8 + $0x131c] sm:$0xf0]  ;;  %v8095_v62 = vld [vmem:[#allocation8 + $0x60] sm:$0xf0] }
  0xd2   :  { %v10749_v1 = vld [vmem:[#allocation8 + $0x1500] sm:$0xf]  ;;  %v10494_v7 = vor.u32 %v12523_v0, %v10493_v63  ;;  %4761 = vmatpush.bf16.msrb.mxu3 %v8258_v3  ;;  %4711 = vmatpush.bf16.msra.mxu0 %v10238_v4  ;;  %v12031_v63 = vld [vmem:[#allocation8 + $0x3c4] sm:$0xf]  ;;  %v8098_v16 = vor.u32 %v11919_v61, %v8095_v62 }
  0xd3   :  { %v12587_v2 = vld [vmem:[#allocation8 + $0x151c] sm:$0xf0]  ;;  %v8543_v0 = vld [vmem:[#allocation8 + $0x3e0] sm:$0xf0] }
  0xd4   :  { %v10750_v8 = vor.u32 %v12587_v2, %v10749_v1  ;;  %v10205_v9 = vld [vmem:[#allocation8 + $0x10c0] sm:$0xf]  ;;  %4724 = vmatpush.bf16.msra.mxu1 %v10494_v7  ;;  %v8130_v1 = vor.u32 %v11927_v50, %v8127_v51  ;;  %v12095_v2 = vld [vmem:[#allocation8 + $0x5c4] sm:$0xf] }
  0xd5   :  { %v12451_v10 = vld [vmem:[#allocation8 + $0x10dc] sm:$0xf0]  ;;  %v8799_v3 = vld [vmem:[#allocation8 + $0x5e0] sm:$0xf0] }
  0xd6   :  { %v10461_v11 = vld [vmem:[#allocation8 + $0x12c0] sm:$0xf]  ;;  %v10206_v17 = vor.u32 %v12451_v10, %v10205_v9  ;;  %4737 = vmatpush.bf16.msra.mxu2 %v10750_v8  ;;  %4762 = vmatpush.bf16.msrb.mxu3 %v8226_v15  ;;  %v12159_v4 = vld [vmem:[#allocation8 + $0x7c4] sm:$0xf] }
  0xd7   :  { %v12515_v12 = vld [vmem:[#allocation8 + $0x12dc] sm:$0xf0]  ;;  %v234_v7 = vld.sshfl [vmem:[#allocation1] sm:$0xff pattern:$0x73625140] }
  0xd8   :  { %v10717_v13 = vld [vmem:[#allocation8 + $0x14c0] sm:$0xf]  ;;  %v10462_v23 = vor.u32 %v12515_v12, %v10461_v11  ;;  %4712 = vmatpush.bf16.msra.mxu0 %v10206_v17  ;;  %v235_v11 = vld.sshfl [vmem:[#allocation1 + $0x8] sm:$0xff pattern:$0x73625140]  ;;  %v8546_v12 = vor.u32 %v12031_v63, %v8543_v0  ;;  %v9058_v17 = vor.u32 %v12159_v4, %v9055_v6 }
  0xd9   :  { %v12579_v14 = vld [vmem:[#allocation8 + $0x14dc] sm:$0xf0]  ;;  %v12023_v15 = vld [vmem:[#allocation8 + $0x384] sm:$0xf] }
  0xda   :  { %v10173_v21 = vld [vmem:[#allocation8 + $0x1080] sm:$0xf]  ;;  %v10718_v25 = vor.u32 %v12579_v14, %v10717_v13  ;;  %4725 = vmatpush.bf16.msra.mxu1 %v10462_v23  ;;  %4763 = vmatpush.bf16.msrb.mxu3 %v8194_v32  ;;  %v8802_v13 = vor.u32 %v12095_v2, %v8799_v3  ;;  %v11911_v14 = vld [vmem:[#allocation8 + $0x4] sm:$0xf]  ;;  %v13383_v23 = vpack.c.bf16 %v234_v7, %v234_v7 }
  0xdb   :  { %v12443_v22 = vld [vmem:[#allocation8 + $0x109c] sm:$0xf0]  ;;  %v9311_v32 = vld [vmem:[#allocation8 + $0x9e0] sm:$0xf0] }
  0xdc   :  { %v10429_v26 = vld [vmem:[#allocation8 + $0x1280] sm:$0xf]  ;;  %v10174_v33 = vor.u32 %v12443_v22, %v10173_v21  ;;  %4738 = vmatpush.bf16.msra.mxu2 %v10718_v25  ;;  %v12087_v21 = vld [vmem:[#allocation8 + $0x584] sm:$0xf] }
  0xdd   :  { %v12507_v29 = vld [vmem:[#allocation8 + $0x129c] sm:$0xf0]  ;;  %v8767_v22 = vld [vmem:[#allocation8 + $0x5a0] sm:$0xf0] }
  0xde   :  { %v10685_v30 = vld [vmem:[#allocation8 + $0x1480] sm:$0xf]  ;;  %v10430_v41 = vor.u32 %v12507_v29, %v10429_v26  ;;  %4713 = vmatpush.bf16.msra.mxu0 %v10174_v33  ;;  %4764 = vmatpush.bf16.msrb.mxu3 %v8162_v49  ;;  %v8063_v26 = vld [vmem:[#allocation8 + $0x20] sm:$0xf0]  ;;  %v8514_v33 = vor.u32 %v12023_v15, %v8511_v18  ;;  %v8770_v35 = vor.u32 %v12087_v21, %v8767_v22 }
  0xdf   :  { %v12571_v31 = vld [vmem:[#allocation8 + $0x149c] sm:$0xf0]  ;;  %v9023_v29 = vld [vmem:[#allocation8 + $0x7a0] sm:$0xf0] }
  0xe0   :  { %v10141_v37 = vld [vmem:[#allocation8 + $0x1040] sm:$0xf]  ;;  %v10686_v43 = vor.u32 %v12571_v31, %v10685_v30  ;;  %4726 = vmatpush.bf16.msra.mxu1 %v10430_v41  ;;  %v13387_v30 = vpack.c.bf16 %v235_v11, %v235_v11  ;;  %v12223_v31 = vld [vmem:[#allocation8 + $0x9c4] sm:$0xf]  ;;  %v9026_v41 = vor.u32 %v12151_v28, %v9023_v29 }
  0xe1   :  { %v12435_v44 = vld [vmem:[#allocation8 + $0x105c] sm:$0xf0]  ;;  %v12215_v49 = vld [vmem:[#allocation8 + $0x984] sm:$0xf] }
  0xe2   :  { %v10397_v45 = vld [vmem:[#allocation8 + $0x1240] sm:$0xf]  ;;  %v10142_v52 = vor.u32 %v12435_v44, %v10141_v37  ;;  %4739 = vmatpush.bf16.msra.mxu2 %v10686_v43  ;;  %4765 = vmatpush.bf16.msrb.mxu3 %v8130_v1  ;;  %v8066_v37 = vor.u32 %v11911_v14, %v8063_v26  ;;  %v8479_v43 = vld [vmem:[#allocation8 + $0x360] sm:$0xf0] }
  0xe3   :  { %v12499_v46 = vld [vmem:[#allocation8 + $0x125c] sm:$0xf0]  ;;  %v12079_v44 = vld [vmem:[#allocation8 + $0x544] sm:$0xf]  ;;  %v8482_v51 = vor.u32 %v12015_v36, %v8479_v43 }
  0xe4   :  { %v10653_v47 = vld [vmem:[#allocation8 + $0x1440] sm:$0xf]  ;;  %v10398_v56 = vor.u32 %v12499_v46, %v10397_v45  ;;  %4714 = vmatpush.bf16.msra.mxu0 %v10142_v52  ;;  %v8735_v45 = vld [vmem:[#allocation8 + $0x560] sm:$0xf0]  ;;  %v9314_v46 = vor.u32 %v12223_v31, %v9311_v32 }
  0xe5   :  { %v12563_v48 = vld [vmem:[#allocation8 + $0x145c] sm:$0xf0]  ;;  %v9279_v50 = vld [vmem:[#allocation8 + $0x9a0] sm:$0xf0]  ;;  %v8738_v52 = vor.u32 %v12079_v44, %v8735_v45 }
  0xe6   :  { %v10109_v53 = vld [vmem:[#allocation8 + $0x1000] sm:$0xf]  ;;  %v10654_v57 = vor.u32 %v12563_v48, %v10653_v47  ;;  %4727 = vmatpush.bf16.msra.mxu1 %v10398_v56  ;;  %4766 = vmatpush.bf16.msrb.mxu3 %v8098_v16  ;;  %v12143_v47 = vld [vmem:[#allocation8 + $0x744] sm:$0xf] }
  0xe7   :  { %v12427_v54 = vld [vmem:[#allocation8 + $0x101c] sm:$0xf0]  ;;  %v8991_v48 = vld [vmem:[#allocation8 + $0x760] sm:$0xf0] }
  0xe8   :  { %v10365_v55 = vld [vmem:[#allocation8 + $0x1200] sm:$0xf]  ;;  %v10110_v5 = vor.u32 %v12427_v54, %v10109_v53  ;;  %4740 = vmatpush.bf16.msra.mxu2 %v10654_v57  ;;  %v12007_v53 = vld [vmem:[#allocation8 + $0x304] sm:$0xf]  ;;  %v8994_v54 = vor.u32 %v12143_v47, %v8991_v48 }
  0xe9   :  { %v12491_v58 = vld [vmem:[#allocation8 + $0x121c] sm:$0xf0]  ;;  %v12071_v56 = vld [vmem:[#allocation8 + $0x504] sm:$0xf] }
  0xea   :  { %v10621_v59 = vld [vmem:[#allocation8 + $0x1400] sm:$0xf]  ;;  %v10366_v8 = vor.u32 %v12491_v58, %v10365_v55  ;;  %4715 = vmatpush.bf16.msra.mxu0 %v10110_v5  ;;  %4767 = vmatpush.bf16.msrb.mxu3 %v8066_v37  ;;  %v8447_v55 = vld [vmem:[#allocation8 + $0x320] sm:$0xf0]  ;;  %v9282_v58 = vor.u32 %v12215_v49, %v9279_v50 }
  0xeb   :  { %v12555_v60 = vld [vmem:[#allocation8 + $0x141c] sm:$0xf0]  ;;  %v8703_v57 = vld [vmem:[#allocation8 + $0x520] sm:$0xf0]  ;;  %v8450_v63 = vor.u32 %v12007_v53, %v8447_v55 }
  0xec   :  { %v10622_v9 = vor.u32 %v12555_v60, %v10621_v59  ;;  %v236_v10 = vld.sshfl [vmem:[#allocation1 + $0x10] sm:$0xff pattern:$0x73625140]  ;;  %4728 = vmatpush.bf16.msra.mxu1 %v10366_v8  ;;  %v8706_v0 = vor.u32 %v12071_v56, %v8703_v57 }
  0xed   :  { %v13385_v25 = vpack.c.bf16 %v236_v10, %v236_v10  ;;  %4716 = vmatmul.bf16.vlgmr.msra.gmra.mxu0 %v13383_v23  ;;  %v12135_v59 = vld [vmem:[#allocation8 + $0x704] sm:$0xf]  ;;  %4768 = vmatmul.bf16.vlgmr.msrb.gmra.mxu3 %v13355_v19 }
  0xee   :  { %4741 = vmatpush.bf16.msra.mxu2 %v10622_v9  ;;  %4773 = vmatpush.bf16.msrb.mxu0 %v8546_v12  ;;  %v8959_v60 = vld [vmem:[#allocation8 + $0x720] sm:$0xf0] }
  0xef   :  { %4729 = vmatmul.bf16.vlgmr.msra.gmra.mxu1 %v13387_v30  ;;  %4812 = vmatpush.bf16.msra.mxu3 %v9314_v46  ;;  %v12207_v61 = vld [vmem:[#allocation8 + $0x944] sm:$0xf]  ;;  %v8962_v2 = vor.u32 %v12135_v59, %v8959_v60 }
  0xf0   :  { %4786 = vmatpush.bf16.msrb.mxu1 %v8802_v13  ;;  %v9247_v62 = vld [vmem:[#allocation8 + $0x960] sm:$0xf0] }
  0xf1   :  { %4742 = vmatmul.bf16.vlgmr.msra.gmra.mxu2 %v13385_v25  ;;  %v11999_v1 = vld [vmem:[#allocation8 + $0x2c4] sm:$0xf]  ;;  %v9250_v6 = vor.u32 %v12207_v61, %v9247_v62 }
  0xf2   :  { %4799 = vmatpush.bf16.msrb.mxu2 %v9058_v17  ;;  %4774 = vmatpush.bf16.msrb.mxu0 %v8514_v33  ;;  %v8415_v3 = vld [vmem:[#allocation8 + $0x2e0] sm:$0xf0] }
  0xf3   :  { %v12063_v4 = vld [vmem:[#allocation8 + $0x4c4] sm:$0xf]  ;;  %4813 = vmatpush.bf16.msra.mxu3 %v9282_v58  ;;  %v8418_v11 = vor.u32 %v11999_v1, %v8415_v3 }
  0xf4   :  { %4787 = vmatpush.bf16.msrb.mxu1 %v8770_v35  ;;  %v8671_v5 = vld [vmem:[#allocation8 + $0x4e0] sm:$0xf0] }
  0xf5   :  { %v12127_v7 = vld [vmem:[#allocation8 + $0x6c4] sm:$0xf]  ;;  %v8674_v12 = vor.u32 %v12063_v4, %v8671_v5 }
  0xf6   :  { %4800 = vmatpush.bf16.msrb.mxu2 %v9026_v41  ;;  %4775 = vmatpush.bf16.msrb.mxu0 %v8482_v51  ;;  %v8927_v8 = vld [vmem:[#allocation8 + $0x6e0] sm:$0xf0] }
  0xf7   :  { %v12199_v9 = vld [vmem:[#allocation8 + $0x904] sm:$0xf]  ;;  %v8930_v14 = vor.u32 %v12127_v7, %v8927_v8  ;;  %4814 = vmatpush.bf16.msra.mxu3 %v9250_v6 }
  0xf8   :  { %4788 = vmatpush.bf16.msrb.mxu1 %v8738_v52  ;;  %v9215_v10 = vld [vmem:[#allocation8 + $0x920] sm:$0xf0] }
  0xf9   :  { %v11991_v13 = vld [vmem:[#allocation8 + $0x284] sm:$0xf]  ;;  %v9218_v18 = vor.u32 %v12199_v9, %v9215_v10 }
  0xfa   :  { %4801 = vmatpush.bf16.msrb.mxu2 %v8994_v54  ;;  %4776 = vmatpush.bf16.msrb.mxu0 %v8450_v63  ;;  %v8383_v15 = vld [vmem:[#allocation8 + $0x2a0] sm:$0xf0] }
  0xfb   :  { %v12055_v16 = vld [vmem:[#allocation8 + $0x484] sm:$0xf]  ;;  %v8386_v29 = vor.u32 %v11991_v13, %v8383_v15  ;;  %4815 = vmatpush.bf16.msra.mxu3 %v9218_v18 }
  0xfc   :  { %4789 = vmatpush.bf16.msrb.mxu1 %v8706_v0  ;;  %v8639_v17 = vld [vmem:[#allocation8 + $0x4a0] sm:$0xf0] }
  0xfd   :  { %v12119_v21 = vld [vmem:[#allocation8 + $0x684] sm:$0xf]  ;;  %v8642_v31 = vor.u32 %v12055_v16, %v8639_v17 }
  0xfe   :  { %4802 = vmatpush.bf16.msrb.mxu2 %v8962_v2  ;;  %v8895_v22 = vld [vmem:[#allocation8 + $0x6a0] sm:$0xf0]  ;;  %4777 = vmatpush.bf16.msrb.mxu0 %v8418_v11 }
  0xff   :  { %v12191_v26 = vld [vmem:[#allocation8 + $0x8c4] sm:$0xf]  ;;  %v8898_v33 = vor.u32 %v12119_v21, %v8895_v22 }
 0x100   :  { %v9183_v28 = vld [vmem:[#allocation8 + $0x8e0] sm:$0xf0]  ;;  %4790 = vmatpush.bf16.msrb.mxu1 %v8674_v12 }
 0x101   :  { %v11983_v32 = vld [vmem:[#allocation8 + $0x244] sm:$0xf]  ;;  %v9186_v41 = vor.u32 %v12191_v26, %v9183_v28 }
 0x102   :  { %4803 = vmatpush.bf16.msrb.mxu2 %v8930_v14  ;;  %v8351_v35 = vld [vmem:[#allocation8 + $0x260] sm:$0xf0]  ;;  %4778 = vmatpush.bf16.msrb.mxu0 %v8386_v29 }
 0x103   :  { %v12047_v36 = vld [vmem:[#allocation8 + $0x444] sm:$0xf]  ;;  %v8354_v47 = vor.u32 %v11983_v32, %v8351_v35  ;;  %4816 = vmatpush.bf16.msra.mxu3 %v9186_v41 }
 0x104   :  { %v8607_v37 = vld [vmem:[#allocation8 + $0x460] sm:$0xf0]  ;;  %4791 = vmatpush.bf16.msrb.mxu1 %v8642_v31 }
 0x105   :  { %v12111_v43 = vld [vmem:[#allocation8 + $0x644] sm:$0xf]  ;;  %v8610_v48 = vor.u32 %v12047_v36, %v8607_v37 }
 0x106   :  { %v8863_v44 = vld [vmem:[#allocation8 + $0x660] sm:$0xf0]  ;;  %4804 = vmatpush.bf16.msrb.mxu2 %v8898_v33  ;;  %4779 = vmatpush.bf16.msrb.mxu0 %v8354_v47 }
 0x107   :  { %v12183_v45 = vld [vmem:[#allocation8 + $0x884] sm:$0xf]  ;;  %v8866_v52 = vor.u32 %v12111_v43, %v8863_v44 }
 0x108   :  { %v9151_v46 = vld [vmem:[#allocation8 + $0x8a0] sm:$0xf0]  ;;  %4792 = vmatpush.bf16.msrb.mxu1 %v8610_v48 }
 0x109   :  { %v11975_v49 = vld [vmem:[#allocation8 + $0x204] sm:$0xf]  ;;  %v9154_v56 = vor.u32 %v12183_v45, %v9151_v46 }
 0x10a   :  { %v8319_v50 = vld [vmem:[#allocation8 + $0x220] sm:$0xf0]  ;;  %4805 = vmatpush.bf16.msrb.mxu2 %v8866_v52 }
 0x10b   :  { %v12039_v51 = vld [vmem:[#allocation8 + $0x404] sm:$0xf]  ;;  %v8322_v63 = vor.u32 %v11975_v49, %v8319_v50  ;;  %4817 = vmatpush.bf16.msra.mxu3 %v9154_v56 }
 0x10c   :  { %v8575_v53 = vld [vmem:[#allocation8 + $0x420] sm:$0xf0] }
 0x10d   :  { %v12103_v54 = vld [vmem:[#allocation8 + $0x604] sm:$0xf]  ;;  %v8578_v0 = vor.u32 %v12039_v51, %v8575_v53  ;;  %4780 = vmatpush.bf16.msrb.mxu0 %v8322_v63 }
 0x10e   :  { %v8831_v55 = vld [vmem:[#allocation8 + $0x620] sm:$0xf0] }
 0x10f   :  { %v12175_v57 = vld [vmem:[#allocation8 + $0x844] sm:$0xf]  ;;  %v8834_v3 = vor.u32 %v12103_v54, %v8831_v55  ;;  %4793 = vmatpush.bf16.msrb.mxu1 %v8578_v0 }
 0x110   :  { %v12287_v58 = vld [vmem:[#allocation8 + $0xbc4] sm:$0xf]  ;;  %4781 = vmatmul.bf16.vlgmr.msrb.gmra.mxu0 %v13361_v27 }
 0x111   :  { %v9567_v59 = vld [vmem:[#allocation8 + $0xbe0] sm:$0xf0]  ;;  %4806 = vmatpush.bf16.msrb.mxu2 %v8834_v3 }
 0x112   :  { %v9119_v60 = vld [vmem:[#allocation8 + $0x860] sm:$0xf0]  ;;  %v9570_v4 = vor.u32 %v12287_v58, %v9567_v59  ;;  %4794 = vmatmul.bf16.vlgmr.msrb.gmra.mxu1 %v13357_v20 }
 0x113   :  { %v12351_v61 = vld [vmem:[#allocation8 + $0xdc4] sm:$0xf]  ;;  %v9122_v6 = vor.u32 %v12175_v57, %v9119_v60 }
 0x114   :  { %v9823_v62 = vld [vmem:[#allocation8 + $0xde0] sm:$0xf0]  ;;  %4825 = vmatpush.bf16.msra.mxu0 %v9570_v4  ;;  %4807 = vmatmul.bf16.vlgmr.msrb.gmra.mxu2 %v13359_v24 }
 0x115   :  { %v12415_v1 = vld [vmem:[#allocation8 + $0xfc4] sm:$0xf]  ;;  %v9826_v7 = vor.u32 %v12351_v61, %v9823_v62  ;;  %4818 = vmatpush.bf16.msra.mxu3 %v9122_v6 }
 0x116   :  { %v10079_v2 = vld [vmem:[#allocation8 + $0xfe0] sm:$0xf0] }
 0x117   :  { %v12167_v5 = vld [vmem:[#allocation8 + $0x804] sm:$0xf]  ;;  %v10082_v11 = vor.u32 %v12415_v1, %v10079_v2  ;;  %4838 = vmatpush.bf16.msra.mxu1 %v9826_v7 }
 0x118   :  { %v9087_v8 = vld [vmem:[#allocation8 + $0x820] sm:$0xf0] }
 0x119   :  { %v12279_v9 = vld [vmem:[#allocation8 + $0xb84] sm:$0xf]  ;;  %v9090_v21 = vor.u32 %v12167_v5, %v9087_v8  ;;  %4851 = vmatpush.bf16.msra.mxu2 %v10082_v11 }
 0x11a   :  { %v9535_v10 = vld [vmem:[#allocation8 + $0xba0] sm:$0xf0] }
 0x11b   :  { %v12343_v12 = vld [vmem:[#allocation8 + $0xd84] sm:$0xf]  ;;  %v9538_v18 = vor.u32 %v12279_v9, %v9535_v10  ;;  %4819 = vmatpush.bf16.msra.mxu3 %v9090_v21 }
 0x11c   :  { %v9791_v13 = vld [vmem:[#allocation8 + $0xda0] sm:$0xf0] }
 0x11d   :  { %v12407_v14 = vld [vmem:[#allocation8 + $0xf84] sm:$0xf]  ;;  %v9794_v22 = vor.u32 %v12343_v12, %v9791_v13  ;;  %4826 = vmatpush.bf16.msra.mxu0 %v9538_v18 }
 0x11e   :  { %v10047_v15 = vld [vmem:[#allocation8 + $0xfa0] sm:$0xf0]  ;;  %4820 = vmatmul.bf16.vlgmr.msra.gmra.mxu3 %v13367_v34 }
 0x11f   :  { %v12479_v16 = vld [vmem:[#allocation8 + $0x11c4] sm:$0xf]  ;;  %v10050_v29 = vor.u32 %v12407_v14, %v10047_v15  ;;  %4839 = vmatpush.bf16.msra.mxu1 %v9794_v22 }
 0x120   :  { %v10335_v17 = vld [vmem:[#allocation8 + $0x11e0] sm:$0xf0] }
 0x121   :  { %v12271_v26 = vld [vmem:[#allocation8 + $0xb44] sm:$0xf]  ;;  %v10338_v31 = vor.u32 %v12479_v16, %v10335_v17  ;;  %4852 = vmatpush.bf16.msra.mxu2 %v10050_v29 }
 0x122   :  { %v9503_v28 = vld [vmem:[#allocation8 + $0xb60] sm:$0xf0] }
 0x123   :  { %v12335_v32 = vld [vmem:[#allocation8 + $0xd44] sm:$0xf]  ;;  %v9506_v43 = vor.u32 %v12271_v26, %v9503_v28  ;;  %4864 = vmatpush.bf16.msrb.mxu3 %v10338_v31 }
 0x124   :  { %v9759_v33 = vld [vmem:[#allocation8 + $0xd60] sm:$0xf0] }
 0x125   :  { %v12399_v35 = vld [vmem:[#allocation8 + $0xf44] sm:$0xf]  ;;  %v9762_v44 = vor.u32 %v12335_v32, %v9759_v33  ;;  %4827 = vmatpush.bf16.msra.mxu0 %v9506_v43 }
 0x126   :  { %v10015_v36 = vld [vmem:[#allocation8 + $0xf60] sm:$0xf0] }
 0x127   :  { %v12471_v37 = vld [vmem:[#allocation8 + $0x1184] sm:$0xf]  ;;  %v10018_v47 = vor.u32 %v12399_v35, %v10015_v36  ;;  %4840 = vmatpush.bf16.msra.mxu1 %v9762_v44 }
 0x128   :  { %v10303_v41 = vld [vmem:[#allocation8 + $0x11a0] sm:$0xf0] }
 0x129   :  { %v12263_v45 = vld [vmem:[#allocation8 + $0xb04] sm:$0xf]  ;;  %v10306_v48 = vor.u32 %v12471_v37, %v10303_v41  ;;  %4853 = vmatpush.bf16.msra.mxu2 %v10018_v47 }
 0x12a   :  { %v9471_v46 = vld [vmem:[#allocation8 + $0xb20] sm:$0xf0] }
 0x12b   :  { %v12327_v49 = vld [vmem:[#allocation8 + $0xd04] sm:$0xf]  ;;  %v9474_v55 = vor.u32 %v12263_v45, %v9471_v46  ;;  %4865 = vmatpush.bf16.msrb.mxu3 %v10306_v48 }
 0x12c   :  { %v9727_v50 = vld [vmem:[#allocation8 + $0xd20] sm:$0xf0] }
 0x12d   :  { %v12391_v51 = vld [vmem:[#allocation8 + $0xf04] sm:$0xf]  ;;  %v9730_v56 = vor.u32 %v12327_v49, %v9727_v50  ;;  %4828 = vmatpush.bf16.msra.mxu0 %v9474_v55 }
 0x12e   :  { %v9983_v52 = vld [vmem:[#allocation8 + $0xf20] sm:$0xf0] }
 0x12f   :  { %v12463_v53 = vld [vmem:[#allocation8 + $0x1144] sm:$0xf]  ;;  %v9986_v59 = vor.u32 %v12391_v51, %v9983_v52  ;;  %4841 = vmatpush.bf16.msra.mxu1 %v9730_v56 }
 0x130   :  { %v10271_v54 = vld [vmem:[#allocation8 + $0x1160] sm:$0xf0] }
 0x131   :  { %v12255_v57 = vld [vmem:[#allocation8 + $0xac4] sm:$0xf]  ;;  %v10274_v60 = vor.u32 %v12463_v53, %v10271_v54  ;;  %4854 = vmatpush.bf16.msra.mxu2 %v9986_v59 }
 0x132   :  { %v9439_v58 = vld [vmem:[#allocation8 + $0xae0] sm:$0xf0] }
 0x133   :  { %v12319_v61 = vld [vmem:[#allocation8 + $0xcc4] sm:$0xf]  ;;  %v9442_v3 = vor.u32 %v12255_v57, %v9439_v58  ;;  %4866 = vmatpush.bf16.msrb.mxu3 %v10274_v60 }
 0x134   :  { %v9695_v62 = vld [vmem:[#allocation8 + $0xce0] sm:$0xf0] }
 0x135   :  { %v12383_v63 = vld [vmem:[#allocation8 + $0xec4] sm:$0xf]  ;;  %v9698_v4 = vor.u32 %v12319_v61, %v9695_v62  ;;  %4829 = vmatpush.bf16.msra.mxu0 %v9442_v3 }
 0x136   :  { %v9951_v0 = vld [vmem:[#allocation8 + $0xee0] sm:$0xf0] }
 0x137   :  { %v12455_v1 = vld [vmem:[#allocation8 + $0x1104] sm:$0xf]  ;;  %v9954_v7 = vor.u32 %v12383_v63, %v9951_v0  ;;  %4842 = vmatpush.bf16.msra.mxu1 %v9698_v4 }
 0x138   :  { %v10239_v2 = vld [vmem:[#allocation8 + $0x1120] sm:$0xf0] }
 0x139   :  { %v12247_v5 = vld [vmem:[#allocation8 + $0xa84] sm:$0xf]  ;;  %v10242_v8 = vor.u32 %v12455_v1, %v10239_v2  ;;  %4855 = vmatpush.bf16.msra.mxu2 %v9954_v7 }
 0x13a   :  { %v9407_v6 = vld [vmem:[#allocation8 + $0xaa0] sm:$0xf0] }
 0x13b   :  { %v12311_v9 = vld [vmem:[#allocation8 + $0xc84] sm:$0xf]  ;;  %v9410_v15 = vor.u32 %v12247_v5, %v9407_v6  ;;  %4867 = vmatpush.bf16.msrb.mxu3 %v10242_v8  ;;  %v8293_v8 = vld [vmem:[#allocation8 + $0x1c8] sm:$0xf] }
 0x13c   :  { %v9663_v10 = vld [vmem:[#allocation8 + $0xca0] sm:$0xf0] }
 0x13d   :  { %v12375_v11 = vld [vmem:[#allocation8 + $0xe84] sm:$0xf]  ;;  %v9666_v16 = vor.u32 %v12311_v9, %v9663_v10  ;;  %4830 = vmatpush.bf16.msra.mxu0 %v9410_v15  ;;  %v11972_v10 = vld [vmem:[#allocation8 + $0x1e4] sm:$0xf0] }
 0x13e   :  { %v9919_v12 = vld [vmem:[#allocation8 + $0xea0] sm:$0xf0] }
 0x13f   :  { %v12447_v13 = vld [vmem:[#allocation8 + $0x10c4] sm:$0xf]  ;;  %v9922_v21 = vor.u32 %v12375_v11, %v9919_v12  ;;  %4843 = vmatpush.bf16.msra.mxu1 %v9666_v16  ;;  %v8549_v11 = vld [vmem:[#allocation8 + $0x3c8] sm:$0xf] }
 0x140   :  { %v10207_v14 = vld [vmem:[#allocation8 + $0x10e0] sm:$0xf0]  ;;  %v12036_v12 = vld [vmem:[#allocation8 + $0x3e4] sm:$0xf0] }
 0x141   :  { %v12239_v17 = vld [vmem:[#allocation8 + $0xa44] sm:$0xf]  ;;  %v10210_v22 = vor.u32 %v12447_v13, %v10207_v14  ;;  %4856 = vmatpush.bf16.msra.mxu2 %v9922_v21  ;;  %v8550_v21 = vor.u32 %v12036_v12, %v8549_v11  ;;  %v8421_v11 = vld [vmem:[#allocation8 + $0x2c8] sm:$0xf] }
 0x142   :  { %v9375_v18 = vld [vmem:[#allocation8 + $0xa60] sm:$0xf0]  ;;  %v12004_v12 = vld [vmem:[#allocation8 + $0x2e4] sm:$0xf0] }
 0x143   :  { %v12303_v26 = vld [vmem:[#allocation8 + $0xc44] sm:$0xf]  ;;  %v9378_v35 = vor.u32 %v12239_v17, %v9375_v18  ;;  %4868 = vmatpush.bf16.msrb.mxu3 %v10210_v22  ;;  %v8294_v18 = vor.u32 %v11972_v10, %v8293_v8  ;;  %v8165_v8 = vld [vmem:[#allocation8 + $0xc8] sm:$0xf] }
 0x144   :  { %v9631_v28 = vld [vmem:[#allocation8 + $0xc60] sm:$0xf0]  ;;  %v11940_v10 = vld [vmem:[#allocation8 + $0xe4] sm:$0xf0] }
 0x145   :  { %v12367_v29 = vld [vmem:[#allocation8 + $0xe44] sm:$0xf]  ;;  %v9634_v41 = vor.u32 %v12303_v26, %v9631_v28  ;;  %4831 = vmatpush.bf16.msra.mxu0 %v9378_v35  ;;  %v8261_v28 = vld [vmem:[#allocation8 + $0x188] sm:$0xf] }
 0x146   :  { %v9887_v31 = vld [vmem:[#allocation8 + $0xe60] sm:$0xf0] }
 0x147   :  { %v12439_v32 = vld [vmem:[#allocation8 + $0x1084] sm:$0xf]  ;;  %v9890_v46 = vor.u32 %v12367_v29, %v9887_v31  ;;  %4844 = vmatpush.bf16.msra.mxu1 %v9634_v41  ;;  %v11964_v31 = vld [vmem:[#allocation8 + $0x1a4] sm:$0xf0] }
 0x148   :  { %v10175_v33 = vld [vmem:[#allocation8 + $0x10a0] sm:$0xf0]  ;;  %v8262_v41 = vor.u32 %v11964_v31, %v8261_v28  ;;  %v8133_v28 = vld [vmem:[#allocation8 + $0x88] sm:$0xf] }
 0x149   :  { %v12231_v36 = vld [vmem:[#allocation8 + $0xa04] sm:$0xf]  ;;  %v10178_v47 = vor.u32 %v12439_v32, %v10175_v33  ;;  %4857 = vmatpush.bf16.msra.mxu2 %v9890_v46  ;;  %v8517_v32 = vld [vmem:[#allocation8 + $0x388] sm:$0xf] }
 0x14a   :  { %v9343_v37 = vld [vmem:[#allocation8 + $0xa20] sm:$0xf0]  ;;  %v12028_v33 = vld [vmem:[#allocation8 + $0x3a4] sm:$0xf0] }
 0x14b   :  { %v12295_v43 = vld [vmem:[#allocation8 + $0xc04] sm:$0xf]  ;;  %v9346_v54 = vor.u32 %v12231_v36, %v9343_v37  ;;  %4869 = vmatpush.bf16.msrb.mxu3 %v10178_v47  ;;  %v8229_v46 = vld [vmem:[#allocation8 + $0x148] sm:$0xf] }
 0x14c   :  { %v9599_v44 = vld [vmem:[#allocation8 + $0xc20] sm:$0xf0] }
 0x14d   :  { %v12359_v45 = vld [vmem:[#allocation8 + $0xe04] sm:$0xf]  ;;  %v9602_v58 = vor.u32 %v12295_v43, %v9599_v44  ;;  %4832 = vmatpush.bf16.msra.mxu0 %v9346_v54  ;;  %v8518_v43 = vor.u32 %v12028_v33, %v8517_v32  ;;  %v11932_v32 = vld [vmem:[#allocation8 + $0xa4] sm:$0xf0] }
 0x14e   :  { %v9855_v48 = vld [vmem:[#allocation8 + $0xe20] sm:$0xf0]  ;;  %v8389_v33 = vld [vmem:[#allocation8 + $0x288] sm:$0xf] }
 0x14f   :  { %v12543_v49 = vld [vmem:[#allocation8 + $0x13c4] sm:$0xf]  ;;  %v9858_v60 = vor.u32 %v12359_v45, %v9855_v48  ;;  %4845 = vmatpush.bf16.msra.mxu1 %v9602_v58  ;;  %v11956_v48 = vld [vmem:[#allocation8 + $0x164] sm:$0xf0] }
 0x150   :  { %v10591_v50 = vld [vmem:[#allocation8 + $0x13e0] sm:$0xf0]  ;;  %4833 = vmatmul.bf16.vlgmr.msra.gmra.mxu0 %v13373_v42  ;;  %v8197_v58 = vld [vmem:[#allocation8 + $0x108] sm:$0xf] }
 0x151   :  { %v12431_v51 = vld [vmem:[#allocation8 + $0x1044] sm:$0xf]  ;;  %v10594_v59 = vor.u32 %v12543_v49, %v10591_v50  ;;  %4858 = vmatpush.bf16.msra.mxu2 %v9858_v60  ;;  %v8485_v49 = vld [vmem:[#allocation8 + $0x348] sm:$0xf] }
 0x152   :  { %v10143_v52 = vld [vmem:[#allocation8 + $0x1060] sm:$0xf0]  ;;  %4846 = vmatmul.bf16.vlgmr.msra.gmra.mxu1 %v13369_v38  ;;  %v12020_v50 = vld [vmem:[#allocation8 + $0x364] sm:$0xf0] }
 0x153   :  { %v12607_v53 = vld [vmem:[#allocation8 + $0x15c4] sm:$0xf]  ;;  %v10146_v61 = vor.u32 %v12431_v51, %v10143_v52  ;;  %4877 = vmatpush.bf16.msrb.mxu0 %v10594_v59 }
 0x154   :  { %v10847_v55 = vld [vmem:[#allocation8 + $0x15e0] sm:$0xf0]  ;;  %4859 = vmatmul.bf16.vlgmr.msra.gmra.mxu2 %v13371_v39 }
 0x155   :  { %v12623_v56 = vld [vmem:[#allocation8 + $0x1644] sm:$0xf]  ;;  %v10850_v1 = vor.u32 %v12607_v53, %v10847_v55  ;;  %4870 = vmatpush.bf16.msrb.mxu3 %v10146_v61  ;;  %v8230_v55 = vor.u32 %v11956_v48, %v8229_v46  ;;  %v11948_v61 = vld [vmem:[#allocation8 + $0x124] sm:$0xf0]  ;;  %v8134_v46 = vor.u32 %v11932_v32, %v8133_v28 }
 0x156   :  { %v10911_v57 = vld [vmem:[#allocation8 + $0x1660] sm:$0xf0]  ;;  %v12148_v32 = vld [vmem:[#allocation8 + $0x764] sm:$0xf0] }
 0x157   :  { %v12423_v62 = vld [vmem:[#allocation8 + $0x1004] sm:$0xf]  ;;  %v10914_v2 = vor.u32 %v12623_v56, %v10911_v57  ;;  %4890 = vmatpush.bf16.msrb.mxu1 %v10850_v1  ;;  %v8486_v56 = vor.u32 %v12020_v50, %v8485_v49  ;;  %v8101_v50 = vld [vmem:[#allocation8 + $0x48] sm:$0xf] }
 0x158   :  { %v12535_v63 = vld [vmem:[#allocation8 + $0x1384] sm:$0xf] }
 0x159   :  { %v10559_v0 = vld [vmem:[#allocation8 + $0x13a0] sm:$0xf0]  ;;  %4909 = vmatpush.bf16.msrb.mxu2 %v10914_v2 }
 0x15a   :  { %v10111_v3 = vld [vmem:[#allocation8 + $0x1020] sm:$0xf0]  ;;  %v10562_v9 = vor.u32 %v12535_v63, %v10559_v0  ;;  %v12012_v63 = vld [vmem:[#allocation8 + $0x324] sm:$0xf0] }
 0x15b   :  { %v12599_v4 = vld [vmem:[#allocation8 + $0x1584] sm:$0xf]  ;;  %v10114_v13 = vor.u32 %v12423_v62, %v10111_v3  ;;  %v8453_v62 = vld [vmem:[#allocation8 + $0x308] sm:$0xf] }
 0x15c   :  { %v10815_v5 = vld [vmem:[#allocation8 + $0x15a0] sm:$0xf0]  ;;  %4878 = vmatpush.bf16.msrb.mxu0 %v10562_v9 }
 0x15d   :  { %v12615_v6 = vld [vmem:[#allocation8 + $0x1604] sm:$0xf]  ;;  %v10818_v16 = vor.u32 %v12599_v4, %v10815_v5  ;;  %4871 = vmatpush.bf16.msrb.mxu3 %v10114_v13  ;;  %v8198_v4 = vor.u32 %v11948_v61, %v8197_v58  ;;  %v8454_v5 = vor.u32 %v12012_v63, %v8453_v62  ;;  %v4613_v13 = vpop.f32.mrf.mxu0  ;;  %v9061_v58 = vld [vmem:[#allocation8 + $0x7c8] sm:$0xf] }
 0x15e   :  { %v10879_v7 = vld [vmem:[#allocation8 + $0x1620] sm:$0xf0] }
 0x15f   :  { %v12527_v14 = vld [vmem:[#allocation8 + $0x1344] sm:$0xf]  ;;  %v10882_v17 = vor.u32 %v12615_v6, %v10879_v7  ;;  %4891 = vmatpush.bf16.msrb.mxu1 %v10818_v16 }
 0x160   :  { %v10527_v15 = vld [vmem:[#allocation8 + $0x1360] sm:$0xf0]  ;;  %4872 = vmatmul.bf16.vlgmr.msrb.gmra.mxu3 %v13383_v23 }
 0x161   :  { %v12591_v22 = vld [vmem:[#allocation8 + $0x1544] sm:$0xf]  ;;  %v10530_v29 = vor.u32 %v12527_v14, %v10527_v15  ;;  %4910 = vmatpush.bf16.msrb.mxu2 %v10882_v17  ;;  %4929 = vmatpush.bf16.msra.mxu3 %v8550_v21  ;;  %v8422_v21 = vor.u32 %v12004_v12, %v8421_v11  ;;  %v9029_v11 = vld [vmem:[#allocation8 + $0x788] sm:$0xf] }
 0x162   :  { %v10783_v26 = vld [vmem:[#allocation8 + $0x1560] sm:$0xf0]  ;;  %v12156_v12 = vld [vmem:[#allocation8 + $0x7a4] sm:$0xf0] }
 0x163   :  { %v12519_v35 = vld [vmem:[#allocation8 + $0x1304] sm:$0xf]  ;;  %v10786_v37 = vor.u32 %v12591_v22, %v10783_v26  ;;  %4879 = vmatpush.bf16.msrb.mxu0 %v10530_v29  ;;  %v4626_v29 = vpop.f32.mrf.mxu1  ;;  %v9030_v28 = vor.u32 %v12156_v12, %v9029_v11  ;;  %v12268_v11 = vld [vmem:[#allocation8 + $0xb24] sm:$0xf0] }
 0x164   :  { %v10495_v36 = vld [vmem:[#allocation8 + $0x1320] sm:$0xf0]  ;;  %10940 = vmatmul.msk.bf16.vlgmr.msrb.gmra.mxu2 %vm4600_vm0, %v13379_v40  ;;  %v8645_v12 = vld [vmem:[#allocation8 + $0x488] sm:$0xf] }
 0x165   :  { %4916 = vmatpush.bf16.msra.mxu2 %v8294_v18  ;;  %v12583_v44 = vld [vmem:[#allocation8 + $0x1504] sm:$0xf]  ;;  %v10498_v47 = vor.u32 %v12519_v35, %v10495_v36  ;;  %4892 = vmatpush.bf16.msrb.mxu1 %v10786_v37  ;;  %v8166_v18 = vor.u32 %v11940_v10, %v8165_v8  ;;  %v11996_v35 = vld [vmem:[#allocation8 + $0x2a4] sm:$0xf0]  ;;  %v4615_v62 = vpop.f32.mrf.mxu0 }
 0x166   :  { %v10751_v45 = vld [vmem:[#allocation8 + $0x1520] sm:$0xf0]  ;;  %4930 = vmatpush.bf16.msra.mxu3 %v8518_v43  ;;  %v11980_v10 = vld [vmem:[#allocation8 + $0x224] sm:$0xf0] }
 0x167   :  { %v12511_v51 = vld [vmem:[#allocation8 + $0x12c4] sm:$0xf]  ;;  %v10754_v53 = vor.u32 %v12583_v44, %v10751_v45  ;;  %4880 = vmatpush.bf16.msrb.mxu0 %v10498_v47  ;;  %v8805_v44 = vld [vmem:[#allocation8 + $0x5c8] sm:$0xf]  ;;  %v8390_v47 = vor.u32 %v11996_v35, %v8389_v33 }
 0x168   :  { %v10463_v52 = vld [vmem:[#allocation8 + $0x12e0] sm:$0xf0]  ;;  %v12100_v45 = vld [vmem:[#allocation8 + $0x5e4] sm:$0xf0] }
 0x169   :  { %v12575_v54 = vld [vmem:[#allocation8 + $0x14c4] sm:$0xf]  ;;  %4917 = vmatpush.bf16.msra.mxu2 %v8262_v41  ;;  %v10466_v60 = vor.u32 %v12511_v51, %v10463_v52  ;;  %4893 = vmatpush.bf16.msrb.mxu1 %v10754_v53  ;;  %v11924_v52 = vld [vmem:[#allocation8 + $0x64] sm:$0xf0] }
 0x16a   :  { %v10719_v57 = vld [vmem:[#allocation8 + $0x14e0] sm:$0xf0]  ;;  %4931 = vmatpush.bf16.msra.mxu3 %v8486_v56  ;;  %v8357_v53 = vld [vmem:[#allocation8 + $0x248] sm:$0xf]  ;;  %v4652_v56 = vpop.f32.mrf.mxu3 }
 0x16b   :  { %v13401_v59 = vld [vmem:[#allocation10] sm:$0xff]  ;;  %v10722_v2 = vor.u32 %v12575_v54, %v10719_v57  ;;  %4881 = vmatpush.bf16.msrb.mxu0 %v10466_v60  ;;  %v11988_v54 = vld [vmem:[#allocation8 + $0x264] sm:$0xf0]  ;;  %v8806_v57 = vor.u32 %v12100_v45, %v8805_v44  ;;  %v4628_v8 = vpop.f32.mrf.mxu1 }
 0x16c   :  { %v12503_v0 = vld [vmem:[#allocation8 + $0x1284] sm:$0xf]  ;;  %v984_v3 = vperm.slane %v13401_v59, 0  ;;  %v12164_v60 = vld [vmem:[#allocation8 + $0x7e4] sm:$0xf0] }
 0x16d   :  { %v10431_v1 = vld [vmem:[#allocation8 + $0x12a0] sm:$0xf0]  ;;  %4918 = vmatpush.bf16.msra.mxu2 %v8230_v55  ;;  %4894 = vmatpush.bf16.msrb.mxu1 %v10722_v2  ;;  %v4639_v55 = vpop.f32.mrf.mxu2  ;;  %v8102_v2 = vor.u32 %v11924_v52, %v8101_v50  ;;  %v9541_v44 = vld [vmem:[#allocation8 + $0xb88] sm:$0xf] }
 0x16e   :  { %v12567_v6 = vld [vmem:[#allocation8 + $0x1484] sm:$0xf]  ;;  %v10434_v9 = vor.u32 %v12503_v0, %v10431_v1  ;;  %v4614_v17 = vadd.f32 %v4613_v13, %v984_v3  ;;  %4932 = vmatpush.bf16.msra.mxu3 %v8454_v5  ;;  %v8773_v0 = vld [vmem:[#allocation8 + $0x588] sm:$0xf]  ;;  %v8358_v3 = vor.u32 %v11988_v54, %v8357_v53 }
 0x16f   :  { %v10687_v7 = vld [vmem:[#allocation8 + $0x14a0] sm:$0xf0]  ;;  %v12092_v1 = vld [vmem:[#allocation8 + $0x5a4] sm:$0xf0] }
 0x170   :  { %v12495_v14 = vld [vmem:[#allocation8 + $0x1244] sm:$0xf]  ;;  %v10690_v16 = vor.u32 %v12567_v6, %v10687_v7  ;;  %4882 = vmatpush.bf16.msrb.mxu0 %v10434_v9  ;;  %v4627_v36 = vadd.f32 %v4626_v29, %v4614_v17  ;;  %v8069_v5 = vld [vmem:[#allocation8 + $0x8] sm:$0xf]  ;;  %v9062_v9 = vor.u32 %v12164_v60, %v9061_v58  ;;  %v8774_v13 = vor.u32 %v12092_v1, %v8773_v0 }
 0x171   :  { %v10399_v15 = vld [vmem:[#allocation8 + $0x1260] sm:$0xf0]  ;;  %4919 = vmatpush.bf16.msra.mxu2 %v8198_v4  ;;  %v11916_v6 = vld [vmem:[#allocation8 + $0x24] sm:$0xf0] }
 0x172   :  { %v12559_v22 = vld [vmem:[#allocation8 + $0x1444] sm:$0xf]  ;;  %v10402_v31 = vor.u32 %v12495_v14, %v10399_v15  ;;  %4895 = vmatpush.bf16.msrb.mxu1 %v10690_v16  ;;  %4933 = vmatpush.bf16.msra.mxu3 %v8422_v21  ;;  %v4640_v61 = vadd.f32 %v4639_v55, %v4627_v36  ;;  %v8325_v7 = vld [vmem:[#allocation8 + $0x208] sm:$0xf]  ;;  %v4654_v35 = vpop.f32.mrf.mxu3 }
 0x173   :  { %v10655_v26 = vld [vmem:[#allocation8 + $0x1460] sm:$0xf0]  ;;  %v9317_v14 = vld [vmem:[#allocation8 + $0x9c8] sm:$0xf] }
 0x174   :  { %v12487_v37 = vld [vmem:[#allocation8 + $0x1204] sm:$0xf]  ;;  %v10658_v43 = vor.u32 %v12559_v22, %v10655_v26  ;;  %4883 = vmatpush.bf16.msrb.mxu0 %v10402_v31  ;;  %v13406_v4 = vadd.f32 %v4652_v56, %v4640_v61  ;;  %v12228_v15 = vld [vmem:[#allocation8 + $0x9e4] sm:$0xf0]  ;;  %v8070_v22 = vor.u32 %v11916_v6, %v8069_v5  ;;  %v8326_v26 = vor.u32 %v11980_v10, %v8325_v7  ;;  %v4665_v61 = vpop.f32.mrf.mxu0 }
 0x175   :  { %v10367_v41 = vld [vmem:[#allocation8 + $0x1220] sm:$0xf0]  ;;  %4920 = vmatpush.bf16.msra.mxu2 %v8166_v18  ;;  %v9573_v16 = vld [vmem:[#allocation8 + $0xbc8] sm:$0xf]  ;;  %v9318_v29 = vor.u32 %v12228_v15, %v9317_v14  ;;  %v4641_v33 = vpop.f32.mrf.mxu2  ;;  %v5852_v14 = vld [vmem:[#allocation7] sm:$0xff] }
 0x176   :  { %v12551_v48 = vld [vmem:[#allocation8 + $0x1404] sm:$0xf]  ;;  %v10370_v51 = vor.u32 %v12487_v37, %v10367_v41  ;;  %4896 = vmatpush.bf16.msrb.mxu1 %v10658_v43  ;;  %4934 = vmatpush.bf16.msra.mxu3 %v8390_v47  ;;  %v12292_v17 = vld [vmem:[#allocation8 + $0xbe4] sm:$0xf0]  ;;  %v4666_v62 = vadd.f32 %v4665_v61, %v13406_v4  ;;  %5856 = vst [vmem:[#allocation1] ss:$4 sm:$0xff] %v5852_v14 }
 0x177   :  { %v10623_v49 = vld [vmem:[#allocation8 + $0x1420] sm:$0xf0]  ;;  %v8741_v18 = vld [vmem:[#allocation8 + $0x548] sm:$0xf]  ;;  %v9574_v36 = vor.u32 %v12292_v17, %v9573_v16 }
 0x178   :  { %v10626_v63 = vor.u32 %v12551_v48, %v10623_v49  ;;  %4884 = vmatpush.bf16.msrb.mxu0 %v10370_v51  ;;  %v12084_v21 = vld [vmem:[#allocation8 + $0x564] sm:$0xf0] }
 0x179   :  { %4921 = vmatpush.bf16.msra.mxu2 %v8134_v46  ;;  %v8997_v31 = vld [vmem:[#allocation8 + $0x748] sm:$0xf]  ;;  %v8742_v37 = vor.u32 %v12084_v21, %v8741_v18 }
 0x17a   :  { %4897 = vmatpush.bf16.msrb.mxu1 %v10626_v63  ;;  %4935 = vmatpush.bf16.msra.mxu3 %v8358_v3  ;;  %v9285_v41 = vld [vmem:[#allocation8 + $0x988] sm:$0xf]  ;;  %v8998_v48 = vor.u32 %v12148_v32, %v8997_v31  ;;  %v4678_v3 = vpop.f32.mrf.mxu1  ;;  %v4704_v31 = vpop.f32.mrf.mxu3 }
 0x17b   :  { %4885 = vmatmul.bf16.vlgmr.msrb.gmra.mxu0 %v13387_v30  ;;  %v12220_v43 = vld [vmem:[#allocation8 + $0x9a4] sm:$0xf0]  ;;  %v4679_v10 = vadd.f32 %v4678_v3, %v4666_v62 }
 0x17c   :  { %4942 = vmatpush.bf16.msra.mxu0 %v8806_v57  ;;  %v12284_v45 = vld [vmem:[#allocation8 + $0xba4] sm:$0xf0]  ;;  %v9286_v49 = vor.u32 %v12220_v43, %v9285_v41 }
 0x17d   :  { %4922 = vmatpush.bf16.msra.mxu2 %v8102_v2  ;;  %4898 = vmatmul.bf16.vlgmr.msrb.gmra.mxu1 %v13385_v25  ;;  %v8709_v46 = vld [vmem:[#allocation8 + $0x508] sm:$0xf]  ;;  %v9542_v52 = vor.u32 %v12284_v45, %v9541_v44 }
 0x17e   :  { %4955 = vmatpush.bf16.msra.mxu1 %v9062_v9  ;;  %v12076_v47 = vld [vmem:[#allocation8 + $0x524] sm:$0xf0]  ;;  %4936 = vmatpush.bf16.msra.mxu3 %v8326_v26 }
 0x17f   :  { %v8965_v50 = vld [vmem:[#allocation8 + $0x708] sm:$0xf]  ;;  %v8710_v53 = vor.u32 %v12076_v47, %v8709_v46 }
 0x180   :  { %4943 = vmatpush.bf16.msra.mxu0 %v8774_v13  ;;  %v12140_v51 = vld [vmem:[#allocation8 + $0x724] sm:$0xf0] }
 0x181   :  { %4923 = vmatpush.bf16.msra.mxu2 %v8070_v22  ;;  %v9253_v54 = vld [vmem:[#allocation8 + $0x948] sm:$0xf]  ;;  %4937 = vmatmul.bf16.vlgmr.msra.gmra.mxu3 %v13361_v27  ;;  %v8966_v63 = vor.u32 %v12140_v51, %v8965_v50 }
 0x182   :  { %4956 = vmatpush.bf16.msra.mxu1 %v9030_v28  ;;  %4981 = vmatpush.bf16.msrb.mxu3 %v9574_v36  ;;  %v12212_v55 = vld [vmem:[#allocation8 + $0x964] sm:$0xf0] }
 0x183   :  { %v9509_v56 = vld [vmem:[#allocation8 + $0xb48] sm:$0xf]  ;;  %v9254_v0 = vor.u32 %v12212_v55, %v9253_v54 }
 0x184   :  { %4944 = vmatpush.bf16.msra.mxu0 %v8742_v37  ;;  %v12276_v57 = vld [vmem:[#allocation8 + $0xb64] sm:$0xf0]  ;;  %4924 = vmatmul.bf16.vlgmr.msra.gmra.mxu2 %v13355_v19  ;;  %v4667_v37 = vpop.f32.mrf.mxu0 }
 0x185   :  { %4968 = vmatpush.bf16.msrb.mxu2 %v9318_v29  ;;  %v8677_v58 = vld [vmem:[#allocation8 + $0x4c8] sm:$0xf]  ;;  %v9510_v5 = vor.u32 %v12276_v57, %v9509_v56  ;;  %v4691_v29 = vpop.f32.mrf.mxu2 }
 0x186   :  { %v12068_v60 = vld [vmem:[#allocation8 + $0x4e4] sm:$0xf0]  ;;  %4957 = vmatpush.bf16.msra.mxu1 %v8998_v48  ;;  %4982 = vmatpush.bf16.msrb.mxu3 %v9542_v52  ;;  %v4692_v36 = vadd.f32 %v4691_v29, %v4679_v10  ;;  %v4680_v52 = vpop.f32.mrf.mxu1 }
 0x187   :  { %v8933_v1 = vld [vmem:[#allocation8 + $0x6c8] sm:$0xf]  ;;  %v8678_v6 = vor.u32 %v12068_v60, %v8677_v58 }
 0x188   :  { %v12132_v2 = vld [vmem:[#allocation8 + $0x6e4] sm:$0xf0]  ;;  %4945 = vmatpush.bf16.msra.mxu0 %v8710_v53  ;;  %v13413_v46 = vadd.f32 %v4704_v31, %v4692_v36 }
 0x189   :  { %4969 = vmatpush.bf16.msrb.mxu2 %v9286_v49  ;;  %v9221_v7 = vld [vmem:[#allocation8 + $0x908] sm:$0xf]  ;;  %v8934_v4 = vor.u32 %v12132_v2, %v8933_v1 }
 0x18a   :  { %v12204_v8 = vld [vmem:[#allocation8 + $0x924] sm:$0xf0]  ;;  %4958 = vmatpush.bf16.msra.mxu1 %v8966_v63  ;;  %4983 = vmatpush.bf16.msrb.mxu3 %v9510_v5  ;;  %v4706_v5 = vpop.f32.mrf.mxu3 }
 0x18b   :  { %v9477_v9 = vld [vmem:[#allocation8 + $0xb08] sm:$0xf]  ;;  %v9222_v15 = vor.u32 %v12204_v8, %v9221_v7 }
 0x18c   :  { %v12060_v13 = vld [vmem:[#allocation8 + $0x4a4] sm:$0xf0]  ;;  %4946 = vmatpush.bf16.msra.mxu0 %v8678_v6  ;;  %v9478_v18 = vor.u32 %v12268_v11, %v9477_v9 }
 0x18d   :  { %4970 = vmatpush.bf16.msrb.mxu2 %v9254_v0  ;;  %v8901_v16 = vld [vmem:[#allocation8 + $0x688] sm:$0xf]  ;;  %v8646_v21 = vor.u32 %v12060_v13, %v8645_v12  ;;  %v4693_v10 = vpop.f32.mrf.mxu2 }
 0x18e   :  { %v12124_v17 = vld [vmem:[#allocation8 + $0x6a4] sm:$0xf0]  ;;  %4959 = vmatpush.bf16.msra.mxu1 %v8934_v4  ;;  %4984 = vmatpush.bf16.msrb.mxu3 %v9478_v18  ;;  %v4730_v10 = vpop.f32.mrf.mxu1 }
 0x18f   :  { %v9189_v22 = vld [vmem:[#allocation8 + $0x8c8] sm:$0xf]  ;;  %v8902_v41 = vor.u32 %v12124_v17, %v8901_v16 }
 0x190   :  { %v12196_v26 = vld [vmem:[#allocation8 + $0x8e4] sm:$0xf0]  ;;  %4947 = vmatpush.bf16.msra.mxu0 %v8646_v21 }
 0x191   :  { %v9445_v28 = vld [vmem:[#allocation8 + $0xac8] sm:$0xf]  ;;  %4971 = vmatpush.bf16.msrb.mxu2 %v9222_v15  ;;  %v9190_v43 = vor.u32 %v12196_v26, %v9189_v22 }
 0x192   :  { %v12260_v32 = vld [vmem:[#allocation8 + $0xae4] sm:$0xf0]  ;;  %4960 = vmatpush.bf16.msra.mxu1 %v8902_v41 }
 0x193   :  { %v8613_v33 = vld [vmem:[#allocation8 + $0x448] sm:$0xf]  ;;  %v9446_v47 = vor.u32 %v12260_v32, %v9445_v28 }
 0x194   :  { %v12052_v35 = vld [vmem:[#allocation8 + $0x464] sm:$0xf0] }
 0x195   :  { %v8869_v44 = vld [vmem:[#allocation8 + $0x648] sm:$0xf]  ;;  %v8614_v48 = vor.u32 %v12052_v35, %v8613_v33  ;;  %4972 = vmatpush.bf16.msrb.mxu2 %v9190_v43  ;;  %4985 = vmatpush.bf16.msrb.mxu3 %v9446_v47 }
 0x196   :  { %v12116_v45 = vld [vmem:[#allocation8 + $0x664] sm:$0xf0] }
 0x197   :  { %v9157_v49 = vld [vmem:[#allocation8 + $0x888] sm:$0xf]  ;;  %v8870_v58 = vor.u32 %v12116_v45, %v8869_v44  ;;  %4948 = vmatpush.bf16.msra.mxu0 %v8614_v48 }
 0x198   :  { %v12188_v50 = vld [vmem:[#allocation8 + $0x8a4] sm:$0xf0] }
 0x199   :  { %v9413_v51 = vld [vmem:[#allocation8 + $0xa88] sm:$0xf]  ;;  %v9158_v60 = vor.u32 %v12188_v50, %v9157_v49  ;;  %4961 = vmatpush.bf16.msra.mxu1 %v8870_v58 }
 0x19a   :  { %v12252_v53 = vld [vmem:[#allocation8 + $0xaa4] sm:$0xf0] }
 0x19b   :  { %v8581_v54 = vld [vmem:[#allocation8 + $0x408] sm:$0xf]  ;;  %v9414_v63 = vor.u32 %v12252_v53, %v9413_v51  ;;  %4973 = vmatpush.bf16.msrb.mxu2 %v9158_v60 }
 0x19c   :  { %v12044_v55 = vld [vmem:[#allocation8 + $0x424] sm:$0xf0] }
 0x19d   :  { %v9829_v56 = vld [vmem:[#allocation8 + $0xdc8] sm:$0xf]  ;;  %v8582_v0 = vor.u32 %v12044_v55, %v8581_v54  ;;  %4986 = vmatpush.bf16.msrb.mxu3 %v9414_v63  ;;  %v13416_v54 = vpop.f32.mrf.mxu3 }
 0x19e   :  { %v12356_v57 = vld [vmem:[#allocation8 + $0xde4] sm:$0xf0] }
 0x19f   :  { %v8837_v61 = vld [vmem:[#allocation8 + $0x608] sm:$0xf]  ;;  %v9830_v7 = vor.u32 %v12356_v57, %v9829_v56  ;;  %4949 = vmatpush.bf16.msra.mxu0 %v8582_v0 }
 0x1a0   :  { %v12108_v62 = vld [vmem:[#allocation8 + $0x624] sm:$0xf0] }
 0x1a1   :  { %v9125_v1 = vld [vmem:[#allocation8 + $0x848] sm:$0xf]  ;;  %v8838_v13 = vor.u32 %v12108_v62, %v8837_v61 }
 0x1a2   :  { %v12180_v2 = vld [vmem:[#allocation8 + $0x864] sm:$0xf0]  ;;  %4950 = vmatmul.bf16.vlgmr.msra.gmra.mxu0 %v13357_v20 }
 0x1a3   :  { %v9381_v3 = vld [vmem:[#allocation8 + $0xa48] sm:$0xf]  ;;  %v9126_v14 = vor.u32 %v12180_v2, %v9125_v1  ;;  %4994 = vmatpush.bf16.msrb.mxu0 %v9830_v7  ;;  %4962 = vmatpush.bf16.msra.mxu1 %v8838_v13  ;;  %v4717_v7 = vpop.f32.mrf.mxu0 }
 0x1a4   :  { %v12244_v6 = vld [vmem:[#allocation8 + $0xa64] sm:$0xf0] }
 0x1a5   :  { %v10085_v8 = vld [vmem:[#allocation8 + $0xfc8] sm:$0xf]  ;;  %v9382_v15 = vor.u32 %v12244_v6, %v9381_v3  ;;  %4974 = vmatpush.bf16.msrb.mxu2 %v9126_v14 }
 0x1a6   :  { %v12420_v9 = vld [vmem:[#allocation8 + $0xfe4] sm:$0xf0]  ;;  %4963 = vmatmul.bf16.vlgmr.msra.gmra.mxu1 %v13359_v24 }
 0x1a7   :  { %v9797_v11 = vld [vmem:[#allocation8 + $0xd88] sm:$0xf]  ;;  %v10086_v16 = vor.u32 %v12420_v9, %v10085_v8  ;;  %4987 = vmatpush.bf16.msrb.mxu3 %v9382_v15  ;;  %v4718_v9 = vadd.f32 %v4717_v7, %v13413_v46 }
 0x1a8   :  { %v12348_v12 = vld [vmem:[#allocation8 + $0xda4] sm:$0xf0] }
 0x1a9   :  { %v9093_v4 = vld [vmem:[#allocation8 + $0x808] sm:$0xf]  ;;  %v9798_v22 = vor.u32 %v12348_v12, %v9797_v11  ;;  %5007 = vmatpush.bf16.msrb.mxu1 %v10086_v16 }
 0x1aa   :  { %v12172_v17 = vld [vmem:[#allocation8 + $0x824] sm:$0xf0] }
 0x1ab   :  { %v9349_v18 = vld [vmem:[#allocation8 + $0xa08] sm:$0xf]  ;;  %v9094_v35 = vor.u32 %v12172_v17, %v9093_v4  ;;  %4995 = vmatpush.bf16.msrb.mxu0 %v9798_v22  ;;  %v4731_v22 = vadd.f32 %v4730_v10, %v4718_v9 }
 0x1ac   :  { %v12236_v21 = vld [vmem:[#allocation8 + $0xa24] sm:$0xf0] }
 0x1ad   :  { %v10053_v26 = vld [vmem:[#allocation8 + $0xf88] sm:$0xf]  ;;  %v9350_v41 = vor.u32 %v12236_v21, %v9349_v18  ;;  %4975 = vmatpush.bf16.msrb.mxu2 %v9094_v35  ;;  %v4758_v21 = vpop.f32.mrf.mxu3 }
 0x1ae   :  { %v12412_v28 = vld [vmem:[#allocation8 + $0xfa4] sm:$0xf0] }
 0x1af   :  { %v10341_v29 = vld [vmem:[#allocation8 + $0x11c8] sm:$0xf]  ;;  %v10054_v43 = vor.u32 %v12412_v28, %v10053_v26  ;;  %4988 = vmatpush.bf16.msrb.mxu3 %v9350_v41 }
 0x1b0   :  { %v12484_v31 = vld [vmem:[#allocation8 + $0x11e4] sm:$0xf0]  ;;  %4976 = vmatmul.bf16.vlgmr.msrb.gmra.mxu2 %v13367_v34 }
 0x1b1   :  { %v10597_v32 = vld [vmem:[#allocation8 + $0x13c8] sm:$0xf]  ;;  %v10342_v44 = vor.u32 %v12484_v31, %v10341_v29  ;;  %5008 = vmatpush.bf16.msrb.mxu1 %v10054_v43 }
 0x1b2   :  { %v12548_v33 = vld [vmem:[#allocation8 + $0x13e4] sm:$0xf0]  ;;  %4989 = vmatmul.bf16.vlgmr.msrb.gmra.mxu3 %v13373_v42 }
 0x1b3   :  { %v9765_v36 = vld [vmem:[#allocation8 + $0xd48] sm:$0xf]  ;;  %v10598_v45 = vor.u32 %v12548_v33, %v10597_v32  ;;  %5020 = vmatpush.bf16.msra.mxu2 %v10342_v44 }
 0x1b4   :  { %v12340_v37 = vld [vmem:[#allocation8 + $0xd64] sm:$0xf0] }
 0x1b5   :  { %v10021_v47 = vld [vmem:[#allocation8 + $0xf48] sm:$0xf]  ;;  %v9766_v50 = vor.u32 %v12340_v37, %v9765_v36  ;;  %5033 = vmatpush.bf16.msra.mxu3 %v10598_v45  ;;  %v4743_v36 = vpop.f32.mrf.mxu2  ;;  %v13425_v10 = vpop.f32.mrf.mxu3 }
 0x1b6   :  { %v12404_v48 = vld [vmem:[#allocation8 + $0xf64] sm:$0xf0]  ;;  %v4744_v45 = vadd.f32 %v4743_v36, %v4731_v22 }
 0x1b7   :  { %v10309_v49 = vld [vmem:[#allocation8 + $0x1188] sm:$0xf]  ;;  %v10022_v57 = vor.u32 %v12404_v48, %v10021_v47  ;;  %4996 = vmatpush.bf16.msrb.mxu0 %v9766_v50  ;;  %v4719_v50 = vpop.f32.mrf.mxu0 }
 0x1b8   :  { %v12476_v51 = vld [vmem:[#allocation8 + $0x11a4] sm:$0xf0] }
 0x1b9   :  { %v10565_v52 = vld [vmem:[#allocation8 + $0x1388] sm:$0xf]  ;;  %v10310_v58 = vor.u32 %v12476_v51, %v10309_v49  ;;  %5009 = vmatpush.bf16.msrb.mxu1 %v10022_v57  ;;  %v13423_v51 = vadd.f32 %v13416_v54, %v4744_v45  ;;  %v8295_v45 = vld [vmem:[#allocation8 + $0x1e8] sm:$0xf0] }
 0x1ba   :  { %v12540_v53 = vld [vmem:[#allocation8 + $0x13a4] sm:$0xf0] }
 0x1bb   :  { %v9733_v55 = vld [vmem:[#allocation8 + $0xd08] sm:$0xf]  ;;  %v10566_v60 = vor.u32 %v12540_v53, %v10565_v52  ;;  %5021 = vmatpush.bf16.msra.mxu2 %v10310_v58  ;;  %v4732_v58 = vpop.f32.mrf.mxu1 }
 0x1bc   :  { %v12332_v56 = vld [vmem:[#allocation8 + $0xd24] sm:$0xf0]  ;;  %v985_v58 = vperm.slane %v13401_v59, 1 }
 0x1bd   :  { %v9989_v61 = vld [vmem:[#allocation8 + $0xf08] sm:$0xf]  ;;  %v9734_v0 = vor.u32 %v12332_v56, %v9733_v55  ;;  %5034 = vmatpush.bf16.msra.mxu3 %v10566_v60 }
 0x1be   :  { %v12396_v62 = vld [vmem:[#allocation8 + $0xf24] sm:$0xf0]  ;;  %v4770_v59 = vadd.f32 %v13425_v10, %v985_v58 }
 0x1bf   :  { %v10277_v63 = vld [vmem:[#allocation8 + $0x1148] sm:$0xf]  ;;  %v9990_v8 = vor.u32 %v12396_v62, %v9989_v61  ;;  %4997 = vmatpush.bf16.msrb.mxu0 %v9734_v0 }
 0x1c0   :  { %v12468_v1 = vld [vmem:[#allocation8 + $0x1164] sm:$0xf0] }
 0x1c1   :  { %v10533_v2 = vld [vmem:[#allocation8 + $0x1348] sm:$0xf]  ;;  %v10278_v11 = vor.u32 %v12468_v1, %v10277_v63  ;;  %5010 = vmatpush.bf16.msrb.mxu1 %v9990_v8 }
 0x1c2   :  { %v12532_v3 = vld [vmem:[#allocation8 + $0x1364] sm:$0xf0] }
 0x1c3   :  { %v9701_v5 = vld [vmem:[#allocation8 + $0xcc8] sm:$0xf]  ;;  %v10534_v12 = vor.u32 %v12532_v3, %v10533_v2  ;;  %5022 = vmatpush.bf16.msra.mxu2 %v10278_v11 }
 0x1c4   :  { %v12324_v6 = vld [vmem:[#allocation8 + $0xce4] sm:$0xf0] }
 0x1c5   :  { %v9957_v13 = vld [vmem:[#allocation8 + $0xec8] sm:$0xf]  ;;  %v9702_v15 = vor.u32 %v12324_v6, %v9701_v5  ;;  %5035 = vmatpush.bf16.msra.mxu3 %v10534_v12 }
 0x1c6   :  { %v12388_v14 = vld [vmem:[#allocation8 + $0xee4] sm:$0xf0] }
 0x1c7   :  { %v10245_v4 = vld [vmem:[#allocation8 + $0x1108] sm:$0xf]  ;;  %v9958_v29 = vor.u32 %v12388_v14, %v9957_v13  ;;  %4998 = vmatpush.bf16.msrb.mxu0 %v9702_v15 }
 0x1c8   :  { %v12460_v16 = vld [vmem:[#allocation8 + $0x1124] sm:$0xf0] }
 0x1c9   :  { %v10501_v17 = vld [vmem:[#allocation8 + $0x1308] sm:$0xf]  ;;  %v10246_v46 = vor.u32 %v12460_v16, %v10245_v4  ;;  %5011 = vmatpush.bf16.msrb.mxu1 %v9958_v29  ;;  %v4745_v4 = vpop.f32.mrf.mxu2 }
 0x1ca   :  { %v12524_v18 = vld [vmem:[#allocation8 + $0x1324] sm:$0xf0]  ;;  %v8231_v4 = vld [vmem:[#allocation8 + $0x168] sm:$0xf0] }
 0x1cb   :  { %v9669_v26 = vld [vmem:[#allocation8 + $0xc88] sm:$0xf]  ;;  %v10502_v31 = vor.u32 %v12524_v18, %v10501_v17  ;;  %5023 = vmatpush.bf16.msra.mxu2 %v10246_v46 }
 0x1cc   :  { %v12316_v28 = vld [vmem:[#allocation8 + $0xca4] sm:$0xf0] }
 0x1cd   :  { %v9925_v32 = vld [vmem:[#allocation8 + $0xe88] sm:$0xf]  ;;  %v9670_v37 = vor.u32 %v12316_v28, %v9669_v26  ;;  %5036 = vmatpush.bf16.msra.mxu3 %v10502_v31 }
 0x1ce   :  { %v12380_v33 = vld [vmem:[#allocation8 + $0xea4] sm:$0xf0] }
 0x1cf   :  { %v10213_v35 = vld [vmem:[#allocation8 + $0x10c8] sm:$0xf]  ;;  %v9926_v49 = vor.u32 %v12380_v33, %v9925_v32  ;;  %4999 = vmatpush.bf16.msrb.mxu0 %v9670_v37 }
 0x1d0   :  { %v12452_v41 = vld [vmem:[#allocation8 + $0x10e4] sm:$0xf0] }
 0x1d1   :  { %v10469_v43 = vld [vmem:[#allocation8 + $0x12c8] sm:$0xf]  ;;  %v10214_v52 = vor.u32 %v12452_v41, %v10213_v35  ;;  %5012 = vmatpush.bf16.msrb.mxu1 %v9926_v49  ;;  %v11968_v41 = vld [vmem:[#allocation8 + $0x1cc] sm:$0xf]  ;;  %v4808_v58 = vpop.f32.mrf.mxu2 }
 0x1d2   :  { %v12516_v44 = vld [vmem:[#allocation8 + $0x12e4] sm:$0xf0] }
 0x1d3   :  { %v9637_v47 = vld [vmem:[#allocation8 + $0xc48] sm:$0xf]  ;;  %v10470_v53 = vor.u32 %v12516_v44, %v10469_v43  ;;  %5024 = vmatpush.bf16.msra.mxu2 %v10214_v52  ;;  %v12032_v43 = vld [vmem:[#allocation8 + $0x3cc] sm:$0xf] }
 0x1d4   :  { %v12308_v48 = vld [vmem:[#allocation8 + $0xc64] sm:$0xf0]  ;;  %v8551_v44 = vld [vmem:[#allocation8 + $0x3e8] sm:$0xf0] }
 0x1d5   :  { %v9893_v55 = vld [vmem:[#allocation8 + $0xe48] sm:$0xf]  ;;  %v9638_v60 = vor.u32 %v12308_v48, %v9637_v47  ;;  %5037 = vmatpush.bf16.msra.mxu3 %v10470_v53  ;;  %v12096_v47 = vld [vmem:[#allocation8 + $0x5cc] sm:$0xf] }
 0x1d6   :  { %v12372_v56 = vld [vmem:[#allocation8 + $0xe64] sm:$0xf0]  ;;  %v8807_v48 = vld [vmem:[#allocation8 + $0x5e8] sm:$0xf0] }
 0x1d7   :  { %v10181_v57 = vld [vmem:[#allocation8 + $0x1088] sm:$0xf]  ;;  %v9894_v2 = vor.u32 %v12372_v56, %v9893_v55  ;;  %5000 = vmatpush.bf16.msrb.mxu0 %v9638_v60  ;;  %v4771_v55 = vpop.f32.mrf.mxu3  ;;  %v8298_v60 = vor.u32 %v11968_v41, %v8295_v45 }
 0x1d8   :  { %v12444_v61 = vld [vmem:[#allocation8 + $0x10a4] sm:$0xf0]  ;;  %v8167_v55 = vld [vmem:[#allocation8 + $0xe8] sm:$0xf0] }
 0x1d9   :  { %v10437_v62 = vld [vmem:[#allocation8 + $0x1288] sm:$0xf]  ;;  %v10182_v5 = vor.u32 %v12444_v61, %v10181_v57  ;;  %5013 = vmatpush.bf16.msrb.mxu1 %v9894_v2  ;;  %v8554_v57 = vor.u32 %v12032_v43, %v8551_v44  ;;  %v8810_v61 = vor.u32 %v12096_v47, %v8807_v48  ;;  %v8263_v2 = vld [vmem:[#allocation8 + $0x1a8] sm:$0xf0] }
 0x1da   :  { %v12508_v63 = vld [vmem:[#allocation8 + $0x12a4] sm:$0xf0] }
 0x1db   :  { %v9605_v0 = vld [vmem:[#allocation8 + $0xc08] sm:$0xf]  ;;  %v10438_v6 = vor.u32 %v12508_v63, %v10437_v62  ;;  %5025 = vmatpush.bf16.msra.mxu2 %v10182_v5  ;;  %v11960_v62 = vld [vmem:[#allocation8 + $0x18c] sm:$0xf] }
 0x1dc   :  { %v12300_v1 = vld [vmem:[#allocation8 + $0xc24] sm:$0xf0]  ;;  %v12024_v63 = vld [vmem:[#allocation8 + $0x38c] sm:$0xf] }
 0x1dd   :  { %v10853_v3 = vld [vmem:[#allocation8 + $0x15c8] sm:$0xf]  ;;  %v9606_v11 = vor.u32 %v12300_v1, %v9605_v0  ;;  %5038 = vmatpush.bf16.msra.mxu3 %v10438_v6  ;;  %v8519_v0 = vld [vmem:[#allocation8 + $0x3a8] sm:$0xf0] }
 0x1de   :  { %v12612_v54 = vld [vmem:[#allocation8 + $0x15e4] sm:$0xf0] }
 0x1df   :  { %v9861_v7 = vld [vmem:[#allocation8 + $0xe08] sm:$0xf]  ;;  %v10854_v15 = vor.u32 %v12612_v54, %v10853_v3  ;;  %5001 = vmatpush.bf16.msrb.mxu0 %v9606_v11  ;;  %v12088_v3 = vld [vmem:[#allocation8 + $0x58c] sm:$0xf] }
 0x1e0   :  { %v12364_v8 = vld [vmem:[#allocation8 + $0xe24] sm:$0xf0]  ;;  %v8775_v54 = vld [vmem:[#allocation8 + $0x5a8] sm:$0xf0] }
 0x1e1   :  { %v10149_v9 = vld [vmem:[#allocation8 + $0x1048] sm:$0xf]  ;;  %v9862_v18 = vor.u32 %v12364_v8, %v9861_v7  ;;  %v8522_v7 = vor.u32 %v12024_v63, %v8519_v0  ;;  %v8266_v8 = vor.u32 %v11960_v62, %v8263_v2  ;;  %v11952_v11 = vld [vmem:[#allocation8 + $0x14c] sm:$0xf] }
 0x1e2   :  { %v12436_v12 = vld [vmem:[#allocation8 + $0x1064] sm:$0xf0]  ;;  %5002 = vmatmul.bf16.vlgmr.msrb.gmra.mxu0 %v13369_v38 }
 0x1e3   :  { %v10405_v13 = vld [vmem:[#allocation8 + $0x1248] sm:$0xf]  ;;  %v10150_v26 = vor.u32 %v12436_v12, %v10149_v9  ;;  %5046 = vmatpush.bf16.msra.mxu0 %v10854_v15  ;;  %5014 = vmatpush.bf16.msrb.mxu1 %v9862_v18  ;;  %v8778_v9 = vor.u32 %v12088_v3, %v8775_v54  ;;  %v12016_v12 = vld [vmem:[#allocation8 + $0x34c] sm:$0xf] }
 0x1e4   :  { %v12500_v14 = vld [vmem:[#allocation8 + $0x1264] sm:$0xf0]  ;;  %v12080_v15 = vld [vmem:[#allocation8 + $0x54c] sm:$0xf] }
 0x1e5   :  { %v10917_v16 = vld [vmem:[#allocation8 + $0x1648] sm:$0xf]  ;;  %v10406_v28 = vor.u32 %v12500_v14, %v10405_v13  ;;  %5026 = vmatpush.bf16.msra.mxu2 %v10150_v26  ;;  %v8487_v13 = vld [vmem:[#allocation8 + $0x368] sm:$0xf0]  ;;  %v4795_v26 = vpop.f32.mrf.mxu1 }
 0x1e6   :  { %v12628_v17 = vld [vmem:[#allocation8 + $0x1664] sm:$0xf0]  ;;  %5015 = vmatmul.bf16.vlgmr.msrb.gmra.mxu1 %v13371_v39  ;;  %v8490_v10 = vor.u32 %v12016_v12, %v8487_v13  ;;  %v11928_v54 = vld [vmem:[#allocation8 + $0x8c] sm:$0xf]  ;;  %v4821_v13 = vpop.f32.mrf.mxu3 }
 0x1e7   :  { %v10821_v21 = vld [vmem:[#allocation8 + $0x1588] sm:$0xf]  ;;  %v10918_v32 = vor.u32 %v12628_v17, %v10917_v16  ;;  %5039 = vmatpush.bf16.msra.mxu3 %v10406_v28  ;;  %v8743_v16 = vld [vmem:[#allocation8 + $0x568] sm:$0xf0]  ;;  %v8234_v28 = vor.u32 %v11952_v11, %v8231_v4 }
 0x1e8   :  { %v12604_v22 = vld [vmem:[#allocation8 + $0x15a4] sm:$0xf0]  ;;  %v12160_v4 = vld [vmem:[#allocation8 + $0x7cc] sm:$0xf] }
 0x1e9   :  { %v10117_v29 = vld [vmem:[#allocation8 + $0x1008] sm:$0xf]  ;;  %v10822_v37 = vor.u32 %v12604_v22, %v10821_v21  ;;  %5065 = vmatpush.bf16.msra.mxu1 %v10918_v32  ;;  %v4782_v21 = vpop.f32.mrf.mxu0  ;;  %v8455_v32 = vld [vmem:[#allocation8 + $0x328] sm:$0xf0] }
 0x1ea   :  { %v12428_v46 = vld [vmem:[#allocation8 + $0x1024] sm:$0xf0]  ;;  %v4783_v22 = vadd.f32 %v4782_v21, %v4770_v59  ;;  %v8135_v59 = vld [vmem:[#allocation8 + $0xa8] sm:$0xf0] }
 0x1eb   :  { %v10373_v31 = vld [vmem:[#allocation8 + $0x1208] sm:$0xf]  ;;  %v10118_v49 = vor.u32 %v12428_v46, %v10117_v29  ;;  %5047 = vmatpush.bf16.msra.mxu0 %v10822_v37  ;;  %v8746_v29 = vor.u32 %v12080_v15, %v8743_v16  ;;  %v11944_v46 = vld [vmem:[#allocation8 + $0x10c] sm:$0xf] }
 0x1ec   :  { %v12492_v33 = vld [vmem:[#allocation8 + $0x1224] sm:$0xf0]  ;;  %v8711_v37 = vld [vmem:[#allocation8 + $0x528] sm:$0xf0]  ;;  %v4796_v41 = vadd.f32 %v4795_v26, %v4783_v22 }
 0x1ed   :  { %v10885_v35 = vld [vmem:[#allocation8 + $0x1608] sm:$0xf]  ;;  %v10374_v50 = vor.u32 %v12492_v33, %v10373_v31  ;;  %5027 = vmatpush.bf16.msra.mxu2 %v10118_v49  ;;  %v12008_v31 = vld [vmem:[#allocation8 + $0x30c] sm:$0xf] }
 0x1ee   :  { %v12620_v36 = vld [vmem:[#allocation8 + $0x1624] sm:$0xf0]  ;;  %v8458_v45 = vor.u32 %v12008_v31, %v8455_v32  ;;  %v11936_v49 = vld [vmem:[#allocation8 + $0xcc] sm:$0xf]  ;;  %v4809_v62 = vadd.f32 %v4808_v58, %v4796_v41  ;;  %v4810_v31 = vpop.f32.mrf.mxu2  ;;  %v4823_v58 = vpop.f32.mrf.mxu3 }
 0x1ef   :  { %v10789_v52 = vld [vmem:[#allocation8 + $0x1548] sm:$0xf]  ;;  %v10886_v56 = vor.u32 %v12620_v36, %v10885_v35  ;;  %5040 = vmatpush.bf16.msra.mxu3 %v10374_v50  ;;  %v8199_v35 = vld [vmem:[#allocation8 + $0x128] sm:$0xf0]  ;;  %v8170_v2 = vor.u32 %v11936_v49, %v8167_v55 }
 0x1f0   :  { %v12596_v53 = vld [vmem:[#allocation8 + $0x1564] sm:$0xf0]  ;;  %5028 = vmatmul.bf16.vlgmr.msra.gmra.mxu2 %v13383_v23  ;;  %v12072_v36 = vld [vmem:[#allocation8 + $0x50c] sm:$0xf]  ;;  %v8202_v47 = vor.u32 %v11944_v46, %v8199_v35  ;;  %v13435_v16 = vadd.f32 %v4821_v13, %v4809_v62 }
 0x1f1   :  { %v10790_v1 = vor.u32 %v12596_v53, %v10789_v52  ;;  %v10757_v5 = vld [vmem:[#allocation8 + $0x1508] sm:$0xf]  ;;  %5066 = vmatpush.bf16.msra.mxu1 %v10886_v56  ;;  %5085 = vmatpush.bf16.msrb.mxu2 %v8554_v57  ;;  %v8714_v48 = vor.u32 %v12072_v36, %v8711_v37  ;;  %v12000_v50 = vld [vmem:[#allocation8 + $0x2cc] sm:$0xf]  ;;  %v4784_v63 = vpop.f32.mrf.mxu0 }
 0x1f2   :  { %v12588_v6 = vld [vmem:[#allocation8 + $0x1524] sm:$0xf0]  ;;  %5041 = vmatmul.bf16.vlgmr.msra.gmra.mxu3 %v13387_v30  ;;  %v8423_v52 = vld [vmem:[#allocation8 + $0x2e8] sm:$0xf0] }
 0x1f3   :  { %5098 = vmatpush.bf16.msrb.mxu3 %v8810_v61  ;;  %5048 = vmatpush.bf16.msra.mxu0 %v10790_v1  ;;  %v10758_v14 = vor.u32 %v12588_v6, %v10757_v5  ;;  %v10725_v17 = vld [vmem:[#allocation8 + $0x14c8] sm:$0xf]  ;;  %v12064_v56 = vld [vmem:[#allocation8 + $0x4cc] sm:$0xf]  ;;  %v8426_v0 = vor.u32 %v12000_v50, %v8423_v52  ;;  %v4797_v1 = vpop.f32.mrf.mxu1 }
 0x1f4   :  { %v12580_v18 = vld [vmem:[#allocation8 + $0x14e4] sm:$0xf0]  ;;  %v8679_v57 = vld [vmem:[#allocation8 + $0x4e8] sm:$0xf0] }
 0x1f5   :  { %5072 = vmatpush.bf16.msrb.mxu1 %v8298_v60  ;;  %5086 = vmatpush.bf16.msrb.mxu2 %v8522_v7  ;;  %v10726_v33 = vor.u32 %v12580_v18, %v10725_v17  ;;  %v10693_v43 = vld [vmem:[#allocation8 + $0x1488] sm:$0xf]  ;;  %v8682_v3 = vor.u32 %v12064_v56, %v8679_v57  ;;  %v11992_v5 = vld [vmem:[#allocation8 + $0x28c] sm:$0xf]  ;;  %v8138_v17 = vor.u32 %v11928_v54, %v8135_v59 }
 0x1f6   :  { %v12572_v44 = vld [vmem:[#allocation8 + $0x14a4] sm:$0xf0]  ;;  %v8391_v6 = vld [vmem:[#allocation8 + $0x2a8] sm:$0xf0]  ;;  %10941 = vmatmul.msk.bf16.vlgmr.msra.gmra.mxu1 %vm4600_vm0, %v13379_v40 }
 0x1f7   :  { %5099 = vmatpush.bf16.msrb.mxu3 %v8778_v9  ;;  %5049 = vmatpush.bf16.msra.mxu0 %v10758_v14  ;;  %v10694_v53 = vor.u32 %v12572_v44, %v10693_v43  ;;  %v10661_v60 = vld [vmem:[#allocation8 + $0x1448] sm:$0xf]  ;;  %v8647_v9 = vld [vmem:[#allocation8 + $0x4a8] sm:$0xf0]  ;;  %v8394_v14 = vor.u32 %v11992_v5, %v8391_v6 }
 0x1f8   :  { %v12564_v61 = vld [vmem:[#allocation8 + $0x1464] sm:$0xf0]  ;;  %v9063_v15 = vld [vmem:[#allocation8 + $0x7e8] sm:$0xf0] }
 0x1f9   :  { %5073 = vmatpush.bf16.msrb.mxu1 %v8266_v8  ;;  %5087 = vmatpush.bf16.msrb.mxu2 %v8490_v10  ;;  %v10662_v7 = vor.u32 %v12564_v61, %v10661_v60  ;;  %v12056_v8 = vld [vmem:[#allocation8 + $0x48c] sm:$0xf]  ;;  %v10629_v11 = vld [vmem:[#allocation8 + $0x1408] sm:$0xf]  ;;  %v9066_v32 = vor.u32 %v12160_v4, %v9063_v15  ;;  %v4834_v31 = vpop.f32.mrf.mxu0 }
 0x1fa   :  { %v12556_v12 = vld [vmem:[#allocation8 + $0x1424] sm:$0xf0]  ;;  %v8650_v18 = vor.u32 %v12056_v8, %v8647_v9  ;;  %v11920_v21 = vld [vmem:[#allocation8 + $0x4c] sm:$0xf] }
 0x1fb   :  { %5100 = vmatpush.bf16.msrb.mxu3 %v8746_v29  ;;  %5050 = vmatpush.bf16.msra.mxu0 %v10726_v33  ;;  %v11984_v10 = vld [vmem:[#allocation8 + $0x24c] sm:$0xf]  ;;  %v10630_v26 = vor.u32 %v12556_v12, %v10629_v11 }
 0x1fc   :  { %v8359_v22 = vld [vmem:[#allocation8 + $0x268] sm:$0xf0] }
 0x1fd   :  { %5074 = vmatpush.bf16.msrb.mxu1 %v8234_v28  ;;  %5088 = vmatpush.bf16.msrb.mxu2 %v8458_v45  ;;  %v8103_v28 = vld [vmem:[#allocation8 + $0x68] sm:$0xf0]  ;;  %v8362_v33 = vor.u32 %v11984_v10, %v8359_v22 }
 0x1fe   :  { %v12048_v29 = vld [vmem:[#allocation8 + $0x44c] sm:$0xf]  ;;  %v8106_v43 = vor.u32 %v11920_v21, %v8103_v28 }
 0x1ff   :  { %5101 = vmatpush.bf16.msrb.mxu3 %v8714_v48  ;;  %5051 = vmatpush.bf16.msra.mxu0 %v10694_v53  ;;  %v8615_v46 = vld [vmem:[#allocation8 + $0x468] sm:$0xf0] }
 0x200   :  { %v11912_v35 = vld [vmem:[#allocation8 + $0xc] sm:$0xf]  ;;  %v8618_v44 = vor.u32 %v12048_v29, %v8615_v46 }
 0x201   :  { %5075 = vmatpush.bf16.msrb.mxu1 %v8202_v47  ;;  %5089 = vmatpush.bf16.msrb.mxu2 %v8426_v0  ;;  %v8071_v36 = vld [vmem:[#allocation8 + $0x28] sm:$0xf0] }
 0x202   :  { %v12152_v37 = vld [vmem:[#allocation8 + $0x78c] sm:$0xf]  ;;  %v8074_v0 = vor.u32 %v11912_v35, %v8071_v36 }
 0x203   :  { %5102 = vmatpush.bf16.msrb.mxu3 %v8682_v3  ;;  %5052 = vmatpush.bf16.msra.mxu0 %v10662_v7  ;;  %v9031_v41 = vld [vmem:[#allocation8 + $0x7a8] sm:$0xf0] }
 0x204   :  { %v11976_v45 = vld [vmem:[#allocation8 + $0x20c] sm:$0xf]  ;;  %v9034_v53 = vor.u32 %v12152_v37, %v9031_v41 }
 0x205   :  { %5076 = vmatpush.bf16.msrb.mxu1 %v8170_v2  ;;  %5090 = vmatpush.bf16.msrb.mxu2 %v8394_v14  ;;  %v8327_v47 = vld [vmem:[#allocation8 + $0x228] sm:$0xf0] }
 0x206   :  { %v12040_v48 = vld [vmem:[#allocation8 + $0x40c] sm:$0xf]  ;;  %v8330_v60 = vor.u32 %v11976_v45, %v8327_v47 }
 0x207   :  { %5103 = vmatpush.bf16.msrb.mxu3 %v8650_v18  ;;  %5053 = vmatpush.bf16.msra.mxu0 %v10630_v26  ;;  %v8583_v49 = vld [vmem:[#allocation8 + $0x428] sm:$0xf0] }
 0x208   :  { %v12224_v50 = vld [vmem:[#allocation8 + $0x9cc] sm:$0xf]  ;;  %v8586_v1 = vor.u32 %v12040_v48, %v8583_v49 }
 0x209   :  { %5077 = vmatpush.bf16.msrb.mxu1 %v8138_v17  ;;  %v9319_v52 = vld [vmem:[#allocation8 + $0x9e8] sm:$0xf0]  ;;  %5091 = vmatpush.bf16.msrb.mxu2 %v8362_v33  ;;  %v4835_v33 = vadd.f32 %v4834_v31, %v13435_v16 }
 0x20a   :  { %v12288_v55 = vld [vmem:[#allocation8 + $0xbcc] sm:$0xf]  ;;  %5054 = vmatmul.bf16.vlgmr.msra.gmra.mxu0 %v13385_v25  ;;  %v9322_v2 = vor.u32 %v12224_v50, %v9319_v52 }
 0x20b   :  { %5111 = vmatpush.bf16.msrb.mxu0 %v9066_v32  ;;  %v9575_v56 = vld [vmem:[#allocation8 + $0xbe8] sm:$0xf0]  ;;  %5104 = vmatpush.bf16.msrb.mxu3 %v8618_v44  ;;  %v4847_v32 = vpop.f32.mrf.mxu1 }
 0x20c   :  { %v12352_v57 = vld [vmem:[#allocation8 + $0xdcc] sm:$0xf]  ;;  %v9578_v3 = vor.u32 %v12288_v55, %v9575_v56  ;;  %v4848_v49 = vadd.f32 %v4847_v32, %v4835_v33 }
 0x20d   :  { %v9831_v61 = vld [vmem:[#allocation8 + $0xde8] sm:$0xf0]  ;;  %5078 = vmatpush.bf16.msrb.mxu1 %v8106_v43  ;;  %5092 = vmatpush.bf16.msrb.mxu2 %v8330_v60 }
 0x20e   :  { %v12144_v62 = vld [vmem:[#allocation8 + $0x74c] sm:$0xf]  ;;  %v9834_v6 = vor.u32 %v12352_v57, %v9831_v61 }
 0x20f   :  { %v8999_v63 = vld [vmem:[#allocation8 + $0x768] sm:$0xf0]  ;;  %5112 = vmatpush.bf16.msrb.mxu0 %v9034_v53  ;;  %5105 = vmatpush.bf16.msrb.mxu3 %v8586_v1 }
 0x210   :  { %v12216_v54 = vld [vmem:[#allocation8 + $0x98c] sm:$0xf]  ;;  %v9002_v7 = vor.u32 %v12144_v62, %v8999_v63  ;;  %5093 = vmatmul.bf16.vlgmr.msrb.gmra.mxu2 %v13361_v27 }
 0x211   :  { %v9287_v5 = vld [vmem:[#allocation8 + $0x9a8] sm:$0xf0]  ;;  %5079 = vmatpush.bf16.msrb.mxu1 %v8074_v0  ;;  %5137 = vmatpush.bf16.msra.mxu2 %v9578_v3  ;;  %v4860_v0 = vpop.f32.mrf.mxu2 }
 0x212   :  { %v12280_v59 = vld [vmem:[#allocation8 + $0xb8c] sm:$0xf]  ;;  %v9290_v14 = vor.u32 %v12216_v54, %v9287_v5  ;;  %5106 = vmatmul.bf16.vlgmr.msrb.gmra.mxu3 %v13357_v20  ;;  %v4861_v54 = vadd.f32 %v4860_v0, %v4848_v49  ;;  %v4836_v5 = vpop.f32.mrf.mxu0 }
 0x213   :  { %v9543_v8 = vld [vmem:[#allocation8 + $0xba8] sm:$0xf0]  ;;  %5150 = vmatpush.bf16.msra.mxu3 %v9834_v6  ;;  %5113 = vmatpush.bf16.msrb.mxu0 %v9002_v7  ;;  %v4849_v6 = vpop.f32.mrf.mxu1 }
 0x214   :  { %v12344_v9 = vld [vmem:[#allocation8 + $0xd8c] sm:$0xf]  ;;  %v9546_v4 = vor.u32 %v12280_v59, %v9543_v8  ;;  %5080 = vmatmul.bf16.vlgmr.msrb.gmra.mxu1 %v13355_v19 }
 0x215   :  { %v9799_v11 = vld [vmem:[#allocation8 + $0xda8] sm:$0xf0]  ;;  %5124 = vmatpush.bf16.msra.mxu1 %v9322_v2 }
 0x216   :  { %v12136_v12 = vld [vmem:[#allocation8 + $0x70c] sm:$0xf]  ;;  %v9802_v18 = vor.u32 %v12344_v9, %v9799_v11  ;;  %5138 = vmatpush.bf16.msra.mxu2 %v9546_v4 }
 0x217   :  { %v8967_v13 = vld [vmem:[#allocation8 + $0x728] sm:$0xf0] }
 0x218   :  { %v12208_v15 = vld [vmem:[#allocation8 + $0x94c] sm:$0xf]  ;;  %v8970_v21 = vor.u32 %v12136_v12, %v8967_v13  ;;  %5151 = vmatpush.bf16.msra.mxu3 %v9802_v18 }
 0x219   :  { %v9255_v17 = vld [vmem:[#allocation8 + $0x968] sm:$0xf0]  ;;  %5125 = vmatpush.bf16.msra.mxu1 %v9290_v14 }
 0x21a   :  { %v12272_v10 = vld [vmem:[#allocation8 + $0xb4c] sm:$0xf]  ;;  %v9258_v35 = vor.u32 %v12208_v15, %v9255_v17  ;;  %5114 = vmatpush.bf16.msrb.mxu0 %v8970_v21  ;;  %v4873_v15 = vpop.f32.mrf.mxu3 }
 0x21b   :  { %v9511_v22 = vld [vmem:[#allocation8 + $0xb68] sm:$0xf0] }
 0x21c   :  { %v12336_v26 = vld [vmem:[#allocation8 + $0xd4c] sm:$0xf]  ;;  %v9514_v36 = vor.u32 %v12272_v10, %v9511_v22  ;;  %v13442_v10 = vadd.f32 %v4873_v15, %v4861_v54 }
 0x21d   :  { %v9767_v28 = vld [vmem:[#allocation8 + $0xd68] sm:$0xf0]  ;;  %5126 = vmatpush.bf16.msra.mxu1 %v9258_v35 }
 0x21e   :  { %v12128_v29 = vld [vmem:[#allocation8 + $0x6cc] sm:$0xf]  ;;  %v9770_v43 = vor.u32 %v12336_v26, %v9767_v28  ;;  %5139 = vmatpush.bf16.msra.mxu2 %v9514_v36 }
 0x21f   :  { %v8935_v46 = vld [vmem:[#allocation8 + $0x6e8] sm:$0xf0] }
 0x220   :  { %v12200_v37 = vld [vmem:[#allocation8 + $0x90c] sm:$0xf]  ;;  %v8938_v44 = vor.u32 %v12128_v29, %v8935_v46  ;;  %5152 = vmatpush.bf16.msra.mxu3 %v9770_v43 }
 0x221   :  { %v9223_v41 = vld [vmem:[#allocation8 + $0x928] sm:$0xf0] }
 0x222   :  { %v12264_v45 = vld [vmem:[#allocation8 + $0xb0c] sm:$0xf]  ;;  %v9226_v55 = vor.u32 %v12200_v37, %v9223_v41  ;;  %5115 = vmatpush.bf16.msrb.mxu0 %v8938_v44  ;;  %v4862_v37 = vpop.f32.mrf.mxu2 }
 0x223   :  { %v9479_v47 = vld [vmem:[#allocation8 + $0xb28] sm:$0xf0] }
 0x224   :  { %v12328_v48 = vld [vmem:[#allocation8 + $0xd0c] sm:$0xf]  ;;  %v9482_v56 = vor.u32 %v12264_v45, %v9479_v47  ;;  %5127 = vmatpush.bf16.msra.mxu1 %v9226_v55 }
 0x225   :  { %v9735_v50 = vld [vmem:[#allocation8 + $0xd28] sm:$0xf0] }
 0x226   :  { %v12120_v52 = vld [vmem:[#allocation8 + $0x68c] sm:$0xf]  ;;  %v9738_v58 = vor.u32 %v12328_v48, %v9735_v50  ;;  %5140 = vmatpush.bf16.msra.mxu2 %v9482_v56 }
 0x227   :  { %v8903_v53 = vld [vmem:[#allocation8 + $0x6a8] sm:$0xf0] }
 0x228   :  { %v12192_v16 = vld [vmem:[#allocation8 + $0x8cc] sm:$0xf]  ;;  %v8906_v60 = vor.u32 %v12120_v52, %v8903_v53  ;;  %5153 = vmatpush.bf16.msra.mxu3 %v9738_v58 }
 0x229   :  { %v9191_v57 = vld [vmem:[#allocation8 + $0x8e8] sm:$0xf0] }
 0x22a   :  { %v12256_v61 = vld [vmem:[#allocation8 + $0xacc] sm:$0xf]  ;;  %v9194_v7 = vor.u32 %v12192_v16, %v9191_v57  ;;  %5116 = vmatpush.bf16.msrb.mxu0 %v8906_v60 }
 0x22b   :  { %v9447_v62 = vld [vmem:[#allocation8 + $0xae8] sm:$0xf0] }
 0x22c   :  { %v12320_v63 = vld [vmem:[#allocation8 + $0xccc] sm:$0xf]  ;;  %v9450_v59 = vor.u32 %v12256_v61, %v9447_v62  ;;  %5128 = vmatpush.bf16.msra.mxu1 %v9194_v7 }
 0x22d   :  { %v9703_v1 = vld [vmem:[#allocation8 + $0xce8] sm:$0xf0] }
 0x22e   :  { %v12112_v2 = vld [vmem:[#allocation8 + $0x64c] sm:$0xf]  ;;  %v9706_v11 = vor.u32 %v12320_v63, %v9703_v1  ;;  %5141 = vmatpush.bf16.msra.mxu2 %v9450_v59  ;;  %v4875_v63 = vpop.f32.mrf.mxu3 }
 0x22f   :  { %v8871_v3 = vld [vmem:[#allocation8 + $0x668] sm:$0xf0] }
 0x230   :  { %v12184_v8 = vld [vmem:[#allocation8 + $0x88c] sm:$0xf]  ;;  %v8874_v12 = vor.u32 %v12112_v2, %v8871_v3  ;;  %5154 = vmatpush.bf16.msra.mxu3 %v9706_v11 }
 0x231   :  { %v9159_v9 = vld [vmem:[#allocation8 + $0x8a8] sm:$0xf0] }
 0x232   :  { %v12248_v13 = vld [vmem:[#allocation8 + $0xa8c] sm:$0xf]  ;;  %v9162_v28 = vor.u32 %v12184_v8, %v9159_v9  ;;  %5117 = vmatpush.bf16.msrb.mxu0 %v8874_v12 }
 0x233   :  { %v9415_v14 = vld [vmem:[#allocation8 + $0xaa8] sm:$0xf0] }
 0x234   :  { %v12312_v4 = vld [vmem:[#allocation8 + $0xc8c] sm:$0xf]  ;;  %v9418_v29 = vor.u32 %v12248_v13, %v9415_v14  ;;  %5129 = vmatpush.bf16.msra.mxu1 %v9162_v28  ;;  %v4912_v14 = vpop.f32.mrf.mxu2 }
 0x235   :  { %v9671_v17 = vld [vmem:[#allocation8 + $0xca8] sm:$0xf0] }
 0x236   :  { %v12104_v18 = vld [vmem:[#allocation8 + $0x60c] sm:$0xf]  ;;  %v9674_v31 = vor.u32 %v12312_v4, %v9671_v17  ;;  %5142 = vmatpush.bf16.msra.mxu2 %v9418_v29 }
 0x237   :  { %v8839_v21 = vld [vmem:[#allocation8 + $0x628] sm:$0xf0] }
 0x238   :  { %v12416_v22 = vld [vmem:[#allocation8 + $0xfcc] sm:$0xf]  ;;  %v8842_v32 = vor.u32 %v12104_v18, %v8839_v21  ;;  %5155 = vmatpush.bf16.msra.mxu3 %v9674_v31 }
 0x239   :  { %v10087_v26 = vld [vmem:[#allocation8 + $0xfe8] sm:$0xf0] }
 0x23a   :  { %v12176_v46 = vld [vmem:[#allocation8 + $0x84c] sm:$0xf]  ;;  %v10090_v44 = vor.u32 %v12416_v22, %v10087_v26  ;;  %5118 = vmatpush.bf16.msrb.mxu0 %v8842_v32 }
 0x23b   :  { %v9127_v33 = vld [vmem:[#allocation8 + $0x868] sm:$0xf0] }
 0x23c   :  { %v12240_v35 = vld [vmem:[#allocation8 + $0xa4c] sm:$0xf]  ;;  %v9130_v48 = vor.u32 %v12176_v46, %v9127_v33 }
 0x23d   :  { %v9383_v36 = vld [vmem:[#allocation8 + $0xa68] sm:$0xf0]  ;;  %5119 = vmatmul.bf16.vlgmr.msrb.gmra.mxu0 %v13359_v24 }
 0x23e   :  { %v12304_v41 = vld [vmem:[#allocation8 + $0xc4c] sm:$0xf]  ;;  %v9386_v49 = vor.u32 %v12240_v35, %v9383_v36  ;;  %5163 = vmatpush.bf16.msra.mxu0 %v10090_v44  ;;  %5130 = vmatpush.bf16.msra.mxu1 %v9130_v48 }
 0x23f   :  { %v9639_v43 = vld [vmem:[#allocation8 + $0xc68] sm:$0xf0] }
 0x240   :  { %v12408_v45 = vld [vmem:[#allocation8 + $0xf8c] sm:$0xf]  ;;  %v9642_v55 = vor.u32 %v12304_v41, %v9639_v43  ;;  %5143 = vmatpush.bf16.msra.mxu2 %v9386_v49  ;;  %v4886_v41 = vpop.f32.mrf.mxu0 }
 0x241   :  { %v10055_v47 = vld [vmem:[#allocation8 + $0xfa8] sm:$0xf0] }
 0x242   :  { %v12168_v50 = vld [vmem:[#allocation8 + $0x80c] sm:$0xf]  ;;  %v10058_v58 = vor.u32 %v12408_v45, %v10055_v47  ;;  %5156 = vmatpush.bf16.msra.mxu3 %v9642_v55  ;;  %v4887_v45 = vadd.f32 %v4886_v41, %v13442_v10  ;;  %v4899_v47 = vpop.f32.mrf.mxu1 }
 0x243   :  { %v9095_v52 = vld [vmem:[#allocation8 + $0x828] sm:$0xf0] }
 0x244   :  { %v12232_v53 = vld [vmem:[#allocation8 + $0xa0c] sm:$0xf]  ;;  %v9098_v3 = vor.u32 %v12168_v50, %v9095_v52  ;;  %5164 = vmatpush.bf16.msra.mxu0 %v10058_v58 }
 0x245   :  { %v9351_v56 = vld [vmem:[#allocation8 + $0xa28] sm:$0xf0] }
 0x246   :  { %v12296_v16 = vld [vmem:[#allocation8 + $0xc0c] sm:$0xf]  ;;  %v9354_v54 = vor.u32 %v12232_v53, %v9351_v56  ;;  %5131 = vmatpush.bf16.msra.mxu1 %v9098_v3  ;;  %v4914_v56 = vpop.f32.mrf.mxu2 }
 0x247   :  { %v9607_v57 = vld [vmem:[#allocation8 + $0xc28] sm:$0xf0] }
 0x248   :  { %v12480_v60 = vld [vmem:[#allocation8 + $0x11cc] sm:$0xf]  ;;  %v9610_v7 = vor.u32 %v12296_v16, %v9607_v57  ;;  %5144 = vmatpush.bf16.msra.mxu2 %v9354_v54  ;;  %v4900_v16 = vadd.f32 %v4899_v47, %v4887_v45 }
 0x249   :  { %v10343_v61 = vld [vmem:[#allocation8 + $0x11e8] sm:$0xf0]  ;;  %5132 = vmatmul.bf16.vlgmr.msra.gmra.mxu1 %v13367_v34 }
 0x24a   :  { %v12544_v62 = vld [vmem:[#allocation8 + $0x13cc] sm:$0xf]  ;;  %v10346_v59 = vor.u32 %v12480_v60, %v10343_v61  ;;  %5157 = vmatpush.bf16.msra.mxu3 %v9610_v7  ;;  %v13449_v10 = vadd.f32 %v4912_v14, %v4900_v16  ;;  %v13451_v14 = vld [vmem:[#allocation10] sm:$0xff] }
 0x24b   :  { %v10599_v0 = vld [vmem:[#allocation8 + $0x13e8] sm:$0xf0]  ;;  %5145 = vmatmul.bf16.vlgmr.msra.gmra.mxu2 %v13373_v42 }
 0x24c   :  { %v12608_v1 = vld [vmem:[#allocation8 + $0x15cc] sm:$0xf]  ;;  %v10602_v8 = vor.u32 %v12544_v62, %v10599_v0  ;;  %5176 = vmatpush.bf16.msrb.mxu1 %v10346_v59 }
 0x24d   :  { %v10855_v2 = vld [vmem:[#allocation8 + $0x15e8] sm:$0xf0]  ;;  %5158 = vmatmul.bf16.vlgmr.msra.gmra.mxu3 %v13369_v38 }
 0x24e   :  { %v12400_v5 = vld [vmem:[#allocation8 + $0xf4c] sm:$0xf]  ;;  %v10858_v9 = vor.u32 %v12608_v1, %v10855_v2  ;;  %5189 = vmatpush.bf16.msrb.mxu2 %v10602_v8 }
 0x24f   :  { %v10023_v6 = vld [vmem:[#allocation8 + $0xf68] sm:$0xf0] }
 0x250   :  { %v12472_v11 = vld [vmem:[#allocation8 + $0x118c] sm:$0xf]  ;;  %v10026_v4 = vor.u32 %v12400_v5, %v10023_v6  ;;  %5202 = vmatpush.bf16.msrb.mxu3 %v10858_v9 }
 0x251   :  { %v10311_v12 = vld [vmem:[#allocation8 + $0x11a8] sm:$0xf0] }
 0x252   :  { %v12536_v13 = vld [vmem:[#allocation8 + $0x138c] sm:$0xf]  ;;  %v10314_v26 = vor.u32 %v12472_v11, %v10311_v12  ;;  %5165 = vmatpush.bf16.msra.mxu0 %v10026_v4  ;;  %v4888_v12 = vpop.f32.mrf.mxu0  ;;  %v986_v4 = vperm.slane %v13451_v14, 2 }
 0x253   :  { %v10567_v15 = vld [vmem:[#allocation8 + $0x13a8] sm:$0xf0]  ;;  %v12101_v12 = vld [vmem:[#allocation8 + $0x5ec] sm:$0xf0] }
 0x254   :  { %v12600_v17 = vld [vmem:[#allocation8 + $0x158c] sm:$0xf]  ;;  %v10570_v28 = vor.u32 %v12536_v13, %v10567_v15  ;;  %5177 = vmatpush.bf16.msrb.mxu1 %v10314_v26  ;;  %v4901_v15 = vpop.f32.mrf.mxu1 }
 0x255   :  { %v10823_v18 = vld [vmem:[#allocation8 + $0x15a8] sm:$0xf0] }
 0x256   :  { %v12392_v21 = vld [vmem:[#allocation8 + $0xf0c] sm:$0xf]  ;;  %v10826_v29 = vor.u32 %v12600_v17, %v10823_v18  ;;  %5190 = vmatpush.bf16.msrb.mxu2 %v10570_v28 }
 0x257   :  { %v9991_v22 = vld [vmem:[#allocation8 + $0xf28] sm:$0xf0] }
 0x258   :  { %v12464_v46 = vld [vmem:[#allocation8 + $0x114c] sm:$0xf]  ;;  %v9994_v33 = vor.u32 %v12392_v21, %v9991_v22  ;;  %5203 = vmatpush.bf16.msrb.mxu3 %v10826_v29 }
 0x259   :  { %v10279_v31 = vld [vmem:[#allocation8 + $0x1168] sm:$0xf0] }
 0x25a   :  { %v12528_v32 = vld [vmem:[#allocation8 + $0x134c] sm:$0xf]  ;;  %v10282_v48 = vor.u32 %v12464_v46, %v10279_v31  ;;  %5166 = vmatpush.bf16.msra.mxu0 %v9994_v33 }
 0x25b   :  { %v10535_v35 = vld [vmem:[#allocation8 + $0x1368] sm:$0xf0] }
 0x25c   :  { %v12592_v36 = vld [vmem:[#allocation8 + $0x154c] sm:$0xf]  ;;  %v10538_v49 = vor.u32 %v12528_v32, %v10535_v35  ;;  %5178 = vmatpush.bf16.msrb.mxu1 %v10282_v48  ;;  %v4925_v35 = vpop.f32.mrf.mxu2 }
 0x25d   :  { %v10791_v37 = vld [vmem:[#allocation8 + $0x1568] sm:$0xf0] }
 0x25e   :  { %v12384_v43 = vld [vmem:[#allocation8 + $0xecc] sm:$0xf]  ;;  %v10794_v50 = vor.u32 %v12592_v36, %v10791_v37  ;;  %5191 = vmatpush.bf16.msrb.mxu2 %v10538_v49  ;;  %v4938_v36 = vpop.f32.mrf.mxu3 }
 0x25f   :  { %v9959_v44 = vld [vmem:[#allocation8 + $0xee8] sm:$0xf0] }
 0x260   :  { %v12456_v52 = vld [vmem:[#allocation8 + $0x110c] sm:$0xf]  ;;  %v9962_v57 = vor.u32 %v12384_v43, %v9959_v44  ;;  %5204 = vmatpush.bf16.msrb.mxu3 %v10794_v50  ;;  %v4926_v44 = vadd.f32 %v4925_v35, %v986_v4  ;;  %v12029_v35 = vld [vmem:[#allocation8 + $0x3ac] sm:$0xf0] }
 0x261   :  { %v10247_v53 = vld [vmem:[#allocation8 + $0x1128] sm:$0xf0] }
 0x262   :  { %v12520_v55 = vld [vmem:[#allocation8 + $0x130c] sm:$0xf]  ;;  %v10250_v0 = vor.u32 %v12456_v52, %v10247_v53  ;;  %5167 = vmatpush.bf16.msra.mxu0 %v9962_v57  ;;  %v13454_v16 = vadd.f32 %v4938_v36, %v4926_v44  ;;  %v8781_v36 = vld [vmem:[#allocation8 + $0x590] sm:$0xf] }
 0x263   :  { %v10503_v58 = vld [vmem:[#allocation8 + $0x1328] sm:$0xf0] }
 0x264   :  { %v12584_v60 = vld [vmem:[#allocation8 + $0x150c] sm:$0xf]  ;;  %v10506_v1 = vor.u32 %v12520_v55, %v10503_v58  ;;  %5179 = vmatpush.bf16.msrb.mxu1 %v10250_v0 }
 0x265   :  { %v10759_v61 = vld [vmem:[#allocation8 + $0x1528] sm:$0xf0] }
 0x266   :  { %v12376_v62 = vld [vmem:[#allocation8 + $0xe8c] sm:$0xf]  ;;  %v10762_v2 = vor.u32 %v12584_v60, %v10759_v61  ;;  %5192 = vmatpush.bf16.msrb.mxu2 %v10506_v1  ;;  %v4940_v4 = vpop.f32.mrf.mxu3 }
 0x267   :  { %v9927_v63 = vld [vmem:[#allocation8 + $0xea8] sm:$0xf0] }
 0x268   :  { %v12448_v3 = vld [vmem:[#allocation8 + $0x10cc] sm:$0xf]  ;;  %v9930_v6 = vor.u32 %v12376_v62, %v9927_v63  ;;  %5205 = vmatpush.bf16.msrb.mxu3 %v10762_v2 }
 0x269   :  { %v10215_v54 = vld [vmem:[#allocation8 + $0x10e8] sm:$0xf0] }
 0x26a   :  { %v12512_v5 = vld [vmem:[#allocation8 + $0x12cc] sm:$0xf]  ;;  %v10218_v13 = vor.u32 %v12448_v3, %v10215_v54  ;;  %5168 = vmatpush.bf16.msra.mxu0 %v9930_v6  ;;  %v8301_v54 = vld [vmem:[#allocation8 + $0x1d0] sm:$0xf] }
 0x26b   :  { %v10471_v7 = vld [vmem:[#allocation8 + $0x12e8] sm:$0xf0] }
 0x26c   :  { %v12576_v59 = vld [vmem:[#allocation8 + $0x14cc] sm:$0xf]  ;;  %v10474_v17 = vor.u32 %v12512_v5, %v10471_v7  ;;  %5180 = vmatpush.bf16.msrb.mxu1 %v10218_v13  ;;  %v11973_v5 = vld [vmem:[#allocation8 + $0x1ec] sm:$0xf0]  ;;  %v4927_v13 = vpop.f32.mrf.mxu2 }
 0x26d   :  { %v10727_v8 = vld [vmem:[#allocation8 + $0x14e8] sm:$0xf0] }
 0x26e   :  { %v12368_v9 = vld [vmem:[#allocation8 + $0xe4c] sm:$0xf]  ;;  %v10730_v18 = vor.u32 %v12576_v59, %v10727_v8  ;;  %5193 = vmatpush.bf16.msrb.mxu2 %v10474_v17  ;;  %v8557_v59 = vld [vmem:[#allocation8 + $0x3d0] sm:$0xf]  ;;  %v8302_v17 = vor.u32 %v11973_v5, %v8301_v54 }
 0x26f   :  { %v9895_v11 = vld [vmem:[#allocation8 + $0xe68] sm:$0xf0]  ;;  %v12013_v5 = vld [vmem:[#allocation8 + $0x32c] sm:$0xf0] }
 0x270   :  { %v12440_v21 = vld [vmem:[#allocation8 + $0x108c] sm:$0xf]  ;;  %v9898_v28 = vor.u32 %v12368_v9, %v9895_v11  ;;  %5206 = vmatpush.bf16.msrb.mxu3 %v10730_v18  ;;  %v12037_v9 = vld [vmem:[#allocation8 + $0x3ec] sm:$0xf0] }
 0x271   :  { %v10183_v22 = vld [vmem:[#allocation8 + $0x10a8] sm:$0xf0]  ;;  %v8813_v11 = vld [vmem:[#allocation8 + $0x5d0] sm:$0xf] }
 0x272   :  { %v12504_v26 = vld [vmem:[#allocation8 + $0x128c] sm:$0xf]  ;;  %v10186_v37 = vor.u32 %v12440_v21, %v10183_v22  ;;  %5169 = vmatpush.bf16.msra.mxu0 %v9898_v28  ;;  %v9069_v18 = vld [vmem:[#allocation8 + $0x7d0] sm:$0xf]  ;;  %v8558_v28 = vor.u32 %v12037_v9, %v8557_v59 }
 0x273   :  { %v10439_v29 = vld [vmem:[#allocation8 + $0x12a8] sm:$0xf0]  ;;  %v12165_v21 = vld [vmem:[#allocation8 + $0x7ec] sm:$0xf0] }
 0x274   :  { %v12568_v46 = vld [vmem:[#allocation8 + $0x148c] sm:$0xf]  ;;  %v10442_v45 = vor.u32 %v12504_v26, %v10439_v29  ;;  %5181 = vmatpush.bf16.msrb.mxu1 %v10186_v37  ;;  %v8814_v29 = vor.u32 %v12101_v12, %v8813_v11  ;;  %v12093_v37 = vld [vmem:[#allocation8 + $0x5ac] sm:$0xf0] }
 0x275   :  { %v10695_v31 = vld [vmem:[#allocation8 + $0x14a8] sm:$0xf0]  ;;  %v12141_v9 = vld [vmem:[#allocation8 + $0x72c] sm:$0xf0] }
 0x276   :  { %v12360_v32 = vld [vmem:[#allocation8 + $0xe0c] sm:$0xf]  ;;  %v10698_v47 = vor.u32 %v12568_v46, %v10695_v31  ;;  %5194 = vmatpush.bf16.msrb.mxu2 %v10442_v45  ;;  %v8269_v46 = vld [vmem:[#allocation8 + $0x190] sm:$0xf] }
 0x277   :  { %v9863_v33 = vld [vmem:[#allocation8 + $0xe28] sm:$0xf0]  ;;  %v11965_v31 = vld [vmem:[#allocation8 + $0x1ac] sm:$0xf0] }
 0x278   :  { %v12624_v41 = vld [vmem:[#allocation8 + $0x164c] sm:$0xf]  ;;  %v9866_v52 = vor.u32 %v12360_v32, %v9863_v33  ;;  %5207 = vmatpush.bf16.msrb.mxu3 %v10698_v47  ;;  %v8525_v32 = vld [vmem:[#allocation8 + $0x390] sm:$0xf]  ;;  %v9070_v33 = vor.u32 %v12165_v21, %v9069_v18  ;;  %v8270_v44 = vor.u32 %v11965_v31, %v8269_v46  ;;  %v8782_v47 = vor.u32 %v12093_v37, %v8781_v36 }
 0x279   :  { %v10919_v43 = vld [vmem:[#allocation8 + $0x1668] sm:$0xf0]  ;;  %v8526_v45 = vor.u32 %v12029_v35, %v8525_v32  ;;  %v8429_v18 = vld [vmem:[#allocation8 + $0x2d0] sm:$0xf] }
 0x27a   :  { %v12432_v48 = vld [vmem:[#allocation8 + $0x104c] sm:$0xf]  ;;  %v10922_v57 = vor.u32 %v12624_v41, %v10919_v43  ;;  %5170 = vmatpush.bf16.msra.mxu0 %v9866_v52  ;;  %v9037_v41 = vld [vmem:[#allocation8 + $0x790] sm:$0xf] }
 0x27b   :  { %v10151_v49 = vld [vmem:[#allocation8 + $0x1068] sm:$0xf0]  ;;  %v12157_v43 = vld [vmem:[#allocation8 + $0x7ac] sm:$0xf0] }
 0x27c   :  { %v12496_v50 = vld [vmem:[#allocation8 + $0x124c] sm:$0xf]  ;;  %v10154_v61 = vor.u32 %v12432_v48, %v10151_v49  ;;  %v8237_v48 = vld [vmem:[#allocation8 + $0x150] sm:$0xf]  ;;  %v9038_v52 = vor.u32 %v12157_v43, %v9037_v41 }
 0x27d   :  { %v10407_v53 = vld [vmem:[#allocation8 + $0x1268] sm:$0xf0]  ;;  %5171 = vmatmul.bf16.vlgmr.msra.gmra.mxu0 %v13371_v39  ;;  %v11957_v49 = vld [vmem:[#allocation8 + $0x16c] sm:$0xf0] }
 0x27e   :  { %v12560_v55 = vld [vmem:[#allocation8 + $0x144c] sm:$0xf]  ;;  %v10410_v1 = vor.u32 %v12496_v50, %v10407_v53  ;;  %5221 = vmatpush.bf16.msrb.mxu0 %v10922_v57  ;;  %5182 = vmatpush.bf16.msrb.mxu1 %v10154_v61  ;;  %v8493_v50 = vld [vmem:[#allocation8 + $0x350] sm:$0xf] }
 0x27f   :  { %v10663_v56 = vld [vmem:[#allocation8 + $0x1468] sm:$0xf0]  ;;  %v12021_v53 = vld [vmem:[#allocation8 + $0x36c] sm:$0xf0] }
 0x280   :  { %v12424_v58 = vld [vmem:[#allocation8 + $0x100c] sm:$0xf]  ;;  %v10666_v2 = vor.u32 %v12560_v55, %v10663_v56  ;;  %5195 = vmatpush.bf16.msrb.mxu2 %v10410_v1  ;;  %v8749_v55 = vld [vmem:[#allocation8 + $0x550] sm:$0xf]  ;;  %v8494_v61 = vor.u32 %v12021_v53, %v8493_v50  ;;  %v4977_v50 = vpop.f32.mrf.mxu2 }
 0x281   :  { %v10119_v60 = vld [vmem:[#allocation8 + $0x1028] sm:$0xf0]  ;;  %v12085_v56 = vld [vmem:[#allocation8 + $0x56c] sm:$0xf0] }
 0x282   :  { %v12488_v62 = vld [vmem:[#allocation8 + $0x120c] sm:$0xf]  ;;  %v10122_v15 = vor.u32 %v12424_v58, %v10119_v60  ;;  %5208 = vmatpush.bf16.msrb.mxu3 %v10666_v2  ;;  %v9005_v57 = vld [vmem:[#allocation8 + $0x750] sm:$0xf]  ;;  %v8238_v60 = vor.u32 %v11957_v49, %v8237_v48  ;;  %v4951_v2 = vpop.f32.mrf.mxu0 }
 0x283   :  { %v12616_v63 = vld [vmem:[#allocation8 + $0x160c] sm:$0xf]  ;;  %v12149_v58 = vld [vmem:[#allocation8 + $0x76c] sm:$0xf0]  ;;  %v4952_v59 = vadd.f32 %v4951_v2, %v13454_v16 }
 0x284   :  { %v10887_v0 = vld [vmem:[#allocation8 + $0x1628] sm:$0xf0]  ;;  %5183 = vmatpush.bf16.msrb.mxu1 %v10122_v15  ;;  %v8461_v1 = vld [vmem:[#allocation8 + $0x310] sm:$0xf]  ;;  %v9006_v54 = vor.u32 %v12149_v58, %v9005_v57 }
 0x285   :  { %v10375_v3 = vld [vmem:[#allocation8 + $0x1228] sm:$0xf0]  ;;  %v10890_v8 = vor.u32 %v12616_v63, %v10887_v0  ;;  %v8205_v63 = vld [vmem:[#allocation8 + $0x110] sm:$0xf]  ;;  %v8462_v13 = vor.u32 %v12013_v5, %v8461_v1 }
 0x286   :  { %v12552_v6 = vld [vmem:[#allocation8 + $0x140c] sm:$0xf]  ;;  %v10378_v22 = vor.u32 %v12488_v62, %v10375_v3  ;;  %v8750_v62 = vor.u32 %v12085_v56, %v8749_v55  ;;  %v11949_v0 = vld [vmem:[#allocation8 + $0x12c] sm:$0xf0]  ;;  %v4964_v3 = vpop.f32.mrf.mxu1  ;;  %v4990_v55 = vpop.f32.mrf.mxu3 }
 0x287   :  { %v10631_v7 = vld [vmem:[#allocation8 + $0x1428] sm:$0xf0]  ;;  %5222 = vmatpush.bf16.msrb.mxu0 %v10890_v8  ;;  %5184 = vmatmul.bf16.vlgmr.msrb.gmra.mxu1 %v13383_v23  ;;  %v8973_v8 = vld [vmem:[#allocation8 + $0x710] sm:$0xf]  ;;  %v8206_v11 = vor.u32 %v11949_v0, %v8205_v63  ;;  %v4965_v12 = vadd.f32 %v4964_v3, %v4952_v59 }
 0x288   :  { %v10634_v26 = vor.u32 %v12552_v6, %v10631_v7  ;;  %5196 = vmatpush.bf16.msrb.mxu2 %v10378_v22  ;;  %5241 = vmatpush.bf16.msra.mxu1 %v8558_v28  ;;  %v8717_v6 = vld [vmem:[#allocation8 + $0x510] sm:$0xf]  ;;  %v8974_v21 = vor.u32 %v12141_v9, %v8973_v8 }
 0x289   :  { %v12077_v7 = vld [vmem:[#allocation8 + $0x52c] sm:$0xf0]  ;;  %v4978_v53 = vadd.f32 %v4977_v50, %v4965_v12 }
 0x28a   :  { %5209 = vmatpush.bf16.msrb.mxu3 %v10634_v26  ;;  %v8718_v4 = vor.u32 %v12077_v7, %v8717_v6  ;;  %v8173_v15 = vld [vmem:[#allocation8 + $0xd0] sm:$0xf]  ;;  %v4953_v37 = vpop.f32.mrf.mxu0 }
 0x28b   :  { %5228 = vmatpush.bf16.msra.mxu0 %v8302_v17  ;;  %5197 = vmatmul.bf16.vlgmr.msrb.gmra.mxu2 %v13387_v30  ;;  %v11941_v17 = vld [vmem:[#allocation8 + $0xec] sm:$0xf0]  ;;  %v13463_v2 = vadd.f32 %v4990_v55, %v4978_v53 }
 0x28c   :  { %5254 = vmatpush.bf16.msra.mxu2 %v8814_v29  ;;  %5242 = vmatpush.bf16.msra.mxu1 %v8526_v45  ;;  %v12005_v22 = vld [vmem:[#allocation8 + $0x2ec] sm:$0xf0]  ;;  %v8174_v16 = vor.u32 %v11941_v17, %v8173_v15 }
 0x28d   :  { %5210 = vmatmul.bf16.vlgmr.msrb.gmra.mxu3 %v13385_v25  ;;  %v8685_v26 = vld [vmem:[#allocation8 + $0x4d0] sm:$0xf]  ;;  %v8430_v31 = vor.u32 %v12005_v22, %v8429_v18  ;;  %10942 = vmatmul.msk.bf16.vlgmr.msrb.gmra.mxu0 %vm4600_vm0, %v13379_v40 }
 0x28e   :  { %5267 = vmatpush.bf16.msra.mxu3 %v9070_v33  ;;  %v12069_v28 = vld [vmem:[#allocation8 + $0x4ec] sm:$0xf0]  ;;  %v4966_v41 = vpop.f32.mrf.mxu1 }
 0x28f   :  { %5229 = vmatpush.bf16.msra.mxu0 %v8270_v44  ;;  %v8941_v29 = vld [vmem:[#allocation8 + $0x6d0] sm:$0xf]  ;;  %v8686_v32 = vor.u32 %v12069_v28, %v8685_v26  ;;  %v4979_v26 = vpop.f32.mrf.mxu2 }
 0x290   :  { %5255 = vmatpush.bf16.msra.mxu2 %v8782_v47  ;;  %5243 = vmatpush.bf16.msra.mxu1 %v8494_v61  ;;  %v12133_v46 = vld [vmem:[#allocation8 + $0x6ec] sm:$0xf0] }
 0x291   :  { %v8141_v33 = vld [vmem:[#allocation8 + $0x90] sm:$0xf]  ;;  %v8942_v43 = vor.u32 %v12133_v46, %v8941_v29 }
 0x292   :  { %5268 = vmatpush.bf16.msra.mxu3 %v9038_v52  ;;  %v11933_v35 = vld [vmem:[#allocation8 + $0xac] sm:$0xf0] }
 0x293   :  { %5230 = vmatpush.bf16.msra.mxu0 %v8238_v60  ;;  %v8397_v36 = vld [vmem:[#allocation8 + $0x290] sm:$0xf]  ;;  %v8142_v52 = vor.u32 %v11933_v35, %v8141_v33 }
 0x294   :  { %5256 = vmatpush.bf16.msra.mxu2 %v8750_v62  ;;  %5244 = vmatpush.bf16.msra.mxu1 %v8462_v13  ;;  %v11997_v44 = vld [vmem:[#allocation8 + $0x2ac] sm:$0xf0] }
 0x295   :  { %v8653_v45 = vld [vmem:[#allocation8 + $0x490] sm:$0xf]  ;;  %v8398_v56 = vor.u32 %v11997_v44, %v8397_v36 }
 0x296   :  { %5269 = vmatpush.bf16.msra.mxu3 %v9006_v54  ;;  %v12061_v47 = vld [vmem:[#allocation8 + $0x4ac] sm:$0xf0] }
 0x297   :  { %5231 = vmatpush.bf16.msra.mxu0 %v8206_v11  ;;  %v8909_v48 = vld [vmem:[#allocation8 + $0x690] sm:$0xf]  ;;  %v8654_v57 = vor.u32 %v12061_v47, %v8653_v45 }
 0x298   :  { %5257 = vmatpush.bf16.msra.mxu2 %v8718_v4  ;;  %v12125_v49 = vld [vmem:[#allocation8 + $0x6ac] sm:$0xf0]  ;;  %5245 = vmatpush.bf16.msra.mxu1 %v8430_v31  ;;  %v4992_v31 = vpop.f32.mrf.mxu3 }
 0x299   :  { %v8109_v58 = vld [vmem:[#allocation8 + $0x50] sm:$0xf]  ;;  %v8910_v62 = vor.u32 %v12125_v49, %v8909_v48 }
 0x29a   :  { %5270 = vmatpush.bf16.msra.mxu3 %v8974_v21  ;;  %v11925_v60 = vld [vmem:[#allocation8 + $0x6c] sm:$0xf0] }
 0x29b   :  { %5232 = vmatpush.bf16.msra.mxu0 %v8174_v16  ;;  %v8365_v61 = vld [vmem:[#allocation8 + $0x250] sm:$0xf]  ;;  %v8110_v5 = vor.u32 %v11925_v60, %v8109_v58 }
 0x29c   :  { %5258 = vmatpush.bf16.msra.mxu2 %v8686_v32  ;;  %v11989_v63 = vld [vmem:[#allocation8 + $0x26c] sm:$0xf0]  ;;  %5246 = vmatpush.bf16.msra.mxu1 %v8398_v56 }
 0x29d   :  { %v8621_v0 = vld [vmem:[#allocation8 + $0x450] sm:$0xf]  ;;  %v8366_v59 = vor.u32 %v11989_v63, %v8365_v61 }
 0x29e   :  { %5271 = vmatpush.bf16.msra.mxu3 %v8942_v43  ;;  %v12053_v1 = vld [vmem:[#allocation8 + $0x46c] sm:$0xf0] }
 0x29f   :  { %v8877_v3 = vld [vmem:[#allocation8 + $0x650] sm:$0xf]  ;;  %5233 = vmatpush.bf16.msra.mxu0 %v8142_v52  ;;  %v8622_v8 = vor.u32 %v12053_v1, %v8621_v0 }
 0x2a0   :  { %v12117_v54 = vld [vmem:[#allocation8 + $0x66c] sm:$0xf0]  ;;  %5259 = vmatpush.bf16.msra.mxu2 %v8654_v57  ;;  %5247 = vmatpush.bf16.msra.mxu1 %v8366_v59 }
 0x2a1   :  { %v8077_v6 = vld [vmem:[#allocation8 + $0x10] sm:$0xf]  ;;  %v8878_v13 = vor.u32 %v12117_v54, %v8877_v3 }
 0x2a2   :  { %v11917_v7 = vld [vmem:[#allocation8 + $0x2c] sm:$0xf0]  ;;  %5272 = vmatpush.bf16.msra.mxu3 %v8910_v62 }
 0x2a3   :  { %v8333_v9 = vld [vmem:[#allocation8 + $0x210] sm:$0xf]  ;;  %5234 = vmatpush.bf16.msra.mxu0 %v8110_v5  ;;  %v8078_v28 = vor.u32 %v11917_v7, %v8077_v6  ;;  %v5003_v5 = vpop.f32.mrf.mxu0 }
 0x2a4   :  { %v11981_v11 = vld [vmem:[#allocation8 + $0x22c] sm:$0xf0]  ;;  %5260 = vmatpush.bf16.msra.mxu2 %v8622_v8  ;;  %v5004_v59 = vadd.f32 %v5003_v5, %v13463_v2  ;;  %v5016_v8 = vpop.f32.mrf.mxu1 }
 0x2a5   :  { %v8589_v12 = vld [vmem:[#allocation8 + $0x410] sm:$0xf]  ;;  %v8334_v32 = vor.u32 %v11981_v11, %v8333_v9 }
 0x2a6   :  { %v12045_v4 = vld [vmem:[#allocation8 + $0x42c] sm:$0xf0]  ;;  %5273 = vmatpush.bf16.msra.mxu3 %v8878_v13 }
 0x2a7   :  { %v8845_v15 = vld [vmem:[#allocation8 + $0x610] sm:$0xf]  ;;  %v8590_v33 = vor.u32 %v12045_v4, %v8589_v12  ;;  %5235 = vmatpush.bf16.msra.mxu0 %v8078_v28  ;;  %5248 = vmatpush.bf16.msra.mxu1 %v8334_v32 }
 0x2a8   :  { %v12109_v17 = vld [vmem:[#allocation8 + $0x62c] sm:$0xf0] }
 0x2a9   :  { %v9325_v18 = vld [vmem:[#allocation8 + $0x9d0] sm:$0xf]  ;;  %v8846_v37 = vor.u32 %v12109_v17, %v8845_v15  ;;  %5261 = vmatpush.bf16.msra.mxu2 %v8590_v33  ;;  %v5017_v17 = vadd.f32 %v5016_v8, %v5004_v59 }
 0x2aa   :  { %v12229_v21 = vld [vmem:[#allocation8 + $0x9ec] sm:$0xf0]  ;;  %5236 = vmatmul.bf16.vlgmr.msra.gmra.mxu0 %v13355_v19  ;;  %5249 = vmatmul.bf16.vlgmr.msra.gmra.mxu1 %v13361_v27 }
 0x2ab   :  { %v9581_v22 = vld [vmem:[#allocation8 + $0xbd0] sm:$0xf]  ;;  %v9326_v41 = vor.u32 %v12229_v21, %v9325_v18  ;;  %5274 = vmatpush.bf16.msra.mxu3 %v8846_v37 }
 0x2ac   :  { %v12293_v29 = vld [vmem:[#allocation8 + $0xbec] sm:$0xf0]  ;;  %5262 = vmatmul.bf16.vlgmr.msra.gmra.mxu2 %v13357_v20 }
 0x2ad   :  { %v9837_v46 = vld [vmem:[#allocation8 + $0xdd0] sm:$0xf]  ;;  %v9582_v43 = vor.u32 %v12293_v29, %v9581_v22  ;;  %5280 = vmatpush.bf16.msrb.mxu0 %v9326_v41 }
 0x2ae   :  { %v12357_v16 = vld [vmem:[#allocation8 + $0xdec] sm:$0xf0]  ;;  %5275 = vmatmul.bf16.vlgmr.msra.gmra.mxu3 %v13359_v24 }
 0x2af   :  { %v10093_v35 = vld [vmem:[#allocation8 + $0xfd0] sm:$0xf]  ;;  %v9838_v44 = vor.u32 %v12357_v16, %v9837_v46  ;;  %5293 = vmatpush.bf16.msrb.mxu1 %v9582_v43 }
 0x2b0   :  { %v12421_v36 = vld [vmem:[#allocation8 + $0xfec] sm:$0xf0] }
 0x2b1   :  { %v9293_v45 = vld [vmem:[#allocation8 + $0x990] sm:$0xf]  ;;  %v10094_v49 = vor.u32 %v12421_v36, %v10093_v35  ;;  %5306 = vmatpush.bf16.msrb.mxu2 %v9838_v44 }
 0x2b2   :  { %v12221_v47 = vld [vmem:[#allocation8 + $0x9ac] sm:$0xf0] }
 0x2b3   :  { %v9549_v48 = vld [vmem:[#allocation8 + $0xb90] sm:$0xf]  ;;  %v9294_v57 = vor.u32 %v12221_v47, %v9293_v45  ;;  %5319 = vmatpush.bf16.msrb.mxu3 %v10094_v49  ;;  %v5005_v45 = vpop.f32.mrf.mxu0 }
 0x2b4   :  { %v12285_v50 = vld [vmem:[#allocation8 + $0xbac] sm:$0xf0] }
 0x2b5   :  { %v9805_v52 = vld [vmem:[#allocation8 + $0xd90] sm:$0xf]  ;;  %v9550_v58 = vor.u32 %v12285_v50, %v9549_v48  ;;  %5281 = vmatpush.bf16.msrb.mxu0 %v9294_v57  ;;  %v5018_v48 = vpop.f32.mrf.mxu1 }
 0x2b6   :  { %v12349_v53 = vld [vmem:[#allocation8 + $0xdac] sm:$0xf0] }
 0x2b7   :  { %v10061_v55 = vld [vmem:[#allocation8 + $0xf90] sm:$0xf]  ;;  %v9806_v60 = vor.u32 %v12349_v53, %v9805_v52  ;;  %5294 = vmatpush.bf16.msrb.mxu1 %v9550_v58 }
 0x2b8   :  { %v12413_v56 = vld [vmem:[#allocation8 + $0xfac] sm:$0xf0] }
 0x2b9   :  { %v9261_v61 = vld [vmem:[#allocation8 + $0x950] sm:$0xf]  ;;  %v10062_v0 = vor.u32 %v12413_v56, %v10061_v55  ;;  %5307 = vmatpush.bf16.msrb.mxu2 %v9806_v60 }
 0x2ba   :  { %v12213_v62 = vld [vmem:[#allocation8 + $0x96c] sm:$0xf0] }
 0x2bb   :  { %v9517_v63 = vld [vmem:[#allocation8 + $0xb50] sm:$0xf]  ;;  %v9262_v9 = vor.u32 %v12213_v62, %v9261_v61  ;;  %5320 = vmatpush.bf16.msrb.mxu3 %v10062_v0  ;;  %v5029_v61 = vpop.f32.mrf.mxu2 }
 0x2bc   :  { %v12277_v1 = vld [vmem:[#allocation8 + $0xb6c] sm:$0xf0]  ;;  %v5030_v0 = vadd.f32 %v5029_v61, %v5017_v17 }
 0x2bd   :  { %v9773_v3 = vld [vmem:[#allocation8 + $0xd50] sm:$0xf]  ;;  %v9518_v11 = vor.u32 %v12277_v1, %v9517_v63  ;;  %5282 = vmatpush.bf16.msrb.mxu0 %v9262_v9  ;;  %v5042_v1 = vpop.f32.mrf.mxu3 }
 0x2be   :  { %v12341_v54 = vld [vmem:[#allocation8 + $0xd6c] sm:$0xf0]  ;;  %v13470_v8 = vadd.f32 %v5042_v1, %v5030_v0 }
 0x2bf   :  { %v10029_v6 = vld [vmem:[#allocation8 + $0xf50] sm:$0xf]  ;;  %v9774_v12 = vor.u32 %v12341_v54, %v9773_v3  ;;  %5295 = vmatpush.bf16.msrb.mxu1 %v9518_v11 }
 0x2c0   :  { %v12405_v7 = vld [vmem:[#allocation8 + $0xf6c] sm:$0xf0] }
 0x2c1   :  { %v9229_v13 = vld [vmem:[#allocation8 + $0x910] sm:$0xf]  ;;  %v10030_v18 = vor.u32 %v12405_v7, %v10029_v6  ;;  %5308 = vmatpush.bf16.msrb.mxu2 %v9774_v12 }
 0x2c2   :  { %v12205_v4 = vld [vmem:[#allocation8 + $0x92c] sm:$0xf0] }
 0x2c3   :  { %v9485_v15 = vld [vmem:[#allocation8 + $0xb10] sm:$0xf]  ;;  %v9230_v2 = vor.u32 %v12205_v4, %v9229_v13  ;;  %5321 = vmatpush.bf16.msrb.mxu3 %v10030_v18 }
 0x2c4   :  { %v12269_v21 = vld [vmem:[#allocation8 + $0xb2c] sm:$0xf0] }
 0x2c5   :  { %v9741_v22 = vld [vmem:[#allocation8 + $0xd10] sm:$0xf]  ;;  %v9486_v46 = vor.u32 %v12269_v21, %v9485_v15  ;;  %5283 = vmatpush.bf16.msrb.mxu0 %v9230_v2  ;;  %v5044_v48 = vpop.f32.mrf.mxu3 }
 0x2c6   :  { %v12333_v26 = vld [vmem:[#allocation8 + $0xd2c] sm:$0xf0]  ;;  %v11953_v48 = vld [vmem:[#allocation8 + $0x154] sm:$0xf] }
 0x2c7   :  { %v9997_v28 = vld [vmem:[#allocation8 + $0xf10] sm:$0xf]  ;;  %v9742_v16 = vor.u32 %v12333_v26, %v9741_v22  ;;  %5296 = vmatpush.bf16.msrb.mxu1 %v9486_v46  ;;  %v13472_v46 = vpop.f32.mrf.mxu1 }
 0x2c8   :  { %v12397_v29 = vld [vmem:[#allocation8 + $0xf2c] sm:$0xf0] }
 0x2c9   :  { %v9197_v31 = vld [vmem:[#allocation8 + $0x8d0] sm:$0xf]  ;;  %v9998_v35 = vor.u32 %v12397_v29, %v9997_v28  ;;  %5309 = vmatpush.bf16.msrb.mxu2 %v9742_v16 }
 0x2ca   :  { %v12197_v32 = vld [vmem:[#allocation8 + $0x8ec] sm:$0xf0] }
 0x2cb   :  { %v9453_v33 = vld [vmem:[#allocation8 + $0xad0] sm:$0xf]  ;;  %v9198_v47 = vor.u32 %v12197_v32, %v9197_v31  ;;  %5322 = vmatpush.bf16.msrb.mxu3 %v9998_v35 }
 0x2cc   :  { %v12261_v36 = vld [vmem:[#allocation8 + $0xaec] sm:$0xf0] }
 0x2cd   :  { %v9709_v37 = vld [vmem:[#allocation8 + $0xcd0] sm:$0xf]  ;;  %v9454_v49 = vor.u32 %v12261_v36, %v9453_v33  ;;  %5284 = vmatpush.bf16.msrb.mxu0 %v9198_v47 }
 0x2ce   :  { %v12325_v41 = vld [vmem:[#allocation8 + $0xcec] sm:$0xf0] }
 0x2cf   :  { %v9965_v43 = vld [vmem:[#allocation8 + $0xed0] sm:$0xf]  ;;  %v9710_v50 = vor.u32 %v12325_v41, %v9709_v37  ;;  %5297 = vmatpush.bf16.msrb.mxu1 %v9454_v49  ;;  %v5031_v41 = vpop.f32.mrf.mxu2 }
 0x2d0   :  { %v12389_v44 = vld [vmem:[#allocation8 + $0xeec] sm:$0xf0] }
 0x2d1   :  { %v9165_v52 = vld [vmem:[#allocation8 + $0x890] sm:$0xf]  ;;  %v9966_v56 = vor.u32 %v12389_v44, %v9965_v43  ;;  %5310 = vmatpush.bf16.msrb.mxu2 %v9710_v50 }
 0x2d2   :  { %v12189_v53 = vld [vmem:[#allocation8 + $0x8ac] sm:$0xf0] }
 0x2d3   :  { %v9421_v55 = vld [vmem:[#allocation8 + $0xa90] sm:$0xf]  ;;  %v9166_v3 = vor.u32 %v12189_v53, %v9165_v52  ;;  %5323 = vmatpush.bf16.msrb.mxu3 %v9966_v56 }
 0x2d4   :  { %v12253_v57 = vld [vmem:[#allocation8 + $0xaac] sm:$0xf0] }
 0x2d5   :  { %v9677_v58 = vld [vmem:[#allocation8 + $0xc90] sm:$0xf]  ;;  %v9422_v54 = vor.u32 %v12253_v57, %v9421_v55  ;;  %5285 = vmatpush.bf16.msrb.mxu0 %v9166_v3 }
 0x2d6   :  { %v12317_v60 = vld [vmem:[#allocation8 + $0xcac] sm:$0xf0] }
 0x2d7   :  { %v9933_v62 = vld [vmem:[#allocation8 + $0xe90] sm:$0xf]  ;;  %v9678_v5 = vor.u32 %v12317_v60, %v9677_v58  ;;  %5298 = vmatpush.bf16.msrb.mxu1 %v9422_v54 }
 0x2d8   :  { %v12381_v63 = vld [vmem:[#allocation8 + $0xeac] sm:$0xf0] }
 0x2d9   :  { %v9133_v6 = vld [vmem:[#allocation8 + $0x850] sm:$0xf]  ;;  %v9934_v9 = vor.u32 %v12381_v63, %v9933_v62  ;;  %5311 = vmatpush.bf16.msrb.mxu2 %v9678_v5 }
 0x2da   :  { %v12181_v7 = vld [vmem:[#allocation8 + $0x86c] sm:$0xf0] }
 0x2db   :  { %v9389_v59 = vld [vmem:[#allocation8 + $0xa50] sm:$0xf]  ;;  %v9134_v17 = vor.u32 %v12181_v7, %v9133_v6  ;;  %5324 = vmatpush.bf16.msrb.mxu3 %v9934_v9  ;;  %v5070_v6 = vpop.f32.mrf.mxu1  ;;  %v8303_v9 = vld [vmem:[#allocation8 + $0x1f0] sm:$0xf0] }
 0x2dc   :  { %v12245_v11 = vld [vmem:[#allocation8 + $0xa6c] sm:$0xf0] }
 0x2dd   :  { %v9645_v12 = vld [vmem:[#allocation8 + $0xc50] sm:$0xf]  ;;  %v9390_v22 = vor.u32 %v12245_v11, %v9389_v59  ;;  %5286 = vmatpush.bf16.msrb.mxu0 %v9134_v17  ;;  %v11969_v59 = vld [vmem:[#allocation8 + $0x1d4] sm:$0xf] }
 0x2de   :  { %v12309_v13 = vld [vmem:[#allocation8 + $0xc6c] sm:$0xf0] }
 0x2df   :  { %v9901_v4 = vld [vmem:[#allocation8 + $0xe50] sm:$0xf]  ;;  %v9646_v26 = vor.u32 %v12309_v13, %v9645_v12  ;;  %5299 = vmatpush.bf16.msrb.mxu1 %v9390_v22 }
 0x2e0   :  { %v12373_v15 = vld [vmem:[#allocation8 + $0xe6c] sm:$0xf0] }
 0x2e1   :  { %v9101_v18 = vld [vmem:[#allocation8 + $0x810] sm:$0xf]  ;;  %v9902_v16 = vor.u32 %v12373_v15, %v9901_v4  ;;  %5312 = vmatpush.bf16.msrb.mxu2 %v9646_v26  ;;  %v8306_v26 = vor.u32 %v11969_v59, %v8303_v9 }
 0x2e2   :  { %v12173_v21 = vld [vmem:[#allocation8 + $0x82c] sm:$0xf0] }
 0x2e3   :  { %v9357_v28 = vld [vmem:[#allocation8 + $0xa10] sm:$0xf]  ;;  %v9102_v43 = vor.u32 %v12173_v21, %v9101_v18  ;;  %5325 = vmatpush.bf16.msrb.mxu3 %v9902_v16  ;;  %v11961_v16 = vld [vmem:[#allocation8 + $0x194] sm:$0xf] }
 0x2e4   :  { %v12237_v29 = vld [vmem:[#allocation8 + $0xa2c] sm:$0xf0] }
 0x2e5   :  { %v9613_v2 = vld [vmem:[#allocation8 + $0xc10] sm:$0xf]  ;;  %v9358_v49 = vor.u32 %v12237_v29, %v9357_v28  ;;  %5287 = vmatpush.bf16.msrb.mxu0 %v9102_v43  ;;  %v5055_v28 = vpop.f32.mrf.mxu0 }
 0x2e6   :  { %v12301_v31 = vld [vmem:[#allocation8 + $0xc2c] sm:$0xf0]  ;;  %v5056_v29 = vadd.f32 %v5055_v28, %v13470_v8 }
 0x2e7   :  { %v9869_v32 = vld [vmem:[#allocation8 + $0xe10] sm:$0xf]  ;;  %v9614_v50 = vor.u32 %v12301_v31, %v9613_v2  ;;  %5300 = vmatpush.bf16.msrb.mxu1 %v9358_v49  ;;  %v8271_v31 = vld [vmem:[#allocation8 + $0x1b0] sm:$0xf0] }
 0x2e8   :  { %v12365_v33 = vld [vmem:[#allocation8 + $0xe2c] sm:$0xf0]  ;;  %5288 = vmatmul.bf16.vlgmr.msrb.gmra.mxu0 %v13367_v34  ;;  %v13480_v41 = vadd.f32 %v13472_v46, %v5056_v29  ;;  %v8239_v49 = vld [vmem:[#allocation8 + $0x170] sm:$0xf0] }
 0x2e9   :  { %v10349_v35 = vld [vmem:[#allocation8 + $0x11d0] sm:$0xf]  ;;  %v9870_v55 = vor.u32 %v12365_v33, %v9869_v32  ;;  %5313 = vmatpush.bf16.msrb.mxu2 %v9614_v50  ;;  %v987_v50 = vperm.slane %v13451_v14, 3 }
 0x2ea   :  { %v12485_v36 = vld [vmem:[#allocation8 + $0x11ec] sm:$0xf0]  ;;  %5301 = vmatmul.bf16.vlgmr.msrb.gmra.mxu1 %v13373_v42 }
 0x2eb   :  { %v10605_v37 = vld [vmem:[#allocation8 + $0x13d0] sm:$0xf]  ;;  %v10350_v56 = vor.u32 %v12485_v36, %v10349_v35  ;;  %5326 = vmatpush.bf16.msrb.mxu3 %v9870_v55 }
 0x2ec   :  { %v12549_v44 = vld [vmem:[#allocation8 + $0x13ec] sm:$0xf0]  ;;  %5314 = vmatmul.bf16.vlgmr.msrb.gmra.mxu2 %v13369_v38 }
 0x2ed   :  { %v10861_v45 = vld [vmem:[#allocation8 + $0x15d0] sm:$0xf]  ;;  %v10606_v57 = vor.u32 %v12549_v44, %v10605_v37  ;;  %5332 = vmatpush.bf16.msra.mxu0 %v10350_v56 }
 0x2ee   :  { %v12613_v47 = vld [vmem:[#allocation8 + $0x15ec] sm:$0xf0]  ;;  %5327 = vmatmul.bf16.vlgmr.msrb.gmra.mxu3 %v13371_v39 }
 0x2ef   :  { %v10925_v52 = vld [vmem:[#allocation8 + $0x1650] sm:$0xf]  ;;  %v10862_v58 = vor.u32 %v12613_v47, %v10861_v45  ;;  %5345 = vmatpush.bf16.msra.mxu1 %v10606_v57  ;;  %v8274_v47 = vor.u32 %v11961_v16, %v8271_v31 }
 0x2f0   :  { %v12629_v53 = vld [vmem:[#allocation8 + $0x166c] sm:$0xf0] }
 0x2f1   :  { %v10317_v60 = vld [vmem:[#allocation8 + $0x1190] sm:$0xf]  ;;  %v10926_v63 = vor.u32 %v12629_v53, %v10925_v52  ;;  %5358 = vmatpush.bf16.msra.mxu2 %v10862_v58 }
 0x2f2   :  { %v12477_v61 = vld [vmem:[#allocation8 + $0x11ac] sm:$0xf0] }
 0x2f3   :  { %v10573_v62 = vld [vmem:[#allocation8 + $0x1390] sm:$0xf]  ;;  %v10318_v7 = vor.u32 %v12477_v61, %v10317_v60  ;;  %5377 = vmatpush.bf16.msra.mxu3 %v10926_v63  ;;  %v5081_v61 = vpop.f32.mrf.mxu1  ;;  %v5057_v63 = vpop.f32.mrf.mxu0 }
 0x2f4   :  { %v12541_v0 = vld [vmem:[#allocation8 + $0x13ac] sm:$0xf0] }
 0x2f5   :  { %v10829_v1 = vld [vmem:[#allocation8 + $0x1590] sm:$0xf]  ;;  %v10574_v11 = vor.u32 %v12541_v0, %v10573_v62  ;;  %5333 = vmatpush.bf16.msra.mxu0 %v10318_v7  ;;  %v8242_v62 = vor.u32 %v11953_v48, %v8239_v49 }
 0x2f6   :  { %v12605_v3 = vld [vmem:[#allocation8 + $0x15ac] sm:$0xf0] }
 0x2f7   :  { %v10893_v54 = vld [vmem:[#allocation8 + $0x1610] sm:$0xf]  ;;  %v10830_v12 = vor.u32 %v12605_v3, %v10829_v1  ;;  %5346 = vmatpush.bf16.msra.mxu1 %v10574_v11  ;;  %v11945_v1 = vld [vmem:[#allocation8 + $0x114] sm:$0xf] }
 0x2f8   :  { %v12621_v5 = vld [vmem:[#allocation8 + $0x162c] sm:$0xf0]  ;;  %v8207_v3 = vld [vmem:[#allocation8 + $0x130] sm:$0xf0] }
 0x2f9   :  { %v10285_v13 = vld [vmem:[#allocation8 + $0x1150] sm:$0xf]  ;;  %v10894_v17 = vor.u32 %v12621_v5, %v10893_v54  ;;  %5359 = vmatpush.bf16.msra.mxu2 %v10830_v12  ;;  %v5082_v54 = vadd.f32 %v5081_v61, %v987_v50  ;;  %v8815_v61 = vld [vmem:[#allocation8 + $0x5f0] sm:$0xf0] }
 0x2fa   :  { %v12469_v4 = vld [vmem:[#allocation8 + $0x116c] sm:$0xf0] }
 0x2fb   :  { %v10541_v15 = vld [vmem:[#allocation8 + $0x1350] sm:$0xf]  ;;  %v10286_v2 = vor.u32 %v12469_v4, %v10285_v13  ;;  %5378 = vmatpush.bf16.msra.mxu3 %v10894_v17  ;;  %v8210_v13 = vor.u32 %v11945_v1, %v8207_v3  ;;  %v5094_v4 = vpop.f32.mrf.mxu2  ;;  %v8111_v1 = vld [vmem:[#allocation8 + $0x70] sm:$0xf0] }
 0x2fc   :  { %v12533_v18 = vld [vmem:[#allocation8 + $0x136c] sm:$0xf0]  ;;  %v12161_v3 = vld [vmem:[#allocation8 + $0x7d4] sm:$0xf] }
 0x2fd   :  { %v10797_v21 = vld [vmem:[#allocation8 + $0x1550] sm:$0xf]  ;;  %v10542_v32 = vor.u32 %v12533_v18, %v10541_v15  ;;  %5334 = vmatpush.bf16.msra.mxu0 %v10286_v2  ;;  %v5107_v15 = vpop.f32.mrf.mxu3  ;;  %v11937_v18 = vld [vmem:[#allocation8 + $0xd4] sm:$0xf] }
 0x2fe   :  { %v12597_v22 = vld [vmem:[#allocation8 + $0x156c] sm:$0xf0]  ;;  %10943 = vmatmul.msk.bf16.vlgmr.msra.gmra.mxu3 %vm4600_vm0, %v13379_v40 }
 0x2ff   :  { %v10798_v33 = vor.u32 %v12597_v22, %v10797_v21  ;;  %v10253_v35 = vld [vmem:[#allocation8 + $0x1110] sm:$0xf]  ;;  %5384 = vmatpush.bf16.msrb.mxu3 %v8306_v26  ;;  %5347 = vmatpush.bf16.msra.mxu1 %v10542_v32  ;;  %v8175_v21 = vld [vmem:[#allocation8 + $0xf0] sm:$0xf0]  ;;  %v5095_v22 = vadd.f32 %v5094_v4, %v5082_v54 }
 0x300   :  { %v12461_v36 = vld [vmem:[#allocation8 + $0x112c] sm:$0xf0]  ;;  %v9071_v54 = vld [vmem:[#allocation8 + $0x7f0] sm:$0xf0] }
 0x301   :  { %v10509_v37 = vld [vmem:[#allocation8 + $0x1310] sm:$0xf]  ;;  %v10254_v8 = vor.u32 %v12461_v36, %v10253_v35  ;;  %5360 = vmatpush.bf16.msra.mxu2 %v10798_v33  ;;  %v13483_v35 = vadd.f32 %v5107_v15, %v5095_v22  ;;  %v5083_v36 = vpop.f32.mrf.mxu1  ;;  %v12089_v4 = vld [vmem:[#allocation8 + $0x594] sm:$0xf] }
 0x302   :  { %v12525_v43 = vld [vmem:[#allocation8 + $0x132c] sm:$0xf0]  ;;  %v8783_v15 = vld [vmem:[#allocation8 + $0x5b0] sm:$0xf0] }
 0x303   :  { %v10765_v44 = vld [vmem:[#allocation8 + $0x1510] sm:$0xf]  ;;  %v10510_v52 = vor.u32 %v12525_v43, %v10509_v37  ;;  %5385 = vmatpush.bf16.msrb.mxu3 %v8274_v47  ;;  %5335 = vmatpush.bf16.msra.mxu0 %v10254_v8  ;;  %v8178_v37 = vor.u32 %v11937_v18, %v8175_v21  ;;  %v11929_v43 = vld [vmem:[#allocation8 + $0x94] sm:$0xf] }
 0x304   :  { %v12589_v45 = vld [vmem:[#allocation8 + $0x152c] sm:$0xf0]  ;;  %v12153_v18 = vld [vmem:[#allocation8 + $0x794] sm:$0xf] }
 0x305   :  { %v10766_v53 = vor.u32 %v12589_v45, %v10765_v44  ;;  %v10221_v55 = vld [vmem:[#allocation8 + $0x10d0] sm:$0xf]  ;;  %5348 = vmatpush.bf16.msra.mxu1 %v10510_v52  ;;  %v8143_v45 = vld [vmem:[#allocation8 + $0xb0] sm:$0xf0]  ;;  %v5109_v63 = vpop.f32.mrf.mxu3 }
 0x306   :  { %v12453_v56 = vld [vmem:[#allocation8 + $0x10ec] sm:$0xf0]  ;;  %v9039_v21 = vld [vmem:[#allocation8 + $0x7b0] sm:$0xf0] }
 0x307   :  { %v10477_v57 = vld [vmem:[#allocation8 + $0x12d0] sm:$0xf]  ;;  %v10222_v0 = vor.u32 %v12453_v56, %v10221_v55  ;;  %5361 = vmatpush.bf16.msra.mxu2 %v10766_v53  ;;  %5386 = vmatpush.bf16.msrb.mxu3 %v8242_v62  ;;  %v11921_v56 = vld [vmem:[#allocation8 + $0x54] sm:$0xf]  ;;  %v5096_v62 = vpop.f32.mrf.mxu2 }
 0x308   :  { %v12517_v46 = vld [vmem:[#allocation8 + $0x12ec] sm:$0xf0]  ;;  %v12225_v22 = vld [vmem:[#allocation8 + $0x9d4] sm:$0xf] }
 0x309   :  { %v10733_v58 = vld [vmem:[#allocation8 + $0x14d0] sm:$0xf]  ;;  %v10478_v14 = vor.u32 %v12517_v46, %v10477_v57  ;;  %5336 = vmatpush.bf16.msra.mxu0 %v10222_v0  ;;  %v12033_v57 = vld [vmem:[#allocation8 + $0x3d4] sm:$0xf]  ;;  %v8146_v46 = vor.u32 %v11929_v43, %v8143_v45  ;;  %v5120_v45 = vpop.f32.mrf.mxu0 }
 0x30a   :  { %v12581_v60 = vld [vmem:[#allocation8 + $0x14ec] sm:$0xf0]  ;;  %v8751_v36 = vld [vmem:[#allocation8 + $0x570] sm:$0xf0] }
 0x30b   :  { %v10734_v5 = vor.u32 %v12581_v60, %v10733_v58  ;;  %v10189_v6 = vld [vmem:[#allocation8 + $0x1090] sm:$0xf]  ;;  %5349 = vmatpush.bf16.msra.mxu1 %v10478_v14  ;;  %5387 = vmatpush.bf16.msrb.mxu3 %v8210_v13  ;;  %v8559_v58 = vld [vmem:[#allocation8 + $0x3f0] sm:$0xf0] }
 0x30c   :  { %v12445_v7 = vld [vmem:[#allocation8 + $0x10ac] sm:$0xf0]  ;;  %v12097_v60 = vld [vmem:[#allocation8 + $0x5d4] sm:$0xf] }
 0x30d   :  { %v10445_v59 = vld [vmem:[#allocation8 + $0x1290] sm:$0xf]  ;;  %v10190_v17 = vor.u32 %v12445_v7, %v10189_v6  ;;  %5362 = vmatpush.bf16.msra.mxu2 %v10734_v5  ;;  %v8562_v6 = vor.u32 %v12033_v57, %v8559_v58  ;;  %v8818_v7 = vor.u32 %v12097_v60, %v8815_v61  ;;  %v8527_v13 = vld [vmem:[#allocation8 + $0x3b0] sm:$0xf0] }
 0x30e   :  { %v12509_v9 = vld [vmem:[#allocation8 + $0x12ac] sm:$0xf0]  ;;  %v12145_v43 = vld [vmem:[#allocation8 + $0x754] sm:$0xf] }
 0x30f   :  { %v10701_v11 = vld [vmem:[#allocation8 + $0x1490] sm:$0xf]  ;;  %v10446_v26 = vor.u32 %v12509_v9, %v10445_v59  ;;  %5337 = vmatpush.bf16.msra.mxu0 %v10190_v17  ;;  %5388 = vmatpush.bf16.msrb.mxu3 %v8178_v37  ;;  %v11913_v59 = vld [vmem:[#allocation8 + $0x14] sm:$0xf] }
 0x310   :  { %v12573_v12 = vld [vmem:[#allocation8 + $0x14ac] sm:$0xf0]  ;;  %v12025_v9 = vld [vmem:[#allocation8 + $0x394] sm:$0xf] }
 0x311   :  { %v10702_v28 = vor.u32 %v12573_v12, %v10701_v11  ;;  %v10157_v29 = vld [vmem:[#allocation8 + $0x1050] sm:$0xf]  ;;  %5350 = vmatpush.bf16.msra.mxu1 %v10446_v26  ;;  %v8114_v11 = vor.u32 %v11921_v56, %v8111_v1  ;;  %v9074_v12 = vor.u32 %v12161_v3, %v9071_v54  ;;  %v8079_v17 = vld [vmem:[#allocation8 + $0x30] sm:$0xf0] }
 0x312   :  { %v12437_v2 = vld [vmem:[#allocation8 + $0x106c] sm:$0xf0]  ;;  %v9327_v26 = vld [vmem:[#allocation8 + $0x9f0] sm:$0xf0] }
 0x313   :  { %v10413_v16 = vld [vmem:[#allocation8 + $0x1250] sm:$0xf]  ;;  %v10158_v44 = vor.u32 %v12437_v2, %v10157_v29  ;;  %5363 = vmatpush.bf16.msra.mxu2 %v10702_v28  ;;  %5389 = vmatpush.bf16.msrb.mxu3 %v8146_v46  ;;  %v8530_v28 = vor.u32 %v12025_v9, %v8527_v13  ;;  %v8786_v29 = vor.u32 %v12089_v4, %v8783_v15  ;;  %v12017_v2 = vld [vmem:[#allocation8 + $0x354] sm:$0xf]  ;;  %v5122_v9 = vpop.f32.mrf.mxu0 }
 0x314   :  { %v12501_v31 = vld [vmem:[#allocation8 + $0x126c] sm:$0xf0]  ;;  %v9330_v37 = vor.u32 %v12225_v22, %v9327_v26  ;;  %v12073_v56 = vld [vmem:[#allocation8 + $0x514] sm:$0xf] }
 0x315   :  { %v10669_v32 = vld [vmem:[#allocation8 + $0x1450] sm:$0xf]  ;;  %v10414_v48 = vor.u32 %v12501_v31, %v10413_v16  ;;  %5338 = vmatpush.bf16.msra.mxu0 %v10158_v44  ;;  %v8082_v16 = vor.u32 %v11913_v59, %v8079_v17  ;;  %v9042_v31 = vor.u32 %v12153_v18, %v9039_v21  ;;  %v9007_v44 = vld [vmem:[#allocation8 + $0x770] sm:$0xf0] }
 0x316   :  { %v12565_v33 = vld [vmem:[#allocation8 + $0x146c] sm:$0xf0]  ;;  %v8719_v57 = vld [vmem:[#allocation8 + $0x530] sm:$0xf0] }
 0x317   :  { %v10125_v47 = vld [vmem:[#allocation8 + $0x1010] sm:$0xf]  ;;  %v10670_v49 = vor.u32 %v12565_v33, %v10669_v32  ;;  %5351 = vmatpush.bf16.msra.mxu1 %v10414_v48  ;;  %5390 = vmatpush.bf16.msrb.mxu3 %v8114_v11  ;;  %v8495_v32 = vld [vmem:[#allocation8 + $0x370] sm:$0xf0]  ;;  %v5121_v48 = vadd.f32 %v5120_v45, %v13483_v35  ;;  %v8722_v63 = vor.u32 %v12073_v56, %v8719_v57 }
 0x318   :  { %v12429_v8 = vld [vmem:[#allocation8 + $0x102c] sm:$0xf0]  ;;  %v12081_v33 = vld [vmem:[#allocation8 + $0x554] sm:$0xf] }
 0x319   :  { %v10381_v50 = vld [vmem:[#allocation8 + $0x1210] sm:$0xf]  ;;  %v10126_v0 = vor.u32 %v12429_v8, %v10125_v47  ;;  %5364 = vmatpush.bf16.msra.mxu2 %v10670_v49  ;;  %v12217_v47 = vld [vmem:[#allocation8 + $0x994] sm:$0xf]  ;;  %v8498_v49 = vor.u32 %v12017_v2, %v8495_v32 }
 0x31a   :  { %v12493_v52 = vld [vmem:[#allocation8 + $0x122c] sm:$0xf0]  ;;  %v9295_v8 = vld [vmem:[#allocation8 + $0x9b0] sm:$0xf0] }
 0x31b   :  { %v10637_v53 = vld [vmem:[#allocation8 + $0x1410] sm:$0xf]  ;;  %v10382_v14 = vor.u32 %v12493_v52, %v10381_v50  ;;  %5339 = vmatpush.bf16.msra.mxu0 %v10126_v0  ;;  %v8754_v50 = vor.u32 %v12081_v33, %v8751_v36  ;;  %v12009_v52 = vld [vmem:[#allocation8 + $0x314] sm:$0xf]  ;;  %5391 = vmatpush.bf16.msrb.mxu3 %v8082_v16  ;;  %v9298_v46 = vor.u32 %v12217_v47, %v9295_v8  ;;  %v5146_v16 = vpop.f32.mrf.mxu2  ;;  %v5159_v36 = vpop.f32.mrf.mxu3 }
 0x31c   :  { %v12557_v55 = vld [vmem:[#allocation8 + $0x142c] sm:$0xf0]  ;;  %v12137_v58 = vld [vmem:[#allocation8 + $0x714] sm:$0xf] }
 0x31d   :  { %v10638_v5 = vor.u32 %v12557_v55, %v10637_v53  ;;  %5352 = vmatpush.bf16.msra.mxu1 %v10382_v14  ;;  %v9010_v53 = vor.u32 %v12145_v43, %v9007_v44  ;;  %v8463_v55 = vld [vmem:[#allocation8 + $0x330] sm:$0xf0] }
 0x31e   :  { %5340 = vmatmul.bf16.vlgmr.msra.gmra.mxu0 %v13383_v23  ;;  %v8975_v60 = vld [vmem:[#allocation8 + $0x730] sm:$0xf0]  ;;  %v8466_v35 = vor.u32 %v12009_v52, %v8463_v55  ;;  %5392 = vmatmul.bf16.vlgmr.msrb.gmra.mxu3 %v13355_v19 }
 0x31f   :  { %5365 = vmatpush.bf16.msra.mxu2 %v10638_v5  ;;  %5397 = vmatpush.bf16.msrb.mxu0 %v8562_v6  ;;  %v12209_v61 = vld [vmem:[#allocation8 + $0x954] sm:$0xf]  ;;  %v8978_v1 = vor.u32 %v12137_v58, %v8975_v60  ;;  %v5133_v5 = vpop.f32.mrf.mxu1 }
 0x320   :  { %5353 = vmatmul.bf16.vlgmr.msra.gmra.mxu1 %v13387_v30  ;;  %5436 = vmatpush.bf16.msra.mxu3 %v9330_v37  ;;  %v9263_v62 = vld [vmem:[#allocation8 + $0x970] sm:$0xf0]  ;;  %v5134_v11 = vadd.f32 %v5133_v5, %v5121_v48 }
 0x321   :  { %5410 = vmatpush.bf16.msrb.mxu1 %v8818_v7  ;;  %v12001_v0 = vld [vmem:[#allocation8 + $0x2d4] sm:$0xf]  ;;  %v9266_v6 = vor.u32 %v12209_v61, %v9263_v62 }
 0x322   :  { %5366 = vmatmul.bf16.vlgmr.msra.gmra.mxu2 %v13385_v25  ;;  %v8431_v3 = vld [vmem:[#allocation8 + $0x2f0] sm:$0xf0]  ;;  %v5147_v33 = vadd.f32 %v5146_v16, %v5134_v11 }
 0x323   :  { %5423 = vmatpush.bf16.msrb.mxu2 %v9074_v12  ;;  %5398 = vmatpush.bf16.msrb.mxu0 %v8530_v28  ;;  %v12065_v54 = vld [vmem:[#allocation8 + $0x4d4] sm:$0xf]  ;;  %v8434_v4 = vor.u32 %v12001_v0, %v8431_v3  ;;  %v5161_v11 = vpop.f32.mrf.mxu3 }
 0x324   :  { %v8687_v14 = vld [vmem:[#allocation8 + $0x4f0] sm:$0xf0]  ;;  %5437 = vmatpush.bf16.msra.mxu3 %v9298_v46 }
 0x325   :  { %5411 = vmatpush.bf16.msrb.mxu1 %v8786_v29  ;;  %v12129_v7 = vld [vmem:[#allocation8 + $0x6d4] sm:$0xf]  ;;  %v8690_v15 = vor.u32 %v12065_v54, %v8687_v14 }
 0x326   :  { %v8943_v59 = vld [vmem:[#allocation8 + $0x6f0] sm:$0xf0] }
 0x327   :  { %5424 = vmatpush.bf16.msrb.mxu2 %v9042_v31  ;;  %5399 = vmatpush.bf16.msrb.mxu0 %v8498_v49  ;;  %v12201_v12 = vld [vmem:[#allocation8 + $0x914] sm:$0xf]  ;;  %v8946_v18 = vor.u32 %v12129_v7, %v8943_v59  ;;  %v13492_v49 = vadd.f32 %v5159_v36, %v5147_v33 }
 0x328   :  { %v9231_v13 = vld [vmem:[#allocation8 + $0x930] sm:$0xf0]  ;;  %5438 = vmatpush.bf16.msra.mxu3 %v9266_v6  ;;  %v5148_v6 = vpop.f32.mrf.mxu2 }
 0x329   :  { %5412 = vmatpush.bf16.msrb.mxu1 %v8754_v50  ;;  %v11993_v17 = vld [vmem:[#allocation8 + $0x294] sm:$0xf]  ;;  %v9234_v28 = vor.u32 %v12201_v12, %v9231_v13  ;;  %v5135_v50 = vpop.f32.mrf.mxu1 }
 0x32a   :  { %v8399_v21 = vld [vmem:[#allocation8 + $0x2b0] sm:$0xf0] }
 0x32b   :  { %5425 = vmatpush.bf16.msrb.mxu2 %v9010_v53  ;;  %5400 = vmatpush.bf16.msrb.mxu0 %v8466_v35  ;;  %v12057_v22 = vld [vmem:[#allocation8 + $0x494] sm:$0xf]  ;;  %v8402_v37 = vor.u32 %v11993_v17, %v8399_v21 }
 0x32c   :  { %v8655_v26 = vld [vmem:[#allocation8 + $0x4b0] sm:$0xf0]  ;;  %5439 = vmatpush.bf16.msra.mxu3 %v9234_v28 }
 0x32d   :  { %5413 = vmatpush.bf16.msrb.mxu1 %v8722_v63  ;;  %v12121_v29 = vld [vmem:[#allocation8 + $0x694] sm:$0xf]  ;;  %v8658_v43 = vor.u32 %v12057_v22, %v8655_v26 }
 0x32e   :  { %v8911_v2 = vld [vmem:[#allocation8 + $0x6b0] sm:$0xf0] }
 0x32f   :  { %5426 = vmatpush.bf16.msrb.mxu2 %v8978_v1  ;;  %v12193_v31 = vld [vmem:[#allocation8 + $0x8d4] sm:$0xf]  ;;  %5401 = vmatpush.bf16.msrb.mxu0 %v8434_v4  ;;  %v8914_v45 = vor.u32 %v12121_v29, %v8911_v2 }
 0x330   :  { %v9199_v32 = vld [vmem:[#allocation8 + $0x8f0] sm:$0xf0] }
 0x331   :  { %5414 = vmatpush.bf16.msrb.mxu1 %v8690_v15  ;;  %v11985_v44 = vld [vmem:[#allocation8 + $0x254] sm:$0xf]  ;;  %v9202_v52 = vor.u32 %v12193_v31, %v9199_v32 }
 0x332   :  { %v8367_v47 = vld [vmem:[#allocation8 + $0x270] sm:$0xf0] }
 0x333   :  { %5427 = vmatpush.bf16.msrb.mxu2 %v8946_v18  ;;  %v12049_v8 = vld [vmem:[#allocation8 + $0x454] sm:$0xf]  ;;  %5402 = vmatpush.bf16.msrb.mxu0 %v8402_v37  ;;  %v8370_v46 = vor.u32 %v11985_v44, %v8367_v47 }
 0x334   :  { %v8623_v48 = vld [vmem:[#allocation8 + $0x470] sm:$0xf0]  ;;  %5440 = vmatpush.bf16.msra.mxu3 %v9202_v52 }
 0x335   :  { %v12113_v53 = vld [vmem:[#allocation8 + $0x654] sm:$0xf]  ;;  %5415 = vmatpush.bf16.msrb.mxu1 %v8658_v43  ;;  %v8626_v58 = vor.u32 %v12049_v8, %v8623_v48 }
 0x336   :  { %v8879_v55 = vld [vmem:[#allocation8 + $0x670] sm:$0xf0] }
 0x337   :  { %v12185_v56 = vld [vmem:[#allocation8 + $0x894] sm:$0xf]  ;;  %5428 = vmatpush.bf16.msrb.mxu2 %v8914_v45  ;;  %v8882_v35 = vor.u32 %v12113_v53, %v8879_v55  ;;  %5403 = vmatpush.bf16.msrb.mxu0 %v8370_v46 }
 0x338   :  { %v9167_v57 = vld [vmem:[#allocation8 + $0x8b0] sm:$0xf0] }
 0x339   :  { %v11977_v60 = vld [vmem:[#allocation8 + $0x214] sm:$0xf]  ;;  %v9170_v3 = vor.u32 %v12185_v56, %v9167_v57  ;;  %5416 = vmatpush.bf16.msrb.mxu1 %v8626_v58  ;;  %v5172_v57 = vpop.f32.mrf.mxu0 }
 0x33a   :  { %v8335_v61 = vld [vmem:[#allocation8 + $0x230] sm:$0xf0] }
 0x33b   :  { %v12041_v62 = vld [vmem:[#allocation8 + $0x414] sm:$0xf]  ;;  %v8338_v12 = vor.u32 %v11977_v60, %v8335_v61  ;;  %5429 = vmatpush.bf16.msrb.mxu2 %v8882_v35  ;;  %5441 = vmatpush.bf16.msra.mxu3 %v9170_v3  ;;  %v5173_v61 = vadd.f32 %v5172_v57, %v13492_v49 }
 0x33c   :  { %v8591_v63 = vld [vmem:[#allocation8 + $0x430] sm:$0xf0] }
 0x33d   :  { %v12105_v0 = vld [vmem:[#allocation8 + $0x614] sm:$0xf]  ;;  %v8594_v13 = vor.u32 %v12041_v62, %v8591_v63  ;;  %5404 = vmatpush.bf16.msrb.mxu0 %v8338_v12 }
 0x33e   :  { %v8847_v1 = vld [vmem:[#allocation8 + $0x630] sm:$0xf0] }
 0x33f   :  { %v12177_v54 = vld [vmem:[#allocation8 + $0x854] sm:$0xf]  ;;  %v8850_v17 = vor.u32 %v12105_v0, %v8847_v1  ;;  %5417 = vmatpush.bf16.msrb.mxu1 %v8594_v13 }
 0x340   :  { %v12289_v14 = vld [vmem:[#allocation8 + $0xbd4] sm:$0xf]  ;;  %5405 = vmatmul.bf16.vlgmr.msrb.gmra.mxu0 %v13361_v27 }
 0x341   :  { %v9583_v5 = vld [vmem:[#allocation8 + $0xbf0] sm:$0xf0]  ;;  %5430 = vmatpush.bf16.msrb.mxu2 %v8850_v17 }
 0x342   :  { %v9135_v7 = vld [vmem:[#allocation8 + $0x870] sm:$0xf0]  ;;  %v9586_v18 = vor.u32 %v12289_v14, %v9583_v5  ;;  %5418 = vmatmul.bf16.vlgmr.msrb.gmra.mxu1 %v13357_v20 }
 0x343   :  { %v12353_v59 = vld [vmem:[#allocation8 + $0xdd4] sm:$0xf]  ;;  %v9138_v22 = vor.u32 %v12177_v54, %v9135_v7 }
 0x344   :  { %v9839_v9 = vld [vmem:[#allocation8 + $0xdf0] sm:$0xf0]  ;;  %5449 = vmatpush.bf16.msra.mxu0 %v9586_v18  ;;  %5431 = vmatmul.bf16.vlgmr.msrb.gmra.mxu2 %v13359_v24 }
 0x345   :  { %v12417_v4 = vld [vmem:[#allocation8 + $0xfd4] sm:$0xf]  ;;  %v9842_v26 = vor.u32 %v12353_v59, %v9839_v9  ;;  %5442 = vmatpush.bf16.msra.mxu3 %v9138_v22  ;;  %v5185_v9 = vpop.f32.mrf.mxu1 }
 0x346   :  { %v10095_v15 = vld [vmem:[#allocation8 + $0xff0] sm:$0xf0]  ;;  %v5186_v49 = vadd.f32 %v5185_v9, %v5173_v61 }
 0x347   :  { %v12169_v21 = vld [vmem:[#allocation8 + $0x814] sm:$0xf]  ;;  %v10098_v16 = vor.u32 %v12417_v4, %v10095_v15  ;;  %5462 = vmatpush.bf16.msra.mxu1 %v9842_v26  ;;  %v5174_v26 = vpop.f32.mrf.mxu0 }
 0x348   :  { %v9103_v28 = vld [vmem:[#allocation8 + $0x830] sm:$0xf0] }
 0x349   :  { %v12281_v29 = vld [vmem:[#allocation8 + $0xb94] sm:$0xf]  ;;  %v9106_v45 = vor.u32 %v12169_v21, %v9103_v28  ;;  %5475 = vmatpush.bf16.msra.mxu2 %v10098_v16 }
 0x34a   :  { %v9551_v2 = vld [vmem:[#allocation8 + $0xbb0] sm:$0xf0] }
 0x34b   :  { %v12345_v31 = vld [vmem:[#allocation8 + $0xd94] sm:$0xf]  ;;  %v9554_v44 = vor.u32 %v12281_v29, %v9551_v2  ;;  %5443 = vmatpush.bf16.msra.mxu3 %v9106_v45 }
 0x34c   :  { %v9807_v32 = vld [vmem:[#allocation8 + $0xdb0] sm:$0xf0] }
 0x34d   :  { %v12409_v33 = vld [vmem:[#allocation8 + $0xf94] sm:$0xf]  ;;  %v9810_v47 = vor.u32 %v12345_v31, %v9807_v32  ;;  %5450 = vmatpush.bf16.msra.mxu0 %v9554_v44 }
 0x34e   :  { %v10063_v36 = vld [vmem:[#allocation8 + $0xfb0] sm:$0xf0]  ;;  %5444 = vmatmul.bf16.vlgmr.msra.gmra.mxu3 %v13367_v34 }
 0x34f   :  { %v12481_v37 = vld [vmem:[#allocation8 + $0x11d4] sm:$0xf]  ;;  %v10066_v50 = vor.u32 %v12409_v33, %v10063_v36  ;;  %5463 = vmatpush.bf16.msra.mxu1 %v9810_v47  ;;  %v5198_v47 = vpop.f32.mrf.mxu2 }
 0x350   :  { %v10351_v43 = vld [vmem:[#allocation8 + $0x11f0] sm:$0xf0] }
 0x351   :  { %v12273_v8 = vld [vmem:[#allocation8 + $0xb54] sm:$0xf]  ;;  %v10354_v52 = vor.u32 %v12481_v37, %v10351_v43  ;;  %5476 = vmatpush.bf16.msra.mxu2 %v10066_v50 }
 0x352   :  { %v9519_v48 = vld [vmem:[#allocation8 + $0xb70] sm:$0xf0] }
 0x353   :  { %v12337_v53 = vld [vmem:[#allocation8 + $0xd54] sm:$0xf]  ;;  %v9522_v62 = vor.u32 %v12273_v8, %v9519_v48  ;;  %5488 = vmatpush.bf16.msrb.mxu3 %v10354_v52  ;;  %v5211_v8 = vpop.f32.mrf.mxu3 }
 0x354   :  { %v9775_v55 = vld [vmem:[#allocation8 + $0xd70] sm:$0xf0] }
 0x355   :  { %v12401_v56 = vld [vmem:[#allocation8 + $0xf54] sm:$0xf]  ;;  %v9778_v35 = vor.u32 %v12337_v53, %v9775_v55  ;;  %5451 = vmatpush.bf16.msra.mxu0 %v9522_v62  ;;  %v5199_v53 = vadd.f32 %v5198_v47, %v5186_v49 }
 0x356   :  { %v10031_v46 = vld [vmem:[#allocation8 + $0xf70] sm:$0xf0] }
 0x357   :  { %v12473_v58 = vld [vmem:[#allocation8 + $0x1194] sm:$0xf]  ;;  %v10034_v1 = vor.u32 %v12401_v56, %v10031_v46  ;;  %5464 = vmatpush.bf16.msra.mxu1 %v9778_v35  ;;  %v5187_v56 = vpop.f32.mrf.mxu1 }
 0x358   :  { %v10319_v60 = vld [vmem:[#allocation8 + $0x11b0] sm:$0xf0] }
 0x359   :  { %v12265_v63 = vld [vmem:[#allocation8 + $0xb14] sm:$0xf]  ;;  %v10322_v3 = vor.u32 %v12473_v58, %v10319_v60  ;;  %5477 = vmatpush.bf16.msra.mxu2 %v10034_v1  ;;  %v5212_v60 = vadd.f32 %v5211_v8, %v5199_v53 }
 0x35a   :  { %v9487_v0 = vld [vmem:[#allocation8 + $0xb30] sm:$0xf0] }
 0x35b   :  { %v12329_v54 = vld [vmem:[#allocation8 + $0xd14] sm:$0xf]  ;;  %v9490_v11 = vor.u32 %v12265_v63, %v9487_v0  ;;  %5489 = vmatpush.bf16.msrb.mxu3 %v10322_v3 }
 0x35c   :  { %v9743_v14 = vld [vmem:[#allocation8 + $0xd30] sm:$0xf0] }
 0x35d   :  { %v12393_v5 = vld [vmem:[#allocation8 + $0xf14] sm:$0xf]  ;;  %v9746_v12 = vor.u32 %v12329_v54, %v9743_v14  ;;  %5452 = vmatpush.bf16.msra.mxu0 %v9490_v11  ;;  %v5224_v14 = vpop.f32.mrf.mxu0 }
 0x35e   :  { %v9999_v6 = vld [vmem:[#allocation8 + $0xf30] sm:$0xf0] }
 0x35f   :  { %v12465_v7 = vld [vmem:[#allocation8 + $0x1154] sm:$0xf]  ;;  %v10002_v15 = vor.u32 %v12393_v5, %v9999_v6  ;;  %5465 = vmatpush.bf16.msra.mxu1 %v9746_v12 }
 0x360   :  { %v10287_v59 = vld [vmem:[#allocation8 + $0x1170] sm:$0xf0] }
 0x361   :  { %v12257_v13 = vld [vmem:[#allocation8 + $0xad4] sm:$0xf]  ;;  %v10290_v17 = vor.u32 %v12465_v7, %v10287_v59  ;;  %5478 = vmatpush.bf16.msra.mxu2 %v10002_v15  ;;  %v13499_v59 = vadd.f32 %v5224_v14, %v5212_v60  ;;  %v11974_v60 = vld [vmem:[#allocation8 + $0x1f4] sm:$0xf0] }
 0x362   :  { %v9455_v4 = vld [vmem:[#allocation8 + $0xaf0] sm:$0xf0] }
 0x363   :  { %v12321_v18 = vld [vmem:[#allocation8 + $0xcd4] sm:$0xf]  ;;  %v9458_v16 = vor.u32 %v12257_v13, %v9455_v4  ;;  %5490 = vmatpush.bf16.msrb.mxu3 %v10290_v17 }
 0x364   :  { %v9711_v21 = vld [vmem:[#allocation8 + $0xcf0] sm:$0xf0] }
 0x365   :  { %v12385_v22 = vld [vmem:[#allocation8 + $0xed4] sm:$0xf]  ;;  %v9714_v31 = vor.u32 %v12321_v18, %v9711_v21  ;;  %5453 = vmatpush.bf16.msra.mxu0 %v9458_v16 }
 0x366   :  { %v9967_v28 = vld [vmem:[#allocation8 + $0xef0] sm:$0xf0] }
 0x367   :  { %v12457_v29 = vld [vmem:[#allocation8 + $0x1114] sm:$0xf]  ;;  %v9970_v36 = vor.u32 %v12385_v22, %v9967_v28  ;;  %5466 = vmatpush.bf16.msra.mxu1 %v9714_v31  ;;  %v5200_v28 = vpop.f32.mrf.mxu2 }
 0x368   :  { %v10255_v2 = vld [vmem:[#allocation8 + $0x1130] sm:$0xf0] }
 0x369   :  { %v12249_v32 = vld [vmem:[#allocation8 + $0xa94] sm:$0xf]  ;;  %v10258_v37 = vor.u32 %v12457_v29, %v10255_v2  ;;  %5479 = vmatpush.bf16.msra.mxu2 %v9970_v36  ;;  %v5213_v29 = vpop.f32.mrf.mxu3 }
 0x36a   :  { %v9423_v33 = vld [vmem:[#allocation8 + $0xab0] sm:$0xf0]  ;;  %v8245_v29 = vld [vmem:[#allocation8 + $0x158] sm:$0xf] }
 0x36b   :  { %v12313_v43 = vld [vmem:[#allocation8 + $0xc94] sm:$0xf]  ;;  %v9426_v55 = vor.u32 %v12249_v32, %v9423_v33  ;;  %5491 = vmatpush.bf16.msrb.mxu3 %v10258_v37 }
 0x36c   :  { %v9679_v44 = vld [vmem:[#allocation8 + $0xcb0] sm:$0xf0] }
 0x36d   :  { %v12377_v45 = vld [vmem:[#allocation8 + $0xe94] sm:$0xf]  ;;  %v9682_v57 = vor.u32 %v12313_v43, %v9679_v44  ;;  %5454 = vmatpush.bf16.msra.mxu0 %v9426_v55 }
 0x36e   :  { %v9935_v48 = vld [vmem:[#allocation8 + $0xeb0] sm:$0xf0] }
 0x36f   :  { %v12449_v50 = vld [vmem:[#allocation8 + $0x10d4] sm:$0xf]  ;;  %v9938_v61 = vor.u32 %v12377_v45, %v9935_v48  ;;  %5467 = vmatpush.bf16.msra.mxu1 %v9682_v57  ;;  %v8309_v57 = vld [vmem:[#allocation8 + $0x1d8] sm:$0xf] }
 0x370   :  { %v10223_v52 = vld [vmem:[#allocation8 + $0x10f0] sm:$0xf0] }
 0x371   :  { %v12241_v46 = vld [vmem:[#allocation8 + $0xa54] sm:$0xf]  ;;  %v10226_v62 = vor.u32 %v12449_v50, %v10223_v52  ;;  %5480 = vmatpush.bf16.msra.mxu2 %v9938_v61  ;;  %v8565_v61 = vld [vmem:[#allocation8 + $0x3d8] sm:$0xf] }
 0x372   :  { %v9391_v58 = vld [vmem:[#allocation8 + $0xa70] sm:$0xf0] }
 0x373   :  { %v12305_v35 = vld [vmem:[#allocation8 + $0xc54] sm:$0xf]  ;;  %v9394_v5 = vor.u32 %v12241_v46, %v9391_v58  ;;  %5492 = vmatpush.bf16.msrb.mxu3 %v10226_v62  ;;  %v5226_v46 = vpop.f32.mrf.mxu0  ;;  %v12038_v62 = vld [vmem:[#allocation8 + $0x3f4] sm:$0xf0] }
 0x374   :  { %v9647_v63 = vld [vmem:[#allocation8 + $0xc70] sm:$0xf0]  ;;  %v8566_v14 = vor.u32 %v12038_v62, %v8565_v61  ;;  %v12014_v46 = vld [vmem:[#allocation8 + $0x334] sm:$0xf0] }
 0x375   :  { %v12369_v0 = vld [vmem:[#allocation8 + $0xe54] sm:$0xf]  ;;  %v9650_v9 = vor.u32 %v12305_v35, %v9647_v63  ;;  %5455 = vmatpush.bf16.msra.mxu0 %v9394_v5 }
 0x376   :  { %v9903_v1 = vld [vmem:[#allocation8 + $0xe70] sm:$0xf0] }
 0x377   :  { %v12441_v3 = vld [vmem:[#allocation8 + $0x1094] sm:$0xf]  ;;  %v9906_v13 = vor.u32 %v12369_v0, %v9903_v1  ;;  %5468 = vmatpush.bf16.msra.mxu1 %v9650_v9 }
 0x378   :  { %v10191_v54 = vld [vmem:[#allocation8 + $0x10b0] sm:$0xf0] }
 0x379   :  { %v12233_v6 = vld [vmem:[#allocation8 + $0xa14] sm:$0xf]  ;;  %v10194_v4 = vor.u32 %v12441_v3, %v10191_v54  ;;  %5481 = vmatpush.bf16.msra.mxu2 %v9906_v13  ;;  %v8310_v54 = vor.u32 %v11974_v60, %v8309_v57  ;;  %v8469_v57 = vld [vmem:[#allocation8 + $0x318] sm:$0xf] }
 0x37a   :  { %v9359_v7 = vld [vmem:[#allocation8 + $0xa30] sm:$0xf0] }
 0x37b   :  { %v12297_v11 = vld [vmem:[#allocation8 + $0xc14] sm:$0xf]  ;;  %v9362_v2 = vor.u32 %v12233_v6, %v9359_v7  ;;  %5493 = vmatpush.bf16.msrb.mxu3 %v10194_v4  ;;  %v8277_v7 = vld [vmem:[#allocation8 + $0x198] sm:$0xf] }
 0x37c   :  { %v9615_v49 = vld [vmem:[#allocation8 + $0xc30] sm:$0xf0] }
 0x37d   :  { %v12361_v12 = vld [vmem:[#allocation8 + $0xe14] sm:$0xf]  ;;  %v9618_v33 = vor.u32 %v12297_v11, %v9615_v49  ;;  %5456 = vmatpush.bf16.msra.mxu0 %v9362_v2  ;;  %v11966_v11 = vld [vmem:[#allocation8 + $0x1b4] sm:$0xf0] }
 0x37e   :  { %v9871_v15 = vld [vmem:[#allocation8 + $0xe30] sm:$0xf0]  ;;  %v8533_v49 = vld [vmem:[#allocation8 + $0x398] sm:$0xf] }
 0x37f   :  { %v12545_v17 = vld [vmem:[#allocation8 + $0x13d4] sm:$0xf]  ;;  %v9874_v37 = vor.u32 %v12361_v12, %v9871_v15  ;;  %5469 = vmatpush.bf16.msra.mxu1 %v9618_v33  ;;  %v12030_v12 = vld [vmem:[#allocation8 + $0x3b4] sm:$0xf0] }
 0x380   :  { %v10607_v18 = vld [vmem:[#allocation8 + $0x13f0] sm:$0xf0]  ;;  %5457 = vmatmul.bf16.vlgmr.msra.gmra.mxu0 %v13373_v42 }
 0x381   :  { %v12433_v21 = vld [vmem:[#allocation8 + $0x1054] sm:$0xf]  ;;  %v10610_v36 = vor.u32 %v12545_v17, %v10607_v18  ;;  %5482 = vmatpush.bf16.msra.mxu2 %v9874_v37  ;;  %v13504_v17 = vld [vmem:[#allocation10] sm:$0xff]  ;;  %v5237_v37 = vpop.f32.mrf.mxu0 }
 0x382   :  { %v10159_v22 = vld [vmem:[#allocation8 + $0x1070] sm:$0xf0]  ;;  %5470 = vmatmul.bf16.vlgmr.msra.gmra.mxu1 %v13369_v38  ;;  %v988_v18 = vperm.slane %v13504_v17, 4 }
 0x383   :  { %v12609_v26 = vld [vmem:[#allocation8 + $0x15d4] sm:$0xf]  ;;  %v10162_v43 = vor.u32 %v12433_v21, %v10159_v22  ;;  %5501 = vmatpush.bf16.msrb.mxu0 %v10610_v36  ;;  %v8278_v21 = vor.u32 %v11966_v11, %v8277_v7  ;;  %v8534_v22 = vor.u32 %v12030_v12, %v8533_v49  ;;  %v8437_v7 = vld [vmem:[#allocation8 + $0x2d8] sm:$0xf]  ;;  %v5263_v11 = vpop.f32.mrf.mxu2  ;;  %v5276_v49 = vpop.f32.mrf.mxu3 }
 0x384   :  { %v10863_v16 = vld [vmem:[#allocation8 + $0x15f0] sm:$0xf0]  ;;  %5483 = vmatmul.bf16.vlgmr.msra.gmra.mxu2 %v13371_v39 }
 0x385   :  { %v12625_v31 = vld [vmem:[#allocation8 + $0x1654] sm:$0xf]  ;;  %v10866_v8 = vor.u32 %v12609_v26, %v10863_v16  ;;  %5494 = vmatpush.bf16.msrb.mxu3 %v10162_v43  ;;  %v11958_v16 = vld [vmem:[#allocation8 + $0x174] sm:$0xf0] }
 0x386   :  { %v10927_v32 = vld [vmem:[#allocation8 + $0x1670] sm:$0xf0] }
 0x387   :  { %v12425_v44 = vld [vmem:[#allocation8 + $0x1014] sm:$0xf]  ;;  %v10930_v48 = vor.u32 %v12625_v31, %v10927_v32  ;;  %5514 = vmatpush.bf16.msrb.mxu1 %v10866_v8  ;;  %v8501_v31 = vld [vmem:[#allocation8 + $0x358] sm:$0xf]  ;;  %v8246_v8 = vor.u32 %v11958_v16, %v8245_v29 }
 0x388   :  { %v12537_v45 = vld [vmem:[#allocation8 + $0x1394] sm:$0xf]  ;;  %v12022_v32 = vld [vmem:[#allocation8 + $0x374] sm:$0xf0] }
 0x389   :  { %v10575_v47 = vld [vmem:[#allocation8 + $0x13b0] sm:$0xf0]  ;;  %5533 = vmatpush.bf16.msrb.mxu2 %v10930_v48  ;;  %v8502_v48 = vor.u32 %v12022_v32, %v8501_v31  ;;  %v8149_v29 = vld [vmem:[#allocation8 + $0x98] sm:$0xf] }
 0x38a   :  { %v10127_v50 = vld [vmem:[#allocation8 + $0x1030] sm:$0xf0]  ;;  %v10578_v58 = vor.u32 %v12537_v45, %v10575_v47  ;;  %v5238_v47 = vadd.f32 %v5237_v37, %v988_v18  ;;  %v11934_v32 = vld [vmem:[#allocation8 + $0xb4] sm:$0xf0] }
 0x38b   :  { %v12601_v52 = vld [vmem:[#allocation8 + $0x1594] sm:$0xf]  ;;  %v10130_v35 = vor.u32 %v12425_v44, %v10127_v50  ;;  %v8213_v50 = vld [vmem:[#allocation8 + $0x118] sm:$0xf] }
 0x38c   :  { %v10831_v53 = vld [vmem:[#allocation8 + $0x15b0] sm:$0xf0]  ;;  %5502 = vmatpush.bf16.msrb.mxu0 %v10578_v58 }
 0x38d   :  { %v12617_v55 = vld [vmem:[#allocation8 + $0x1614] sm:$0xf]  ;;  %v10834_v1 = vor.u32 %v12601_v52, %v10831_v53  ;;  %5495 = vmatpush.bf16.msrb.mxu3 %v10130_v35  ;;  %v11950_v52 = vld [vmem:[#allocation8 + $0x134] sm:$0xf0]  ;;  %v5250_v53 = vpop.f32.mrf.mxu1 }
 0x38e   :  { %v10895_v56 = vld [vmem:[#allocation8 + $0x1630] sm:$0xf0]  ;;  %v5251_v58 = vadd.f32 %v5250_v53, %v5238_v47  ;;  %v12102_v47 = vld [vmem:[#allocation8 + $0x5f4] sm:$0xf0] }
 0x38f   :  { %v12529_v63 = vld [vmem:[#allocation8 + $0x1354] sm:$0xf]  ;;  %v10898_v3 = vor.u32 %v12617_v55, %v10895_v56  ;;  %5515 = vmatpush.bf16.msrb.mxu1 %v10834_v1  ;;  %v5883_v55 = vld [vmem:[#allocation5] sm:$0x3]  ;;  %v8470_v1 = vor.u32 %v12014_v46, %v8469_v57  ;;  %v8117_v53 = vld [vmem:[#allocation8 + $0x58] sm:$0xf] }
 0x390   :  { %v10543_v0 = vld [vmem:[#allocation8 + $0x1370] sm:$0xf0]  ;;  %5496 = vmatmul.bf16.vlgmr.msrb.gmra.mxu3 %v13383_v23  ;;  %v5884_v60 = vmul.f32 %v5883_v55, %v5883_v55  ;;  %v8373_v57 = vld [vmem:[#allocation8 + $0x258] sm:$0xf] }
 0x391   :  { %v12593_v5 = vld [vmem:[#allocation8 + $0x1554] sm:$0xf]  ;;  %v10546_v9 = vor.u32 %v12529_v63, %v10543_v0  ;;  %5534 = vmatpush.bf16.msrb.mxu2 %v10898_v3  ;;  %5553 = vmatpush.bf16.msra.mxu3 %v8566_v14  ;;  %v8214_v0 = vor.u32 %v11950_v52, %v8213_v50  ;;  %v8181_v14 = vld [vmem:[#allocation8 + $0xd8] sm:$0xf] }
 0x392   :  { %v10799_v6 = vld [vmem:[#allocation8 + $0x1570] sm:$0xf0]  ;;  %v5886_v63 = vsel %vm5885_vm1, %v5884_v60, 0.0  ;;  %v11990_v46 = vld [vmem:[#allocation8 + $0x274] sm:$0xf0]  ;;  %v5278_v60 = vpop.f32.mrf.mxu3 }
 0x393   :  { %v12521_v13 = vld [vmem:[#allocation8 + $0x1314] sm:$0xf]  ;;  %v10802_v15 = vor.u32 %v12593_v5, %v10799_v6  ;;  %5503 = vmatpush.bf16.msrb.mxu0 %v10546_v9  ;;  %v11942_v6 = vld [vmem:[#allocation8 + $0xf4] sm:$0xf0]  ;;  %5887 = vadd.xlane.f32.xlu0 %v5886_v63 }
 0x394   :  { %v10511_v4 = vld [vmem:[#allocation8 + $0x1330] sm:$0xf0]  ;;  %v12006_v9 = vld [vmem:[#allocation8 + $0x2f4] sm:$0xf0]  ;;  %10944 = vmatmul.msk.bf16.vlgmr.msrb.gmra.mxu2 %vm4600_vm0, %v13379_v40 }
 0x395   :  { %5540 = vmatpush.bf16.msra.mxu2 %v8310_v54  ;;  %v12585_v26 = vld [vmem:[#allocation8 + $0x1514] sm:$0xf]  ;;  %v10514_v2 = vor.u32 %v12521_v13, %v10511_v4  ;;  %5516 = vmatpush.bf16.msrb.mxu1 %v10802_v15  ;;  %v5264_v4 = vadd.f32 %v5263_v11, %v5251_v58  ;;  %v5239_v15 = vpop.f32.mrf.mxu0  ;;  %v5252_v16 = vpop.f32.mrf.mxu1  ;;  %v9045_v11 = vld [vmem:[#allocation8 + $0x798] sm:$0xf] }
 0x396   :  { %v10767_v28 = vld [vmem:[#allocation8 + $0x1530] sm:$0xf0]  ;;  %5554 = vmatpush.bf16.msra.mxu3 %v8534_v22  ;;  %v8438_v22 = vor.u32 %v12006_v9, %v8437_v7  ;;  %v5265_v58 = vpop.f32.mrf.mxu2  ;;  %v11982_v9 = vld [vmem:[#allocation8 + $0x234] sm:$0xf0] }
 0x397   :  { %v12513_v33 = vld [vmem:[#allocation8 + $0x12d4] sm:$0xf]  ;;  %v10770_v43 = vor.u32 %v12585_v26, %v10767_v28  ;;  %5504 = vmatpush.bf16.msrb.mxu0 %v10514_v2  ;;  %v13508_v2 = vadd.f32 %v5276_v49, %v5264_v4  ;;  %v12158_v49 = vld [vmem:[#allocation8 + $0x7b4] sm:$0xf0] }
 0x398   :  { %v10479_v36 = vld [vmem:[#allocation8 + $0x12f0] sm:$0xf0]  ;;  %v12230_v4 = vld [vmem:[#allocation8 + $0x9f4] sm:$0xf0] }
 0x399   :  { %v12577_v44 = vld [vmem:[#allocation8 + $0x14d4] sm:$0xf]  ;;  %5541 = vmatpush.bf16.msra.mxu2 %v8278_v21  ;;  %v10482_v56 = vor.u32 %v12513_v33, %v10479_v36  ;;  %5517 = vmatpush.bf16.msrb.mxu1 %v10770_v43  ;;  %v8182_v21 = vor.u32 %v11942_v6, %v8181_v14  ;;  %v8405_v33 = vld [vmem:[#allocation8 + $0x298] sm:$0xf] }
 0x39a   :  { %v10735_v45 = vld [vmem:[#allocation8 + $0x14f0] sm:$0xf0]  ;;  %5555 = vmatpush.bf16.msra.mxu3 %v8502_v48  ;;  %v11998_v36 = vld [vmem:[#allocation8 + $0x2b4] sm:$0xf0] }
 0x39b   :  { %v12505_v61 = vld [vmem:[#allocation8 + $0x1294] sm:$0xf]  ;;  %v10738_v35 = vor.u32 %v12577_v44, %v10735_v45  ;;  %5505 = vmatpush.bf16.msrb.mxu0 %v10482_v56  ;;  %v8821_v45 = vld [vmem:[#allocation8 + $0x5d8] sm:$0xf]  ;;  %v8406_v48 = vor.u32 %v11998_v36, %v8405_v33 }
 0x39c   :  { %v10447_v62 = vld [vmem:[#allocation8 + $0x12b0] sm:$0xf0]  ;;  %v11926_v56 = vld [vmem:[#allocation8 + $0x74] sm:$0xf0] }
 0x39d   :  { %5542 = vmatpush.bf16.msra.mxu2 %v8246_v8  ;;  %v12569_v3 = vld [vmem:[#allocation8 + $0x1494] sm:$0xf]  ;;  %v10450_v5 = vor.u32 %v12505_v61, %v10447_v62  ;;  %5518 = vmatpush.bf16.msrb.mxu1 %v10738_v35  ;;  %v8150_v8 = vor.u32 %v11934_v32, %v8149_v29  ;;  %v8822_v61 = vor.u32 %v12102_v47, %v8821_v45  ;;  %v9077_v62 = vld [vmem:[#allocation8 + $0x7d8] sm:$0xf] }
 0x39e   :  { %v10703_v54 = vld [vmem:[#allocation8 + $0x14b0] sm:$0xf0]  ;;  %5556 = vmatpush.bf16.msra.mxu3 %v8470_v1  ;;  %v12166_v35 = vld [vmem:[#allocation8 + $0x7f4] sm:$0xf0]  ;;  %v9046_v29 = vor.u32 %v12158_v49, %v9045_v11 }
 0x39f   :  { %v12497_v12 = vld [vmem:[#allocation8 + $0x1254] sm:$0xf]  ;;  %v10706_v18 = vor.u32 %v12569_v3, %v10703_v54  ;;  %5506 = vmatpush.bf16.msrb.mxu0 %v10450_v5  ;;  %v12094_v1 = vld [vmem:[#allocation8 + $0x5b4] sm:$0xf0]  ;;  %v8118_v3 = vor.u32 %v11926_v56, %v8117_v53  ;;  %v8374_v54 = vor.u32 %v11990_v46, %v8373_v57  ;;  %v9078_v7 = vor.u32 %v12166_v35, %v9077_v62  ;;  %v5289_v35 = vpop.f32.mrf.mxu0 }
 0x3a0   :  { %v10415_v13 = vld [vmem:[#allocation8 + $0x1270] sm:$0xf0]  ;;  %v8085_v14 = vld [vmem:[#allocation8 + $0x18] sm:$0xf] }
 0x3a1   :  { %5543 = vmatpush.bf16.msra.mxu2 %v8214_v0  ;;  %v12561_v26 = vld [vmem:[#allocation8 + $0x1454] sm:$0xf]  ;;  %v10418_v31 = vor.u32 %v12497_v12, %v10415_v13  ;;  %5519 = vmatpush.bf16.msrb.mxu1 %v10706_v18  ;;  %v8789_v0 = vld [vmem:[#allocation8 + $0x598] sm:$0xf] }
 0x3a2   :  { %v10671_v28 = vld [vmem:[#allocation8 + $0x1470] sm:$0xf0]  ;;  %5557 = vmatpush.bf16.msra.mxu3 %v8438_v22  ;;  %v11918_v5 = vld [vmem:[#allocation8 + $0x34] sm:$0xf0]  ;;  %v8790_v12 = vor.u32 %v12094_v1, %v8789_v0 }
 0x3a3   :  { %v12489_v37 = vld [vmem:[#allocation8 + $0x1214] sm:$0xf]  ;;  %v10674_v44 = vor.u32 %v12561_v26, %v10671_v28  ;;  %5507 = vmatpush.bf16.msrb.mxu0 %v10418_v31  ;;  %v8341_v6 = vld [vmem:[#allocation8 + $0x218] sm:$0xf]  ;;  %v8086_v26 = vor.u32 %v11918_v5, %v8085_v14  ;;  %v5302_v14 = vpop.f32.mrf.mxu1 }
 0x3a4   :  { %v10383_v43 = vld [vmem:[#allocation8 + $0x1230] sm:$0xf0]  ;;  %v9333_v13 = vld [vmem:[#allocation8 + $0x9d8] sm:$0xf]  ;;  %v8342_v28 = vor.u32 %v11982_v9, %v8341_v6 }
 0x3a5   :  { %5544 = vmatpush.bf16.msra.mxu2 %v8182_v21  ;;  %v12553_v50 = vld [vmem:[#allocation8 + $0x1414] sm:$0xf]  ;;  %v10386_v55 = vor.u32 %v12489_v37, %v10383_v43  ;;  %5520 = vmatpush.bf16.msrb.mxu1 %v10674_v44  ;;  %v9589_v15 = vld [vmem:[#allocation8 + $0xbd8] sm:$0xf]  ;;  %v9334_v16 = vor.u32 %v12230_v4, %v9333_v13 }
 0x3a6   :  { %v10639_v52 = vld [vmem:[#allocation8 + $0x1430] sm:$0xf0]  ;;  %5558 = vmatpush.bf16.msra.mxu3 %v8406_v48  ;;  %v12294_v18 = vld [vmem:[#allocation8 + $0xbf4] sm:$0xf0] }
 0x3a7   :  { %v10642_v63 = vor.u32 %v12553_v50, %v10639_v52  ;;  %5508 = vmatpush.bf16.msrb.mxu0 %v10386_v55  ;;  %v8757_v21 = vld [vmem:[#allocation8 + $0x558] sm:$0xf]  ;;  %v9590_v33 = vor.u32 %v12294_v18, %v9589_v15 }
 0x3a8   :  { %v12086_v22 = vld [vmem:[#allocation8 + $0x574] sm:$0xf0] }
 0x3a9   :  { %5545 = vmatpush.bf16.msra.mxu2 %v8150_v8  ;;  %5521 = vmatpush.bf16.msrb.mxu1 %v10642_v63  ;;  %v9013_v31 = vld [vmem:[#allocation8 + $0x758] sm:$0xf]  ;;  %v8758_v36 = vor.u32 %v12086_v22, %v8757_v21  ;;  %v5290_v63 = vadd.f32 %v5289_v35, %v13508_v2 }
 0x3aa   :  { %5559 = vmatpush.bf16.msra.mxu3 %v8374_v54  ;;  %5509 = vmatmul.bf16.vlgmr.msrb.gmra.mxu0 %v13387_v30  ;;  %v12150_v32 = vld [vmem:[#allocation8 + $0x774] sm:$0xf0] }
 0x3ab   :  { %5566 = vmatpush.bf16.msra.mxu0 %v8822_v61  ;;  %v9301_v37 = vld [vmem:[#allocation8 + $0x998] sm:$0xf]  ;;  %v9014_v48 = vor.u32 %v12150_v32, %v9013_v31  ;;  %v5303_v49 = vadd.f32 %v5302_v14, %v5290_v63  ;;  %v5315_v32 = vpop.f32.mrf.mxu2 }
 0x3ac   :  { %5522 = vmatmul.bf16.vlgmr.msrb.gmra.mxu1 %v13385_v25  ;;  %v12222_v43 = vld [vmem:[#allocation8 + $0x9b4] sm:$0xf0] }
 0x3ad   :  { %5546 = vmatpush.bf16.msra.mxu2 %v8118_v3  ;;  %5579 = vmatpush.bf16.msra.mxu1 %v9078_v7  ;;  %v9557_v44 = vld [vmem:[#allocation8 + $0xb98] sm:$0xf]  ;;  %v9302_v50 = vor.u32 %v12222_v43, %v9301_v37 }
 0x3ae   :  { %v12286_v45 = vld [vmem:[#allocation8 + $0xbb4] sm:$0xf0]  ;;  %5560 = vmatpush.bf16.msra.mxu3 %v8342_v28 }
 0x3af   :  { %5567 = vmatpush.bf16.msra.mxu0 %v8790_v12  ;;  %v8725_v47 = vld [vmem:[#allocation8 + $0x518] sm:$0xf]  ;;  %v9558_v55 = vor.u32 %v12286_v45, %v9557_v44  ;;  %v5316_v44 = vadd.f32 %v5315_v32, %v5303_v49  ;;  %v5291_v45 = vpop.f32.mrf.mxu0 }
 0x3b0   :  { %v12078_v8 = vld [vmem:[#allocation8 + $0x534] sm:$0xf0] }
 0x3b1   :  { %5547 = vmatpush.bf16.msra.mxu2 %v8086_v26  ;;  %5580 = vmatpush.bf16.msra.mxu1 %v9046_v29  ;;  %v8981_v52 = vld [vmem:[#allocation8 + $0x718] sm:$0xf]  ;;  %v8726_v56 = vor.u32 %v12078_v8, %v8725_v47 }
 0x3b2   :  { %v12142_v53 = vld [vmem:[#allocation8 + $0x734] sm:$0xf0]  ;;  %5605 = vmatpush.bf16.msrb.mxu3 %v9590_v33  ;;  %v5328_v33 = vpop.f32.mrf.mxu3 }
 0x3b3   :  { %5568 = vmatpush.bf16.msra.mxu0 %v8758_v36  ;;  %v9269_v57 = vld [vmem:[#allocation8 + $0x958] sm:$0xf]  ;;  %5561 = vmatmul.bf16.vlgmr.msra.gmra.mxu3 %v13361_v27  ;;  %v8982_v0 = vor.u32 %v12142_v53, %v8981_v52  ;;  %v13517_v52 = vadd.f32 %v5328_v33, %v5316_v44 }
 0x3b4   :  { %v12214_v46 = vld [vmem:[#allocation8 + $0x974] sm:$0xf0]  ;;  %5548 = vmatmul.bf16.vlgmr.msra.gmra.mxu2 %v13355_v19 }
 0x3b5   :  { %5592 = vmatpush.bf16.msrb.mxu2 %v9334_v16  ;;  %v9525_v58 = vld [vmem:[#allocation8 + $0xb58] sm:$0xf]  ;;  %5581 = vmatpush.bf16.msra.mxu1 %v9014_v48  ;;  %v9270_v1 = vor.u32 %v12214_v46, %v9269_v57 }
 0x3b6   :  { %v12278_v60 = vld [vmem:[#allocation8 + $0xb74] sm:$0xf0]  ;;  %5606 = vmatpush.bf16.msrb.mxu3 %v9558_v55 }
 0x3b7   :  { %v8693_v61 = vld [vmem:[#allocation8 + $0x4d8] sm:$0xf]  ;;  %5569 = vmatpush.bf16.msra.mxu0 %v8726_v56  ;;  %v9526_v5 = vor.u32 %v12278_v60, %v9525_v58  ;;  %v5304_v58 = vpop.f32.mrf.mxu1 }
 0x3b8   :  { %v12070_v62 = vld [vmem:[#allocation8 + $0x4f4] sm:$0xf0] }
 0x3b9   :  { %5593 = vmatpush.bf16.msrb.mxu2 %v9302_v50  ;;  %v8949_v3 = vld [vmem:[#allocation8 + $0x6d8] sm:$0xf]  ;;  %v8694_v6 = vor.u32 %v12070_v62, %v8693_v61  ;;  %5582 = vmatpush.bf16.msra.mxu1 %v8982_v0 }
 0x3ba   :  { %v12134_v54 = vld [vmem:[#allocation8 + $0x6f4] sm:$0xf0]  ;;  %5607 = vmatpush.bf16.msrb.mxu3 %v9526_v5 }
 0x3bb   :  { %v9237_v7 = vld [vmem:[#allocation8 + $0x918] sm:$0xf]  ;;  %v8950_v2 = vor.u32 %v12134_v54, %v8949_v3  ;;  %5570 = vmatpush.bf16.msra.mxu0 %v8694_v6 }
 0x3bc   :  { %v12206_v9 = vld [vmem:[#allocation8 + $0x934] sm:$0xf0] }
 0x3bd   :  { %v9493_v11 = vld [vmem:[#allocation8 + $0xb18] sm:$0xf]  ;;  %5594 = vmatpush.bf16.msrb.mxu2 %v9270_v1  ;;  %v9238_v18 = vor.u32 %v12206_v9, %v9237_v7  ;;  %5583 = vmatpush.bf16.msra.mxu1 %v8950_v2 }
 0x3be   :  { %v12270_v12 = vld [vmem:[#allocation8 + $0xb34] sm:$0xf0] }
 0x3bf   :  { %v8661_v13 = vld [vmem:[#allocation8 + $0x498] sm:$0xf]  ;;  %v9494_v26 = vor.u32 %v12270_v12, %v9493_v11  ;;  %v5330_v11 = vpop.f32.mrf.mxu3 }
 0x3c0   :  { %v12062_v4 = vld [vmem:[#allocation8 + $0x4b4] sm:$0xf0] }
 0x3c1   :  { %v5853_v15 = vld [vmem:[#allocation7 + $0x8] sm:$0xff]  ;;  %v8662_v28 = vor.u32 %v12062_v4, %v8661_v13  ;;  %5595 = vmatpush.bf16.msrb.mxu2 %v9238_v18  ;;  %5608 = vmatpush.bf16.msrb.mxu3 %v9494_v26 }
 0x3c2   :  { %v8917_v21 = vld [vmem:[#allocation8 + $0x698] sm:$0xf]  ;;  %5858 = vst [vmem:[#allocation1 + $0x20] ss:$4 sm:$0xff] %v5853_v15  ;;  %v5317_v15 = vpop.f32.mrf.mxu2 }
 0x3c3   :  { %v12126_v22 = vld [vmem:[#allocation8 + $0x6b4] sm:$0xf0]  ;;  %5571 = vmatpush.bf16.msra.mxu0 %v8662_v28 }
 0x3c4   :  { %v9205_v29 = vld [vmem:[#allocation8 + $0x8d8] sm:$0xf]  ;;  %v8918_v47 = vor.u32 %v12126_v22, %v8917_v21 }
 0x3c5   :  { %v12198_v16 = vld [vmem:[#allocation8 + $0x8f4] sm:$0xf0] }
 0x3c6   :  { %v9461_v31 = vld [vmem:[#allocation8 + $0xad8] sm:$0xf]  ;;  %v9206_v8 = vor.u32 %v12198_v16, %v9205_v29  ;;  %5584 = vmatpush.bf16.msra.mxu1 %v8918_v47 }
 0x3c7   :  { %v12262_v36 = vld [vmem:[#allocation8 + $0xaf4] sm:$0xf0] }
 0x3c8   :  { %v8629_v37 = vld [vmem:[#allocation8 + $0x458] sm:$0xf]  ;;  %v9462_v53 = vor.u32 %v12262_v36, %v9461_v31  ;;  %5596 = vmatpush.bf16.msrb.mxu2 %v9206_v8 }
 0x3c9   :  { %v12054_v43 = vld [vmem:[#allocation8 + $0x474] sm:$0xf0] }
 0x3ca   :  { %v8885_v48 = vld [vmem:[#allocation8 + $0x658] sm:$0xf]  ;;  %v8630_v55 = vor.u32 %v12054_v43, %v8629_v37  ;;  %5609 = vmatpush.bf16.msrb.mxu3 %v9462_v53 }
 0x3cb   :  { %v12118_v50 = vld [vmem:[#allocation8 + $0x674] sm:$0xf0] }
 0x3cc   :  { %v9173_v56 = vld [vmem:[#allocation8 + $0x898] sm:$0xf]  ;;  %v8886_v0 = vor.u32 %v12118_v50, %v8885_v48  ;;  %5572 = vmatpush.bf16.msra.mxu0 %v8630_v55 }
 0x3cd   :  { %v12190_v57 = vld [vmem:[#allocation8 + $0x8b4] sm:$0xf0] }
 0x3ce   :  { %v9429_v46 = vld [vmem:[#allocation8 + $0xa98] sm:$0xf]  ;;  %v9174_v1 = vor.u32 %v12190_v57, %v9173_v56  ;;  %5585 = vmatpush.bf16.msra.mxu1 %v8886_v0  ;;  %v13520_v0 = vpop.f32.mrf.mxu3 }
 0x3cf   :  { %v12254_v60 = vld [vmem:[#allocation8 + $0xab4] sm:$0xf0] }
 0x3d0   :  { %v8597_v61 = vld [vmem:[#allocation8 + $0x418] sm:$0xf]  ;;  %v9430_v14 = vor.u32 %v12254_v60, %v9429_v46  ;;  %5597 = vmatpush.bf16.msrb.mxu2 %v9174_v1 }
 0x3d1   :  { %v12046_v62 = vld [vmem:[#allocation8 + $0x434] sm:$0xf0] }
 0x3d2   :  { %v9845_v35 = vld [vmem:[#allocation8 + $0xdd8] sm:$0xf]  ;;  %v8598_v5 = vor.u32 %v12046_v62, %v8597_v61  ;;  %5610 = vmatpush.bf16.msrb.mxu3 %v9430_v14 }
 0x3d3   :  { %v12358_v63 = vld [vmem:[#allocation8 + $0xdf4] sm:$0xf0] }
 0x3d4   :  { %v8853_v3 = vld [vmem:[#allocation8 + $0x618] sm:$0xf]  ;;  %v9846_v12 = vor.u32 %v12358_v63, %v9845_v35  ;;  %5573 = vmatpush.bf16.msra.mxu0 %v8598_v5 }
 0x3d5   :  { %v12110_v54 = vld [vmem:[#allocation8 + $0x634] sm:$0xf0] }
 0x3d6   :  { %v9141_v6 = vld [vmem:[#allocation8 + $0x858] sm:$0xf]  ;;  %v8854_v21 = vor.u32 %v12110_v54, %v8853_v3 }
 0x3d7   :  { %v12182_v7 = vld [vmem:[#allocation8 + $0x874] sm:$0xf0]  ;;  %5574 = vmatmul.bf16.vlgmr.msra.gmra.mxu0 %v13357_v20 }
 0x3d8   :  { %v9397_v9 = vld [vmem:[#allocation8 + $0xa58] sm:$0xf]  ;;  %v9142_v22 = vor.u32 %v12182_v7, %v9141_v6  ;;  %5618 = vmatpush.bf16.msrb.mxu0 %v9846_v12  ;;  %5586 = vmatpush.bf16.msra.mxu1 %v8854_v21 }
 0x3d9   :  { %v12246_v49 = vld [vmem:[#allocation8 + $0xa74] sm:$0xf0] }
 0x3da   :  { %v10101_v13 = vld [vmem:[#allocation8 + $0xfd8] sm:$0xf]  ;;  %v9398_v28 = vor.u32 %v12246_v49, %v9397_v9  ;;  %5598 = vmatpush.bf16.msrb.mxu2 %v9142_v22  ;;  %v5354_v22 = vpop.f32.mrf.mxu1 }
 0x3db   :  { %v12422_v4 = vld [vmem:[#allocation8 + $0xff4] sm:$0xf0]  ;;  %5587 = vmatmul.bf16.vlgmr.msra.gmra.mxu1 %v13359_v24 }
 0x3dc   :  { %v9813_v2 = vld [vmem:[#allocation8 + $0xd98] sm:$0xf]  ;;  %v10102_v29 = vor.u32 %v12422_v4, %v10101_v13  ;;  %5611 = vmatpush.bf16.msrb.mxu3 %v9398_v28 }
 0x3dd   :  { %v12350_v18 = vld [vmem:[#allocation8 + $0xdb4] sm:$0xf0] }
 0x3de   :  { %v9109_v26 = vld [vmem:[#allocation8 + $0x818] sm:$0xf]  ;;  %v9814_v33 = vor.u32 %v12350_v18, %v9813_v2  ;;  %5631 = vmatpush.bf16.msrb.mxu1 %v10102_v29  ;;  %v5341_v2 = vpop.f32.mrf.mxu0 }
 0x3df   :  { %v12174_v16 = vld [vmem:[#allocation8 + $0x834] sm:$0xf0]  ;;  %v5342_v21 = vadd.f32 %v5341_v2, %v13517_v52 }
 0x3e0   :  { %v9365_v31 = vld [vmem:[#allocation8 + $0xa18] sm:$0xf]  ;;  %v9110_v8 = vor.u32 %v12174_v16, %v9109_v26  ;;  %5619 = vmatpush.bf16.msrb.mxu0 %v9814_v33 }
 0x3e1   :  { %v12238_v32 = vld [vmem:[#allocation8 + $0xa34] sm:$0xf0] }
 0x3e2   :  { %v10069_v36 = vld [vmem:[#allocation8 + $0xf98] sm:$0xf]  ;;  %v9366_v53 = vor.u32 %v12238_v32, %v9365_v31  ;;  %5599 = vmatpush.bf16.msrb.mxu2 %v9110_v8 }
 0x3e3   :  { %v12414_v37 = vld [vmem:[#allocation8 + $0xfb4] sm:$0xf0] }
 0x3e4   :  { %v10357_v43 = vld [vmem:[#allocation8 + $0x11d8] sm:$0xf]  ;;  %v10070_v55 = vor.u32 %v12414_v37, %v10069_v36  ;;  %5612 = vmatpush.bf16.msrb.mxu3 %v9366_v53 }
 0x3e5   :  { %v12486_v44 = vld [vmem:[#allocation8 + $0x11f4] sm:$0xf0]  ;;  %5600 = vmatmul.bf16.vlgmr.msrb.gmra.mxu2 %v13367_v34 }
 0x3e6   :  { %v10613_v45 = vld [vmem:[#allocation8 + $0x13d8] sm:$0xf]  ;;  %v10358_v56 = vor.u32 %v12486_v44, %v10357_v43  ;;  %5632 = vmatpush.bf16.msrb.mxu1 %v10070_v55  ;;  %v5382_v43 = vpop.f32.mrf.mxu3  ;;  %v5355_v44 = vadd.f32 %v5354_v22, %v5342_v21 }
 0x3e7   :  { %v12550_v47 = vld [vmem:[#allocation8 + $0x13f4] sm:$0xf0]  ;;  %5613 = vmatmul.bf16.vlgmr.msrb.gmra.mxu3 %v13373_v42 }
 0x3e8   :  { %v9781_v48 = vld [vmem:[#allocation8 + $0xd58] sm:$0xf]  ;;  %v10614_v57 = vor.u32 %v12550_v47, %v10613_v45  ;;  %5644 = vmatpush.bf16.msra.mxu2 %v10358_v56  ;;  %v5367_v56 = vpop.f32.mrf.mxu2 }
 0x3e9   :  { %v12342_v50 = vld [vmem:[#allocation8 + $0xd74] sm:$0xf0] }
 0x3ea   :  { %v10037_v46 = vld [vmem:[#allocation8 + $0xf58] sm:$0xf]  ;;  %v9782_v61 = vor.u32 %v12342_v50, %v9781_v48  ;;  %5657 = vmatpush.bf16.msra.mxu3 %v10614_v57 }
 0x3eb   :  { %v12406_v58 = vld [vmem:[#allocation8 + $0xf74] sm:$0xf0] }
 0x3ec   :  { %v10325_v60 = vld [vmem:[#allocation8 + $0x1198] sm:$0xf]  ;;  %v10038_v54 = vor.u32 %v12406_v58, %v10037_v46  ;;  %5620 = vmatpush.bf16.msrb.mxu0 %v9782_v61  ;;  %v5368_v61 = vadd.f32 %v5367_v56, %v5355_v44 }
 0x3ed   :  { %v12478_v62 = vld [vmem:[#allocation8 + $0x11b4] sm:$0xf0] }
 0x3ee   :  { %v10581_v35 = vld [vmem:[#allocation8 + $0x1398] sm:$0xf]  ;;  %v10326_v14 = vor.u32 %v12478_v62, %v10325_v60  ;;  %5633 = vmatpush.bf16.msrb.mxu1 %v10038_v54 }
 0x3ef   :  { %v12542_v63 = vld [vmem:[#allocation8 + $0x13b4] sm:$0xf0] }
 0x3f0   :  { %v9749_v1 = vld [vmem:[#allocation8 + $0xd18] sm:$0xf]  ;;  %v10582_v5 = vor.u32 %v12542_v63, %v10581_v35  ;;  %5645 = vmatpush.bf16.msra.mxu2 %v10326_v14 }
 0x3f1   :  { %v12334_v3 = vld [vmem:[#allocation8 + $0xd34] sm:$0xf0] }
 0x3f2   :  { %v10005_v6 = vld [vmem:[#allocation8 + $0xf18] sm:$0xf]  ;;  %v9750_v11 = vor.u32 %v12334_v3, %v9749_v1  ;;  %5658 = vmatpush.bf16.msra.mxu3 %v10582_v5  ;;  %v5343_v1 = vpop.f32.mrf.mxu0  ;;  %v13527_v3 = vadd.f32 %v13520_v0, %v5368_v61 }
 0x3f3   :  { %v12398_v7 = vld [vmem:[#allocation8 + $0xf34] sm:$0xf0]  ;;  %v8311_v1 = vld [vmem:[#allocation8 + $0x1f8] sm:$0xf0] }
 0x3f4   :  { %v10293_v9 = vld [vmem:[#allocation8 + $0x1158] sm:$0xf]  ;;  %v10006_v18 = vor.u32 %v12398_v7, %v10005_v6  ;;  %5621 = vmatpush.bf16.msrb.mxu0 %v9750_v11 }
 0x3f5   :  { %v12470_v49 = vld [vmem:[#allocation8 + $0x1174] sm:$0xf0] }
 0x3f6   :  { %v10549_v12 = vld [vmem:[#allocation8 + $0x1358] sm:$0xf]  ;;  %v10294_v26 = vor.u32 %v12470_v49, %v10293_v9  ;;  %5634 = vmatpush.bf16.msrb.mxu1 %v10006_v18  ;;  %v5356_v9 = vpop.f32.mrf.mxu1 }
 0x3f7   :  { %v12534_v13 = vld [vmem:[#allocation8 + $0x1374] sm:$0xf0] }
 0x3f8   :  { %v9717_v4 = vld [vmem:[#allocation8 + $0xcd8] sm:$0xf]  ;;  %v10550_v28 = vor.u32 %v12534_v13, %v10549_v12  ;;  %5646 = vmatpush.bf16.msra.mxu2 %v10294_v26 }
 0x3f9   :  { %v12326_v15 = vld [vmem:[#allocation8 + $0xcf4] sm:$0xf0] }
 0x3fa   :  { %v9973_v29 = vld [vmem:[#allocation8 + $0xed8] sm:$0xf]  ;;  %v9718_v32 = vor.u32 %v12326_v15, %v9717_v4  ;;  %5659 = vmatpush.bf16.msra.mxu3 %v10550_v28 }
 0x3fb   :  { %v12390_v16 = vld [vmem:[#allocation8 + $0xef4] sm:$0xf0] }
 0x3fc   :  { %v10261_v31 = vld [vmem:[#allocation8 + $0x1118] sm:$0xf]  ;;  %v9974_v8 = vor.u32 %v12390_v16, %v9973_v29  ;;  %5622 = vmatpush.bf16.msrb.mxu0 %v9718_v32  ;;  %v13529_v16 = vpop.f32.mrf.mxu3 }
 0x3fd   :  { %v12462_v33 = vld [vmem:[#allocation8 + $0x1134] sm:$0xf0] }
 0x3fe   :  { %v10517_v36 = vld [vmem:[#allocation8 + $0x1318] sm:$0xf]  ;;  %v10262_v52 = vor.u32 %v12462_v33, %v10261_v31  ;;  %5635 = vmatpush.bf16.msrb.mxu1 %v9974_v8 }
 0x3ff   :  { %v12526_v37 = vld [vmem:[#allocation8 + $0x1334] sm:$0xf0] }
 0x400   :  { %v9685_v45 = vld [vmem:[#allocation8 + $0xc98] sm:$0xf]  ;;  %v10518_v48 = vor.u32 %v12526_v37, %v10517_v36  ;;  %5647 = vmatpush.bf16.msra.mxu2 %v10262_v52  ;;  %v5369_v37 = vpop.f32.mrf.mxu2 }
 0x401   :  { %v12318_v47 = vld [vmem:[#allocation8 + $0xcb4] sm:$0xf0]  ;;  %v11954_v37 = vld [vmem:[#allocation8 + $0x15c] sm:$0xf] }
 0x402   :  { %v9941_v50 = vld [vmem:[#allocation8 + $0xe98] sm:$0xf]  ;;  %v9686_v57 = vor.u32 %v12318_v47, %v9685_v45  ;;  %5660 = vmatpush.bf16.msra.mxu3 %v10518_v48 }
 0x403   :  { %v12382_v53 = vld [vmem:[#allocation8 + $0xeb4] sm:$0xf0] }
 0x404   :  { %v10229_v55 = vld [vmem:[#allocation8 + $0x10d8] sm:$0xf]  ;;  %v9942_v63 = vor.u32 %v12382_v53, %v9941_v50  ;;  %5623 = vmatpush.bf16.msrb.mxu0 %v9686_v57 }
 0x405   :  { %v12454_v46 = vld [vmem:[#allocation8 + $0x10f4] sm:$0xf0] }
 0x406   :  { %v10485_v58 = vld [vmem:[#allocation8 + $0x12d8] sm:$0xf]  ;;  %v10230_v54 = vor.u32 %v12454_v46, %v10229_v55  ;;  %5636 = vmatpush.bf16.msrb.mxu1 %v9942_v63  ;;  %v8567_v63 = vld [vmem:[#allocation8 + $0x3f8] sm:$0xf0] }
 0x407   :  { %v12518_v60 = vld [vmem:[#allocation8 + $0x12f4] sm:$0xf0] }
 0x408   :  { %v9653_v62 = vld [vmem:[#allocation8 + $0xc58] sm:$0xf]  ;;  %v10486_v14 = vor.u32 %v12518_v60, %v10485_v58  ;;  %5648 = vmatpush.bf16.msra.mxu2 %v10230_v54  ;;  %v12098_v54 = vld [vmem:[#allocation8 + $0x5dc] sm:$0xf] }
 0x409   :  { %v12310_v35 = vld [vmem:[#allocation8 + $0xc74] sm:$0xf0] }
 0x40a   :  { %v9909_v5 = vld [vmem:[#allocation8 + $0xe58] sm:$0xf]  ;;  %v9654_v11 = vor.u32 %v12310_v35, %v9653_v62  ;;  %5661 = vmatpush.bf16.msra.mxu3 %v10486_v14  ;;  %v11970_v62 = vld [vmem:[#allocation8 + $0x1dc] sm:$0xf] }
 0x40b   :  { %v12374_v6 = vld [vmem:[#allocation8 + $0xe74] sm:$0xf0]  ;;  %v12034_v35 = vld [vmem:[#allocation8 + $0x3dc] sm:$0xf] }
 0x40c   :  { %v10197_v7 = vld [vmem:[#allocation8 + $0x1098] sm:$0xf]  ;;  %v9910_v2 = vor.u32 %v12374_v6, %v9909_v5  ;;  %5624 = vmatpush.bf16.msrb.mxu0 %v9654_v11  ;;  %v8823_v14 = vld [vmem:[#allocation8 + $0x5f8] sm:$0xf0]  ;;  %v5395_v11 = vpop.f32.mrf.mxu3 }
 0x40d   :  { %v12446_v49 = vld [vmem:[#allocation8 + $0x10b4] sm:$0xf0]  ;;  %v11938_v11 = vld [vmem:[#allocation8 + $0xdc] sm:$0xf] }
 0x40e   :  { %v10453_v12 = vld [vmem:[#allocation8 + $0x1298] sm:$0xf]  ;;  %v10198_v21 = vor.u32 %v12446_v49, %v10197_v7  ;;  %5637 = vmatpush.bf16.msrb.mxu1 %v9910_v2  ;;  %v11962_v2 = vld [vmem:[#allocation8 + $0x19c] sm:$0xf] }
 0x40f   :  { %v12510_v13 = vld [vmem:[#allocation8 + $0x12b4] sm:$0xf0] }
 0x410   :  { %v9621_v4 = vld [vmem:[#allocation8 + $0xc18] sm:$0xf]  ;;  %v10454_v22 = vor.u32 %v12510_v13, %v10453_v12  ;;  %5649 = vmatpush.bf16.msra.mxu2 %v10198_v21  ;;  %v8570_v12 = vor.u32 %v12034_v35, %v8567_v63  ;;  %v989_v13 = vperm.slane %v13504_v17, 5  ;;  %v8215_v35 = vld [vmem:[#allocation8 + $0x138] sm:$0xf0] }
 0x411   :  { %v12302_v15 = vld [vmem:[#allocation8 + $0xc34] sm:$0xf0]  ;;  %v12074_v63 = vld [vmem:[#allocation8 + $0x51c] sm:$0xf] }
 0x412   :  { %v10869_v18 = vld [vmem:[#allocation8 + $0x15d8] sm:$0xf]  ;;  %v9622_v31 = vor.u32 %v12302_v15, %v9621_v4  ;;  %5662 = vmatpush.bf16.msra.mxu3 %v10454_v22  ;;  %v8314_v4 = vor.u32 %v11970_v62, %v8311_v1  ;;  %v8826_v15 = vor.u32 %v12098_v54, %v8823_v14  ;;  %v8279_v22 = vld [vmem:[#allocation8 + $0x1b8] sm:$0xf0]  ;;  %v5394_v17 = vadd.f32 %v13529_v16, %v989_v13 }
 0x413   :  { %v12614_v0 = vld [vmem:[#allocation8 + $0x15f4] sm:$0xf0]  ;;  %v8727_v1 = vld [vmem:[#allocation8 + $0x538] sm:$0xf0] }
 0x414   :  { %v9877_v26 = vld [vmem:[#allocation8 + $0xe18] sm:$0xf]  ;;  %v10870_v43 = vor.u32 %v12614_v0, %v10869_v18  ;;  %5625 = vmatpush.bf16.msrb.mxu0 %v9622_v31  ;;  %v12026_v18 = vld [vmem:[#allocation8 + $0x39c] sm:$0xf] }
 0x415   :  { %v12366_v28 = vld [vmem:[#allocation8 + $0xe34] sm:$0xf0]  ;;  %v8535_v0 = vld [vmem:[#allocation8 + $0x3b8] sm:$0xf0] }
 0x416   :  { %v10165_v29 = vld [vmem:[#allocation8 + $0x1058] sm:$0xf]  ;;  %v9878_v47 = vor.u32 %v12366_v28, %v9877_v26  ;;  %v12090_v26 = vld [vmem:[#allocation8 + $0x59c] sm:$0xf] }
 0x417   :  { %v12438_v32 = vld [vmem:[#allocation8 + $0x1074] sm:$0xf0]  ;;  %5626 = vmatmul.bf16.vlgmr.msrb.gmra.mxu0 %v13369_v38  ;;  %v8791_v28 = vld [vmem:[#allocation8 + $0x5b8] sm:$0xf0] }
 0x418   :  { %v10421_v33 = vld [vmem:[#allocation8 + $0x1258] sm:$0xf]  ;;  %v10166_v48 = vor.u32 %v12438_v32, %v10165_v29  ;;  %5670 = vmatpush.bf16.msra.mxu0 %v10870_v43  ;;  %5638 = vmatpush.bf16.msrb.mxu1 %v9878_v47  ;;  %v8538_v32 = vor.u32 %v12026_v18, %v8535_v0  ;;  %v12018_v43 = vld [vmem:[#allocation8 + $0x35c] sm:$0xf]  ;;  %v5432_v18 = vpop.f32.mrf.mxu2 }
 0x419   :  { %v12502_v36 = vld [vmem:[#allocation8 + $0x1274] sm:$0xf0]  ;;  %v8247_v47 = vld [vmem:[#allocation8 + $0x178] sm:$0xf0] }
 0x41a   :  { %v10933_v44 = vld [vmem:[#allocation8 + $0x1658] sm:$0xf]  ;;  %v10422_v50 = vor.u32 %v12502_v36, %v10421_v33  ;;  %5650 = vmatpush.bf16.msra.mxu2 %v10166_v48  ;;  %v8282_v33 = vor.u32 %v11962_v2, %v8279_v22  ;;  %v8794_v36 = vor.u32 %v12090_v26, %v8791_v28  ;;  %v8695_v2 = vld [vmem:[#allocation8 + $0x4f8] sm:$0xf0] }
 0x41b   :  { %v12630_v45 = vld [vmem:[#allocation8 + $0x1674] sm:$0xf0]  ;;  %5639 = vmatmul.bf16.vlgmr.msrb.gmra.mxu1 %v13371_v39 }
 0x41c   :  { %v10837_v8 = vld [vmem:[#allocation8 + $0x1598] sm:$0xf]  ;;  %v10934_v57 = vor.u32 %v12630_v45, %v10933_v44  ;;  %5663 = vmatpush.bf16.msra.mxu3 %v10422_v50  ;;  %v8503_v44 = vld [vmem:[#allocation8 + $0x378] sm:$0xf0] }
 0x41d   :  { %v12606_v52 = vld [vmem:[#allocation8 + $0x15b4] sm:$0xf0]  ;;  %v8506_v16 = vor.u32 %v12018_v43, %v8503_v44  ;;  %v8151_v43 = vld [vmem:[#allocation8 + $0xb8] sm:$0xf0] }
 0x41e   :  { %v10133_v53 = vld [vmem:[#allocation8 + $0x1018] sm:$0xf]  ;;  %v10838_v61 = vor.u32 %v12606_v52, %v10837_v8  ;;  %5689 = vmatpush.bf16.msra.mxu1 %v10934_v57  ;;  %v12082_v8 = vld [vmem:[#allocation8 + $0x55c] sm:$0xf]  ;;  %v8250_v57 = vor.u32 %v11954_v37, %v8247_v47 }
 0x41f   :  { %v12430_v55 = vld [vmem:[#allocation8 + $0x1034] sm:$0xf0]  ;;  %v8759_v52 = vld [vmem:[#allocation8 + $0x578] sm:$0xf0] }
 0x420   :  { %v10389_v56 = vld [vmem:[#allocation8 + $0x1218] sm:$0xf]  ;;  %v10134_v5 = vor.u32 %v12430_v55, %v10133_v53  ;;  %5671 = vmatpush.bf16.msra.mxu0 %v10838_v61  ;;  %v5406_v53 = vpop.f32.mrf.mxu0  ;;  %v8471_v61 = vld [vmem:[#allocation8 + $0x338] sm:$0xf0] }
 0x421   :  { %v12494_v46 = vld [vmem:[#allocation8 + $0x1234] sm:$0xf0]  ;;  %v5407_v55 = vadd.f32 %v5406_v53, %v5394_v17  ;;  %v11930_v17 = vld [vmem:[#allocation8 + $0x9c] sm:$0xf] }
 0x422   :  { %v10901_v58 = vld [vmem:[#allocation8 + $0x1618] sm:$0xf]  ;;  %v10390_v6 = vor.u32 %v12494_v46, %v10389_v56  ;;  %5651 = vmatpush.bf16.msra.mxu2 %v10134_v5  ;;  %v5419_v56 = vpop.f32.mrf.mxu1  ;;  %v8762_v46 = vor.u32 %v12082_v8, %v8759_v52  ;;  %v12058_v44 = vld [vmem:[#allocation8 + $0x49c] sm:$0xf]  ;;  %v5445_v52 = vpop.f32.mrf.mxu3 }
 0x423   :  { %v12622_v60 = vld [vmem:[#allocation8 + $0x1634] sm:$0xf0]  ;;  %v5420_v54 = vadd.f32 %v5419_v56, %v5407_v55  ;;  %v9079_v53 = vld [vmem:[#allocation8 + $0x7f8] sm:$0xf0]  ;;  %v8154_v55 = vor.u32 %v11930_v17, %v8151_v43 }
 0x424   :  { %v10805_v7 = vld [vmem:[#allocation8 + $0x1558] sm:$0xf]  ;;  %v10902_v49 = vor.u32 %v12622_v60, %v10901_v58  ;;  %5664 = vmatpush.bf16.msra.mxu3 %v10390_v6  ;;  %v11946_v58 = vld [vmem:[#allocation8 + $0x11c] sm:$0xf] }
 0x425   :  { %v12598_v9 = vld [vmem:[#allocation8 + $0x1574] sm:$0xf0]  ;;  %5652 = vmatmul.bf16.vlgmr.msra.gmra.mxu2 %v13383_v23  ;;  %v12010_v60 = vld [vmem:[#allocation8 + $0x31c] sm:$0xf]  ;;  %v5433_v22 = vadd.f32 %v5432_v18, %v5420_v54 }
 0x426   :  { %v10806_v21 = vor.u32 %v12598_v9, %v10805_v7  ;;  %v10773_v29 = vld [vmem:[#allocation8 + $0x1518] sm:$0xf]  ;;  %5690 = vmatpush.bf16.msra.mxu1 %v10902_v49  ;;  %5709 = vmatpush.bf16.msrb.mxu2 %v8570_v12  ;;  %v8474_v6 = vor.u32 %v12010_v60, %v8471_v61  ;;  %v8218_v7 = vor.u32 %v11946_v58, %v8215_v35  ;;  %v12002_v49 = vld [vmem:[#allocation8 + $0x2dc] sm:$0xf] }
 0x427   :  { %v12590_v31 = vld [vmem:[#allocation8 + $0x1534] sm:$0xf0]  ;;  %5665 = vmatmul.bf16.vlgmr.msra.gmra.mxu3 %v13387_v30  ;;  %v8730_v9 = vor.u32 %v12074_v63, %v8727_v1  ;;  %v8439_v12 = vld [vmem:[#allocation8 + $0x2f8] sm:$0xf0]  ;;  %v5434_v63 = vpop.f32.mrf.mxu2 }
 0x428   :  { %5722 = vmatpush.bf16.msrb.mxu3 %v8826_v15  ;;  %5672 = vmatpush.bf16.msra.mxu0 %v10806_v21  ;;  %v10774_v45 = vor.u32 %v12590_v31, %v10773_v29  ;;  %v10741_v48 = vld [vmem:[#allocation8 + $0x14d8] sm:$0xf]  ;;  %v12066_v15 = vld [vmem:[#allocation8 + $0x4dc] sm:$0xf]  ;;  %v5408_v26 = vpop.f32.mrf.mxu0  ;;  %v8442_v28 = vor.u32 %v12002_v49, %v8439_v12 }
 0x429   :  { %v12582_v50 = vld [vmem:[#allocation8 + $0x14f4] sm:$0xf0]  ;;  %v8375_v58 = vld [vmem:[#allocation8 + $0x278] sm:$0xf0] }
 0x42a   :  { %5696 = vmatpush.bf16.msrb.mxu1 %v8314_v4  ;;  %5710 = vmatpush.bf16.msrb.mxu2 %v8538_v32  ;;  %v10742_v62 = vor.u32 %v12582_v50, %v10741_v48  ;;  %v10709_v14 = vld [vmem:[#allocation8 + $0x1498] sm:$0xf]  ;;  %v8183_v4 = vld [vmem:[#allocation8 + $0xf8] sm:$0xf0]  ;;  %v5421_v29 = vpop.f32.mrf.mxu1  ;;  %v8698_v32 = vor.u32 %v12066_v15, %v8695_v2  ;;  %v5447_v26 = vpop.f32.mrf.mxu3 }
 0x42b   :  { %v12574_v5 = vld [vmem:[#allocation8 + $0x14b4] sm:$0xf0]  ;;  %v8186_v31 = vor.u32 %v11938_v11, %v8183_v4  ;;  %10945 = vmatmul.msk.bf16.vlgmr.msra.gmra.mxu1 %vm4600_vm0, %v13379_v40  ;;  %v12162_v50 = vld [vmem:[#allocation8 + $0x7dc] sm:$0xf] }
 0x42c   :  { %5723 = vmatpush.bf16.msrb.mxu3 %v8794_v36  ;;  %5673 = vmatpush.bf16.msra.mxu0 %v10774_v45  ;;  %v10710_v13 = vor.u32 %v12574_v5, %v10709_v14  ;;  %v10677_v0 = vld [vmem:[#allocation8 + $0x1458] sm:$0xf]  ;;  %v8407_v36 = vld [vmem:[#allocation8 + $0x2b8] sm:$0xf0]  ;;  %v9082_v1 = vor.u32 %v12162_v50, %v9079_v53 }
 0x42d   :  { %v12566_v21 = vld [vmem:[#allocation8 + $0x1474] sm:$0xf0]  ;;  %v8663_v45 = vld [vmem:[#allocation8 + $0x4b8] sm:$0xf0] }
 0x42e   :  { %5697 = vmatpush.bf16.msrb.mxu1 %v8282_v33  ;;  %5711 = vmatpush.bf16.msrb.mxu2 %v8506_v16  ;;  %v11994_v33 = vld [vmem:[#allocation8 + $0x29c] sm:$0xf]  ;;  %v10678_v37 = vor.u32 %v12566_v21, %v10677_v0  ;;  %v10645_v47 = vld [vmem:[#allocation8 + $0x1418] sm:$0xf]  ;;  %v13539_v16 = vadd.f32 %v5445_v52, %v5433_v22  ;;  %v8666_v56 = vor.u32 %v12058_v44, %v8663_v45 }
 0x42f   :  { %v12558_v8 = vld [vmem:[#allocation8 + $0x1434] sm:$0xf0]  ;;  %v8410_v48 = vor.u32 %v11994_v33, %v8407_v36  ;;  %v8119_v61 = vld [vmem:[#allocation8 + $0x78] sm:$0xf0] }
 0x430   :  { %5724 = vmatpush.bf16.msrb.mxu3 %v8762_v46  ;;  %5674 = vmatpush.bf16.msra.mxu0 %v10742_v62  ;;  %v11986_v46 = vld [vmem:[#allocation8 + $0x25c] sm:$0xf]  ;;  %v10646_v60 = vor.u32 %v12558_v8, %v10645_v47 }
 0x431   :  { %v12050_v62 = vld [vmem:[#allocation8 + $0x45c] sm:$0xf]  ;;  %v8378_v54 = vor.u32 %v11986_v46, %v8375_v58 }
 0x432   :  { %5698 = vmatpush.bf16.msrb.mxu1 %v8250_v57  ;;  %5712 = vmatpush.bf16.msrb.mxu2 %v8474_v6  ;;  %v11922_v57 = vld [vmem:[#allocation8 + $0x5c] sm:$0xf] }
 0x433   :  { %v8631_v35 = vld [vmem:[#allocation8 + $0x478] sm:$0xf0] }
 0x434   :  { %5725 = vmatpush.bf16.msrb.mxu3 %v8730_v9  ;;  %5675 = vmatpush.bf16.msra.mxu0 %v10710_v13  ;;  %v11914_v14 = vld [vmem:[#allocation8 + $0x1c] sm:$0xf]  ;;  %v8122_v9 = vor.u32 %v11922_v57, %v8119_v61  ;;  %v8634_v11 = vor.u32 %v12050_v62, %v8631_v35 }
 0x435   :  { %v8087_v5 = vld [vmem:[#allocation8 + $0x38] sm:$0xf0] }
 0x436   :  { %5699 = vmatpush.bf16.msrb.mxu1 %v8218_v7  ;;  %5713 = vmatpush.bf16.msrb.mxu2 %v8442_v28  ;;  %v12154_v6 = vld [vmem:[#allocation8 + $0x79c] sm:$0xf]  ;;  %v8090_v17 = vor.u32 %v11914_v14, %v8087_v5 }
 0x437   :  { %v9047_v7 = vld [vmem:[#allocation8 + $0x7b8] sm:$0xf0] }
 0x438   :  { %5726 = vmatpush.bf16.msrb.mxu3 %v8698_v32  ;;  %5676 = vmatpush.bf16.msra.mxu0 %v10678_v37  ;;  %v11978_v49 = vld [vmem:[#allocation8 + $0x21c] sm:$0xf]  ;;  %v9050_v18 = vor.u32 %v12154_v6, %v9047_v7  ;;  %v5458_v6 = vpop.f32.mrf.mxu0  ;;  %v5471_v7 = vpop.f32.mrf.mxu1 }
 0x439   :  { %v8343_v12 = vld [vmem:[#allocation8 + $0x238] sm:$0xf0] }
 0x43a   :  { %5700 = vmatpush.bf16.msrb.mxu1 %v8186_v31  ;;  %5714 = vmatpush.bf16.msrb.mxu2 %v8410_v48  ;;  %v12042_v13 = vld [vmem:[#allocation8 + $0x41c] sm:$0xf]  ;;  %v8346_v28 = vor.u32 %v11978_v49, %v8343_v12 }
 0x43b   :  { %v8599_v4 = vld [vmem:[#allocation8 + $0x438] sm:$0xf0] }
 0x43c   :  { %5727 = vmatpush.bf16.msrb.mxu3 %v8666_v56  ;;  %5677 = vmatpush.bf16.msra.mxu0 %v10646_v60  ;;  %v12226_v15 = vld [vmem:[#allocation8 + $0x9dc] sm:$0xf]  ;;  %v8602_v33 = vor.u32 %v12042_v13, %v8599_v4 }
 0x43d   :  { %v9335_v2 = vld [vmem:[#allocation8 + $0x9f8] sm:$0xf0] }
 0x43e   :  { %5701 = vmatpush.bf16.msrb.mxu1 %v8154_v55  ;;  %v12290_v0 = vld [vmem:[#allocation8 + $0xbdc] sm:$0xf]  ;;  %5715 = vmatpush.bf16.msrb.mxu2 %v8378_v54  ;;  %v9338_v36 = vor.u32 %v12226_v15, %v9335_v2 }
 0x43f   :  { %v9591_v21 = vld [vmem:[#allocation8 + $0xbf8] sm:$0xf0]  ;;  %5678 = vmatmul.bf16.vlgmr.msra.gmra.mxu0 %v13385_v25 }
 0x440   :  { %5735 = vmatpush.bf16.msrb.mxu0 %v9082_v1  ;;  %v12354_v22 = vld [vmem:[#allocation8 + $0xddc] sm:$0xf]  ;;  %5728 = vmatpush.bf16.msrb.mxu3 %v8634_v11  ;;  %v9594_v37 = vor.u32 %v12290_v0, %v9591_v21  ;;  %v13246_v1 = vmov 64.0  }
 0x441   :  { %v9847_v29 = vld [vmem:[#allocation8 + $0xdf8] sm:$0xf0]  ;;  %12892 = vrcp.f32 %v13246_v1 }
 0x442   :  { %v12146_v31 = vld [vmem:[#allocation8 + $0x75c] sm:$0xf]  ;;  %5702 = vmatpush.bf16.msrb.mxu1 %v8122_v9  ;;  %v9850_v47 = vor.u32 %v12354_v22, %v9847_v29  ;;  %5716 = vmatpush.bf16.msrb.mxu2 %v8346_v28  ;;  %v5459_v9 = vadd.f32 %v5458_v6, %v13539_v16 }
 0x443   :  { %v9015_v32 = vld [vmem:[#allocation8 + $0x778] sm:$0xf0] }
 0x444   :  { %v12218_v43 = vld [vmem:[#allocation8 + $0x99c] sm:$0xf]  ;;  %5736 = vmatpush.bf16.msrb.mxu0 %v9050_v18  ;;  %v9018_v8 = vor.u32 %v12146_v31, %v9015_v32  ;;  %5729 = vmatpush.bf16.msrb.mxu3 %v8602_v33 }
 0x445   :  { %v9303_v44 = vld [vmem:[#allocation8 + $0x9b8] sm:$0xf0]  ;;  %5717 = vmatmul.bf16.vlgmr.msrb.gmra.mxu2 %v13361_v27 }
 0x446   :  { %v12282_v45 = vld [vmem:[#allocation8 + $0xb9c] sm:$0xf]  ;;  %5703 = vmatpush.bf16.msrb.mxu1 %v8090_v17  ;;  %5761 = vmatpush.bf16.msra.mxu2 %v9594_v37  ;;  %v9306_v56 = vor.u32 %v12218_v43, %v9303_v44  ;;  %v5484_v43 = vpop.f32.mrf.mxu2 }
 0x447   :  { %v9559_v52 = vld [vmem:[#allocation8 + $0xbb8] sm:$0xf0]  ;;  %5730 = vmatmul.bf16.vlgmr.msrb.gmra.mxu3 %v13357_v20  ;;  %v5472_v20 = vadd.f32 %v5471_v7, %v5459_v9 }
 0x448   :  { %v12346_v48 = vld [vmem:[#allocation8 + $0xd9c] sm:$0xf]  ;;  %v9562_v57 = vor.u32 %v12282_v45, %v9559_v52  ;;  %5774 = vmatpush.bf16.msra.mxu3 %v9850_v47  ;;  %5737 = vmatpush.bf16.msrb.mxu0 %v9018_v8  ;;  %v5460_v52 = vpop.f32.mrf.mxu0 }
 0x449   :  { %v9815_v50 = vld [vmem:[#allocation8 + $0xdb8] sm:$0xf0]  ;;  %5704 = vmatmul.bf16.vlgmr.msrb.gmra.mxu1 %v13355_v19  ;;  %v13546_v19 = vpop.eup %12892  ;;  %v5485_v8 = vadd.f32 %v5484_v43, %v5472_v20 }
 0x44a   :  { %v12138_v53 = vld [vmem:[#allocation8 + $0x71c] sm:$0xf]  ;;  %5748 = vmatpush.bf16.msra.mxu1 %v9338_v36  ;;  %v9818_v60 = vor.u32 %v12346_v48, %v9815_v50  ;;  %5762 = vmatpush.bf16.msra.mxu2 %v9562_v57  ;;  %v5890_v47 = vmul.f32 64.0, %v13546_v19  ;;  %v5473_v48 = vpop.f32.mrf.mxu1  ;;  %vm5894_vm2 = vweird.f32 %v13546_v19 }
 0x44b   :  { %v8983_v55 = vld [vmem:[#allocation8 + $0x738] sm:$0xf0] }
 0x44c   :  { %v12210_v46 = vld [vmem:[#allocation8 + $0x95c] sm:$0xf]  ;;  %v8986_v61 = vor.u32 %v12138_v53, %v8983_v55  ;;  %5775 = vmatpush.bf16.msra.mxu3 %v9818_v60 }
 0x44d   :  { %v9271_v58 = vld [vmem:[#allocation8 + $0x978] sm:$0xf0] }
 0x44e   :  { %v12274_v62 = vld [vmem:[#allocation8 + $0xb5c] sm:$0xf]  ;;  %5749 = vmatpush.bf16.msra.mxu1 %v9306_v56  ;;  %v9274_v11 = vor.u32 %v12210_v46, %v9271_v58  ;;  %5738 = vmatpush.bf16.msrb.mxu0 %v8986_v61 }
 0x44f   :  { %v9527_v35 = vld [vmem:[#allocation8 + $0xb78] sm:$0xf0] }
 0x450   :  { %v12338_v63 = vld [vmem:[#allocation8 + $0xd5c] sm:$0xf]  ;;  %v9530_v49 = vor.u32 %v12274_v62, %v9527_v35  ;;  %v5497_v35 = vpop.f32.mrf.mxu3 }
 0x451   :  { %v9783_v54 = vld [vmem:[#allocation8 + $0xd78] sm:$0xf0] }
 0x452   :  { %v12130_v14 = vld [vmem:[#allocation8 + $0x6dc] sm:$0xf]  ;;  %v9786_v4 = vor.u32 %v12338_v63, %v9783_v54  ;;  %5750 = vmatpush.bf16.msra.mxu1 %v9274_v11  ;;  %5763 = vmatpush.bf16.msra.mxu2 %v9530_v49  ;;  %v5891_v54 = vsub.f32 1.0, %v5890_v47 }
 0x453   :  { %v8951_v5 = vld [vmem:[#allocation8 + $0x6f8] sm:$0xf0] }
 0x454   :  { %v12202_v12 = vld [vmem:[#allocation8 + $0x91c] sm:$0xf]  ;;  %v8954_v15 = vor.u32 %v12130_v14, %v8951_v5  ;;  %5776 = vmatpush.bf16.msra.mxu3 %v9786_v4  ;;  %v13549_v14 = vadd.f32 %v5497_v35, %v5485_v8 }
 0x455   :  { %v9239_v13 = vld [vmem:[#allocation8 + $0x938] sm:$0xf0] }
 0x456   :  { %v12266_v2 = vld [vmem:[#allocation8 + $0xb1c] sm:$0xf]  ;;  %v9242_v16 = vor.u32 %v12202_v12, %v9239_v13  ;;  %5739 = vmatpush.bf16.msrb.mxu0 %v8954_v15 }
 0x457   :  { %v9495_v27 = vld [vmem:[#allocation8 + $0xb38] sm:$0xf0] }
 0x458   :  { %v12330_v18 = vld [vmem:[#allocation8 + $0xd1c] sm:$0xf]  ;;  %v9498_v26 = vor.u32 %v12266_v2, %v9495_v27  ;;  %5751 = vmatpush.bf16.msra.mxu1 %v9242_v16  ;;  %v5486_v2 = vpop.f32.mrf.mxu2  ;;  %v5499_v8 = vpop.f32.mrf.mxu3 }
 0x459   :  { %v9751_v0 = vld [vmem:[#allocation8 + $0xd38] sm:$0xf0] }
 0x45a   :  { %v12122_v21 = vld [vmem:[#allocation8 + $0x69c] sm:$0xf]  ;;  %v9754_v32 = vor.u32 %v12330_v18, %v9751_v0  ;;  %5764 = vmatpush.bf16.msra.mxu2 %v9498_v26  ;;  %v5892_v0 = vmul.f32 %v13546_v19, %v5891_v54 }
 0x45b   :  { %v8919_v22 = vld [vmem:[#allocation8 + $0x6b8] sm:$0xf0] }
 0x45c   :  { %v12194_v28 = vld [vmem:[#allocation8 + $0x8dc] sm:$0xf]  ;;  %v8922_v17 = vor.u32 %v12122_v21, %v8919_v22  ;;  %5777 = vmatpush.bf16.msra.mxu3 %v9754_v32  ;;  %v5893_v47 = vadd.f32 %v13546_v19, %v5892_v0 }
 0x45d   :  { %v9207_v29 = vld [vmem:[#allocation8 + $0x8f8] sm:$0xf0] }
 0x45e   :  { %v12258_v31 = vld [vmem:[#allocation8 + $0xadc] sm:$0xf]  ;;  %v9210_v50 = vor.u32 %v12194_v28, %v9207_v29  ;;  %5740 = vmatpush.bf16.msrb.mxu0 %v8922_v17  ;;  %v5895_v54 = vsel %vm5894_vm2, %v13546_v19, %v5893_v47 }
 0x45f   :  { %v9463_v33 = vld [vmem:[#allocation8 + $0xaf8] sm:$0xf0] }
 0x460   :  { %v12322_v36 = vld [vmem:[#allocation8 + $0xcdc] sm:$0xf]  ;;  %v9466_v53 = vor.u32 %v12258_v31, %v9463_v33  ;;  %5752 = vmatpush.bf16.msra.mxu1 %v9210_v50 }
 0x461   :  { %v9719_v37 = vld [vmem:[#allocation8 + $0xcf8] sm:$0xf0] }
 0x462   :  { %v12114_v44 = vld [vmem:[#allocation8 + $0x65c] sm:$0xf]  ;;  %v9722_v46 = vor.u32 %v12322_v36, %v9719_v37  ;;  %5765 = vmatpush.bf16.msra.mxu2 %v9466_v53 }
 0x463   :  { %v8887_v45 = vld [vmem:[#allocation8 + $0x678] sm:$0xf0] }
 0x464   :  { %v12186_v55 = vld [vmem:[#allocation8 + $0x89c] sm:$0xf]  ;;  %v8890_v58 = vor.u32 %v12114_v44, %v8887_v45  ;;  %5778 = vmatpush.bf16.msra.mxu3 %v9722_v46 }
 0x465   :  { %v9175_v56 = vld [vmem:[#allocation8 + $0x8b8] sm:$0xf0] }
 0x466   :  { %v12250_v57 = vld [vmem:[#allocation8 + $0xa9c] sm:$0xf]  ;;  %v9178_v7 = vor.u32 %v12186_v55, %v9175_v56  ;;  %5741 = vmatpush.bf16.msrb.mxu0 %v8890_v58 }
 0x467   :  { %v9431_v60 = vld [vmem:[#allocation8 + $0xab8] sm:$0xf0] }
 0x468   :  { %v12314_v61 = vld [vmem:[#allocation8 + $0xc9c] sm:$0xf]  ;;  %v9434_v9 = vor.u32 %v12250_v57, %v9431_v60  ;;  %5753 = vmatpush.bf16.msra.mxu1 %v9178_v7 }
 0x469   :  { %v9687_v62 = vld [vmem:[#allocation8 + $0xcb8] sm:$0xf0] }
 0x46a   :  { %v12106_v63 = vld [vmem:[#allocation8 + $0x61c] sm:$0xf]  ;;  %v9690_v49 = vor.u32 %v12314_v61, %v9687_v62  ;;  %5766 = vmatpush.bf16.msra.mxu2 %v9434_v9 }
 0x46b   :  { %v8855_v1 = vld [vmem:[#allocation8 + $0x638] sm:$0xf0] }
 0x46c   :  { %v12418_v5 = vld [vmem:[#allocation8 + $0xfdc] sm:$0xf]  ;;  %v8858_v12 = vor.u32 %v12106_v63, %v8855_v1  ;;  %5779 = vmatpush.bf16.msra.mxu3 %v9690_v49  ;;  %v5888_v1 = vpop.xlane.xlu0 %5887 }
 0x46d   :  { %v10103_v6 = vld [vmem:[#allocation8 + $0xff8] sm:$0xf0] }
 0x46e   :  { %v12178_v11 = vld [vmem:[#allocation8 + $0x85c] sm:$0xf]  ;;  %v10106_v20 = vor.u32 %v12418_v5, %v10103_v6  ;;  %5742 = vmatpush.bf16.msrb.mxu0 %v8858_v12  ;;  %v5536_v5 = vpop.f32.mrf.mxu2 }
 0x46f   :  { %v9143_v13 = vld [vmem:[#allocation8 + $0x878] sm:$0xf0] }
 0x470   :  { %v12242_v4 = vld [vmem:[#allocation8 + $0xa5c] sm:$0xf]  ;;  %v9146_v16 = vor.u32 %v12178_v11, %v9143_v13  ;;  %v5896_v13 = vmul.f32 %v5895_v54, %v5888_v1  ;;  %v13567_v54 = vld [vmem:[#allocation10] sm:$0xff] }
 0x471   :  { %v9399_v15 = vld [vmem:[#allocation8 + $0xa78] sm:$0xf0]  ;;  %5743 = vmatmul.bf16.vlgmr.msrb.gmra.mxu0 %v13359_v24 }
 0x472   :  { %v12306_v27 = vld [vmem:[#allocation8 + $0xc5c] sm:$0xf]  ;;  %v9402_v26 = vor.u32 %v12242_v4, %v9399_v15  ;;  %5787 = vmatpush.bf16.msra.mxu0 %v10106_v20  ;;  %5754 = vmatpush.bf16.msra.mxu1 %v9146_v16 }
 0x473   :  { %v9655_v18 = vld [vmem:[#allocation8 + $0xc78] sm:$0xf0] }
 0x474   :  { %v12410_v21 = vld [vmem:[#allocation8 + $0xf9c] sm:$0xf]  ;;  %v9658_v32 = vor.u32 %v12306_v27, %v9655_v18  ;;  %5767 = vmatpush.bf16.msra.mxu2 %v9402_v26 }
 0x475   :  { %v10071_v22 = vld [vmem:[#allocation8 + $0xfb8] sm:$0xf0] }
 0x476   :  { %v12170_v28 = vld [vmem:[#allocation8 + $0x81c] sm:$0xf]  ;;  %v10074_v37 = vor.u32 %v12410_v21, %v10071_v22  ;;  %5780 = vmatpush.bf16.msra.mxu3 %v9658_v32  ;;  %v5510_v22 = vpop.f32.mrf.mxu0  ;;  %v13562_v32 = vadd.f32 1e-08, %v5896_v13 }
 0x477   :  { %v9111_v29 = vld [vmem:[#allocation8 + $0x838] sm:$0xf0] }
 0x478   :  { %v12234_v31 = vld [vmem:[#allocation8 + $0xa1c] sm:$0xf]  ;;  %v9114_v53 = vor.u32 %v12170_v28, %v9111_v29  ;;  %5788 = vmatpush.bf16.msra.mxu0 %v10074_v37  ;;  %v5511_v28 = vadd.f32 %v5510_v22, %v13549_v14  ;;  %v5523_v29 = vpop.f32.mrf.mxu1  ;;  %12894 = vrsqrt.f32 %v13562_v32  ;;  %vm5904_vm3 = vweird.f32 %v13562_v32 }
 0x479   :  { %v9367_v17 = vld [vmem:[#allocation8 + $0xa38] sm:$0xf0] }
 0x47a   :  { %v12298_v33 = vld [vmem:[#allocation8 + $0xc1c] sm:$0xf]  ;;  %v9370_v55 = vor.u32 %v12234_v31, %v9367_v17  ;;  %5755 = vmatpush.bf16.msra.mxu1 %v9114_v53 }
 0x47b   :  { %v9623_v36 = vld [vmem:[#allocation8 + $0xc38] sm:$0xf0] }
 0x47c   :  { %v12482_v43 = vld [vmem:[#allocation8 + $0x11dc] sm:$0xf]  ;;  %v9626_v46 = vor.u32 %v12298_v33, %v9623_v36  ;;  %5768 = vmatpush.bf16.msra.mxu2 %v9370_v55 }
 0x47d   :  { %v10359_v44 = vld [vmem:[#allocation8 + $0x11f8] sm:$0xf0]  ;;  %5756 = vmatmul.bf16.vlgmr.msra.gmra.mxu1 %v13367_v34 }
 0x47e   :  { %v12546_v45 = vld [vmem:[#allocation8 + $0x13dc] sm:$0xf]  ;;  %v10362_v58 = vor.u32 %v12482_v43, %v10359_v44  ;;  %5781 = vmatpush.bf16.msra.mxu3 %v9626_v46  ;;  %v5538_v43 = vpop.f32.mrf.mxu2 }
 0x47f   :  { %v10615_v52 = vld [vmem:[#allocation8 + $0x13f8] sm:$0xf0]  ;;  %5769 = vmatmul.bf16.vlgmr.msra.gmra.mxu2 %v13373_v42 }
 0x480   :  { %v12610_v48 = vld [vmem:[#allocation8 + $0x15dc] sm:$0xf]  ;;  %v10618_v60 = vor.u32 %v12546_v45, %v10615_v52  ;;  %5800 = vmatpush.bf16.msrb.mxu1 %v10362_v58 }
 0x481   :  { %v10871_v50 = vld [vmem:[#allocation8 + $0x15f8] sm:$0xf0]  ;;  %5782 = vmatmul.bf16.vlgmr.msra.gmra.mxu3 %v13369_v38  ;;  %v5524_v38 = vadd.f32 %v5523_v29, %v5511_v28 }
 0x482   :  { %v12402_v56 = vld [vmem:[#allocation8 + $0xf5c] sm:$0xf]  ;;  %v10874_v61 = vor.u32 %v12610_v48, %v10871_v50  ;;  %5813 = vmatpush.bf16.msrb.mxu2 %v10618_v60 }
 0x483   :  { %v10039_v57 = vld [vmem:[#allocation8 + $0xf78] sm:$0xf0]  ;;  %v13565_v52 = vadd.f32 %v5536_v5, %v5524_v38  ;;  %v990_v5 = vperm.slane %v13567_v54, 6 }
 0x484   :  { %v12474_v62 = vld [vmem:[#allocation8 + $0x119c] sm:$0xf]  ;;  %v10042_v6 = vor.u32 %v12402_v56, %v10039_v57  ;;  %5826 = vmatpush.bf16.msrb.mxu3 %v10874_v61 }
 0x485   :  { %v10327_v35 = vld [vmem:[#allocation8 + $0x11b8] sm:$0xf0] }
 0x486   :  { %v12538_v63 = vld [vmem:[#allocation8 + $0x139c] sm:$0xf]  ;;  %v10330_v12 = vor.u32 %v12474_v62, %v10327_v35  ;;  %5789 = vmatpush.bf16.msra.mxu0 %v10042_v6  ;;  %v5525_v6 = vpop.f32.mrf.mxu1 }
 0x487   :  { %v10583_v7 = vld [vmem:[#allocation8 + $0x13b8] sm:$0xf0] }
 0x488   :  { %v12602_v9 = vld [vmem:[#allocation8 + $0x159c] sm:$0xf]  ;;  %v10586_v4 = vor.u32 %v12538_v63, %v10583_v7  ;;  %5801 = vmatpush.bf16.msrb.mxu1 %v10330_v12  ;;  %v5512_v63 = vpop.f32.mrf.mxu0  ;;  %v13570_v12 = vpop.eup %12894 }
 0x489   :  { %v10839_v11 = vld [vmem:[#allocation8 + $0x15b8] sm:$0xf0]  ;;  %v12646_v63 = vld [vmem:[#allocation11 + $0x74] sm:$0xf0]  ;;  %vm5905_vm4 = vweird.f32 %v13570_v12 }
 0x48a   :  { %v12394_v49 = vld [vmem:[#allocation8 + $0xf1c] sm:$0xf]  ;;  %v10842_v15 = vor.u32 %v12602_v9, %v10839_v11  ;;  %5814 = vmatpush.bf16.msrb.mxu2 %v10586_v4  ;;  %vm13586_vm5 = vmor %vm5904_vm3, %vm5905_vm4 }
 0x48b   :  { %v10007_v24 = vld [vmem:[#allocation8 + $0xf38] sm:$0xf0] }
 0x48c   :  { %v12466_v2 = vld [vmem:[#allocation8 + $0x115c] sm:$0xf]  ;;  %v10010_v18 = vor.u32 %v12394_v49, %v10007_v24  ;;  %5827 = vmatpush.bf16.msrb.mxu3 %v10842_v15 }
 0x48d   :  { %v10295_v27 = vld [vmem:[#allocation8 + $0x1178] sm:$0xf0] }
 0x48e   :  { %v12530_v19 = vld [vmem:[#allocation8 + $0x135c] sm:$0xf]  ;;  %v10298_v31 = vor.u32 %v12466_v2, %v10295_v27  ;;  %5790 = vmatpush.bf16.msra.mxu0 %v10010_v18  ;;  %v5549_v18 = vpop.f32.mrf.mxu2 }
 0x48f   :  { %v10551_v20 = vld [vmem:[#allocation8 + $0x1378] sm:$0xf0] }
 0x490   :  { %v12594_v0 = vld [vmem:[#allocation8 + $0x155c] sm:$0xf]  ;;  %v10554_v42 = vor.u32 %v12530_v19, %v10551_v20  ;;  %5802 = vmatpush.bf16.msrb.mxu1 %v10298_v31  ;;  %v5562_v20 = vpop.f32.mrf.mxu3 }
 0x491   :  { %v10807_v21 = vld [vmem:[#allocation8 + $0x1578] sm:$0xf0] }
 0x492   :  { %v12386_v16 = vld [vmem:[#allocation8 + $0xedc] sm:$0xf]  ;;  %v10810_v17 = vor.u32 %v12594_v0, %v10807_v21  ;;  %5815 = vmatpush.bf16.msrb.mxu2 %v10554_v42 }
 0x493   :  { %v9975_v26 = vld [vmem:[#allocation8 + $0xef8] sm:$0xf0] }
 0x494   :  { %v12458_v33 = vld [vmem:[#allocation8 + $0x111c] sm:$0xf]  ;;  %v9978_v44 = vor.u32 %v12386_v16, %v9975_v26  ;;  %5828 = vmatpush.bf16.msrb.mxu3 %v10810_v17  ;;  %v5550_v16 = vadd.f32 %v5549_v18, %v990_v5  ;;  %v5899_v26 = vmul.f32 %v13570_v12, %v13562_v32  ;;  %v12641_v18 = vld [vmem:[#allocation11 + $0x4c] sm:$0xf0]  ;;  %v12634_v32 = vld [vmem:[#allocation11 + $0x14] sm:$0xf0] }
 0x495   :  { %v10263_v36 = vld [vmem:[#allocation8 + $0x1138] sm:$0xf0] }
 0x496   :  { %v12522_v37 = vld [vmem:[#allocation8 + $0x131c] sm:$0xf]  ;;  %v10266_v48 = vor.u32 %v12458_v33, %v10263_v36  ;;  %5791 = vmatpush.bf16.msra.mxu0 %v9978_v44  ;;  %v13574_v38 = vadd.f32 %v5562_v20, %v5550_v16  ;;  %v5551_v5 = vpop.f32.mrf.mxu2  ;;  %v12640_v16 = vld [vmem:[#allocation11 + $0x4c] sm:$0xf] }
 0x497   :  { %v10519_v45 = vld [vmem:[#allocation8 + $0x1338] sm:$0xf0] }
 0x498   :  { %v12586_v34 = vld [vmem:[#allocation8 + $0x151c] sm:$0xf]  ;;  %v10522_v50 = vor.u32 %v12522_v37, %v10519_v45  ;;  %5803 = vmatpush.bf16.msrb.mxu1 %v10266_v48  ;;  %v5564_v6 = vpop.f32.mrf.mxu3 }
 0x499   :  { %v10775_v47 = vld [vmem:[#allocation8 + $0x1538] sm:$0xf0] }
 0x49a   :  { %v12378_v8 = vld [vmem:[#allocation8 + $0xe9c] sm:$0xf]  ;;  %v10778_v53 = vor.u32 %v12586_v34, %v10775_v47  ;;  %5816 = vmatpush.bf16.msrb.mxu2 %v10522_v50  ;;  %v5900_v50 = vmul.f32 %v13570_v12, %v5899_v26  ;;  %v10991_v26 = vld [vmem:[#allocation11 + $0x58] sm:$0xf0] }
 0x49b   :  { %v9943_v14 = vld [vmem:[#allocation8 + $0xeb8] sm:$0xf0] }
 0x49c   :  { %v12450_v55 = vld [vmem:[#allocation8 + $0x10dc] sm:$0xf]  ;;  %v9946_v46 = vor.u32 %v12378_v8, %v9943_v14  ;;  %5829 = vmatpush.bf16.msrb.mxu3 %v10778_v53 }
 0x49d   :  { %v10231_v56 = vld [vmem:[#allocation8 + $0x10f8] sm:$0xf0] }
 0x49e   :  { %v12514_v57 = vld [vmem:[#allocation8 + $0x12dc] sm:$0xf]  ;;  %v10234_v1 = vor.u32 %v12450_v55, %v10231_v56  ;;  %5792 = vmatpush.bf16.msra.mxu0 %v9946_v46  ;;  %v12645_v46 = vld [vmem:[#allocation11 + $0x6c] sm:$0xf0] }
 0x49f   :  { %v10487_v58 = vld [vmem:[#allocation8 + $0x12f8] sm:$0xf0] }
 0x4a0   :  { %v12578_v60 = vld [vmem:[#allocation8 + $0x14dc] sm:$0xf]  ;;  %v10490_v7 = vor.u32 %v12514_v57, %v10487_v58  ;;  %5804 = vmatpush.bf16.msrb.mxu1 %v10234_v1  ;;  %v10997_v57 = vld [vmem:[#allocation11 + $0x60] sm:$0xf] }
 0x4a1   :  { %v10743_v61 = vld [vmem:[#allocation8 + $0x14f8] sm:$0xf0] }
 0x4a2   :  { %v12370_v62 = vld [vmem:[#allocation8 + $0xe5c] sm:$0xf]  ;;  %v10746_v9 = vor.u32 %v12578_v60, %v10743_v61  ;;  %5817 = vmatpush.bf16.msrb.mxu2 %v10490_v7  ;;  %v12643_v61 = vld [vmem:[#allocation11 + $0x64] sm:$0xf] }
 0x4a3   :  { %v9911_v35 = vld [vmem:[#allocation8 + $0xe78] sm:$0xf0] }
 0x4a4   :  { %v12442_v11 = vld [vmem:[#allocation8 + $0x109c] sm:$0xf]  ;;  %v9914_v13 = vor.u32 %v12370_v62, %v9911_v35  ;;  %5830 = vmatpush.bf16.msrb.mxu3 %v10746_v9  ;;  %v11005_v35 = vld [vmem:[#allocation11 + $0x68] sm:$0xf]  ;;  %v12644_v9 = vld [vmem:[#allocation11 + $0x6c] sm:$0xf] }
 0x4a5   :  { %v10199_v49 = vld [vmem:[#allocation8 + $0x10b8] sm:$0xf0] }
 0x4a6   :  { %v12506_v24 = vld [vmem:[#allocation8 + $0x129c] sm:$0xf]  ;;  %v10202_v0 = vor.u32 %v12442_v11, %v10199_v49  ;;  %5793 = vmatpush.bf16.msra.mxu0 %v9914_v13  ;;  %v11007_v11 = vld [vmem:[#allocation11 + $0x78] sm:$0xf0]  ;;  %v10998_v49 = vor.u32 %v12645_v46, %v10997_v57  ;;  %v10957_v46 = vld [vmem:[#allocation11 + $0x8] sm:$0xf] }
 0x4a7   :  { %v10455_v4 = vld [vmem:[#allocation8 + $0x12b8] sm:$0xf0]  ;;  %v11010_v20 = vor.u32 %v12644_v9, %v11007_v11  ;;  %v10958_v5 = vor.u32 %v12634_v32, %v10957_v46 }
 0x4a8   :  { %v12570_v15 = vld [vmem:[#allocation8 + $0x149c] sm:$0xf]  ;;  %v10458_v28 = vor.u32 %v12506_v24, %v10455_v4  ;;  %5805 = vmatpush.bf16.msrb.mxu1 %v10202_v0  ;;  %v5901_v24 = vmul.f32 0.5, %v5900_v50  ;;  %v5575_v50 = vpop.f32.mrf.mxu0 }
 0x4a9   :  { %v10711_v2 = vld [vmem:[#allocation8 + $0x14b8] sm:$0xf0] }
 0x4aa   :  { %v12362_v27 = vld [vmem:[#allocation8 + $0xe1c] sm:$0xf]  ;;  %v10714_v29 = vor.u32 %v12570_v15, %v10711_v2  ;;  %5818 = vmatpush.bf16.msrb.mxu2 %v10458_v28  ;;  %v11006_v2 = vor.u32 %v12646_v63, %v11005_v35  ;;  %v5902_v28 = vsub.f32 1.5, %v5901_v24 }
 0x4ab   :  { %v9879_v19 = vld [vmem:[#allocation8 + $0xe38] sm:$0xf0] }
 0x4ac   :  { %v12626_v21 = vld [vmem:[#allocation8 + $0x165c] sm:$0xf]  ;;  %v9882_v33 = vor.u32 %v12362_v27, %v9879_v19  ;;  %5831 = vmatpush.bf16.msrb.mxu3 %v10714_v29  ;;  %v12639_v27 = vld [vmem:[#allocation11 + $0x44] sm:$0xf]  ;;  %v10981_v19 = vld [vmem:[#allocation11 + $0x40] sm:$0xf] }
 0x4ad   :  { %v10935_v22 = vld [vmem:[#allocation8 + $0x1678] sm:$0xf0]  ;;  %v10982_v29 = vor.u32 %v12641_v18, %v10981_v19 }
 0x4ae   :  { %v12434_v31 = vld [vmem:[#allocation8 + $0x105c] sm:$0xf]  ;;  %v10938_v34 = vor.u32 %v12626_v21, %v10935_v22  ;;  %5794 = vmatpush.bf16.msra.mxu0 %v9882_v33  ;;  %v10989_v21 = vld [vmem:[#allocation11 + $0x48] sm:$0xf]  ;;  %v12642_v22 = vld [vmem:[#allocation11 + $0x54] sm:$0xf0] }
 0x4af   :  { %v10167_v42 = vld [vmem:[#allocation8 + $0x1078] sm:$0xf0]  ;;  %v12637_v33 = vld [vmem:[#allocation11 + $0x2c] sm:$0xf0] }
 0x4b0   :  { %v12498_v17 = vld [vmem:[#allocation8 + $0x125c] sm:$0xf]  ;;  %v10170_v47 = vor.u32 %v12434_v31, %v10167_v42  ;;  %v10990_v31 = vor.u32 %v12642_v22, %v10989_v21  ;;  %v12635_v42 = vld [vmem:[#allocation11 + $0x24] sm:$0xf] }
 0x4b1   :  { %v10423_v36 = vld [vmem:[#allocation8 + $0x1278] sm:$0xf0]  ;;  %5795 = vmatmul.bf16.vlgmr.msra.gmra.mxu0 %v13371_v39  ;;  %v11257_v21 = vld [vmem:[#allocation14 + $0x1e0] sm:$0xf] }
 0x4b2   :  { %v12562_v37 = vld [vmem:[#allocation8 + $0x145c] sm:$0xf]  ;;  %v10426_v53 = vor.u32 %v12498_v17, %v10423_v36  ;;  %5845 = vmatpush.bf16.msrb.mxu0 %v10938_v34  ;;  %5806 = vmatpush.bf16.msrb.mxu1 %v10170_v47  ;;  %v10965_v17 = vld [vmem:[#allocation11 + $0x20] sm:$0xf]  ;;  %v10994_v36 = vor.u32 %v12640_v16, %v10991_v26  ;;  %v10975_v34 = vld [vmem:[#allocation11 + $0x38] sm:$0xf0] }
 0x4b3   :  { %v10679_v43 = vld [vmem:[#allocation8 + $0x1478] sm:$0xf0]  ;;  %v10966_v47 = vor.u32 %v12637_v33, %v10965_v17 }
 0x4b4   :  { %v12426_v44 = vld [vmem:[#allocation8 + $0x101c] sm:$0xf]  ;;  %v10682_v55 = vor.u32 %v12562_v37, %v10679_v43  ;;  %5819 = vmatpush.bf16.msrb.mxu2 %v10426_v53  ;;  %v10973_v43 = vld [vmem:[#allocation11 + $0x28] sm:$0xf]  ;;  %v10949_v53 = vld [vmem:[#allocation11] sm:$0xf] }
 0x4b5   :  { %v10135_v45 = vld [vmem:[#allocation8 + $0x1038] sm:$0xf0] }
 0x4b6   :  { %v12490_v8 = vld [vmem:[#allocation8 + $0x121c] sm:$0xf]  ;;  %v10138_v7 = vor.u32 %v12426_v44, %v10135_v45  ;;  %5832 = vmatpush.bf16.msrb.mxu3 %v10682_v55  ;;  %v12638_v44 = vld [vmem:[#allocation11 + $0x34] sm:$0xf0]  ;;  %v12636_v45 = vld [vmem:[#allocation11 + $0x2c] sm:$0xf] }
 0x4b7   :  { %v12618_v14 = vld [vmem:[#allocation8 + $0x161c] sm:$0xf]  ;;  %v10978_v55 = vor.u32 %v12636_v45, %v10975_v34  ;;  %v11513_v34 = vld [vmem:[#allocation14 + $0x3e0] sm:$0xf] }
 0x4b8   :  { %v10903_v48 = vld [vmem:[#allocation8 + $0x1638] sm:$0xf0]  ;;  %5807 = vmatpush.bf16.msrb.mxu1 %v10138_v7  ;;  %v12899_v7 = vld [vmem:[#allocation5] sm:$0x3] }
 0x4b9   :  { %v10391_v56 = vld [vmem:[#allocation8 + $0x1238] sm:$0xf0]  ;;  %v10906_v1 = vor.u32 %v12618_v14, %v10903_v48  ;;  %v10974_v48 = vor.u32 %v12638_v44, %v10973_v43  ;;  %v11385_v43 = vld [vmem:[#allocation14 + $0x2e0] sm:$0xf] }
 0x4ba   :  { %v12554_v58 = vld [vmem:[#allocation8 + $0x141c] sm:$0xf]  ;;  %v10394_v13 = vor.u32 %v12490_v8, %v10391_v56  ;;  %v5903_v8 = vmul.f32 %v13570_v12, %v5902_v28  ;;  %v12631_v56 = vld [vmem:[#allocation11 + $0x4] sm:$0xf] }
 0x4bb   :  { %v10647_v60 = vld [vmem:[#allocation8 + $0x1438] sm:$0xf0]  ;;  %5846 = vmatpush.bf16.msrb.mxu0 %v10906_v1  ;;  %5808 = vmatmul.bf16.vlgmr.msrb.gmra.mxu1 %v13383_v23 }
 0x4bc   :  { %v10999_v62 = vld [vmem:[#allocation11 + $0x70] sm:$0xf0]  ;;  %v10650_v4 = vor.u32 %v12554_v58, %v10647_v60  ;;  %5820 = vmatpush.bf16.msrb.mxu2 %v10394_v13  ;;  %v5576_v58 = vadd.f32 %v5575_v50, %v13574_v38  ;;  %v12632_v60 = vld [vmem:[#allocation11 + $0xc] sm:$0xf]  ;;  %v5907_v63 = vsel %vm13586_vm5, %v13570_v12, %v5903_v8  ;;  %v5577_v38 = vpop.f32.mrf.mxu0  ;;  %v5614_v13 = vpop.f32.mrf.mxu3 }
 0x4bd   :  { %v11002_v15 = vor.u32 %v12643_v61, %v10999_v62  ;;  %v10983_v0 = vld [vmem:[#allocation11 + $0x50] sm:$0xf0]  ;;  %v10959_v61 = vld [vmem:[#allocation11 + $0x18] sm:$0xf0]  ;;  %v5908_v9 = vmul.f32 %v12899_v7, %v5907_v63 }
 0x4be   :  { %5833 = vmatpush.bf16.msrb.mxu3 %v10650_v4  ;;  %v10986_v39 = vor.u32 %v12639_v27, %v10983_v0  ;;  %v10967_v37 = vld [vmem:[#allocation11 + $0x30] sm:$0xf0]  ;;  %v10962_v6 = vor.u32 %v12632_v60, %v10959_v61  ;;  %v991_v60 = vperm.slane %v13567_v54, 7  ;;  %v11129_v61 = vld [vmem:[#allocation14 + $0xe0] sm:$0xf] }
 0x4bf   :  { %6024 = vmatpush.bf16.msra.mxu0 %v10998_v49  ;;  %6037 = vmatpush.bf16.msra.mxu1 %v11002_v15  ;;  %v10970_v23 = vor.u32 %v12635_v42, %v10967_v37  ;;  %v10951_v57 = vld [vmem:[#allocation11 + $0x10] sm:$0xf0]  ;;  %v5601_v49 = vpop.f32.mrf.mxu2  ;;  %v5909_v12 = vpack.c.bf16 %v5908_v9, %v5908_v9  ;;  %v11113_v54 = vld [vmem:[#allocation14 + $0xc0] sm:$0xf] }
 0x4c0   :  { %6050 = vmatpush.bf16.msra.mxu2 %v11006_v2  ;;  %v10954_v1 = vor.u32 %v12631_v56, %v10951_v57  ;;  %v12709_v22 = vld [vmem:[#allocation14 + $0x1ec] sm:$0xf0]  ;;  %v11497_v56 = vld [vmem:[#allocation14 + $0x3c0] sm:$0xf] }
 0x4c1   :  { %5821 = vmatmul.bf16.vlgmr.msrb.gmra.mxu2 %v13387_v30  ;;  %5834 = vmatmul.bf16.vlgmr.msrb.gmra.mxu3 %v13385_v25  ;;  %v5588_v30 = vpop.f32.mrf.mxu1  ;;  %v12633_v25 = vld [vmem:[#allocation11 + $0xc] sm:$0xf0]  ;;  %v11258_v26 = vor.u32 %v12709_v22, %v11257_v21  ;;  %v12705_v37 = vld [vmem:[#allocation14 + $0x1cc] sm:$0xf0]  ;;  %v11465_v21 = vld [vmem:[#allocation14 + $0x380] sm:$0xf] }
 0x4c2   :  { %6063 = vmatpush.bf16.msra.mxu3 %v11010_v20  ;;  %v5589_v62 = vadd.f32 %v5588_v30, %v5576_v58  ;;  %v10950_v35 = vor.u32 %v12633_v25, %v10949_v53  ;;  %10946 = vmatmul.msk.bf16.vlgmr.msrb.gmra.mxu0 %vm4600_vm0, %v13379_v40  ;;  %v12741_v45 = vld [vmem:[#allocation14 + $0x2ec] sm:$0xf0]  ;;  %v11369_v30 = vld [vmem:[#allocation14 + $0x2c0] sm:$0xf] }
 0x4c3   :  { %6025 = vmatpush.bf16.msra.mxu0 %v10982_v29  ;;  %6038 = vmatpush.bf16.msra.mxu1 %v10986_v39  ;;  %v11386_v14 = vor.u32 %v12741_v45, %v11385_v43  ;;  %v12701_v50 = vld [vmem:[#allocation14 + $0x1ac] sm:$0xf0]  ;;  %v11449_v45 = vld [vmem:[#allocation14 + $0x360] sm:$0xf] }
 0x4c4   :  { %6051 = vmatpush.bf16.msra.mxu2 %v10990_v31  ;;  %v5602_v24 = vadd.f32 %v5601_v49, %v5589_v62  ;;  %v5616_v2 = vpop.f32.mrf.mxu3  ;;  %v5627_v27 = vpop.f32.mrf.mxu0  ;;  %v12769_v57 = vld [vmem:[#allocation14 + $0x3cc] sm:$0xf0] }
 0x4c5   :  { %v11498_v58 = vor.u32 %v12769_v57, %v11497_v56  ;;  %v12677_v62 = vld [vmem:[#allocation14 + $0xec] sm:$0xf0]  ;;  %v11433_v56 = vld [vmem:[#allocation14 + $0x340] sm:$0xf] }
 0x4c6   :  { %6064 = vmatpush.bf16.msra.mxu3 %v10994_v36  ;;  %v5615_v4 = vadd.f32 %v5614_v13, %v5602_v24  ;;  %v11241_v36 = vld [vmem:[#allocation14 + $0x1c0] sm:$0xf]  ;;  %v11130_v63 = vor.u32 %v12677_v62, %v11129_v61  ;;  %v12765_v49 = vld [vmem:[#allocation14 + $0x3ac] sm:$0xf0] }
 0x4c7   :  { %6026 = vmatpush.bf16.msra.mxu0 %v10966_v47  ;;  %6039 = vmatpush.bf16.msra.mxu1 %v10970_v23  ;;  %v5603_v15 = vpop.f32.mrf.mxu2  ;;  %v11242_v44 = vor.u32 %v12705_v37, %v11241_v36  ;;  %v12773_v47 = vld [vmem:[#allocation14 + $0x3ec] sm:$0xf0]  ;;  %v11065_v62 = vld [vmem:[#allocation14 + $0x60] sm:$0xf] }
 0x4c8   :  { %6052 = vmatpush.bf16.msra.mxu2 %v10974_v48  ;;  %v5628_v19 = vadd.f32 %v5627_v27, %v5615_v4  ;;  %v11514_v23 = vor.u32 %v12773_v47, %v11513_v34  ;;  %v11225_v48 = vld [vmem:[#allocation14 + $0x1a0] sm:$0xf]  ;;  %v12673_v4 = vld [vmem:[#allocation14 + $0xcc] sm:$0xf0] }
 0x4c9   :  { %v5590_v11 = vpop.f32.mrf.mxu1  ;;  %v11226_v25 = vor.u32 %v12701_v50, %v11225_v48  ;;  %v11193_v15 = vld [vmem:[#allocation14 + $0x160] sm:$0xf]  ;;  %v11114_v2 = vor.u32 %v12673_v4, %v11113_v54  ;;  %v12693_v27 = vld [vmem:[#allocation14 + $0x16c] sm:$0xf0] }
 0x4ca   :  { %6065 = vmatpush.bf16.msra.mxu3 %v10978_v55  ;;  %v12737_v55 = vld [vmem:[#allocation14 + $0x2cc] sm:$0xf0]  ;;  %v11481_v11 = vld [vmem:[#allocation14 + $0x3a0] sm:$0xf] }
 0x4cb   :  { %6027 = vmatpush.bf16.msra.mxu0 %v10950_v35  ;;  %6040 = vmatpush.bf16.msra.mxu1 %v10954_v1  ;;  %v11370_v46 = vor.u32 %v12737_v55, %v11369_v30  ;;  %v11209_v35 = vld [vmem:[#allocation14 + $0x180] sm:$0xf]  ;;  %v12697_v1 = vld [vmem:[#allocation14 + $0x18c] sm:$0xf0]  ;;  %v11482_v24 = vor.u32 %v12765_v49, %v11481_v11 }
 0x4cc   :  { %6053 = vmatpush.bf16.msra.mxu2 %v10958_v5  ;;  %v5629_v20 = vpop.f32.mrf.mxu0  ;;  %v5666_v29 = vpop.f32.mrf.mxu3  ;;  %v11353_v5 = vld [vmem:[#allocation14 + $0x2a0] sm:$0xf]  ;;  %v11210_v9 = vor.u32 %v12697_v1, %v11209_v35  ;;  %v12757_v34 = vld [vmem:[#allocation14 + $0x36c] sm:$0xf0] }
 0x4cd   :  { %v11337_v20 = vld [vmem:[#allocation14 + $0x280] sm:$0xf]  ;;  %v12685_v30 = vld [vmem:[#allocation14 + $0x12c] sm:$0xf0] }
 0x4ce   :  { %6066 = vmatpush.bf16.msra.mxu3 %v10962_v6  ;;  %11012 = vmatmul.msk.bf16.vlgmr.msra.gmra.mxu1 %vm6016_vm6, %v5909_v12  ;;  %v12733_v6 = vld [vmem:[#allocation14 + $0x2ac] sm:$0xf0]  ;;  %v11161_v48 = vld [vmem:[#allocation14 + $0x120] sm:$0xf] }
 0x4cf   :  { %v5653_v16 = vpop.f32.mrf.mxu2  ;;  %6883 = vmatpush.bf16.msrb.mxu1 %v11258_v26  ;;  %v11354_v38 = vor.u32 %v12733_v6, %v11353_v5  ;;  %6870 = vmatpush.bf16.msrb.mxu0 %v11130_v63  ;;  %v12761_v26 = vld [vmem:[#allocation14 + $0x38c] sm:$0xf0]  ;;  %v11162_v55 = vor.u32 %v12685_v30, %v11161_v48  ;;  %v11145_v1 = vld [vmem:[#allocation14 + $0x100] sm:$0xf] }
 0x4d0   :  { %6896 = vmatpush.bf16.msrb.mxu2 %v11386_v14  ;;  %v11081_v14 = vld [vmem:[#allocation14 + $0x80] sm:$0xf]  ;;  %v12753_v57 = vld [vmem:[#allocation14 + $0x34c] sm:$0xf0] }
 0x4d1   :  { %11013 = vmatmul.msk.bf16.vlgmr.msra.gmra.mxu2 %vm6016_vm6, %v5909_v12  ;;  %11014 = vmatmul.msk.bf16.vlgmr.msra.gmra.mxu3 %vm6016_vm6, %v5909_v12  ;;  %v5640_v40 = vpop.f32.mrf.mxu1  ;;  %v11434_v61 = vor.u32 %v12753_v57, %v11433_v56  ;;  %v12661_v35 = vld [vmem:[#allocation14 + $0x6c] sm:$0xf0]  ;;  %v11289_v11 = vld [vmem:[#allocation14 + $0x220] sm:$0xf] }
 0x4d2   :  { %11011 = vmatmul.msk.bf16.vlgmr.msra.gmra.mxu0 %vm6016_vm6, %v5909_v12  ;;  %v5641_v18 = vadd.f32 %v5640_v40, %v5628_v19  ;;  %6909 = vmatpush.bf16.msrb.mxu3 %v11514_v23  ;;  %v12665_v23 = vld [vmem:[#allocation14 + $0x8c] sm:$0xf0]  ;;  %v11066_v63 = vor.u32 %v12661_v35, %v11065_v62  ;;  %v11049_v4 = vld [vmem:[#allocation14 + $0x40] sm:$0xf]  ;;  %v11211_v62 = vld [vmem:[#allocation14 + $0x190] sm:$0xf0] }
 0x4d3   :  { %6884 = vmatpush.bf16.msrb.mxu1 %v11242_v44  ;;  %6871 = vmatpush.bf16.msrb.mxu0 %v11114_v2  ;;  %v12725_v44 = vld [vmem:[#allocation14 + $0x26c] sm:$0xf0]  ;;  %v11082_v50 = vor.u32 %v12665_v23, %v11081_v14  ;;  %v11017_v23 = vld [vmem:[#allocation14] sm:$0xf] }
 0x4d4   :  { %v5654_v28 = vadd.f32 %v5653_v16, %v5641_v18  ;;  %v5668_v17 = vpop.f32.mrf.mxu3  ;;  %v5679_v8 = vpop.f32.mrf.mxu0  ;;  %6897 = vmatpush.bf16.msrb.mxu2 %v11370_v46  ;;  %v11194_v18 = vor.u32 %v12693_v27, %v11193_v15  ;;  %v12681_v5 = vld [vmem:[#allocation14 + $0x10c] sm:$0xf0] }
 0x4d5   :  { %v12689_v17 = vld [vmem:[#allocation14 + $0x14c] sm:$0xf0]  ;;  %v11146_v6 = vor.u32 %v12681_v5, %v11145_v1  ;;  %v12731_v1 = vld [vmem:[#allocation14 + $0x2a4] sm:$0xf]  ;;  %v11355_v5 = vld [vmem:[#allocation14 + $0x2b0] sm:$0xf0] }
 0x4d6   :  { %v5667_v39 = vadd.f32 %v5666_v29, %v5654_v28  ;;  %6910 = vmatpush.bf16.msrb.mxu3 %v11498_v58  ;;  %v11097_v28 = vld [vmem:[#allocation14 + $0xa0] sm:$0xf]  ;;  %v12669_v29 = vld [vmem:[#allocation14 + $0xac] sm:$0xf0] }
 0x4d7   :  { %v5655_v42 = vpop.f32.mrf.mxu2  ;;  %6885 = vmatpush.bf16.msrb.mxu1 %v11226_v25  ;;  %v12721_v25 = vld [vmem:[#allocation14 + $0x24c] sm:$0xf0] }
 0x4d8   :  { %v5680_v53 = vadd.f32 %v5679_v8, %v5667_v39  ;;  %6898 = vmatpush.bf16.msrb.mxu2 %v11354_v38  ;;  %v11466_v39 = vor.u32 %v12761_v26, %v11465_v21  ;;  %v11177_v42 = vld [vmem:[#allocation14 + $0x140] sm:$0xf]  ;;  %v11450_v8 = vor.u32 %v12757_v34, %v11449_v45  ;;  %v12717_v49 = vld [vmem:[#allocation14 + $0x22c] sm:$0xf0] }
 0x4d9   :  { %v5642_v0 = vpop.f32.mrf.mxu1  ;;  %v11178_v43 = vor.u32 %v12689_v17, %v11177_v42  ;;  %v12749_v54 = vld [vmem:[#allocation14 + $0x32c] sm:$0xf0]  ;;  %v12739_v42 = vld [vmem:[#allocation14 + $0x2e4] sm:$0xf]  ;;  %v11387_v17 = vld [vmem:[#allocation14 + $0x2f0] sm:$0xf0] }
 0x4da   :  { %6911 = vmatpush.bf16.msrb.mxu3 %v11482_v24  ;;  %v12729_v0 = vld [vmem:[#allocation14 + $0x28c] sm:$0xf0] }
 0x4db   :  { %6886 = vmatpush.bf16.msrb.mxu1 %v11210_v9  ;;  %v11338_v16 = vor.u32 %v12729_v0, %v11337_v20  ;;  %v11259_v9 = vld [vmem:[#allocation14 + $0x1f0] sm:$0xf0]  ;;  %v12657_v15 = vld [vmem:[#allocation14 + $0x4c] sm:$0xf0]  ;;  %v11273_v0 = vld [vmem:[#allocation14 + $0x200] sm:$0xf] }
 0x4dc   :  { %v5681_v12 = vpop.f32.mrf.mxu0  ;;  %v5731_v40 = vpop.f32.mrf.mxu3  ;;  %v12713_v21 = vld [vmem:[#allocation14 + $0x20c] sm:$0xf0] }
 0x4dd   :  { %6899 = vmatpush.bf16.msrb.mxu2 %v11338_v16  ;;  %v11417_v12 = vld [vmem:[#allocation14 + $0x320] sm:$0xf]  ;;  %v11274_v16 = vor.u32 %v12713_v21, %v11273_v0  ;;  %v12745_v26 = vld [vmem:[#allocation14 + $0x30c] sm:$0xf0]  ;;  %v11467_v0 = vld [vmem:[#allocation14 + $0x390] sm:$0xf0] }
 0x4de   :  { %6912 = vmatpush.bf16.msrb.mxu3 %v11466_v39  ;;  %v11418_v27 = vor.u32 %v12749_v54, %v11417_v12  ;;  %v12649_v48 = vld [vmem:[#allocation14 + $0xc] sm:$0xf0]  ;;  %v11115_v12 = vld [vmem:[#allocation14 + $0xd0] sm:$0xf0]  ;;  %v12691_v54 = vld [vmem:[#allocation14 + $0x164] sm:$0xf] }
 0x4df   :  { %v5718_v19 = vpop.f32.mrf.mxu2  ;;  %6887 = vmatpush.bf16.msrb.mxu1 %v11194_v18  ;;  %v11243_v18 = vld [vmem:[#allocation14 + $0x1d0] sm:$0xf0]  ;;  %v11018_v30 = vor.u32 %v12649_v48, %v11017_v23  ;;  %v12667_v21 = vld [vmem:[#allocation14 + $0xa4] sm:$0xf] }
 0x4e0   :  { %v12719_v48 = vld [vmem:[#allocation14 + $0x244] sm:$0xf] }
 0x4e1   :  { %v5692_v31 = vpop.f32.mrf.mxu1 }
 0x4e2   :  { %v13596_v32 = vadd.f32 %v5692_v31, %v5680_v53  ;;  %v11098_v31 = vor.u32 %v12669_v29, %v11097_v28  ;;  %v11305_v53 = vld [vmem:[#allocation14 + $0x240] sm:$0xf]  ;;  %6913 = vmatpush.bf16.msrb.mxu3 %v11450_v8  ;;  %v12653_v29 = vld [vmem:[#allocation14 + $0x2c] sm:$0xf0] }
 0x4e3   :  { %6888 = vmatpush.bf16.msrb.mxu1 %v11178_v43  ;;  %v11306_v46 = vor.u32 %v12721_v25, %v11305_v53  ;;  %v11033_v28 = vld [vmem:[#allocation14 + $0x20] sm:$0xf]  ;;  %v12699_v43 = vld [vmem:[#allocation14 + $0x1a4] sm:$0xf]  ;;  %v11371_v53 = vld [vmem:[#allocation14 + $0x2d0] sm:$0xf0] }
 0x4e4   :  { %6872 = vmatpush.bf16.msrb.mxu0 %v11098_v31  ;;  %v11034_v31 = vor.u32 %v12653_v29, %v11033_v28  ;;  %v12767_v25 = vld [vmem:[#allocation14 + $0x3c4] sm:$0xf]  ;;  %v11179_v29 = vld [vmem:[#allocation14 + $0x150] sm:$0xf0] }
 0x4e5   :  { %v12687_v28 = vld [vmem:[#allocation14 + $0x144] sm:$0xf] }
 0x4e6   :  { %6914 = vmatpush.bf16.msrb.mxu3 %v11434_v61 }
 0x4e7   :  { %v5720_v58 = vpop.f32.mrf.mxu2  ;;  %6889 = vmatpush.bf16.msrb.mxu1 %v11162_v55  ;;  %v11499_v55 = vld [vmem:[#allocation14 + $0x3d0] sm:$0xf0] }
 0x4e8   :  { %6873 = vmatpush.bf16.msrb.mxu0 %v11082_v50  ;;  %v12735_v50 = vld [vmem:[#allocation14 + $0x2c4] sm:$0xf]  ;;  %v11502_v57 = vor.u32 %v12767_v25, %v11499_v55  ;;  %v11131_v58 = vld [vmem:[#allocation14 + $0xf0] sm:$0xf0] }
 0x4e9   :  { %v5694_v33 = vpop.f32.mrf.mxu1  ;;  %v11374_v56 = vor.u32 %v12735_v50, %v11371_v53  ;;  %v11307_v50 = vld [vmem:[#allocation14 + $0x250] sm:$0xf0]  ;;  %v12659_v55 = vld [vmem:[#allocation14 + $0x64] sm:$0xf] }
 0x4ea   :  { %v11321_v33 = vld [vmem:[#allocation14 + $0x260] sm:$0xf]  ;;  %6915 = vmatpush.bf16.msrb.mxu3 %v11418_v27  ;;  %v11310_v53 = vor.u32 %v12719_v48, %v11307_v50  ;;  %v11435_v25 = vld [vmem:[#allocation14 + $0x350] sm:$0xf0] }
 0x4eb   :  { %v11322_v47 = vor.u32 %v12725_v44, %v11321_v33  ;;  %6890 = vmatpush.bf16.msrb.mxu1 %v11146_v6  ;;  %v12771_v33 = vld [vmem:[#allocation14 + $0x3e4] sm:$0xf]  ;;  %v11227_v44 = vld [vmem:[#allocation14 + $0x1b0] sm:$0xf0] }
 0x4ec   :  { %6874 = vmatpush.bf16.msrb.mxu0 %v11066_v63  ;;  %v12763_v6 = vld [vmem:[#allocation14 + $0x3a4] sm:$0xf] }
 0x4ed   :  { %6900 = vmatpush.bf16.msrb.mxu2 %v11322_v47  ;;  %v11230_v47 = vor.u32 %v12699_v43, %v11227_v44  ;;  %v11451_v43 = vld [vmem:[#allocation14 + $0x370] sm:$0xf0]  ;;  %v12663_v44 = vld [vmem:[#allocation14 + $0x84] sm:$0xf] }
 0x4ee   :  { %v5744_v24 = vpop.f32.mrf.mxu0 }
 0x4f1   :  { %v5705_v7 = vpop.f32.mrf.mxu1  ;;  %6901 = vmatpush.bf16.msrb.mxu2 %v11306_v46  ;;  %v12675_v46 = vld [vmem:[#allocation14 + $0xe4] sm:$0xf] }
 0x4f2   :  { %v5706_v13 = vadd.f32 %v5705_v7, %v991_v60  ;;  %v5733_v60 = vpop.f32.mrf.mxu3  ;;  %v12707_v7 = vld [vmem:[#allocation14 + $0x1e4] sm:$0xf]  ;;  %v11134_v61 = vor.u32 %v12675_v46, %v11131_v58  ;;  %v11147_v58 = vld [vmem:[#allocation14 + $0x110] sm:$0xf0] }
 0x4f3   :  { %v11262_v38 = vor.u32 %v12707_v7, %v11259_v9  ;;  %v12695_v60 = vld [vmem:[#allocation14 + $0x184] sm:$0xf] }
 0x4f4   :  { %v5719_v22 = vadd.f32 %v5718_v19, %v5706_v13  ;;  %v11290_v13 = vor.u32 %v12717_v49, %v11289_v11  ;;  %v11050_v19 = vor.u32 %v12657_v15, %v11049_v4  ;;  %v11214_v63 = vor.u32 %v12695_v60, %v11211_v62  ;;  %v11483_v11 = vld [vmem:[#allocation14 + $0x3b0] sm:$0xf0]  ;;  %v12671_v49 = vld [vmem:[#allocation14 + $0xc4] sm:$0xf] }
 0x4f5   :  { %6935 = vmatpush.bf16.msra.mxu1 %v11262_v38  ;;  %v11358_v38 = vor.u32 %v12731_v1, %v11355_v5  ;;  %v11195_v4 = vld [vmem:[#allocation14 + $0x170] sm:$0xf0]  ;;  %v12679_v46 = vld [vmem:[#allocation14 + $0x104] sm:$0xf] }
 0x4f6   :  { %v5732_v36 = vadd.f32 %v5731_v40, %v5719_v22  ;;  %6902 = vmatpush.bf16.msrb.mxu2 %v11290_v13  ;;  %v12703_v40 = vld [vmem:[#allocation14 + $0x1c4] sm:$0xf]  ;;  %6875 = vmatpush.bf16.msrb.mxu0 %v11050_v19  ;;  %v11401_v22 = vld [vmem:[#allocation14 + $0x300] sm:$0xf]  ;;  %v5746_v8 = vpop.f32.mrf.mxu0  ;;  %v11118_v13 = vor.u32 %v12671_v49, %v11115_v12  ;;  %v11198_v27 = vor.u32 %v12691_v54, %v11195_v4  ;;  %v11419_v5 = vld [vmem:[#allocation14 + $0x330] sm:$0xf0] }
 0x4f7   :  { %v11246_v20 = vor.u32 %v12703_v40, %v11243_v18  ;;  %v11402_v39 = vor.u32 %v12745_v26, %v11401_v22  ;;  %v12727_v19 = vld [vmem:[#allocation14 + $0x284] sm:$0xf]  ;;  %v11339_v40 = vld [vmem:[#allocation14 + $0x290] sm:$0xf0] }
 0x4f8   :  { %v5745_v2 = vadd.f32 %v5744_v24, %v5732_v36  ;;  %v11390_v36 = vor.u32 %v12739_v42, %v11387_v17  ;;  %v11486_v24 = vor.u32 %v12763_v6, %v11483_v11  ;;  %v12759_v18 = vld [vmem:[#allocation14 + $0x384] sm:$0xf]  ;;  %v11099_v22 = vld [vmem:[#allocation14 + $0xb0] sm:$0xf0] }
 0x4f9   :  { %v5707_v37 = vpop.f32.mrf.mxu1  ;;  %6936 = vmatpush.bf16.msra.mxu1 %v11246_v20  ;;  %6916 = vmatpush.bf16.msrb.mxu3 %v11402_v39  ;;  %v11342_v20 = vor.u32 %v12727_v19, %v11339_v40  ;;  %v11102_v26 = vor.u32 %v12667_v21, %v11099_v22  ;;  %v11182_v39 = vor.u32 %v12687_v28, %v11179_v29  ;;  %v12723_v42 = vld [vmem:[#allocation14 + $0x264] sm:$0xf]  ;;  %v11323_v17 = vld [vmem:[#allocation14 + $0x270] sm:$0xf0] }
 0x4fa   :  { %6903 = vmatpush.bf16.msrb.mxu2 %v11274_v16  ;;  %v11515_v37 = vld [vmem:[#allocation14 + $0x3f0] sm:$0xf0]  ;;  %6876 = vmatpush.bf16.msrb.mxu0 %v11034_v31  ;;  %v11470_v16 = vor.u32 %v12759_v18, %v11467_v0  ;;  %v12683_v8 = vld [vmem:[#allocation14 + $0x124] sm:$0xf] }
 0x4fb   :  { %v11518_v34 = vor.u32 %v12771_v33, %v11515_v37  ;;  %v12755_v33 = vld [vmem:[#allocation14 + $0x364] sm:$0xf]  ;;  %v11326_v37 = vor.u32 %v12723_v42, %v11323_v17  ;;  %v11403_v4 = vld [vmem:[#allocation14 + $0x310] sm:$0xf0] }
 0x4fc   :  { %v12715_v62 = vld [vmem:[#allocation14 + $0x224] sm:$0xf] }
 0x4fd   :  { %6961 = vmatpush.bf16.msra.mxu3 %v11518_v34  ;;  %6937 = vmatpush.bf16.msra.mxu1 %v11230_v47  ;;  %v11454_v34 = vor.u32 %v12755_v33, %v11451_v43  ;;  %v12655_v6 = vld [vmem:[#allocation14 + $0x44] sm:$0xf] }
 0x4fe   :  { %6948 = vmatpush.bf16.msra.mxu2 %v11390_v36  ;;  %6877 = vmatpush.bf16.msrb.mxu0 %v11018_v30  ;;  %v12751_v30 = vld [vmem:[#allocation14 + $0x344] sm:$0xf] }
 0x4ff   :  { %v12711_v12 = vld [vmem:[#allocation14 + $0x204] sm:$0xf] }
 0x500   :  { %v12647_v21 = vld [vmem:[#allocation14 + $0x4] sm:$0xf] }
 0x501   :  { %v5757_v45 = vpop.f32.mrf.mxu1  ;;  %6962 = vmatpush.bf16.msra.mxu3 %v11502_v57  ;;  %6938 = vmatpush.bf16.msra.mxu1 %v11214_v63  ;;  %v11067_v57 = vld [vmem:[#allocation14 + $0x70] sm:$0xf0]  ;;  %v12747_v63 = vld [vmem:[#allocation14 + $0x324] sm:$0xf] }
 0x502   :  { %v5758_v14 = vadd.f32 %v5757_v45, %v5745_v2  ;;  %v5770_v35 = vpop.f32.mrf.mxu2  ;;  %6949 = vmatpush.bf16.msra.mxu2 %v11374_v56  ;;  %6922 = vmatpush.bf16.msra.mxu0 %v11134_v61  ;;  %v11083_v45 = vld [vmem:[#allocation14 + $0x90] sm:$0xf0]  ;;  %v11438_v56 = vor.u32 %v12751_v30, %v11435_v25  ;;  %v11070_v60 = vor.u32 %v12659_v55, %v11067_v57 }
 0x503   :  { %v11086_v47 = vor.u32 %v12663_v44, %v11083_v45  ;;  %v11150_v61 = vor.u32 %v12679_v46, %v11147_v58 }
 0x504   :  { %v5771_v7 = vadd.f32 %v5770_v35, %v5758_v14  ;;  %v5783_v9 = vpop.f32.mrf.mxu3  ;;  %v11163_v14 = vld [vmem:[#allocation14 + $0x130] sm:$0xf0] }
 0x505   :  { %6963 = vmatpush.bf16.msra.mxu3 %v11486_v24  ;;  %6939 = vmatpush.bf16.msra.mxu1 %v11198_v27  ;;  %v11166_v23 = vor.u32 %v12683_v8, %v11163_v14  ;;  %v11291_v35 = vld [vmem:[#allocation14 + $0x230] sm:$0xf0]  ;;  %v11265_v14 = vld [vmem:[#allocation14 + $0x1e8] sm:$0xf] }
 0x506   :  { %v13599_v15 = vadd.f32 %v5783_v9, %v5771_v7  ;;  %6950 = vmatpush.bf16.msra.mxu2 %v11358_v38  ;;  %6923 = vmatpush.bf16.msra.mxu0 %v11118_v13  ;;  %v11294_v1 = vor.u32 %v12715_v62, %v11291_v35  ;;  %v11051_v7 = vld [vmem:[#allocation14 + $0x50] sm:$0xf0]  ;;  %v11422_v38 = vor.u32 %v12747_v63, %v11419_v5  ;;  %v12743_v13 = vld [vmem:[#allocation14 + $0x304] sm:$0xf]  ;;  %v11393_v62 = vld [vmem:[#allocation14 + $0x2e8] sm:$0xf] }
 0x507   :  { %v11054_v11 = vor.u32 %v12655_v6, %v11051_v7  ;;  %v11275_v24 = vld [vmem:[#allocation14 + $0x210] sm:$0xf0]  ;;  %v11406_v19 = vor.u32 %v12743_v13, %v11403_v4  ;;  %v12742_v6 = vld [vmem:[#allocation14 + $0x2f4] sm:$0xf0]  ;;  %v11521_v7 = vld [vmem:[#allocation14 + $0x3e8] sm:$0xf] }
 0x508   :  { %v11278_v54 = vor.u32 %v12711_v12, %v11275_v24  ;;  %v11035_v27 = vld [vmem:[#allocation14 + $0x30] sm:$0xf0]  ;;  %v11233_v12 = vld [vmem:[#allocation14 + $0x1a8] sm:$0xf]  ;;  %v12702_v24 = vld [vmem:[#allocation14 + $0x1b4] sm:$0xf0] }
 0x509   :  { %v5759_v2 = vpop.f32.mrf.mxu1  ;;  %6964 = vmatpush.bf16.msra.mxu3 %v11470_v16  ;;  %6940 = vmatpush.bf16.msra.mxu1 %v11182_v39  ;;  %v11377_v4 = vld [vmem:[#allocation14 + $0x2c8] sm:$0xf] }
 0x50a   :  { %v5772_v31 = vpop.f32.mrf.mxu2  ;;  %6951 = vmatpush.bf16.msra.mxu2 %v11342_v20  ;;  %6924 = vmatpush.bf16.msra.mxu0 %v11102_v26  ;;  %v12651_v2 = vld [vmem:[#allocation14 + $0x24] sm:$0xf] }
 0x50b   :  { %v11038_v40 = vor.u32 %v12651_v2, %v11035_v27  ;;  %v5926_v31 = vld [vmem:[#allocation13] sm:$0xf]  ;;  %v11394_v27 = vor.u32 %v12742_v6, %v11393_v62  ;;  %v11105_v62 = vld [vmem:[#allocation14 + $0xa8] sm:$0xf] }
 0x50c   :  { %v5785_v36 = vpop.f32.mrf.mxu3  ;;  %v5929_v33 = vperm.slane %v5926_v31, 1  ;;  %v5931_v8 = vperm.slane %v5926_v31, 3  ;;  %v5928_v58 = vperm.slane %v5926_v31, 0 }
 0x50d   :  { %6965 = vmatpush.bf16.msra.mxu3 %v11454_v34  ;;  %6941 = vmatpush.bf16.msra.mxu1 %v11166_v23  ;;  %v12710_v23 = vld [vmem:[#allocation14 + $0x1f4] sm:$0xf0] }
 0x50e   :  { %6952 = vmatpush.bf16.msra.mxu2 %v11326_v37  ;;  %6925 = vmatpush.bf16.msra.mxu0 %v11086_v47  ;;  %v5930_v47 = vperm.slane %v5926_v31, 2  ;;  %v11266_v25 = vor.u32 %v12710_v23, %v11265_v14  ;;  %v12698_v31 = vld [vmem:[#allocation14 + $0x194] sm:$0xf0]  ;;  %v11121_v23 = vld [vmem:[#allocation14 + $0xc8] sm:$0xf] }
 0x50f   :  { %v12766_v14 = vld [vmem:[#allocation14 + $0x3b4] sm:$0xf0] }
 0x511   :  { %6966 = vmatpush.bf16.msra.mxu3 %v11438_v56  ;;  %6942 = vmatpush.bf16.msra.mxu1 %v11150_v61  ;;  %v12706_v61 = vld [vmem:[#allocation14 + $0x1d4] sm:$0xf0] }
 0x512   :  { %6953 = vmatpush.bf16.msra.mxu2 %v11310_v53  ;;  %6926 = vmatpush.bf16.msra.mxu0 %v11070_v60  ;;  %v11249_v60 = vld [vmem:[#allocation14 + $0x1c8] sm:$0xf] }
 0x513   :  { %v11250_v5 = vor.u32 %v12706_v61, %v11249_v60  ;;  %v12762_v60 = vld [vmem:[#allocation14 + $0x394] sm:$0xf0] }
 0x515   :  { %6967 = vmatpush.bf16.msra.mxu3 %v11422_v38 }
 0x516   :  { %6954 = vmatpush.bf16.msra.mxu2 %v11294_v1  ;;  %6927 = vmatpush.bf16.msra.mxu0 %v11054_v11 }
 0x519   :  { %6968 = vmatpush.bf16.msra.mxu3 %v11406_v19 }
 0x51a   :  { %6955 = vmatpush.bf16.msra.mxu2 %v11278_v54  ;;  %6928 = vmatpush.bf16.msra.mxu0 %v11038_v40  ;;  %v12738_v40 = vld [vmem:[#allocation14 + $0x2d4] sm:$0xf0] }
 0x52e   :  { %v5796_v9 = vpop.f32.mrf.mxu0 }
 0x52f   :  { %v5797_v49 = vadd.f32 %v5796_v9, %v13599_v15  ;;  %v11019_v15 = vld [vmem:[#allocation14 + $0x10] sm:$0xf0]  ;;  %v12774_v9 = vld [vmem:[#allocation14 + $0x3f4] sm:$0xf0] }
 0x530   :  { %v11022_v22 = vor.u32 %v12647_v21, %v11019_v15  ;;  %v11522_v19 = vor.u32 %v12774_v9, %v11521_v7  ;;  %v11234_v15 = vor.u32 %v12702_v24, %v11233_v12  ;;  %v11329_v7 = vld [vmem:[#allocation14 + $0x268] sm:$0xf] }
 0x531   :  { %v11089_v24 = vld [vmem:[#allocation14 + $0x88] sm:$0xf] }
 0x532   :  { %6929 = vmatpush.bf16.msra.mxu0 %v11022_v22  ;;  %v11505_v22 = vld [vmem:[#allocation14 + $0x3c8] sm:$0xf] }
 0x536   :  { %v5798_v0 = vpop.f32.mrf.mxu0 }
 0x538   :  { %v5809_v18 = vpop.f32.mrf.mxu1 }
 0x539   :  { %v5810_v20 = vadd.f32 %v5809_v18, %v5797_v49 }
 0x53f   :  { %v5848_v42 = vpop.f32.mrf.mxu0 }
 0x540   :  { %v5811_v29 = vpop.f32.mrf.mxu1 }
 0x541   :  { %v12678_v29 = vld [vmem:[#allocation14 + $0xf4] sm:$0xf0] }
 0x544   :  { %v5822_v16 = vpop.f32.mrf.mxu2  ;;  %v5835_v26 = vpop.f32.mrf.mxu3 }
 0x545   :  { %v5823_v28 = vadd.f32 %v5822_v16, %v5810_v20  ;;  %v12770_v16 = vld [vmem:[#allocation14 + $0x3d4] sm:$0xf0] }
 0x547   :  { %v5836_v39 = vadd.f32 %v5835_v26, %v5823_v28  ;;  %v5850_v34 = vpop.f32.mrf.mxu0  ;;  %v11137_v26 = vld [vmem:[#allocation14 + $0xe8] sm:$0xf] }
 0x549   :  { %v13602_v17 = vadd.f32 %v5848_v42, %v5836_v39  ;;  %v11217_v39 = vld [vmem:[#allocation14 + $0x188] sm:$0xf] }
 0x54a   :  { %v11218_v34 = vor.u32 %v12698_v31, %v11217_v39 }
 0x54b   :  { %v6042_v43 = vpop.f32.mrf.mxu1 }
 0x54c   :  { %v5824_v36 = vpop.f32.mrf.mxu2  ;;  %v5837_v37 = vpop.f32.mrf.mxu3  ;;  %v6043_v44 = vadd.f32 %v6042_v43, %v5929_v33  ;;  %v11378_v33 = vor.u32 %v12738_v40, %v11377_v4  ;;  %v12686_v4 = vld [vmem:[#allocation14 + $0x134] sm:$0xf0] }
 0x54d   :  { %v11506_v36 = vor.u32 %v12770_v16, %v11505_v22  ;;  %v11361_v37 = vld [vmem:[#allocation14 + $0x2a8] sm:$0xf] }
 0x54e   :  { %vm6073_vm7 = vcmp.ge.f32.partialorder %v6043_v44, 0.0  ;;  %v6077_v45 = vmul.f32 0.2, %v6043_v44  ;;  %v11073_v16 = vld [vmem:[#allocation14 + $0x68] sm:$0xf] }
 0x54f   :  { %v6029_v1 = vpop.f32.mrf.mxu0 }
 0x550   :  { %v6081_v48 = vsel %vm6073_vm7, %v6043_v44, %v6077_v45  ;;  %v6030_v49 = vadd.f32 %v6029_v1, %v5928_v58  ;;  %v11138_v45 = vor.u32 %v12678_v29, %v11137_v26  ;;  %v11473_v58 = vld [vmem:[#allocation14 + $0x388] sm:$0xf]  ;;  %v12690_v1 = vld [vmem:[#allocation14 + $0x154] sm:$0xf0] }
 0x551   :  { %v6085_v50 = vmul.f32 1.4142135, %v6081_v48  ;;  %v12674_v48 = vld [vmem:[#allocation14 + $0xd4] sm:$0xf0]  ;;  %v11474_v6 = vor.u32 %v12762_v60, %v11473_v58  ;;  %v11041_v60 = vld [vmem:[#allocation14 + $0x28] sm:$0xf] }
 0x552   :  { %vm6072_vm10 = vcmp.ge.f32.partialorder %v6030_v49, 0.0  ;;  %v6076_v2 = vmul.f32 0.2, %v6030_v49  ;;  %v12662_v26 = vld [vmem:[#allocation14 + $0x74] sm:$0xf0] }
 0x553   :  { %v13604_v55 = vpack.c.bf16 %v6085_v50, %v6085_v50  ;;  %v6044_v46 = vpop.f32.mrf.mxu1  ;;  %v11201_v50 = vld [vmem:[#allocation14 + $0x168] sm:$0xf]  ;;  %v12682_v29 = vld [vmem:[#allocation14 + $0x114] sm:$0xf0] }
 0x554   :  { %v6055_v30 = vpop.f32.mrf.mxu2  ;;  %v6068_v53 = vpop.f32.mrf.mxu3  ;;  %v6080_v28 = vsel %vm6072_vm10, %v6030_v49, %v6076_v2  ;;  %v12730_v46 = vld [vmem:[#allocation14 + $0x294] sm:$0xf0] }
 0x555   :  { %v6056_v56 = vadd.f32 %v6055_v30, %v5930_v47  ;;  %v6069_v57 = vadd.f32 %v6068_v53, %v5931_v8  ;;  %6891 = vmatmul.bf16.vlgmr.msrb.gmra.mxu1 %v13604_v55  ;;  %v6084_v42 = vmul.f32 1.4142135, %v6080_v28  ;;  %v12734_v47 = vld [vmem:[#allocation14 + $0x2b4] sm:$0xf0]  ;;  %v11489_v8 = vld [vmem:[#allocation14 + $0x3a8] sm:$0xf] }
 0x556   :  { %6987 = vmatpush.bf16.msrb.mxu1 %v11266_v25  ;;  %v12694_v30 = vld [vmem:[#allocation14 + $0x174] sm:$0xf0]  ;;  %v11362_v53 = vor.u32 %v12734_v47, %v11361_v37  ;;  %v11490_v25 = vor.u32 %v12766_v14, %v11489_v8  ;;  %v11153_v28 = vld [vmem:[#allocation14 + $0x108] sm:$0xf]  ;;  %v11074_v37 = vor.u32 %v12662_v26, %v11073_v16 }
 0x557   :  { %vm6074_vm8 = vcmp.ge.f32.partialorder %v6056_v56, 0.0  ;;  %v6078_v35 = vmul.f32 0.2, %v6056_v56  ;;  %vm6075_vm9 = vcmp.ge.f32.partialorder %v6069_v57, 0.0  ;;  %v6079_v63 = vmul.f32 0.2, %v6069_v57  ;;  %v6031_v44 = vpop.f32.mrf.mxu0 }
 0x558   :  { %v13613_v43 = vpack.c.bf16 %v6084_v42, %v6084_v42  ;;  %v11202_v61 = vor.u32 %v12694_v30, %v11201_v50  ;;  %v12758_v49 = vld [vmem:[#allocation14 + $0x374] sm:$0xf0]  ;;  %v12708_v42 = vld [vmem:[#allocation14 + $0x1ec] sm:$0xf]  ;;  %v11154_v47 = vor.u32 %v12682_v29, %v11153_v28  ;;  %v11057_v8 = vld [vmem:[#allocation14 + $0x48] sm:$0xf] }
 0x559   :  { %v6082_v38 = vsel %vm6074_vm8, %v6056_v56, %v6078_v35  ;;  %v6083_v11 = vsel %vm6075_vm9, %v6069_v57, %v6079_v63  ;;  %v11345_v56 = vld [vmem:[#allocation14 + $0x288] sm:$0xf]  ;;  %v11122_v57 = vor.u32 %v12674_v48, %v11121_v23  ;;  %v12670_v35 = vld [vmem:[#allocation14 + $0xb4] sm:$0xf0]  ;;  %v12704_v48 = vld [vmem:[#allocation14 + $0x1cc] sm:$0xf] }
 0x55a   :  { %v6086_v13 = vmul.f32 1.4142135, %v6082_v38  ;;  %v6087_v54 = vmul.f32 1.4142135, %v6083_v11  ;;  %6988 = vmatpush.bf16.msrb.mxu1 %v11250_v5  ;;  %6878 = vmatmul.bf16.vlgmr.msrb.gmra.mxu0 %v13613_v43  ;;  %v11185_v63 = vld [vmem:[#allocation14 + $0x148] sm:$0xf]  ;;  %v11346_v5 = vor.u32 %v12730_v46, %v11345_v56  ;;  %v11106_v9 = vor.u32 %v12670_v35, %v11105_v62 }
 0x55b   :  { %6974 = vmatpush.bf16.msrb.mxu0 %v11138_v45  ;;  %v12726_v38 = vld [vmem:[#allocation14 + $0x274] sm:$0xf0]  ;;  %v11457_v11 = vld [vmem:[#allocation14 + $0x368] sm:$0xf]  ;;  %v11186_v12 = vor.u32 %v12690_v1, %v11185_v63  ;;  %v12740_v62 = vld [vmem:[#allocation14 + $0x2ec] sm:$0xf] }
 0x55c   :  { %v13607_v18 = vpack.c.bf16 %v6086_v13, %v6086_v13  ;;  %v13609_v20 = vpack.c.bf16 %v6087_v54, %v6087_v54  ;;  %v6057_v0 = vpop.f32.mrf.mxu2  ;;  %v6070_v21 = vpop.f32.mrf.mxu3  ;;  %v12666_v13 = vld [vmem:[#allocation14 + $0x94] sm:$0xf0]  ;;  %v11169_v54 = vld [vmem:[#allocation14 + $0x128] sm:$0xf]  ;;  %v11330_v2 = vor.u32 %v12726_v38, %v11329_v7  ;;  %v11395_v35 = vld [vmem:[#allocation14 + $0x2f8] sm:$0xf0] }
 0x55d   :  { %v11090_v40 = vor.u32 %v12666_v13, %v11089_v24  ;;  %v12722_v0 = vld [vmem:[#allocation14 + $0x254] sm:$0xf0]  ;;  %v11441_v21 = vld [vmem:[#allocation14 + $0x348] sm:$0xf]  ;;  %v11170_v22 = vor.u32 %v12686_v4, %v11169_v54  ;;  %v12772_v1 = vld [vmem:[#allocation14 + $0x3ec] sm:$0xf] }
 0x55e   :  { %6904 = vmatmul.bf16.vlgmr.msrb.gmra.mxu2 %v13607_v18  ;;  %6917 = vmatmul.bf16.vlgmr.msrb.gmra.mxu3 %v13609_v20  ;;  %v12718_v44 = vld [vmem:[#allocation14 + $0x234] sm:$0xf0]  ;;  %v11425_v45 = vld [vmem:[#allocation14 + $0x328] sm:$0xf]  ;;  %v11235_v38 = vld [vmem:[#allocation14 + $0x1b8] sm:$0xf0] }
 0x55f   :  { %7000 = vmatpush.bf16.msrb.mxu2 %v11394_v27  ;;  %7013 = vmatpush.bf16.msrb.mxu3 %v11522_v19  ;;  %v11458_v27 = vor.u32 %v12758_v49, %v11457_v11  ;;  %v11313_v19 = vld [vmem:[#allocation14 + $0x248] sm:$0xf]  ;;  %v12658_v14 = vld [vmem:[#allocation14 + $0x54] sm:$0xf0]  ;;  %v11398_v49 = vor.u32 %v12740_v62, %v11395_v35  ;;  %v12736_v54 = vld [vmem:[#allocation14 + $0x2cc] sm:$0xf] }
 0x560   :  { %6989 = vmatpush.bf16.msrb.mxu1 %v11234_v15  ;;  %6975 = vmatpush.bf16.msrb.mxu0 %v11122_v57  ;;  %v12754_v15 = vld [vmem:[#allocation14 + $0x354] sm:$0xf0]  ;;  %v11314_v39 = vor.u32 %v12722_v0, %v11313_v19  ;;  %v11058_v57 = vor.u32 %v12658_v14, %v11057_v8  ;;  %v11409_v46 = vld [vmem:[#allocation14 + $0x308] sm:$0xf]  ;;  %v11379_v4 = vld [vmem:[#allocation14 + $0x2d8] sm:$0xf0] }
 0x561   :  { %v11442_v31 = vor.u32 %v12754_v15, %v11441_v21  ;;  %v12714_v56 = vld [vmem:[#allocation14 + $0x214] sm:$0xf0]  ;;  %v11507_v19 = vld [vmem:[#allocation14 + $0x3d8] sm:$0xf0]  ;;  %v12696_v21 = vld [vmem:[#allocation14 + $0x18c] sm:$0xf]  ;;  %v11382_v16 = vor.u32 %v12736_v54, %v11379_v4 }
 0x562   :  { %v12746_v58 = vld [vmem:[#allocation14 + $0x314] sm:$0xf0]  ;;  %v11139_v0 = vld [vmem:[#allocation14 + $0xf8] sm:$0xf0]  ;;  %v12732_v29 = vld [vmem:[#allocation14 + $0x2ac] sm:$0xf] }
 0x563   :  { %7001 = vmatpush.bf16.msrb.mxu2 %v11378_v33  ;;  %7014 = vmatpush.bf16.msrb.mxu3 %v11506_v36  ;;  %v11267_v33 = vld [vmem:[#allocation14 + $0x1f8] sm:$0xf0]  ;;  %v11297_v36 = vld [vmem:[#allocation14 + $0x228] sm:$0xf]  ;;  %v11410_v7 = vor.u32 %v12746_v58, %v11409_v46  ;;  %v12650_v24 = vld [vmem:[#allocation14 + $0x14] sm:$0xf0] }
 0x564   :  { %6990 = vmatpush.bf16.msrb.mxu1 %v11218_v34  ;;  %6976 = vmatpush.bf16.msrb.mxu0 %v11106_v9  ;;  %v12750_v34 = vld [vmem:[#allocation14 + $0x334] sm:$0xf0]  ;;  %v11270_v23 = vor.u32 %v12708_v42, %v11267_v33  ;;  %v11298_v50 = vor.u32 %v12718_v44, %v11297_v36  ;;  %v12700_v9 = vld [vmem:[#allocation14 + $0x1ac] sm:$0xf]  ;;  %v11219_v15 = vld [vmem:[#allocation14 + $0x198] sm:$0xf0] }
 0x565   :  { %6943 = vmatmul.bf16.vlgmr.msra.gmra.mxu1 %v13604_v55  ;;  %v11426_v30 = vor.u32 %v12750_v34, %v11425_v45  ;;  %v11222_v42 = vor.u32 %v12696_v21, %v11219_v15  ;;  %v11491_v33 = vld [vmem:[#allocation14 + $0x3b8] sm:$0xf0]  ;;  %v12672_v36 = vld [vmem:[#allocation14 + $0xcc] sm:$0xf] }
 0x566   :  { %v12692_v44 = vld [vmem:[#allocation14 + $0x16c] sm:$0xf]  ;;  %v11203_v45 = vld [vmem:[#allocation14 + $0x178] sm:$0xf0] }
 0x567   :  { %7002 = vmatpush.bf16.msrb.mxu2 %v11362_v53  ;;  %7015 = vmatpush.bf16.msrb.mxu3 %v11490_v25  ;;  %v11251_v53 = vld [vmem:[#allocation14 + $0x1d8] sm:$0xf0]  ;;  %v11281_v25 = vld [vmem:[#allocation14 + $0x208] sm:$0xf]  ;;  %v12728_v14 = vld [vmem:[#allocation14 + $0x28c] sm:$0xf] }
 0x568   :  { %6991 = vmatpush.bf16.msrb.mxu1 %v11202_v61  ;;  %6977 = vmatpush.bf16.msrb.mxu0 %v11090_v40  ;;  %v12654_v61 = vld [vmem:[#allocation14 + $0x34] sm:$0xf0]  ;;  %v11254_v63 = vor.u32 %v12704_v48, %v11251_v53  ;;  %v12676_v40 = vld [vmem:[#allocation14 + $0xec] sm:$0xf]  ;;  %v11331_v62 = vld [vmem:[#allocation14 + $0x278] sm:$0xf0] }
 0x569   :  { %v11042_v11 = vor.u32 %v12654_v61, %v11041_v60  ;;  %v11142_v28 = vor.u32 %v12676_v40, %v11139_v0  ;;  %v12760_v48 = vld [vmem:[#allocation14 + $0x38c] sm:$0xf]  ;;  %v11443_v4 = vld [vmem:[#allocation14 + $0x358] sm:$0xf0] }
 0x56a   :  { %6930 = vmatmul.bf16.vlgmr.msra.gmra.mxu0 %v13613_v43  ;;  %v12668_v53 = vld [vmem:[#allocation14 + $0xac] sm:$0xf]  ;;  %v11155_v40 = vld [vmem:[#allocation14 + $0x118] sm:$0xf0] }
 0x56b   :  { %7003 = vmatpush.bf16.msrb.mxu2 %v11346_v5  ;;  %7016 = vmatpush.bf16.msrb.mxu3 %v11474_v6  ;;  %v11523_v5 = vld [vmem:[#allocation14 + $0x3f8] sm:$0xf0]  ;;  %v11282_v6 = vor.u32 %v12714_v56, %v11281_v25  ;;  %v12688_v56 = vld [vmem:[#allocation14 + $0x14c] sm:$0xf] }
 0x56c   :  { %6992 = vmatpush.bf16.msrb.mxu1 %v11186_v12  ;;  %6978 = vmatpush.bf16.msrb.mxu0 %v11074_v37  ;;  %v11025_v12 = vld [vmem:[#allocation14 + $0x8] sm:$0xf]  ;;  %v11526_v13 = vor.u32 %v12772_v1, %v11523_v5  ;;  %v11123_v37 = vld [vmem:[#allocation14 + $0xd8] sm:$0xf0]  ;;  %v12724_v61 = vld [vmem:[#allocation14 + $0x26c] sm:$0xf] }
 0x56d   :  { %v11126_v8 = vor.u32 %v12672_v36, %v11123_v37  ;;  %v11107_v25 = vld [vmem:[#allocation14 + $0xb8] sm:$0xf0]  ;;  %v12756_v35 = vld [vmem:[#allocation14 + $0x36c] sm:$0xf] }
 0x56e   :  { %6956 = vmatmul.bf16.vlgmr.msra.gmra.mxu2 %v13607_v18  ;;  %6969 = vmatmul.bf16.vlgmr.msra.gmra.mxu3 %v13609_v20  ;;  %v11110_v60 = vor.u32 %v12668_v53, %v11107_v25  ;;  %v11459_v1 = vld [vmem:[#allocation14 + $0x378] sm:$0xf0]  ;;  %v12664_v5 = vld [vmem:[#allocation14 + $0x8c] sm:$0xf] }
 0x56f   :  { %7004 = vmatpush.bf16.msrb.mxu2 %v11330_v2  ;;  %7017 = vmatpush.bf16.msrb.mxu3 %v11458_v27  ;;  %v12768_v2 = vld [vmem:[#allocation14 + $0x3cc] sm:$0xf]  ;;  %v11238_v27 = vor.u32 %v12700_v9, %v11235_v38  ;;  %v11171_v9 = vld [vmem:[#allocation14 + $0x138] sm:$0xf0]  ;;  %v11334_v38 = vor.u32 %v12724_v61, %v11331_v62  ;;  %v12837_v61 = vld [vmem:[#allocation19 + $0xf0] sm:$0xff] }
 0x570   :  { %6993 = vmatpush.bf16.msrb.mxu1 %v11170_v22  ;;  %6979 = vmatpush.bf16.msrb.mxu0 %v11058_v57  ;;  %v11026_v22 = vor.u32 %v12650_v24, %v11025_v12  ;;  %v11510_v26 = vor.u32 %v12768_v2, %v11507_v19  ;;  %v11187_v57 = vld [vmem:[#allocation14 + $0x158] sm:$0xf0]  ;;  %v12720_v12 = vld [vmem:[#allocation14 + $0x24c] sm:$0xf] }
 0x571   :  { %v11315_v24 = vld [vmem:[#allocation14 + $0x258] sm:$0xf0]  ;;  %v12660_v2 = vld [vmem:[#allocation14 + $0x6c] sm:$0xf] }
 0x572   :  { %v12680_v19 = vld [vmem:[#allocation14 + $0x10c] sm:$0xf]  ;;  %v11318_v0 = vor.u32 %v12720_v12, %v11315_v24  ;;  %v12830_v53 = vld [vmem:[#allocation19 + $0xb8] sm:$0xff]  ;;  %v12833_v24 = vld [vmem:[#allocation19 + $0xd0] sm:$0xff] }
 0x573   :  { %7005 = vmatpush.bf16.msrb.mxu2 %v11314_v39  ;;  %7018 = vmatpush.bf16.msrb.mxu3 %v11442_v31  ;;  %v11363_v39 = vld [vmem:[#allocation14 + $0x2b8] sm:$0xf0]  ;;  %v12764_v31 = vld [vmem:[#allocation14 + $0x3ac] sm:$0xf] }
 0x574   :  { %6994 = vmatpush.bf16.msrb.mxu1 %v11154_v47  ;;  %6980 = vmatpush.bf16.msrb.mxu0 %v11042_v11  ;;  %v11366_v34 = vor.u32 %v12732_v29, %v11363_v39  ;;  %v11494_v47 = vor.u32 %v12764_v31, %v11491_v33  ;;  %v11462_v11 = vor.u32 %v12756_v35, %v11459_v1  ;;  %v11427_v29 = vld [vmem:[#allocation14 + $0x338] sm:$0xf0]  ;;  %v12656_v39 = vld [vmem:[#allocation14 + $0x4c] sm:$0xf]  ;;  %v12819_v35 = vld [vmem:[#allocation19 + $0x60] sm:$0xff] }
 0x575   :  { %v11059_v31 = vld [vmem:[#allocation14 + $0x58] sm:$0xf0]  ;;  %v12813_v1 = vld [vmem:[#allocation19 + $0x30] sm:$0xff]  ;;  %v5860_v12 = vld.sshfl [vmem:[#allocation1 + $0x8] sm:$0xff pattern:$0x73625140] }
 0x576   :  { %v11062_v37 = vor.u32 %v12656_v39, %v11059_v31  ;;  %v12838_v25 = vld [vmem:[#allocation19 + $0xf8] sm:$0xff] }
 0x577   :  { %7006 = vmatpush.bf16.msrb.mxu2 %v11298_v50  ;;  %7019 = vmatpush.bf16.msrb.mxu3 %v11426_v30  ;;  %v11206_v50 = vor.u32 %v12692_v44, %v11203_v45  ;;  %v11475_v30 = vld [vmem:[#allocation14 + $0x398] sm:$0xf0]  ;;  %v12712_v44 = vld [vmem:[#allocation14 + $0x20c] sm:$0xf] }
 0x578   :  { %7039 = vmatpush.bf16.msra.mxu1 %v11270_v23  ;;  %6981 = vmatpush.bf16.msrb.mxu0 %v11026_v22  ;;  %v11347_v23 = vld [vmem:[#allocation14 + $0x298] sm:$0xf0]  ;;  %v11478_v58 = vor.u32 %v12760_v48, %v11475_v30  ;;  %v12716_v22 = vld [vmem:[#allocation14 + $0x22c] sm:$0xf] }
 0x579   :  { %6995 = vmatmul.bf16.vlgmr.msrb.gmra.mxu1 %v13604_v55  ;;  %v11350_v46 = vor.u32 %v12728_v14, %v11347_v23  ;;  %v11283_v45 = vld [vmem:[#allocation14 + $0x218] sm:$0xf0]  ;;  %v12821_v23 = vld [vmem:[#allocation19 + $0x70] sm:$0xff] }
 0x57a   :  { %v11043_v14 = vld [vmem:[#allocation14 + $0x38] sm:$0xf0]  ;;  %v11286_v48 = vor.u32 %v12712_v44, %v11283_v45  ;;  %v12807_v44 = vld [vmem:[#allocation19] sm:$0xff]  ;;  %v12861_v45 = vld [vmem:[#allocation19 + $0x1b0] sm:$0xff] }
 0x57b   :  { %7007 = vmatpush.bf16.msrb.mxu2 %v11282_v6  ;;  %7020 = vmatpush.bf16.msrb.mxu3 %v11410_v7  ;;  %v11091_v6 = vld [vmem:[#allocation14 + $0x98] sm:$0xf0]  ;;  %v12684_v7 = vld [vmem:[#allocation14 + $0x12c] sm:$0xf] }
 0x57c   :  { %7040 = vmatpush.bf16.msra.mxu1 %v11254_v63  ;;  %7026 = vmatpush.bf16.msra.mxu0 %v11142_v28  ;;  %v11190_v63 = vor.u32 %v12688_v56, %v11187_v57  ;;  %v11174_v54 = vor.u32 %v12684_v7, %v11171_v9  ;;  %v11158_v28 = vor.u32 %v12680_v19, %v11155_v40  ;;  %v12648_v56 = vld [vmem:[#allocation14 + $0xc] sm:$0xf]  ;;  %v11027_v57 = vld [vmem:[#allocation14 + $0x18] sm:$0xf0]  ;;  %v12817_v9 = vld [vmem:[#allocation19 + $0x50] sm:$0xff] }
 0x57d   :  { %6982 = vmatmul.bf16.vlgmr.msrb.gmra.mxu0 %v13613_v43  ;;  %v12814_v62 = vld [vmem:[#allocation19 + $0x38] sm:$0xff]  ;;  %v12812_v7 = vld [vmem:[#allocation19 + $0x28] sm:$0xff] }
 0x57e   :  { %7008 = vmatmul.bf16.vlgmr.msrb.gmra.mxu2 %v13607_v18  ;;  %7021 = vmatmul.bf16.vlgmr.msrb.gmra.mxu3 %v13609_v20  ;;  %v12832_v19 = vld [vmem:[#allocation19 + $0xc8] sm:$0xff]  ;;  %v12862_v39 = vld [vmem:[#allocation19 + $0x1b8] sm:$0xff] }
 0x57f   :  { %7052 = vmatpush.bf16.msra.mxu2 %v11398_v49  ;;  %7065 = vmatpush.bf16.msra.mxu3 %v11526_v13  ;;  %v11094_v49 = vor.u32 %v12664_v5, %v11091_v6  ;;  %v12752_v13 = vld [vmem:[#allocation14 + $0x34c] sm:$0xf]  ;;  %v12818_v5 = vld [vmem:[#allocation19 + $0x58] sm:$0xff]  ;;  %v12827_v6 = vld [vmem:[#allocation19 + $0xa0] sm:$0xff] }
 0x580   :  { %7041 = vmatpush.bf16.msra.mxu1 %v11238_v27  ;;  %7027 = vmatpush.bf16.msra.mxu0 %v11126_v8  ;;  %v11075_v27 = vld [vmem:[#allocation14 + $0x78] sm:$0xf0]  ;;  %v11446_v21 = vor.u32 %v12752_v13, %v11443_v4  ;;  %v12652_v8 = vld [vmem:[#allocation14 + $0x2c] sm:$0xf] }
 0x581   :  { %v11078_v15 = vor.u32 %v12660_v2, %v11075_v27  ;;  %v11046_v30 = vor.u32 %v12652_v8, %v11043_v14  ;;  %v12810_v13 = vld [vmem:[#allocation19 + $0x18] sm:$0xff]  ;;  %v5876_v2 = vmul.f32 %v5860_v12, %v13449_v10  ;;  %v12824_v27 = vld [vmem:[#allocation19 + $0x88] sm:$0xff]  ;;  %v12863_v12 = vld [vmem:[#allocation19 + $0x1c0] sm:$0xff] }
 0x582   :  { %v12854_v4 = vld [vmem:[#allocation19 + $0x178] sm:$0xff]  ;;  %v5861_v40 = vld.sshfl [vmem:[#allocation1 + $0x10] sm:$0xff pattern:$0x73625140] }
 0x583   :  { %7053 = vmatpush.bf16.msra.mxu2 %v11382_v16  ;;  %7066 = vmatpush.bf16.msra.mxu3 %v11510_v26  ;;  %v11299_v16 = vld [vmem:[#allocation14 + $0x238] sm:$0xf0]  ;;  %v12748_v26 = vld [vmem:[#allocation14 + $0x32c] sm:$0xf] }
 0x584   :  { %7042 = vmatpush.bf16.msra.mxu1 %v11222_v42  ;;  %7028 = vmatpush.bf16.msra.mxu0 %v11110_v60  ;;  %v12822_v42 = vld [vmem:[#allocation19 + $0x78] sm:$0xff]  ;;  %v11302_v33 = vor.u32 %v12716_v22, %v11299_v16  ;;  %v11430_v36 = vor.u32 %v12748_v26, %v11427_v29  ;;  %v12829_v60 = vld [vmem:[#allocation19 + $0xb0] sm:$0xff]  ;;  %v7163_v22 = vpack.c.bf16 %v5876_v2, %v5876_v2  ;;  %v12823_v16 = vld [vmem:[#allocation19 + $0x80] sm:$0xff] }
 0x585   :  { %v12831_v26 = vld [vmem:[#allocation19 + $0xc0] sm:$0xff]  ;;  %v12808_v29 = vld [vmem:[#allocation19 + $0x8] sm:$0xff]  ;;  %v12870_v31 = vld [vmem:[#allocation19 + $0x1f8] sm:$0xff] }
 0x586   :  { %v12860_v8 = vld [vmem:[#allocation19 + $0x1a8] sm:$0xff] }
 0x587   :  { %7054 = vmatpush.bf16.msra.mxu2 %v11366_v34  ;;  %7067 = vmatpush.bf16.msra.mxu3 %v11494_v47  ;;  %v12744_v34 = vld [vmem:[#allocation14 + $0x30c] sm:$0xf]  ;;  %v11411_v47 = vld [vmem:[#allocation14 + $0x318] sm:$0xf0] }
 0x588   :  { %7043 = vmatpush.bf16.msra.mxu1 %v11206_v50  ;;  %7029 = vmatpush.bf16.msra.mxu0 %v11094_v49  ;;  %v11414_v50 = vor.u32 %v12744_v34, %v11411_v47  ;;  %v12816_v49 = vld [vmem:[#allocation19 + $0x48] sm:$0xff]  ;;  %v12846_v34 = vld [vmem:[#allocation19 + $0x138] sm:$0xff]  ;;  %v12851_v47 = vld [vmem:[#allocation19 + $0x160] sm:$0xff] }
 0x58b   :  { %7055 = vmatpush.bf16.msra.mxu2 %v11350_v46  ;;  %7068 = vmatpush.bf16.msra.mxu3 %v11478_v58  ;;  %v12820_v46 = vld [vmem:[#allocation19 + $0x68] sm:$0xff]  ;;  %v11030_v58 = vor.u32 %v12648_v56, %v11027_v57  ;;  %v12858_v56 = vld [vmem:[#allocation19 + $0x198] sm:$0xff] }
 0x58c   :  { %7044 = vmatpush.bf16.msra.mxu1 %v11190_v63  ;;  %7030 = vmatpush.bf16.msra.mxu0 %v11078_v15  ;;  %v12836_v63 = vld [vmem:[#allocation19 + $0xe8] sm:$0xff]  ;;  %v12853_v15 = vld [vmem:[#allocation19 + $0x170] sm:$0xff]  ;;  %v12866_v57 = vld [vmem:[#allocation19 + $0x1d8] sm:$0xff] }
 0x58f   :  { %7056 = vmatpush.bf16.msra.mxu2 %v11334_v38  ;;  %7069 = vmatpush.bf16.msra.mxu3 %v11462_v11  ;;  %v12834_v38 = vld [vmem:[#allocation19 + $0xd8] sm:$0xff]  ;;  %v12811_v11 = vld [vmem:[#allocation19 + $0x20] sm:$0xff] }
 0x590   :  { %7045 = vmatpush.bf16.msra.mxu1 %v11174_v54  ;;  %7031 = vmatpush.bf16.msra.mxu0 %v11062_v37  ;;  %v12815_v54 = vld [vmem:[#allocation19 + $0x40] sm:$0xff] }
 0x593   :  { %7057 = vmatpush.bf16.msra.mxu2 %v11318_v0  ;;  %7070 = vmatpush.bf16.msra.mxu3 %v11446_v21  ;;  %v12809_v0 = vld [vmem:[#allocation19 + $0x10] sm:$0xff] }
 0x594   :  { %7046 = vmatpush.bf16.msra.mxu1 %v11158_v28  ;;  %7032 = vmatpush.bf16.msra.mxu0 %v11046_v30  ;;  %v5862_v21 = vld.sshfl [vmem:[#allocation1 + $0x18] sm:$0xff pattern:$0x73625140]  ;;  %v5877_v28 = vmul.f32 %v5861_v40, %v13480_v41  ;;  %v12867_v30 = vld [vmem:[#allocation19 + $0x1e0] sm:$0xff] }
 0x595   :  { %v5878_v10 = vmul.f32 %v5862_v21, %v13499_v59  ;;  %v12869_v59 = vld [vmem:[#allocation19 + $0x1f0] sm:$0xff]  ;;  %v12782_v40 = vld [vmem:[#allocation17 + $0x38] sm:$0xff] }
 0x597   :  { %7058 = vmatpush.bf16.msra.mxu2 %v11302_v33  ;;  %7071 = vmatpush.bf16.msra.mxu3 %v11430_v36  ;;  %v5859_v33 = vld.sshfl [vmem:[#allocation1] sm:$0xff pattern:$0x73625140]  ;;  %v7164_v36 = vpack.c.bf16 %v5877_v28, %v5877_v28  ;;  %v7165_v37 = vpack.c.bf16 %v5878_v10, %v5878_v10  ;;  %v12780_v10 = vld [vmem:[#allocation17 + $0x28] sm:$0xff] }
 0x598   :  { %7695 = vmatpush.bf16.msrb.mxu1 %v12822_v42  ;;  %7033 = vmatpush.bf16.msra.mxu0 %v11030_v58  ;;  %v12852_v42 = vld [vmem:[#allocation19 + $0x168] sm:$0xff]  ;;  %v5875_v41 = vmul.f32 %v5859_v33, %v13423_v51  ;;  %v12859_v51 = vld [vmem:[#allocation19 + $0x1a0] sm:$0xff] }
 0x599   :  { %7047 = vmatmul.bf16.vlgmr.msra.gmra.mxu1 %v13604_v55  ;;  %v12828_v55 = vld [vmem:[#allocation19 + $0xa8] sm:$0xff] }
 0x59a   :  { %v7162_v14 = vpack.c.bf16 %v5875_v41, %v5875_v41  ;;  %v12848_v58 = vld [vmem:[#allocation19 + $0x148] sm:$0xff]  ;;  %v12794_v41 = vld [vmem:[#allocation17 + $0x98] sm:$0xff] }
 0x59b   :  { %7059 = vmatpush.bf16.msra.mxu2 %v11286_v48  ;;  %7072 = vmatpush.bf16.msra.mxu3 %v11414_v50  ;;  %v12845_v48 = vld [vmem:[#allocation19 + $0x130] sm:$0xff]  ;;  %v12850_v50 = vld [vmem:[#allocation19 + $0x158] sm:$0xff] }
 0x59c   :  { %7696 = vmatpush.bf16.msrb.mxu1 %v12821_v23  ;;  %7682 = vmatpush.bf16.msrb.mxu0 %v12814_v62  ;;  %v12868_v23 = vld [vmem:[#allocation19 + $0x1e8] sm:$0xff]  ;;  %v12865_v62 = vld [vmem:[#allocation19 + $0x1d0] sm:$0xff] }
 0x59d   :  { %7034 = vmatmul.bf16.vlgmr.msra.gmra.mxu0 %v13613_v43  ;;  %v12825_v43 = vld [vmem:[#allocation19 + $0x90] sm:$0xff] }
 0x59e   :  { %7060 = vmatmul.bf16.vlgmr.msra.gmra.mxu2 %v13607_v18  ;;  %7073 = vmatmul.bf16.vlgmr.msra.gmra.mxu3 %v13609_v20  ;;  %v12835_v18 = vld [vmem:[#allocation19 + $0xe0] sm:$0xff]  ;;  %v12826_v20 = vld [vmem:[#allocation19 + $0x98] sm:$0xff] }
 0x59f   :  { %7708 = vmatpush.bf16.msrb.mxu2 %v12830_v53  ;;  %7721 = vmatpush.bf16.msrb.mxu3 %v12838_v25  ;;  %v12844_v53 = vld [vmem:[#allocation19 + $0x128] sm:$0xff]  ;;  %v12849_v25 = vld [vmem:[#allocation19 + $0x150] sm:$0xff] }
 0x5a0   :  { %7697 = vmatpush.bf16.msrb.mxu1 %v12820_v46  ;;  %7683 = vmatpush.bf16.msrb.mxu0 %v12813_v1  ;;  %v12843_v46 = vld [vmem:[#allocation19 + $0x120] sm:$0xff] }
 0x5a3   :  { %7709 = vmatpush.bf16.msrb.mxu2 %v12829_v60  ;;  %7722 = vmatpush.bf16.msrb.mxu3 %v12837_v61  ;;  %v12857_v60 = vld [vmem:[#allocation19 + $0x190] sm:$0xff]  ;;  %v5864_v61 = vld.sshfl [vmem:[#allocation1 + $0x28] sm:$0xff pattern:$0x73625140] }
 0x5a4   :  { %7698 = vmatpush.bf16.msrb.mxu1 %v12819_v35  ;;  %7684 = vmatpush.bf16.msrb.mxu0 %v12812_v7  ;;  %v12842_v35 = vld [vmem:[#allocation19 + $0x118] sm:$0xff]  ;;  %v5880_v1 = vmul.f32 %v5864_v61, %v13565_v52  ;;  %v5865_v7 = vld.sshfl [vmem:[#allocation1 + $0x30] sm:$0xff pattern:$0x73625140] }
 0x5a5   :  { %v12840_v52 = vld [vmem:[#allocation19 + $0x108] sm:$0xff] }
 0x5a7   :  { %7710 = vmatpush.bf16.msrb.mxu2 %v12828_v55  ;;  %7723 = vmatpush.bf16.msrb.mxu3 %v12836_v63  ;;  %v12847_v55 = vld [vmem:[#allocation19 + $0x140] sm:$0xff]  ;;  %v12790_v63 = vld [vmem:[#allocation17 + $0x78] sm:$0xff] }
 0x5a8   :  { %7699 = vmatpush.bf16.msrb.mxu1 %v12818_v5  ;;  %7685 = vmatpush.bf16.msrb.mxu0 %v12811_v11  ;;  %v12856_v5 = vld [vmem:[#allocation19 + $0x188] sm:$0xff]  ;;  %v12855_v11 = vld [vmem:[#allocation19 + $0x180] sm:$0xff] }
 0x5ab   :  { %7711 = vmatpush.bf16.msrb.mxu2 %v12827_v6  ;;  %7724 = vmatpush.bf16.msrb.mxu3 %v12835_v18  ;;  %v12864_v6 = vld [vmem:[#allocation19 + $0x1c8] sm:$0xff]  ;;  %v12841_v18 = vld [vmem:[#allocation19 + $0x110] sm:$0xff] }
 0x5ac   :  { %7700 = vmatpush.bf16.msrb.mxu1 %v12817_v9  ;;  %7686 = vmatpush.bf16.msrb.mxu0 %v12810_v13  ;;  %v5866_v9 = vld.sshfl [vmem:[#allocation1 + $0x38] sm:$0xff pattern:$0x73625140]  ;;  %v12788_v13 = vld [vmem:[#allocation17 + $0x68] sm:$0xff] }
 0x5af   :  { %7712 = vmatpush.bf16.msrb.mxu2 %v12826_v20  ;;  %7725 = vmatpush.bf16.msrb.mxu3 %v12834_v38  ;;  %v12789_v20 = vld [vmem:[#allocation17 + $0x70] sm:$0xff]  ;;  %v7167_v38 = vpack.c.bf16 %v5880_v1, %v5880_v1  ;;  %v12775_v1 = vld [vmem:[#allocation17] sm:$0xff] }
 0x5b0   :  { %7701 = vmatpush.bf16.msrb.mxu1 %v12816_v49  ;;  %7687 = vmatpush.bf16.msrb.mxu0 %v12809_v0  ;;  %v5881_v49 = vmul.f32 %v5865_v7, %v13596_v32  ;;  %v12787_v0 = vld [vmem:[#allocation17 + $0x60] sm:$0xff] }
 0x5b3   :  { %7713 = vmatpush.bf16.msrb.mxu2 %v12825_v43  ;;  %7726 = vmatpush.bf16.msrb.mxu3 %v12833_v24  ;;  %v5882_v43 = vmul.f32 %v5866_v9, %v13602_v17  ;;  %v5863_v24 = vld.sshfl [vmem:[#allocation1 + $0x20] sm:$0xff pattern:$0x73625140]  ;;  %v12797_v17 = vld [vmem:[#allocation17 + $0xb0] sm:$0xff]  ;;  %v12804_v9 = vld [vmem:[#allocation17 + $0xe8] sm:$0xff] }
 0x5b4   :  { %7702 = vmatpush.bf16.msrb.mxu1 %v12815_v54  ;;  %7688 = vmatpush.bf16.msrb.mxu0 %v12808_v29  ;;  %v12798_v54 = vld [vmem:[#allocation17 + $0xb8] sm:$0xff]  ;;  %v12795_v29 = vld [vmem:[#allocation17 + $0xa0] sm:$0xff] }
 0x5b5   :  { %v7169_v32 = vpack.c.bf16 %v5882_v43, %v5882_v43 }
 0x5b7   :  { %7714 = vmatpush.bf16.msrb.mxu2 %v12824_v27  ;;  %7727 = vmatpush.bf16.msrb.mxu3 %v12832_v19  ;;  %v12839_v27 = vld [vmem:[#allocation19 + $0x100] sm:$0xff]  ;;  %v5879_v19 = vmul.f32 %v5863_v24, %v13527_v3 }
 0x5b8   :  { %7747 = vmatpush.bf16.msra.mxu1 %v12854_v4  ;;  %7689 = vmatpush.bf16.msrb.mxu0 %v12807_v44  ;;  %v7168_v4 = vpack.c.bf16 %v5881_v49, %v5881_v49 }
 0x5b9   :  { %7703 = vmatmul.bf16.vlgmr.msrb.gmra.mxu1 %v7163_v22  ;;  %v7166_v21 = vpack.c.bf16 %v5879_v19, %v5879_v19  ;;  %v13636_v22 = vld [vmem:[#allocation16] sm:$0xf] }
 0x5ba   :  { %v6222_v28 = vperm.slane %v13636_v22, 0  ;;  %v12802_v19 = vld [vmem:[#allocation17 + $0xd8] sm:$0xff] }
 0x5bb   :  { %7715 = vmatpush.bf16.msrb.mxu2 %v12823_v16  ;;  %7728 = vmatpush.bf16.msrb.mxu3 %v12831_v26  ;;  %v12786_v16 = vld [vmem:[#allocation17 + $0x58] sm:$0xff]  ;;  %v12796_v26 = vld [vmem:[#allocation17 + $0xa8] sm:$0xff] }
 0x5bc   :  { %7748 = vmatpush.bf16.msra.mxu1 %v12853_v15  ;;  %7734 = vmatpush.bf16.msra.mxu0 %v12846_v34  ;;  %v12781_v15 = vld [vmem:[#allocation17 + $0x30] sm:$0xff] }
 0x5bd   :  { %7690 = vmatmul.bf16.vlgmr.msrb.gmra.mxu0 %v7162_v14  ;;  %v12793_v14 = vld [vmem:[#allocation17 + $0x90] sm:$0xff] }
 0x5be   :  { %7716 = vmatmul.bf16.vlgmr.msrb.gmra.mxu2 %v7164_v36  ;;  %7729 = vmatmul.bf16.vlgmr.msrb.gmra.mxu3 %v7165_v37  ;;  %v12779_v37 = vld [vmem:[#allocation17 + $0x20] sm:$0xff] }
 0x5bf   :  { %7760 = vmatpush.bf16.msra.mxu2 %v12862_v39  ;;  %7773 = vmatpush.bf16.msra.mxu3 %v12870_v31  ;;  %v12785_v39 = vld [vmem:[#allocation17 + $0x50] sm:$0xff] }
 0x5c0   :  { %7749 = vmatpush.bf16.msra.mxu1 %v12852_v42  ;;  %7735 = vmatpush.bf16.msra.mxu0 %v12845_v48 }
 0x5c3   :  { %7761 = vmatpush.bf16.msra.mxu2 %v12861_v45  ;;  %7774 = vmatpush.bf16.msra.mxu3 %v12869_v59  ;;  %v12784_v45 = vld [vmem:[#allocation17 + $0x48] sm:$0xff] }
 0x5c4   :  { %7750 = vmatpush.bf16.msra.mxu1 %v12851_v47  ;;  %7736 = vmatpush.bf16.msra.mxu0 %v12844_v53  ;;  %v12778_v47 = vld [vmem:[#allocation17 + $0x18] sm:$0xff]  ;;  %v12792_v53 = vld [vmem:[#allocation17 + $0x88] sm:$0xff] }
 0x5c7   :  { %7762 = vmatpush.bf16.msra.mxu2 %v12860_v8  ;;  %7775 = vmatpush.bf16.msra.mxu3 %v12868_v23  ;;  %v12783_v8 = vld [vmem:[#allocation17 + $0x40] sm:$0xff] }
 0x5c8   :  { %7751 = vmatpush.bf16.msra.mxu1 %v12850_v50  ;;  %7737 = vmatpush.bf16.msra.mxu0 %v12843_v46  ;;  %v12776_v46 = vld [vmem:[#allocation17 + $0x8] sm:$0xff] }
 0x5cb   :  { %7763 = vmatpush.bf16.msra.mxu2 %v12859_v51  ;;  %7776 = vmatpush.bf16.msra.mxu3 %v12867_v30  ;;  %v12777_v30 = vld [vmem:[#allocation17 + $0x10] sm:$0xff] }
 0x5cc   :  { %7752 = vmatpush.bf16.msra.mxu1 %v12849_v25  ;;  %7738 = vmatpush.bf16.msra.mxu0 %v12842_v35 }
 0x5cf   :  { %7764 = vmatpush.bf16.msra.mxu2 %v12858_v56  ;;  %7777 = vmatpush.bf16.msra.mxu3 %v12866_v57  ;;  %v6223_v56 = vperm.slane %v13636_v22, 1 }
 0x5d0   :  { %7753 = vmatpush.bf16.msra.mxu1 %v12848_v58  ;;  %7739 = vmatpush.bf16.msra.mxu0 %v12841_v18  ;;  %v12791_v58 = vld [vmem:[#allocation17 + $0x80] sm:$0xff]  ;;  %v12805_v18 = vld [vmem:[#allocation17 + $0xf0] sm:$0xff] }
 0x5d2   :  { %v6892_v2 = vpop.f32.mrf.mxu1 }
 0x5d3   :  { %7765 = vmatpush.bf16.msra.mxu2 %v12857_v60  ;;  %7778 = vmatpush.bf16.msra.mxu3 %v12865_v62  ;;  %v12806_v60 = vld [vmem:[#allocation17 + $0xf8] sm:$0xff] }
 0x5d4   :  { %7754 = vmatpush.bf16.msra.mxu1 %v12847_v55  ;;  %7740 = vmatpush.bf16.msra.mxu0 %v12840_v52 }
 0x5d7   :  { %7766 = vmatpush.bf16.msra.mxu2 %v12856_v5  ;;  %7779 = vmatpush.bf16.msra.mxu3 %v12864_v6  ;;  %v6879_v31 = vpop.f32.mrf.mxu0 }
 0x5d8   :  { %7991 = vmatpush.bf16.msrb.mxu1 %v12790_v63  ;;  %7741 = vmatpush.bf16.msra.mxu0 %v12839_v27  ;;  %v6880_v42 = vadd.f32 %v6879_v31, %v6222_v28  ;;  %v6224_v27 = vperm.slane %v13636_v22, 2  ;;  %v12799_v31 = vld [vmem:[#allocation17 + $0xc0] sm:$0xff] }
 0x5d9   :  { %7755 = vmatmul.bf16.vlgmr.msra.gmra.mxu1 %v7167_v38 }
 0x5da   :  { %v6894_v3 = vpop.f32.mrf.mxu1  ;;  %v6893_v44 = vadd.f32 %v6892_v2, %v6880_v42 }
 0x5db   :  { %7767 = vmatpush.bf16.msra.mxu2 %v12855_v11  ;;  %7780 = vmatpush.bf16.msra.mxu3 %v12863_v12 }
 0x5dc   :  { %7992 = vmatpush.bf16.msrb.mxu1 %v12789_v20  ;;  %7978 = vmatpush.bf16.msrb.mxu0 %v12782_v40 }
 0x5dd   :  { %7742 = vmatmul.bf16.vlgmr.msra.gmra.mxu0 %v7166_v21  ;;  %v12801_v21 = vld [vmem:[#allocation17 + $0xd0] sm:$0xff] }
 0x5de   :  { %7768 = vmatmul.bf16.vlgmr.msra.gmra.mxu2 %v7168_v4  ;;  %7781 = vmatmul.bf16.vlgmr.msra.gmra.mxu3 %v7169_v32 }
 0x5df   :  { %8004 = vmatpush.bf16.msrb.mxu2 %v12798_v54  ;;  %v6881_v48 = vpop.f32.mrf.mxu0  ;;  %8017 = vmatpush.bf16.msrb.mxu3 %v12806_v60 }
 0x5e0   :  { %7993 = vmatpush.bf16.msrb.mxu1 %v12788_v13  ;;  %7979 = vmatpush.bf16.msrb.mxu0 %v12781_v15  ;;  %v12803_v13 = vld [vmem:[#allocation17 + $0xe0] sm:$0xff] }
 0x5e1   :  { %v6905_v33 = vpop.f32.mrf.mxu2  ;;  %v6918_v36 = vpop.f32.mrf.mxu3 }
 0x5e2   :  { %v6906_v59 = vadd.f32 %v6905_v33, %v6893_v44  ;;  %v6944_v34 = vpop.f32.mrf.mxu1  ;;  %v6225_v44 = vperm.slane %v13636_v22, 3 }
 0x5e3   :  { %8005 = vmatpush.bf16.msrb.mxu2 %v12797_v17  ;;  %8018 = vmatpush.bf16.msrb.mxu3 %v12805_v18 }
 0x5e4   :  { %7994 = vmatpush.bf16.msrb.mxu1 %v12787_v0  ;;  %7980 = vmatpush.bf16.msrb.mxu0 %v12780_v10  ;;  %v6919_v23 = vadd.f32 %v6918_v36, %v6906_v59 }
 0x5e6   :  { %v7082_v25 = vmul.f32 0.2, %v6919_v23  ;;  %vm7078_vm11 = vcmp.ge.f32.partialorder %v6919_v23, 0.0 }
 0x5e7   :  { %8006 = vmatpush.bf16.msrb.mxu2 %v12796_v26  ;;  %v6931_v62 = vpop.f32.mrf.mxu0  ;;  %8019 = vmatpush.bf16.msrb.mxu3 %v12804_v9  ;;  %v12800_v26 = vld [vmem:[#allocation17 + $0xc8] sm:$0xff] }
 0x5e8   :  { %7995 = vmatpush.bf16.msrb.mxu1 %v12786_v16  ;;  %7981 = vmatpush.bf16.msrb.mxu0 %v12779_v37  ;;  %v7086_v61 = vsel %vm7078_vm11, %v6919_v23, %v7082_v25  ;;  %v6932_v35 = vadd.f32 %v6931_v62, %v6223_v56 }
 0x5e9   :  { %v6907_v50 = vpop.f32.mrf.mxu2  ;;  %v6920_v51 = vpop.f32.mrf.mxu3  ;;  %v7090_v5 = vmul.f32 1.4142135, %v7086_v61 }
 0x5ea   :  { %v6946_v57 = vpop.f32.mrf.mxu1  ;;  %v6945_v6 = vadd.f32 %v6944_v34, %v6932_v35 }
 0x5eb   :  { %8007 = vmatpush.bf16.msrb.mxu2 %v12795_v29  ;;  %v7094_v38 = vpack.c.bf16 %v7090_v5, %v7090_v5  ;;  %8020 = vmatpush.bf16.msrb.mxu3 %v12803_v13 }
 0x5ec   :  { %7996 = vmatpush.bf16.msrb.mxu1 %v12785_v39  ;;  %7982 = vmatpush.bf16.msrb.mxu0 %v12778_v47 }
 0x5ef   :  { %8008 = vmatpush.bf16.msrb.mxu2 %v12794_v41  ;;  %v6933_v49 = vpop.f32.mrf.mxu0  ;;  %8021 = vmatpush.bf16.msrb.mxu3 %v12802_v19 }
 0x5f0   :  { %7997 = vmatpush.bf16.msrb.mxu1 %v12784_v45  ;;  %7983 = vmatpush.bf16.msrb.mxu0 %v12777_v30 }
 0x5f1   :  { %v6957_v55 = vpop.f32.mrf.mxu2  ;;  %v6970_v63 = vpop.f32.mrf.mxu3 }
 0x5f2   :  { %v6958_v7 = vadd.f32 %v6957_v55, %v6945_v6 }
 0x5f3   :  { %8009 = vmatpush.bf16.msrb.mxu2 %v12793_v14  ;;  %8022 = vmatpush.bf16.msrb.mxu3 %v12801_v21 }
 0x5f4   :  { %7998 = vmatpush.bf16.msrb.mxu1 %v12783_v8  ;;  %7984 = vmatpush.bf16.msrb.mxu0 %v12776_v46  ;;  %v6971_v11 = vadd.f32 %v6970_v63, %v6958_v7 }
 0x5f6   :  { %v6996_v20 = vpop.f32.mrf.mxu1  ;;  %vm7079_vm12 = vcmp.ge.f32.partialorder %v6971_v11, 0.0  ;;  %v7083_v12 = vmul.f32 0.2, %v6971_v11 }
 0x5f7   :  { %8010 = vmatpush.bf16.msrb.mxu2 %v12792_v53  ;;  %8023 = vmatpush.bf16.msrb.mxu3 %v12800_v26 }
 0x5f8   :  { %7985 = vmatpush.bf16.msrb.mxu0 %v12775_v1  ;;  %v7087_v24 = vsel %vm7079_vm12, %v6971_v11, %v7083_v12 }
 0x5f9   :  { %v6959_v52 = vpop.f32.mrf.mxu2  ;;  %v6972_v43 = vpop.f32.mrf.mxu3  ;;  %v7091_v54 = vmul.f32 1.4142135, %v7087_v24 }
 0x5fa   :  { %v6983_v32 = vpop.f32.mrf.mxu0 }
 0x5fb   :  { %8011 = vmatpush.bf16.msrb.mxu2 %v12791_v58  ;;  %7986 = vmatmul.bf16.vlgmr.msrb.gmra.mxu0 %v7094_v38  ;;  %v7095_v4 = vpack.c.bf16 %v7091_v54, %v7091_v54  ;;  %v6984_v40 = vadd.f32 %v6983_v32, %v6224_v27 }
 0x5fc   :  { %8024 = vmatpush.bf16.msrb.mxu3 %v12799_v31 }
 0x5fd   :  { %7999 = vmatmul.bf16.vlgmr.msrb.gmra.mxu1 %v7095_v4  ;;  %v6997_v15 = vadd.f32 %v6996_v20, %v6984_v40 }
 0x5fe   :  { %v6998_v2 = vpop.f32.mrf.mxu1 }
 0x601   :  { %v7009_v0 = vpop.f32.mrf.mxu2  ;;  %v7022_v17 = vpop.f32.mrf.mxu3 }
 0x602   :  { %v7010_v16 = vadd.f32 %v7009_v0, %v6997_v15  ;;  %v6985_v28 = vpop.f32.mrf.mxu0  ;;  %v12891_v0 = vld [vmem:[#allocation20] ss:$0 sm:$0xff] }
 0x604   :  { %v7023_v3 = vadd.f32 %v7022_v17, %v7010_v16 }
 0x606   :  { %vm7080_vm13 = vcmp.ge.f32.partialorder %v7023_v3, 0.0  ;;  %v7084_v10 = vmul.f32 0.2, %v7023_v3 }
 0x608   :  { %v7088_v42 = vsel %vm7080_vm13, %v7023_v3, %v7084_v10 }
 0x609   :  { %v7011_v29 = vpop.f32.mrf.mxu2  ;;  %v7024_v39 = vpop.f32.mrf.mxu3  ;;  %v7092_v33 = vmul.f32 1.4142135, %v7088_v42 }
 0x60b   :  { %v7096_v36 = vpack.c.bf16 %v7092_v33, %v7092_v33 }
 0x60d   :  { %8012 = vmatmul.bf16.vlgmr.msrb.gmra.mxu2 %v7096_v36 }
 0x616   :  { %v7048_v37 = vpop.f32.mrf.mxu1 }
 0x61a   :  { %v7035_v41 = vpop.f32.mrf.mxu0 }
 0x61b   :  { %v7036_v59 = vadd.f32 %v7035_v41, %v6225_v44 }
 0x61d   :  { %v7049_v8 = vadd.f32 %v7048_v37, %v7036_v59 }
 0x61e   :  { %v7050_v45 = vpop.f32.mrf.mxu1 }
 0x621   :  { %v7061_v34 = vpop.f32.mrf.mxu2  ;;  %v7074_v47 = vpop.f32.mrf.mxu3 }
 0x622   :  { %v7062_v14 = vadd.f32 %v7061_v34, %v7049_v8  ;;  %v7037_v48 = vpop.f32.mrf.mxu0 }
 0x624   :  { %v7075_v23 = vadd.f32 %v7074_v47, %v7062_v14 }
 0x626   :  { %vm7081_vm14 = vcmp.ge.f32.partialorder %v7075_v23, 0.0  ;;  %v7085_v50 = vmul.f32 0.2, %v7075_v23 }
 0x628   :  { %v7089_v53 = vsel %vm7081_vm14, %v7075_v23, %v7085_v50 }
 0x629   :  { %v7063_v51 = vpop.f32.mrf.mxu2  ;;  %v7076_v30 = vpop.f32.mrf.mxu3  ;;  %v7093_v25 = vmul.f32 1.4142135, %v7089_v53 }
 0x62b   :  { %v7097_v56 = vpack.c.bf16 %v7093_v25, %v7093_v25 }
 0x62d   :  { %8025 = vmatmul.bf16.vlgmr.msrb.gmra.mxu3 %v7097_v56 }
 0x636   :  { %v7704_v57 = vpop.f32.mrf.mxu1 }
 0x63a   :  { %v7691_v22 = vpop.f32.mrf.mxu0 }
 0x63b   :  { %v7705_v58 = vadd.f32 %v7704_v57, %v7691_v22 }
 0x63e   :  { %v7706_v46 = vpop.f32.mrf.mxu1 }
 0x641   :  { %v7717_v60 = vpop.f32.mrf.mxu2  ;;  %v7730_v61 = vpop.f32.mrf.mxu3 }
 0x642   :  { %v7718_v62 = vadd.f32 %v7717_v60, %v7705_v58  ;;  %v7693_v55 = vpop.f32.mrf.mxu0 }
 0x644   :  { %v7731_v35 = vadd.f32 %v7730_v61, %v7718_v62 }
 0x649   :  { %v7719_v63 = vpop.f32.mrf.mxu2  ;;  %v7732_v1 = vpop.f32.mrf.mxu3 }
 0x656   :  { %v7756_v5 = vpop.f32.mrf.mxu1 }
 0x65a   :  { %v7743_v18 = vpop.f32.mrf.mxu0 }
 0x65b   :  { %v7744_v7 = vadd.f32 %v7743_v18, %v7731_v35 }
 0x65d   :  { %v7757_v38 = vadd.f32 %v7756_v5, %v7744_v7 }
 0x65e   :  { %v7758_v6 = vpop.f32.mrf.mxu1 }
 0x661   :  { %v7769_v9 = vpop.f32.mrf.mxu2  ;;  %v7782_v20 = vpop.f32.mrf.mxu3 }
 0x662   :  { %v7770_v11 = vadd.f32 %v7769_v9, %v7757_v38  ;;  %v7745_v12 = vpop.f32.mrf.mxu0 }
 0x664   :  { %v7783_v49 = vadd.f32 %v7782_v20, %v7770_v11 }
 0x669   :  { %v7771_v52 = vpop.f32.mrf.mxu2  ;;  %v7784_v43 = vpop.f32.mrf.mxu3 }
 0x678   :  { %v7987_v24 = vpop.f32.mrf.mxu0 }
 0x679   :  { %v7988_v19 = vadd.f32 %v7987_v24, %v7783_v49 }
 0x67a   :  { %v8000_v13 = vpop.f32.mrf.mxu1 }
 0x67b   :  { %v8001_v32 = vadd.f32 %v8000_v13, %v7988_v19 }
 0x680   :  { %v7989_v54 = vpop.f32.mrf.mxu0 }
 0x682   :  { %v8002_v4 = vpop.f32.mrf.mxu1 }
 0x690   :  { %v8013_v2 = vpop.f32.mrf.mxu2 }
 0x691   :  { %v8014_v40 = vadd.f32 %v8013_v2, %v8001_v32 }
 0x698   :  { %v8015_v27 = vpop.f32.mrf.mxu2 }
 0x6b0   :  { %v8026_v17 = vpop.f32.mrf.mxu3 }
 0x6b1   :  { %v8027_v21 = vadd.f32 %v8026_v17, %v8014_v40 }
 0x6b3   :  { %v8034_v15 = vadd.f32 %v12891_v0, %v8027_v21 }
 0x6b5   :  { %8035 = vst [vmem:[#allocation22] sm:$0x3] %v8034_v15 }
 0x6b6   :  { %8046 = dma.vmem_to_hbm [thread:$0]  %s8042_s11, 32, %s8044_s19, [#allocation4]  }
 0x6b8   :  { %v8028_v16 = vpop.f32.mrf.mxu3 }
 0x6b9   :  { %13226 = dma.done.wait [#allocation4], 32  }
 0x6ba   :  { %13227 = vsyncadd [#allocation4], 4294967264 }
 0x6bb   :  { %8051 = vsyncpa [#allocation3], 1 }
 0x6bc   :  { %8052 = vsyncpa [#allocation6], 1 }
 0x6bd   :  { %8053 = vsyncpa [#allocation9], 1 }
 0x6be   :  { %8054 = vsyncpa [#allocation12], 1 }
 0x6bf   :  { %8055 = vsyncpa [#allocation15], 1 }
 0x6c0   :  { %8056 = vsyncpa [#allocation18], 1 }
 0x6c1   :  { %8057 = vsyncpa [#allocation21], 1 }
 0x6c2   :  { %8058 = vsyncpa [#allocation4], 1 }

</bundles_post_ra>
